<compile_context>
chip_gen: v5e
topology: v5e:2x2
jax: 0.10.0
libtpu: 0.0.40
codegen_flags: <defaults>
</compile_context>

<pallas_src>
import jax
import jax.numpy as jnp
import numpy as np
from jax import lax
from jax.experimental import pallas as pl
from jax.experimental.pallas import tpu as pltpu


# --------------------------------------------------------------------------
# Fused forward-pass kernel (TB images per grid step)
# --------------------------------------------------------------------------
def _net_kernel(x_ref, w1_ref, b1_ref, w2_ref, b2_ref,
                wf1_ref, bf1_ref, wf2_ref, bf2_ref, out_ref):
    f32, bf16 = jnp.float32, jnp.bfloat16
    tb = x_ref.shape[1]                       # batch tile (8 = f32 sublane tile)
    x = x_ref[...]                            # (28, TB, 28) f32

    # ---- conv1: ONE fused K=140 matmul -----------------------------------
    # LHS[(ho, b), kh*28 + wi] = x[ho+kh, b, wi];  out lane = (wo%2)*256 + (wo//2)*20 + co
    lhs1 = jnp.concatenate([x[kh:kh + 24] for kh in range(5)], axis=-1)   # (24,TB,140)
    lhs1 = lhs1.reshape(24 * tb, 140)                                     # layout-exact
    y1 = jnp.dot(lhs1.astype(bf16), w1_ref[...], preferred_element_type=f32)
    y1 = jnp.maximum(y1 + b1_ref[...], 0.0)                               # (24*TB, 512)

    # ---- pool1 (2x2): W = lane-half max, H = shift-by-one-row max --------
    wp1 = jnp.maximum(y1[:, 0:256], y1[:, 256:512]).reshape(24, tb, 256)
    m1 = jnp.maximum(wp1, jnp.concatenate([wp1[1:], wp1[:1]], axis=0))
    # m1[j] holds pooled row j//2 for even j; odd j is ignored scratch.

    # ---- conv2: ONE fused K=1280 matmul (16 rows/img, even rows valid) ---
    lhs2 = jnp.concatenate([m1[2 * kh:2 * kh + 16] for kh in range(5)], axis=-1)
    lhs2 = lhs2.reshape(16 * tb, 1280)
    y2 = jnp.dot(lhs2.astype(bf16), w2_ref[...], preferred_element_type=f32)
    y2 = jnp.maximum(y2 + b2_ref[...], 0.0)                               # (16*TB, 512)

    # ---- pool2 -----------------------------------------------------------
    wp2 = jnp.maximum(y2[:, 0:256], y2[:, 256:512]).reshape(16, tb, 256)
    m2 = jnp.maximum(wp2, jnp.concatenate([wp2[2:], wp2[:2]], axis=0))
    # pooled rows po=0..3 live at major indices 0, 4, 8, 12 (others = scratch)

    # ---- fc1: ONE (TB, 1024) x (1024, 512) matmul ------------------------
    flat = jnp.concatenate([m2[0], m2[4], m2[8], m2[12]], axis=-1)        # (TB, 1024)
    h = jnp.dot(flat.astype(bf16), wf1_ref[...], preferred_element_type=f32)
    h = jnp.maximum(h + bf1_ref[...], 0.0)                                # (TB, 512)

    # ---- fc2 + fused log_softmax (pad lanes carry -1e30 bias -> exp==0) --
    logits = jnp.dot(h.astype(bf16), wf2_ref[...],
                     preferred_element_type=f32) + bf2_ref[...]           # (TB, 128)
    m = jnp.max(logits, axis=-1, keepdims=True)
    s = logits - m
    lse = jnp.log(jnp.sum(jnp.exp(s), axis=-1, keepdims=True))
    out_ref[...] = (s - lse).astype(out_ref.dtype)


def net_forward(x_nchw, kp, tb=8):
    """x_nchw: (B, 1, 28, 28); kp: kernel-ready params from prepare_params."""
    assert tb % 8 == 0, "tb must be a multiple of the f32 sublane tile (8)"
    B = x_nchw.shape[0]
    Bp = ((B + tb - 1) // tb) * tb
    x = x_nchw[:, 0, :, :]                                  # Cin == 1
    if Bp != B:
        x = jnp.concatenate([x, jnp.zeros((Bp - B, 28, 28), x.dtype)], axis=0)
    xt = jnp.transpose(x, (1, 0, 2))                        # (28, Bp, 28): batch -> sublanes

    flops = 2 * Bp * (24 * 140 * 512 + 16 * 1280 * 512 + 1024 * 512 + 512 * 128)
    bytes_accessed = (sum(int(v.size) * v.dtype.itemsize for v in kp.values())
                      + Bp * (28 * 28 + 128) * 4)
    cost = pl.CostEstimate(flops=flops, transcendentals=129 * Bp,
                           bytes_accessed=bytes_accessed)

    out = pl.pallas_call(
        _net_kernel,
        out_shape=jax.ShapeDtypeStruct((Bp, 128), jnp.float32),
        grid=(Bp // tb,),
        in_specs=[
            pl.BlockSpec((28, tb, 28), lambda i: (0, i, 0)),   # images (batch tile)
            pl.BlockSpec((140, 512), lambda i: (0, 0)),        # conv1 fused banded W (bf16)
            pl.BlockSpec((1, 512), lambda i: (0, 0)),          # conv1 bias (f32)
            pl.BlockSpec((1280, 512), lambda i: (0, 0)),       # conv2 fused banded W (bf16)
            pl.BlockSpec((1, 512), lambda i: (0, 0)),          # conv2 bias (f32)
            pl.BlockSpec((1024, 512), lambda i: (0, 0)),       # fc1 permuted W (bf16)
            pl.BlockSpec((1, 512), lambda i: (0, 0)),          # fc1 bias (f32)
            pl.BlockSpec((512, 128), lambda i: (0, 0)),        # fc2 W padded (bf16)
            pl.BlockSpec((1, 128), lambda i: (0, 0)),          # fc2 bias (pad = -1e30)
        ],
        out_specs=pl.BlockSpec((tb, 128), lambda i: (i, 0)),
        compiler_params=pltpu.CompilerParams(
            dimension_semantics=("parallel",),
            vmem_limit_bytes=32 * 1024 * 1024),
        cost_estimate=cost,
    )(xt, kp["w1"], kp["b1"], kp["w2"], kp["b2"],
      kp["wf1"], kp["bf1"], kp["wf2"], kp["bf2"])
    return out[:B, :10]


# --------------------------------------------------------------------------
# One-time host-side weight preparation (fused banded conv mats, permuted fc1)
# --------------------------------------------------------------------------
def prepare_params(p):
    w1, b1 = np.asarray(p["conv1_w"]), np.asarray(p["conv1_b"])   # (20,1,5,5), (20,)
    w2, b2 = np.asarray(p["conv2_w"]), np.asarray(p["conv2_b"])   # (50,20,5,5), (50,)
    f1w, f1b = np.asarray(p["fc1_w"]), np.asarray(p["fc1_b"])     # (500,800), (500,)
    f2w, f2b = np.asarray(p["fc2_w"]), np.asarray(p["fc2_b"])     # (10,500), (10,)

    # conv1 fused banded weight (140, 512):
    #   W1[kh*28 + wo + dw, (wo%2)*256 + (wo//2)*20 + co] = w1[co, 0, kh, dw]
    KH, WO, DW, CO = np.meshgrid(np.arange(5), np.arange(24), np.arange(5),
                                 np.arange(20), indexing="ij")
    w1cat = np.zeros((140, 512), np.float32)
    w1cat[KH * 28 + WO + DW, (WO % 2) * 256 + (WO // 2) * 20 + CO] = \
        w1[:, 0, :, :][CO, KH, DW]
    b1t = np.tile(b1, 12)
    b1b = np.zeros((1, 512), np.float32)
    b1b[0, 0:240] = b1t; b1b[0, 256:496] = b1t

    # conv2 fused banded weight (1280, 512): input lane per kh block = wi*20 + ci
    KH, WO, DW, CI, CO = np.meshgrid(np.arange(5), np.arange(8), np.arange(5),
                                     np.arange(20), np.arange(50), indexing="ij")
    w2cat = np.zeros((1280, 512), np.float32)
    w2cat[KH * 256 + (WO + DW) * 20 + CI,
          (WO % 2) * 256 + (WO // 2) * 50 + CO] = w2[CO, CI, KH, DW]
    b2t = np.tile(b2, 4)
    b2b = np.zeros((1, 512), np.float32)
    b2b[0, 0:200] = b2t; b2b[0, 256:456] = b2t

    # fc1: kernel lane = po*256 + q*50 + c   <-   torch flatten col c*16 + po*4 + q
    P, Q, C = np.meshgrid(np.arange(4), np.arange(4), np.arange(50), indexing="ij")
    src = C * 16 + P * 4 + Q
    t = np.transpose(f1w[:, src], (1, 2, 3, 0)).reshape(4, 200, 500)
    wf1 = np.zeros((4, 256, 512), np.float32)
    wf1[:, 0:200, 0:500] = t
    wf1 = wf1.reshape(1024, 512)
    bf1 = np.zeros((1, 512), np.float32); bf1[0, :500] = f1b

    # fc2 padded to (512, 128); padded logit lanes masked via a -1e30 bias
    wf2 = np.zeros((512, 128), np.float32)
    wf2[0:500, 0:10] = f2w.T
    bf2 = np.full((1, 128), -1e30, np.float32)
    bf2[0, :10] = f2b

    return {"w1": jnp.asarray(w1cat, jnp.bfloat16), "b1": jnp.asarray(b1b),
            "w2": jnp.asarray(w2cat, jnp.bfloat16), "b2": jnp.asarray(b2b),
            "wf1": jnp.asarray(wf1, jnp.bfloat16), "bf1": jnp.asarray(bf1),
            "wf2": jnp.asarray(wf2, jnp.bfloat16), "bf2": jnp.asarray(bf2)}


# --------------------------------------------------------------------------
# Pure-JAX / XLA reference mirroring the PyTorch module exactly.
# --------------------------------------------------------------------------
def net_reference(x_nchw, p):
    def conv(x, w, b):
        y = lax.conv_general_dilated(
            x, w, window_strides=(1, 1), padding="VALID",
            dimension_numbers=("NCHW", "OIHW", "NCHW"),
            precision=lax.Precision.HIGHEST)
        return jax.nn.relu(y + b[None, :, None, None])

    def pool(x):
        return lax.reduce_window(
            x, -jnp.inf, lax.max, (1, 1, 2, 2), (1, 1, 2, 2), "VALID")

    x = pool(conv(x_nchw, p["conv1_w"], p["conv1_b"]))
    x = pool(conv(x, p["conv2_w"], p["conv2_b"]))
    x = x.reshape(x.shape[0], -1)
    x = jax.nn.relu(
        jnp.matmul(x, p["fc1_w"].T, precision=lax.Precision.HIGHEST) + p["fc1_b"])
    x = jnp.matmul(x, p["fc2_w"].T, precision=lax.Precision.HIGHEST) + p["fc2_b"]
    return jax.nn.log_softmax(x, axis=1)


# --------------------------------------------------------------------------
# Deterministic synthetic parameters (shapes from Net.__init__)
# --------------------------------------------------------------------------
def init_params(key):
    ks = jax.random.split(key, 8)

    def u(k, shape, fan_in):
        bound = 1.0 / (fan_in ** 0.5)
        return jax.random.uniform(k, shape, jnp.float32, -bound, bound)

    return {
        "conv1_w": u(ks[0], (20, 1, 5, 5), 25),
        "conv1_b": u(ks[1], (20,), 25),
        "conv2_w": u(ks[2], (50, 20, 5, 5), 500),
        "conv2_b": u(ks[3], (50,), 500),
        "fc1_w": u(ks[4], (500, 800), 800),
        "fc1_b": u(ks[5], (500,), 800),
        "fc2_w": u(ks[6], (10, 500), 500),
        "fc2_b": u(ks[7], (10,), 500),
    }


if __name__ == "__main__":
    key = jax.random.PRNGKey(0)
    pkey, xkey = jax.random.split(key)
    params = init_params(pkey)
    # 28x28 is required by the module (4*4*50 flatten); B=16 -> 2 grid steps of TB=8.
    B = 16
    x = jax.random.normal(xkey, (B, 1, 28, 28), jnp.float32)

    kparams = prepare_params(params)          # one-time host-side weight prep
    out = jax.jit(net_forward)(x, kparams)
    out = jax.block_until_ready(out)

    ref = net_reference(x, params)
    max_diff = float(jnp.max(jnp.abs(out - ref)))
    assert out.shape == (B, 10), out.shape
    # bf16 matmul operands (f32 accumulation) vs an f32 HIGHEST-precision reference.
    assert max_diff < 2e-2, f"mismatch vs reference: {max_diff}"
    print("KERNEL_OK")
</pallas_src>

<mosaic_0001>
module attributes {stable_mosaic.version = 11 : i64} {
  func.func @_net_kernel(%arg0: i32, %arg1: memref<28x8x28xf32, #tpu.memory_space<vmem>>, %arg2: memref<140x512xbf16, #tpu.memory_space<vmem>>, %arg3: memref<1x512xf32, #tpu.memory_space<vmem>>, %arg4: memref<1280x512xbf16, #tpu.memory_space<vmem>>, %arg5: memref<1x512xf32, #tpu.memory_space<vmem>>, %arg6: memref<1024x512xbf16, #tpu.memory_space<vmem>>, %arg7: memref<1x512xf32, #tpu.memory_space<vmem>>, %arg8: memref<512x128xbf16, #tpu.memory_space<vmem>>, %arg9: memref<1x128xf32, #tpu.memory_space<vmem>>, %arg10: memref<8x128xf32, #tpu.memory_space<vmem>>) attributes {dimension_semantics = [#tpu.dimension_semantics<parallel>], iteration_bounds = array<i64: 2>, scalar_prefetch = 0 : i64, scratch_operands = 0 : i64, tpu.core_type = #tpu.core_type<tc>, window_params = [{transform_indices = @transform_0, window_bounds = array<i64: 28, 8, 28>}, {pipeline_mode = #tpu.pipeline_mode<synchronous>, transform_indices = @transform_1, window_bounds = array<i64: 140, 512>}, {pipeline_mode = #tpu.pipeline_mode<synchronous>, transform_indices = @transform_2, window_bounds = array<i64: 1, 512>}, {pipeline_mode = #tpu.pipeline_mode<synchronous>, transform_indices = @transform_3, window_bounds = array<i64: 1280, 512>}, {pipeline_mode = #tpu.pipeline_mode<synchronous>, transform_indices = @transform_4, window_bounds = array<i64: 1, 512>}, {pipeline_mode = #tpu.pipeline_mode<synchronous>, transform_indices = @transform_5, window_bounds = array<i64: 1024, 512>}, {pipeline_mode = #tpu.pipeline_mode<synchronous>, transform_indices = @transform_6, window_bounds = array<i64: 1, 512>}, {pipeline_mode = #tpu.pipeline_mode<synchronous>, transform_indices = @transform_7, window_bounds = array<i64: 512, 128>}, {pipeline_mode = #tpu.pipeline_mode<synchronous>, transform_indices = @transform_8, window_bounds = array<i64: 1, 128>}, {transform_indices = @transform_9, window_bounds = array<i64: 8, 128>}]} {
    %c0 = arith.constant 0 : index
    %c0_0 = arith.constant 0 : index
    %c0_1 = arith.constant 0 : index
    %0 = vector.load %arg1[%c0, %c0_0, %c0_1] : memref<28x8x28xf32, #tpu.memory_space<vmem>>, vector<28x8x28xf32>
    %1 = vector.extract_strided_slice %0 {offsets = [0, 0, 0], sizes = [24, 8, 28], strides = [1, 1, 1]} : vector<28x8x28xf32> to vector<24x8x28xf32>
    %2 = vector.extract_strided_slice %0 {offsets = [1, 0, 0], sizes = [24, 8, 28], strides = [1, 1, 1]} : vector<28x8x28xf32> to vector<24x8x28xf32>
    %3 = vector.extract_strided_slice %0 {offsets = [2, 0, 0], sizes = [24, 8, 28], strides = [1, 1, 1]} : vector<28x8x28xf32> to vector<24x8x28xf32>
    %4 = vector.extract_strided_slice %0 {offsets = [3, 0, 0], sizes = [24, 8, 28], strides = [1, 1, 1]} : vector<28x8x28xf32> to vector<24x8x28xf32>
    %5 = vector.extract_strided_slice %0 {offsets = [4, 0, 0], sizes = [24, 8, 28], strides = [1, 1, 1]} : vector<28x8x28xf32> to vector<24x8x28xf32>
    %6 = tpu.concatenate %1, %2, %3, %4, %5 in 2 : vector<24x8x28xf32>, vector<24x8x28xf32>, vector<24x8x28xf32>, vector<24x8x28xf32>, vector<24x8x28xf32> -> vector<24x8x140xf32>
    %7 = vector.shape_cast %6 : vector<24x8x140xf32> to vector<192x140xf32>
    %8 = arith.truncf %7 : vector<192x140xf32> to vector<192x140xbf16>
    %c0_2 = arith.constant 0 : index
    %c0_3 = arith.constant 0 : index
    %9 = vector.load %arg2[%c0_2, %c0_3] : memref<140x512xbf16, #tpu.memory_space<vmem>>, vector<140x512xbf16>
    %cst = arith.constant dense<0.000000e+00> : vector<192x512xf32>
    %10 = tpu.matmul %8, %9, %cst {dimension_numbers = #tpu.dot_dimension_numbers<[1], [0], [0], [1], [0, 0, 1, 1], [], []>} : vector<192x140xbf16>, vector<140x512xbf16>, vector<192x512xf32> -> vector<192x512xf32>
    %c0_4 = arith.constant 0 : index
    %c0_5 = arith.constant 0 : index
    %11 = vector.load %arg3[%c0_4, %c0_5] : memref<1x512xf32, #tpu.memory_space<vmem>>, vector<1x512xf32>
    %12 = vector.broadcast %11 : vector<1x512xf32> to vector<192x512xf32>
    %13 = arith.addf %10, %12 : vector<192x512xf32>
    %cst_6 = arith.constant 0.000000e+00 : f32
    %14 = vector.broadcast %cst_6 : f32 to vector<192x512xf32>
    %15 = arith.maximumf %13, %14 : vector<192x512xf32>
    %16 = vector.extract_strided_slice %15 {offsets = [0, 0], sizes = [192, 256], strides = [1, 1]} : vector<192x512xf32> to vector<192x256xf32>
    %17 = vector.extract_strided_slice %15 {offsets = [0, 256], sizes = [192, 256], strides = [1, 1]} : vector<192x512xf32> to vector<192x256xf32>
    %18 = arith.maximumf %16, %17 : vector<192x256xf32>
    %19 = vector.shape_cast %18 : vector<192x256xf32> to vector<24x8x256xf32>
    %20 = vector.extract_strided_slice %19 {offsets = [1, 0, 0], sizes = [23, 8, 256], strides = [1, 1, 1]} : vector<24x8x256xf32> to vector<23x8x256xf32>
    %21 = vector.extract_strided_slice %19 {offsets = [0, 0, 0], sizes = [1, 8, 256], strides = [1, 1, 1]} : vector<24x8x256xf32> to vector<1x8x256xf32>
    %22 = tpu.concatenate %20, %21 in 0 : vector<23x8x256xf32>, vector<1x8x256xf32> -> vector<24x8x256xf32>
    %23 = arith.maximumf %19, %22 : vector<24x8x256xf32>
    %24 = vector.extract_strided_slice %23 {offsets = [0, 0, 0], sizes = [16, 8, 256], strides = [1, 1, 1]} : vector<24x8x256xf32> to vector<16x8x256xf32>
    %25 = vector.extract_strided_slice %23 {offsets = [2, 0, 0], sizes = [16, 8, 256], strides = [1, 1, 1]} : vector<24x8x256xf32> to vector<16x8x256xf32>
    %26 = vector.extract_strided_slice %23 {offsets = [4, 0, 0], sizes = [16, 8, 256], strides = [1, 1, 1]} : vector<24x8x256xf32> to vector<16x8x256xf32>
    %27 = vector.extract_strided_slice %23 {offsets = [6, 0, 0], sizes = [16, 8, 256], strides = [1, 1, 1]} : vector<24x8x256xf32> to vector<16x8x256xf32>
    %28 = vector.extract_strided_slice %23 {offsets = [8, 0, 0], sizes = [16, 8, 256], strides = [1, 1, 1]} : vector<24x8x256xf32> to vector<16x8x256xf32>
    %29 = tpu.concatenate %24, %25, %26, %27, %28 in 2 : vector<16x8x256xf32>, vector<16x8x256xf32>, vector<16x8x256xf32>, vector<16x8x256xf32>, vector<16x8x256xf32> -> vector<16x8x1280xf32>
    %30 = vector.shape_cast %29 : vector<16x8x1280xf32> to vector<128x1280xf32>
    %31 = arith.truncf %30 : vector<128x1280xf32> to vector<128x1280xbf16>
    %c0_7 = arith.constant 0 : index
    %c0_8 = arith.constant 0 : index
    %32 = vector.load %arg4[%c0_7, %c0_8] : memref<1280x512xbf16, #tpu.memory_space<vmem>>, vector<1280x512xbf16>
    %cst_9 = arith.constant dense<0.000000e+00> : vector<128x512xf32>
    %33 = tpu.matmul %31, %32, %cst_9 {dimension_numbers = #tpu.dot_dimension_numbers<[1], [0], [0], [1], [0, 0, 1, 1], [], []>} : vector<128x1280xbf16>, vector<1280x512xbf16>, vector<128x512xf32> -> vector<128x512xf32>
    %c0_10 = arith.constant 0 : index
    %c0_11 = arith.constant 0 : index
    %34 = vector.load %arg5[%c0_10, %c0_11] : memref<1x512xf32, #tpu.memory_space<vmem>>, vector<1x512xf32>
    %35 = vector.broadcast %34 : vector<1x512xf32> to vector<128x512xf32>
    %36 = arith.addf %33, %35 : vector<128x512xf32>
    %cst_12 = arith.constant 0.000000e+00 : f32
    %37 = vector.broadcast %cst_12 : f32 to vector<128x512xf32>
    %38 = arith.maximumf %36, %37 : vector<128x512xf32>
    %39 = vector.extract_strided_slice %38 {offsets = [0, 0], sizes = [128, 256], strides = [1, 1]} : vector<128x512xf32> to vector<128x256xf32>
    %40 = vector.extract_strided_slice %38 {offsets = [0, 256], sizes = [128, 256], strides = [1, 1]} : vector<128x512xf32> to vector<128x256xf32>
    %41 = arith.maximumf %39, %40 : vector<128x256xf32>
    %42 = vector.shape_cast %41 : vector<128x256xf32> to vector<16x8x256xf32>
    %43 = vector.extract_strided_slice %42 {offsets = [2, 0, 0], sizes = [14, 8, 256], strides = [1, 1, 1]} : vector<16x8x256xf32> to vector<14x8x256xf32>
    %44 = vector.extract_strided_slice %42 {offsets = [0, 0, 0], sizes = [2, 8, 256], strides = [1, 1, 1]} : vector<16x8x256xf32> to vector<2x8x256xf32>
    %45 = tpu.concatenate %43, %44 in 0 : vector<14x8x256xf32>, vector<2x8x256xf32> -> vector<16x8x256xf32>
    %46 = arith.maximumf %42, %45 : vector<16x8x256xf32>
    %47 = vector.extract_strided_slice %46 {offsets = [0, 0, 0], sizes = [1, 8, 256], strides = [1, 1, 1]} : vector<16x8x256xf32> to vector<1x8x256xf32>
    %48 = vector.shape_cast %47 : vector<1x8x256xf32> to vector<8x256xf32>
    %49 = vector.extract_strided_slice %46 {offsets = [4, 0, 0], sizes = [1, 8, 256], strides = [1, 1, 1]} : vector<16x8x256xf32> to vector<1x8x256xf32>
    %50 = vector.shape_cast %49 : vector<1x8x256xf32> to vector<8x256xf32>
    %51 = vector.extract_strided_slice %46 {offsets = [8, 0, 0], sizes = [1, 8, 256], strides = [1, 1, 1]} : vector<16x8x256xf32> to vector<1x8x256xf32>
    %52 = vector.shape_cast %51 : vector<1x8x256xf32> to vector<8x256xf32>
    %53 = vector.extract_strided_slice %46 {offsets = [12, 0, 0], sizes = [1, 8, 256], strides = [1, 1, 1]} : vector<16x8x256xf32> to vector<1x8x256xf32>
    %54 = vector.shape_cast %53 : vector<1x8x256xf32> to vector<8x256xf32>
    %55 = tpu.concatenate %48, %50, %52, %54 in 1 : vector<8x256xf32>, vector<8x256xf32>, vector<8x256xf32>, vector<8x256xf32> -> vector<8x1024xf32>
    %56 = arith.truncf %55 : vector<8x1024xf32> to vector<8x1024xbf16>
    %c0_13 = arith.constant 0 : index
    %c0_14 = arith.constant 0 : index
    %57 = vector.load %arg6[%c0_13, %c0_14] : memref<1024x512xbf16, #tpu.memory_space<vmem>>, vector<1024x512xbf16>
    %cst_15 = arith.constant dense<0.000000e+00> : vector<8x512xf32>
    %58 = tpu.matmul %56, %57, %cst_15 {dimension_numbers = #tpu.dot_dimension_numbers<[1], [0], [0], [1], [0, 0, 1, 1], [], []>} : vector<8x1024xbf16>, vector<1024x512xbf16>, vector<8x512xf32> -> vector<8x512xf32>
    %c0_16 = arith.constant 0 : index
    %c0_17 = arith.constant 0 : index
    %59 = vector.load %arg7[%c0_16, %c0_17] : memref<1x512xf32, #tpu.memory_space<vmem>>, vector<1x512xf32>
    %60 = vector.broadcast %59 : vector<1x512xf32> to vector<8x512xf32>
    %61 = arith.addf %58, %60 : vector<8x512xf32>
    %cst_18 = arith.constant 0.000000e+00 : f32
    %62 = vector.broadcast %cst_18 : f32 to vector<8x512xf32>
    %63 = arith.maximumf %61, %62 : vector<8x512xf32>
    %64 = arith.truncf %63 : vector<8x512xf32> to vector<8x512xbf16>
    %c0_19 = arith.constant 0 : index
    %c0_20 = arith.constant 0 : index
    %65 = vector.load %arg8[%c0_19, %c0_20] : memref<512x128xbf16, #tpu.memory_space<vmem>>, vector<512x128xbf16>
    %cst_21 = arith.constant dense<0.000000e+00> : vector<8x128xf32>
    %66 = tpu.matmul %64, %65, %cst_21 {dimension_numbers = #tpu.dot_dimension_numbers<[1], [0], [0], [1], [0, 0, 1, 1], [], []>} : vector<8x512xbf16>, vector<512x128xbf16>, vector<8x128xf32> -> vector<8x128xf32>
    %c0_22 = arith.constant 0 : index
    %c0_23 = arith.constant 0 : index
    %67 = vector.load %arg9[%c0_22, %c0_23] : memref<1x128xf32, #tpu.memory_space<vmem>>, vector<1x128xf32>
    %68 = vector.broadcast %67 : vector<1x128xf32> to vector<8x128xf32>
    %69 = arith.addf %66, %68 : vector<8x128xf32>
    %cst_24 = arith.constant dense<0xFF800000> : vector<8xf32>
    %70 = vector.multi_reduction <maximumf>, %69, %cst_24 [1] : vector<8x128xf32> to vector<8xf32>
    %71 = vector.shape_cast %70 : vector<8xf32> to vector<8x1xf32>
    %72 = vector.broadcast %71 : vector<8x1xf32> to vector<8x128xf32>
    %73 = arith.subf %69, %72 : vector<8x128xf32>
    %74 = math.exp %73 : vector<8x128xf32>
    %cst_25 = arith.constant dense<0.000000e+00> : vector<8xf32>
    %75 = vector.multi_reduction <add>, %74, %cst_25 [1] : vector<8x128xf32> to vector<8xf32>
    %76 = vector.shape_cast %75 : vector<8xf32> to vector<8x1xf32>
    %77 = math.log %76 : vector<8x1xf32>
    %78 = vector.broadcast %77 : vector<8x1xf32> to vector<8x128xf32>
    %79 = arith.subf %73, %78 : vector<8x128xf32>
    %c0_26 = arith.constant 0 : index
    %c0_27 = arith.constant 0 : index
    %80 = vector.load %arg10[%c0_26, %c0_27] : memref<8x128xf32, #tpu.memory_space<vmem>>, vector<8x128xf32>
    tpu.vector_store %arg10[%c0_26, %c0_27], %79 {strides = array<i32>} : memref<8x128xf32, #tpu.memory_space<vmem>>, vector<8x128xf32>,
    return
  }
  func.func @transform_0(%arg0: i32) -> (i32, i32, i32) {
    %c0_i32 = arith.constant 0 : i32
    %c0_i32_0 = arith.constant 0 : i32
    %c0_i32_1 = arith.constant 0 : i32
    return %c0_i32, %arg0, %c0_i32_0 : i32, i32, i32
  }
  func.func @transform_1(%arg0: i32) -> (i32, i32) {
    %c0_i32 = arith.constant 0 : i32
    %c0_i32_0 = arith.constant 0 : i32
    %c0_i32_1 = arith.constant 0 : i32
    return %c0_i32, %c0_i32_0 : i32, i32
  }
  func.func @transform_2(%arg0: i32) -> (i32, i32) {
    %c0_i32 = arith.constant 0 : i32
    %c0_i32_0 = arith.constant 0 : i32
    %c0_i32_1 = arith.constant 0 : i32
    return %c0_i32, %c0_i32_0 : i32, i32
  }
  func.func @transform_3(%arg0: i32) -> (i32, i32) {
    %c0_i32 = arith.constant 0 : i32
    %c0_i32_0 = arith.constant 0 : i32
    %c0_i32_1 = arith.constant 0 : i32
    return %c0_i32, %c0_i32_0 : i32, i32
  }
  func.func @transform_4(%arg0: i32) -> (i32, i32) {
    %c0_i32 = arith.constant 0 : i32
    %c0_i32_0 = arith.constant 0 : i32
    %c0_i32_1 = arith.constant 0 : i32
    return %c0_i32, %c0_i32_0 : i32, i32
  }
  func.func @transform_5(%arg0: i32) -> (i32, i32) {
    %c0_i32 = arith.constant 0 : i32
    %c0_i32_0 = arith.constant 0 : i32
    %c0_i32_1 = arith.constant 0 : i32
    return %c0_i32, %c0_i32_0 : i32, i32
  }
  func.func @transform_6(%arg0: i32) -> (i32, i32) {
    %c0_i32 = arith.constant 0 : i32
    %c0_i32_0 = arith.constant 0 : i32
    %c0_i32_1 = arith.constant 0 : i32
    return %c0_i32, %c0_i32_0 : i32, i32
  }
  func.func @transform_7(%arg0: i32) -> (i32, i32) {
    %c0_i32 = arith.constant 0 : i32
    %c0_i32_0 = arith.constant 0 : i32
    %c0_i32_1 = arith.constant 0 : i32
    return %c0_i32, %c0_i32_0 : i32, i32
  }
  func.func @transform_8(%arg0: i32) -> (i32, i32) {
    %c0_i32 = arith.constant 0 : i32
    %c0_i32_0 = arith.constant 0 : i32
    %c0_i32_1 = arith.constant 0 : i32
    return %c0_i32, %c0_i32_0 : i32, i32
  }
  func.func @transform_9(%arg0: i32) -> (i32, i32) {
    %c0_i32 = arith.constant 0 : i32
    %c0_i32_0 = arith.constant 0 : i32
    return %arg0, %c0_i32 : i32, i32
  }
}

</mosaic_0001>

<bundles_post_ra>
// kernel: net_forward.1
= control target key start
LH: loop header
LB: loop body
LE: loop exit
PB: predicated region body
PF: predicated region fallthrough
CT: control target
= control target key end

     0   :  { %s14082_s0 = inlined_call_operand.vmem [shape: f32[28,16,28], index: 0, kind: input, shape index: {}]   ;;  %s14083_s1 = inlined_call_operand.hbm [shape: bf16[140,512], index: 1, kind: input, shape index: {}]   ;;  %s14084_s2 = inlined_call_operand.hbm [shape: f32[1,512], index: 2, kind: input, shape index: {}]   ;;  %s14085_s3 = inlined_call_operand.hbm [shape: bf16[1280,512], index: 3, kind: input, shape index: {}]   ;;  %s14086_s4 = inlined_call_operand.hbm [shape: f32[1,512], index: 4, kind: input, shape index: {}]   ;;  %s14087_s5 = inlined_call_operand.hbm [shape: bf16[1024,512], index: 5, kind: input, shape index: {}]   ;;  %s14088_s6 = inlined_call_operand.hbm [shape: f32[1,512], index: 6, kind: input, shape index: {}]   ;;  %s14089_s7 = inlined_call_operand.hbm [shape: bf16[512,128], index: 7, kind: input, shape index: {}]   ;;  %s14090_s8 = inlined_call_operand.hbm [shape: f32[1,128], index: 8, kind: input, shape index: {}]   ;;  %s14091_s9 = inlined_call_operand.hbm [shape: f32[16,128], index: 9, kind: output, shape index: {}]  }
   0x1   :  { %14094 = sst [smem:[#allocation42_spill]] %s14083_s1 }
   0x2   :  { %14095 = sst [smem:[#allocation43_spill]] %s14084_s2 }
   0x3   :  { %14096 = sst [smem:[#allocation44_spill]] %s14086_s4 }
   0x4   :  { %14097 = sst [smem:[#allocation45_spill]] %s14088_s6 }
   0x5   :  { %14 = vsyncpa [#allocation4], 0 }
   0x6   :  { %15 = vsyncpa [#allocation7], 0 }
   0x7   :  { %16 = vsyncpa [#allocation10], 0 }
   0x8   :  { %17 = vsyncpa [#allocation13], 0 }
   0x9   :  { %18 = vsyncpa [#allocation16], 0 }
   0xa   :  { %19 = vsyncpa [#allocation5], 0 }
   0xb   :  { %21 = vsyncpa [#allocation5 + $0x1], 0  ;;  %s12256_s30 = smov 0   ;;  %s12258_s10 = smov 0  }
   0xc   :  { %s12260_s11 = smov 0   ;;  %s12262_s12 = smov 0  }
   0xd LB: > { %s12277_s13 = sadd.s32 4294967295, %s12188_s12   ;;  %s8194_s14 = sadd.s32 4294967294, %s12188_s12   ;;  %s12188_s12 = sphi %s12262_s12, %s14155_s12   ;;  %s12184_s11 = sphi %s12260_s11, %s14159_s11   ;;  %s12180_s10 = sphi %s12258_s10, %s14158_s10   ;;  %s12176_s30 = sphi %s12256_s30, %s14157_s30  }
   0xe   : > { %s12281_s15 = sadd.s32 1, %s12188_s12   ;;  %s34_s16 = sadd.s32 1, %s12184_s11 }
   0xf   : > { %14098 = sst [smem:[#allocation24_spill]] %s12281_s15  ;;  %s31_s17 = ssub.s32 %s12188_s12, %s12281_s15 }
  0x10   : > { %p41_p0 = scmp.ne.s32.totalorder %s12184_s11, %s12180_s10  ;;  %p32_p1 = scmp.eq.s32.totalorder %s31_s17, 0 }
  0x11   : > { %p42_p2 = scmp.eq.s32.totalorder %s12188_s12, 0  ;;  %p239_p3 = scmp.eq.s32.totalorder %s12277_s13, 1 }
  0x12   : > { %p244_p4 = scmp.ne.s32.totalorder %s12180_s10, %s12176_s30  ;;  %p245_p7 = scmp.eq.s32.totalorder %s8194_s14, 1 }
  0x13   : > { %s12293_s18 = scalar_select %p32_p1, %s12184_s11, %s34_s16  }
  0x14   : > { %p12295_p5 = por %p42_p2, %p41_p0  ;;  %p12299_p6 = por %p239_p3, %p41_p0 }
  0x15   : > { %14099 = sst [smem:[#allocation25_spill]] %s12293_s18  ;;  %p8195_p8 = scmp.ge.s32.totalorder %s12188_s12, 1 }
  0x16   : > { %p252_p9 = scmp.lt.s32.totalorder %s12188_s12, 3  ;;  %p12305_p10 = por %p245_p7, %p244_p4 }
  0x17   : > { %p11553_p11 = scmp.eq.s32.totalorder %s12277_s13, 0  ;;  %s14104_s2 = sld [smem:[#allocation43_spill]] }
  0x18   : > { %p12310_p12 = pnand %p8195_p8, %p252_p9  ;;  %s12190_s26 = smov [#allocation6]  }
  0x19   : > { %s280_s27 = sshll.u32 %s12190_s26, 4  ;;  %s14105_s4 = sld [smem:[#allocation44_spill]]  ;;  %s281_s27 = int_to_ptr.vmem [resolvable:$true] %s280_s27 }
  0x1a   : > { %p11524_p13 = pneg %p12310_p12  ;;  %s14107_s6 = sld [smem:[#allocation45_spill]] }
  0x1b   : > { %s14108_s1 = sld [smem:[#allocation42_spill]]  ;;  %s12192_s18 = smov [#allocation12]  }
  0x1c   : > { %p12324_p0 = pnand %p11553_p11, %p11524_p13  ;;  %s332_s15 = sshll.u32 %s12192_s18, 4  ;;  %s333_s15 = int_to_ptr.vmem [resolvable:$true] %s332_s15 }
  0x1d   : > { %s278_s25 = sshll.u32 %s14104_s2, 4  ;;  %s12191_s2 = smov [#allocation9]   ;;  %s279_s25 = int_to_ptr.hbm [resolvable:$true] %s278_s25 }
  0x1e   : > { %s306_s26 = sshll.u32 %s12191_s2, 4  ;;  %s12193_s17 = smov [#allocation3]   ;;  %s307_s26 = int_to_ptr.vmem [resolvable:$true] %s306_s26 }
  0x1f   : > { %s304_s14 = sshll.u32 %s14105_s4, 4  ;;  %s265_s2 = sshll.u32 %s12193_s17, 4  ;;  %s305_s14 = int_to_ptr.hbm [resolvable:$true] %s304_s14  ;;  %s266_s2 = int_to_ptr.vmem [resolvable:$true] %s265_s2 }
  0x20   : > { %s330_s24 = sshll.u32 %s14107_s6, 4  ;;  %s12194_s23 = smov 256   ;;  %s331_s24 = int_to_ptr.hbm [resolvable:$true] %s330_s24 }
  0x21   : > { %11530 = dma.hbm_to_vmem [thread:$0]  (!%p12324_p0), %s279_s25, 64, %s281_s27, [#allocation7]  }
  0x22   : > { %11536 = dma.hbm_to_vmem [thread:$0]  (!%p12324_p0), %s305_s14, 64, %s307_s26, [#allocation10]  }
  0x23   : > { %s263_s4 = sshll.u32 %s14108_s1, 4  ;;  %s12195_s25 = smov 16   ;;  %s264_s4 = int_to_ptr.hbm [resolvable:$true] %s263_s4 }
  0x24   : > { %11542 = dma.hbm_to_vmem [thread:$0]  (!%p12324_p0), %s331_s24, 64, %s333_s15, [#allocation13]  }
  0x25   : > { %11527 = dma.hbm_to_vmem [thread:$0]  (!%p12324_p0), %s264_s4, 4608, %s266_s2, [#allocation4], %s12194_s23, %s12194_s23, %s12195_s25  }
  0x26   : > { %s289_s26 = sshll.u32 %s14085_s3, 4  ;;  %s12196_s28 = smov [#allocation8]   ;;  %s290_s26 = int_to_ptr.hbm [resolvable:$true] %s289_s26 }
  0x27   : > { %s291_s18 = sshll.u32 %s12196_s28, 4  ;;  %s315_s15 = sshll.u32 %s14087_s5, 4  ;;  %s292_s18 = int_to_ptr.vmem [resolvable:$true] %s291_s18  ;;  %s316_s15 = int_to_ptr.hbm [resolvable:$true] %s315_s15 }
  0x28   : > { %11533 = dma.hbm_to_vmem [thread:$0]  (!%p12324_p0), %s290_s26, 40960, %s292_s18, [#allocation7], %s12194_s23, %s12194_s23, %s12195_s25  }
  0x29   : > { %s12197_s24 = smov [#allocation11]   ;;  %s341_s2 = sshll.u32 %s14089_s7, 4  ;;  %s342_s2 = int_to_ptr.hbm [resolvable:$true] %s341_s2 }
  0x2a   : > { %s317_s17 = sshll.u32 %s12197_s24, 4  ;;  %s12198_s27 = smov [#allocation14]   ;;  %s318_s17 = int_to_ptr.vmem [resolvable:$true] %s317_s17 }
  0x2b   : > { %11539 = dma.hbm_to_vmem [thread:$0]  (!%p12324_p0), %s316_s15, 32768, %s318_s17, [#allocation10], %s12194_s23, %s12194_s23, %s12195_s25  }
  0x2c   : > { %s343_s14 = sshll.u32 %s12198_s27, 4  ;;  %s356_s29 = sshll.u32 %s14090_s8, 4  ;;  %s344_s14 = int_to_ptr.vmem [resolvable:$true] %s343_s14  ;;  %s357_s29 = int_to_ptr.hbm [resolvable:$true] %s356_s29 }
  0x2d   : > { %s12199_s26 = smov 64   ;;  %s12200_s18 = smov 4  }
  0x2e   : > { %11545 = dma.hbm_to_vmem [thread:$0]  (!%p12324_p0), %s342_s2, 4096, %s344_s14, [#allocation13], %s12199_s26, %s12199_s26, %s12200_s18  }
  0x2f   : > { %s12201_s24 = smov [#allocation15]   ;;  %p8204_p1 = scmp.ge.s32.totalorder %s12188_s12, 2 }
  0x30   : > { %s358_s6 = sshll.u32 %s12201_s24, 4  ;;  %s359_s6 = int_to_ptr.vmem [resolvable:$true] %s358_s6 }
  0x31   : > { %11548 = dma.hbm_to_vmem [thread:$0]  (!%p12324_p0), %s357_s29, 16, %s359_s6, [#allocation16]  }
  0x32   : > { %365 = sbr.rel (%p8204_p1) target bundleno = 87 (0x57), region = 48 }
  0x37   : > { %368 = sbr.rel (!%p12295_p5) target bundleno = 87 (0x57), region = 52  ;;  %s370_s23 = sand.u32 (%p12295_p5), 1, %s12184_s11  }
  0x38   : > { %s8205_s25 = sshll.u32 (%p12295_p5), %s12188_s12, 3  ;;  %s11488_s15 = smul.u32 (%p12295_p5), 224, %s370_s23 }
  0x39   : > { %s12372_s2 = scalar_lea.vmem (%p12295_p5), %s14082_s0, %s8205_s25 }
  0x3a   : > { %v457_v0 = vld [vmem:[%s12372_s2] sm:$0xff] (%p12295_p5)  ;;  %v459_v1 = vld [vmem:[%s12372_s2 + $0x10] sm:$0xff] (%p12295_p5)  ;;  %s12377_s19 = scalar_lea.vmem (%p12295_p5), [#allocation2], %s11488_s15 }
  0x3b   : > { %v461_v2 = vld [vmem:[%s12372_s2 + $0x20] sm:$0xff] (%p12295_p5)  ;;  %458 = vst [vmem:[%s12377_s19] sm:$0xff] (%p12295_p5), %v457_v0  ;;  %v463_v3 = vld [vmem:[%s12372_s2 + $0x30] sm:$0xff] (%p12295_p5) }
  0x3c   : > { %460 = vst [vmem:[%s12377_s19 + $0x8] sm:$0xff] %v459_v1  ;;  %v465_v4 = vld [vmem:[%s12372_s2 + $0x40] sm:$0xff]  ;;  %v467_v5 = vld [vmem:[%s12372_s2 + $0x50] sm:$0xff] }
  0x3d   : > { %462 = vst [vmem:[%s12377_s19 + $0x10] sm:$0xff] %v461_v2  ;;  %v469_v6 = vld [vmem:[%s12372_s2 + $0x60] sm:$0xff]  ;;  %v471_v7 = vld [vmem:[%s12372_s2 + $0x70] sm:$0xff] }
  0x3e   : > { %464 = vst [vmem:[%s12377_s19 + $0x18] sm:$0xff] %v463_v3  ;;  %v473_v8 = vld [vmem:[%s12372_s2 + $0x80] sm:$0xff]  ;;  %v475_v9 = vld [vmem:[%s12372_s2 + $0x90] sm:$0xff] }
  0x3f   : > { %466 = vst [vmem:[%s12377_s19 + $0x20] sm:$0xff] %v465_v4  ;;  %v477_v10 = vld [vmem:[%s12372_s2 + $0xa0] sm:$0xff]  ;;  %v479_v11 = vld [vmem:[%s12372_s2 + $0xb0] sm:$0xff] }
  0x40   : > { %468 = vst [vmem:[%s12377_s19 + $0x28] sm:$0xff] %v467_v5  ;;  %v481_v12 = vld [vmem:[%s12372_s2 + $0xc0] sm:$0xff]  ;;  %v483_v13 = vld [vmem:[%s12372_s2 + $0xd0] sm:$0xff] }
  0x41   : > { %470 = vst [vmem:[%s12377_s19 + $0x30] sm:$0xff] %v469_v6  ;;  %v485_v14 = vld [vmem:[%s12372_s2 + $0xe0] sm:$0xff]  ;;  %v487_v15 = vld [vmem:[%s12372_s2 + $0xf0] sm:$0xff] }
  0x42   : > { %472 = vst [vmem:[%s12377_s19 + $0x38] sm:$0xff] %v471_v7  ;;  %v489_v16 = vld [vmem:[%s12372_s2 + $0x100] sm:$0xff]  ;;  %v491_v17 = vld [vmem:[%s12372_s2 + $0x110] sm:$0xff] }
  0x43   : > { %474 = vst [vmem:[%s12377_s19 + $0x40] sm:$0xff] %v473_v8  ;;  %v493_v18 = vld [vmem:[%s12372_s2 + $0x120] sm:$0xff]  ;;  %v495_v19 = vld [vmem:[%s12372_s2 + $0x130] sm:$0xff] }
  0x44   : > { %476 = vst [vmem:[%s12377_s19 + $0x48] sm:$0xff] %v475_v9  ;;  %v497_v20 = vld [vmem:[%s12372_s2 + $0x140] sm:$0xff]  ;;  %v499_v21 = vld [vmem:[%s12372_s2 + $0x150] sm:$0xff] }
  0x45   : > { %478 = vst [vmem:[%s12377_s19 + $0x50] sm:$0xff] %v477_v10  ;;  %v501_v22 = vld [vmem:[%s12372_s2 + $0x160] sm:$0xff]  ;;  %v503_v23 = vld [vmem:[%s12372_s2 + $0x170] sm:$0xff] }
  0x46   : > { %480 = vst [vmem:[%s12377_s19 + $0x58] sm:$0xff] %v479_v11  ;;  %v505_v24 = vld [vmem:[%s12372_s2 + $0x180] sm:$0xff]  ;;  %v507_v25 = vld [vmem:[%s12372_s2 + $0x190] sm:$0xff] }
  0x47   : > { %482 = vst [vmem:[%s12377_s19 + $0x60] sm:$0xff] %v481_v12  ;;  %v509_v26 = vld [vmem:[%s12372_s2 + $0x1a0] sm:$0xff]  ;;  %v511_v27 = vld [vmem:[%s12372_s2 + $0x1b0] sm:$0xff] }
  0x48   : > { %484 = vst [vmem:[%s12377_s19 + $0x68] sm:$0xff] %v483_v13 }
  0x49   : > { %486 = vst [vmem:[%s12377_s19 + $0x70] sm:$0xff] %v485_v14 }
  0x4a   : > { %488 = vst [vmem:[%s12377_s19 + $0x78] sm:$0xff] %v487_v15 }
  0x4b   : > { %490 = vst [vmem:[%s12377_s19 + $0x80] sm:$0xff] %v489_v16 }
  0x4c   : > { %492 = vst [vmem:[%s12377_s19 + $0x88] sm:$0xff] %v491_v17 }
  0x4d   : > { %494 = vst [vmem:[%s12377_s19 + $0x90] sm:$0xff] %v493_v18 }
  0x4e   : > { %496 = vst [vmem:[%s12377_s19 + $0x98] sm:$0xff] %v495_v19 }
  0x4f   : > { %498 = vst [vmem:[%s12377_s19 + $0xa0] sm:$0xff] %v497_v20 }
  0x50   : > { %500 = vst [vmem:[%s12377_s19 + $0xa8] sm:$0xff] %v499_v21 }
  0x51   : > { %502 = vst [vmem:[%s12377_s19 + $0xb0] sm:$0xff] %v501_v22 }
  0x52   : > { %504 = vst [vmem:[%s12377_s19 + $0xb8] sm:$0xff] %v503_v23 }
  0x53   : > { %506 = vst [vmem:[%s12377_s19 + $0xc0] sm:$0xff] %v505_v24 }
  0x54   : > { %508 = vst [vmem:[%s12377_s19 + $0xc8] sm:$0xff] %v507_v25 }
  0x55   : > { %510 = vst [vmem:[%s12377_s19 + $0xd0] sm:$0xff] %v509_v26 }
  0x56   : > { %512 = vst [vmem:[%s12377_s19 + $0xd8] sm:$0xff] %v511_v27 }
  0x57 PF: > { %521 = sbr.rel (%p12310_p12) target bundleno = 2720 (0xaa0), region = 90 }
  0x5c   : > { %s12435_s16 = sand.u32 1, %s12180_s10  }
  0x5d   : > { %s11489_s27 = smul.u32 224, %s12435_s16 }
  0x5f   : > { %s12438_s14 = scalar_lea.vmem [#allocation2], %s11489_s27 }
  0x60   : > { %12151 = dma.done.wait (%p11553_p11), [#allocation4], 4608  }
  0x61   : > { %12153 = vsyncadd (%p11553_p11), [#allocation4], 4294962688 }
  0x62   : > { %12155 = dma.done.wait (%p11553_p11), [#allocation7], 41024  }
  0x63   : > { %12157 = vsyncadd (%p11553_p11), [#allocation7], 4294926272 }
  0x64   : > { %12159 = dma.done.wait (%p11553_p11), [#allocation10], 32832  }
  0x65   : > { %12161 = vsyncadd (%p11553_p11), [#allocation10], 4294934464 }
  0x66   : > { %12163 = dma.done.wait (%p11553_p11), [#allocation13], 4160  }
  0x67   : > { %12165 = vsyncadd (%p11553_p11), [#allocation13], 4294963136 }
  0x68   : > { %12167 = dma.done.wait (%p11553_p11), [#allocation16], 16  }
  0x69   : > { %12169 = vsyncadd (%p11553_p11), [#allocation16], 4294967280  ;;  %v12461_v28 = vld [vmem:[%s12438_s14 + $0x10] sm:$0xff]  ;;  %v12464_v29 = vld [vmem:[%s12438_s14 + $0x18] sm:$0xff]  ;;  %s12202_s22 = smov 56   ;;  %s12203_s1 = smov 28  }
  0x6a   : > { %v12467_v30 = vld [vmem:[%s12438_s14 + $0x8] sm:$0xff]  ;;  %v11628_v31 = vpack.i.bf16 %v12464_v29, %v12461_v28  ;;  %v12474_v33 = vld [vmem:[%s12438_s14 + $0x20] sm:$0xff]  ;;  %v12487_v37 = vld [vmem:[%s12438_s14 + $0x30] sm:$0xff]  ;;  %s12204_s28 = smov 84   ;;  %s12205_s29 = smov 112   ;;  %vm1326_vm0 = vcmask 1045504  }
  0x6b   : > { %v11618_v32 = vpack.i.bf16 %v12461_v28, %v12467_v30  ;;  %v11638_v34 = vpack.i.bf16 %v12474_v33, %v12464_v29  ;;  %v12481_v35 = vld [vmem:[%s12438_s14 + $0x28] sm:$0xff]  ;;  %v12490_v38 = vld [vmem:[%s12438_s14 + $0x38] sm:$0xff]  ;;  %v12502_v41 = vld [vmem:[%s12438_s14 + $0x40] sm:$0xff]  ;;  %vm943_vm1 = vcmask 228352   ;;  %vm968_vm2 = vcmask 457728   ;;  %s8215_s26 = sshll.u32 %s12435_s16, 3 }
  0x6c   : > { %11629 = vrot.lane.b32.xlu1 %v11628_v31, %s12202_s22  ;;  %v11623_v36 = vpack.i.bf16 %v12481_v35, %v12474_v33  ;;  %v11643_v39 = vpack.i.bf16 %v12490_v38, %v12487_v37  ;;  %v11653_v40 = vpack.i.bf16 %v12487_v37, %v12481_v35  ;;  %v12505_v42 = vld [vmem:[%s12438_s14 + $0x48] sm:$0xff]  ;;  %v11673_v44 = vpack.i.bf16 %v12502_v41, %v12490_v38  ;;  %v12515_v45 = vld [vmem:[%s12438_s14 + $0x50] sm:$0xff]  ;;  %v12518_v46 = vld [vmem:[%s12438_s14 + $0x58] sm:$0xff]  ;;  %s10841_s18 = sshll.u32 %s12277_s13, 3  ;;  %s598_s25 = scalar_lea.vmem [#allocation17], %s8215_s26 }
  0x6d   : > { %11619 = vrot.lane.b32.xlu0 %v11618_v32, %s12203_s1  ;;  %11639 = vrot.lane.b32.xlu2 %v11638_v34, %s12203_s1  ;;  %v11663_v43 = vpack.i.bf16 %v12505_v42, %v12502_v41  ;;  %v11683_v47 = vpack.i.bf16 %v12518_v46, %v12515_v45  ;;  %v8330_v48 = vld [vmem:[#allocation3 + $0xe0] sm:$0xf]  ;;  %v10874_v49 = vld [vmem:[#allocation3 + $0xec] sm:$0xf0]  ;;  %v10872_v50 = vld [vmem:[#allocation3 + $0xe4] sm:$0xf]  ;;  %v11693_v54 = vpack.i.bf16 %v12515_v45, %v12505_v42  ;;  %s8045_s23 = scalar_lea.hbm %s14091_s9, %s10841_s18 }
  0x6e   : > { %v8331_v51 = vor.u32 %v10874_v49, %v8330_v48  ;;  %v8332_v52 = vld [vmem:[#allocation3 + $0xf0] sm:$0xf0]  ;;  %v12529_v55 = vld [vmem:[%s12438_s14 + $0x60] sm:$0xff]  ;;  %v12532_v56 = vld [vmem:[%s12438_s14 + $0x68] sm:$0xff]  ;;  %vm993_vm3 = vcmask 687104   ;;  %vm1018_vm4 = vcmask 916480  }
  0x6f   : > { %v8335_v53 = vor.u32 %v10872_v50, %v8332_v52  ;;  %v11703_v57 = vpack.i.bf16 %v12532_v56, %v12529_v55  ;;  %v8314_v58 = vld [vmem:[#allocation3 + $0xc0] sm:$0xf]  ;;  %v10870_v59 = vld [vmem:[#allocation3 + $0xcc] sm:$0xf0]  ;;  %v10868_v60 = vld [vmem:[#allocation3 + $0xc4] sm:$0xf]  ;;  %v11713_v5 = vpack.i.bf16 %v12529_v55, %v12518_v46 }
  0x70   : > { %1339 = vmatpush.bf16.msra.mxu0 %v8331_v51  ;;  %v8315_v61 = vor.u32 %v10870_v59, %v8314_v58  ;;  %v8316_v62 = vld [vmem:[#allocation3 + $0xd0] sm:$0xf0]  ;;  %v8298_v63 = vld [vmem:[#allocation3 + $0xa0] sm:$0xf]  ;;  %v10866_v0 = vld [vmem:[#allocation3 + $0xac] sm:$0xf0] }
  0x71   : > { %1477 = vmatpush.bf16.msra.mxu2 %v8335_v53  ;;  %v8319_v1 = vor.u32 %v10868_v60, %v8316_v62  ;;  %v10864_v2 = vld [vmem:[#allocation3 + $0xa4] sm:$0xf]  ;;  %v8300_v3 = vld [vmem:[#allocation3 + $0xb0] sm:$0xf0]  ;;  %v8299_v4 = vor.u32 %v10866_v0, %v8298_v63  ;;  %v8282_v6 = vld [vmem:[#allocation3 + $0x80] sm:$0xf] }
  0x72   : > { %v10862_v7 = vld [vmem:[#allocation3 + $0x8c] sm:$0xf0]  ;;  %v8303_v8 = vor.u32 %v10864_v2, %v8300_v3  ;;  %v10860_v9 = vld [vmem:[#allocation3 + $0x84] sm:$0xf]  ;;  %v8284_v10 = vld [vmem:[#allocation3 + $0x90] sm:$0xf0] }
  0x73   : > { %v8283_v11 = vor.u32 %v10862_v7, %v8282_v6  ;;  %v8266_v12 = vld [vmem:[#allocation3 + $0x60] sm:$0xf]  ;;  %v10858_v13 = vld [vmem:[#allocation3 + $0x6c] sm:$0xf0]  ;;  %v12547_v15 = vld [vmem:[%s12438_s14 + $0x78] sm:$0xff]  ;;  %v8287_v16 = vor.u32 %v10860_v9, %v8284_v10  ;;  %vm1289_vm5 = vcmask 97280  }
  0x74   : > { %11634 = vrot.lane.b32.xlu1 %v11638_v34, %s12204_s28  ;;  %1340 = vmatpush.bf16.msra.mxu0 %v8315_v61  ;;  %v12544_v14 = vld [vmem:[%s12438_s14 + $0x70] sm:$0xff]  ;;  %v10856_v17 = vld [vmem:[#allocation3 + $0x64] sm:$0xf]  ;;  %v8267_v19 = vor.u32 %v10858_v13, %v8266_v12  ;;  %v12560_v24 = vld [vmem:[%s12438_s14 + $0x88] sm:$0xff]  ;;  %s8047_s15 = sshll.u32 %s598_s25, 4  ;;  %s8049_s17 = sshll.u32 %s8045_s23, 4  ;;  %s8048_s15 = int_to_ptr.vmem [resolvable:$true] %s8047_s15  ;;  %s8050_s17 = int_to_ptr.hbm [resolvable:$true] %s8049_s17 }
  0x75   : > { %11624 = vrot.lane.b32.xlu0 %v11623_v36, %s12205_s29  ;;  %11644 = vrot.lane.b32.xlu2 %v11643_v39, %s12205_s29  ;;  %v8268_v18 = vld [vmem:[#allocation3 + $0x70] sm:$0xf0]  ;;  %v11723_v20 = vpack.i.bf16 %v12547_v15, %v12544_v14  ;;  %v11733_v22 = vpack.i.bf16 %v12544_v14, %v12532_v56  ;;  %v12557_v23 = vld [vmem:[%s12438_s14 + $0x80] sm:$0xff]  ;;  %v10854_v34 = vld [vmem:[#allocation3 + $0x4c] sm:$0xf0]  ;;  %s8035_s4 = scalar_lea.sflag [#allocation5], %s12435_s16 }
  0x76   : > { %1478 = vmatpush.bf16.msra.mxu2 %v8319_v1  ;;  %v8271_v21 = vor.u32 %v10856_v17, %v8268_v18  ;;  %v11743_v25 = vpack.i.bf16 %v12560_v24, %v12557_v23  ;;  %v11753_v26 = vpack.i.bf16 %v12557_v23, %v12547_v15  ;;  %v12572_v27 = vld [vmem:[%s12438_s14 + $0x90] sm:$0xff]  ;;  %v8250_v32 = vld [vmem:[#allocation3 + $0x40] sm:$0xf]  ;;  %v10848_v48 = vld [vmem:[#allocation3 + $0x24] sm:$0xf]  ;;  %s12120_s2 = sshra.s32 %s8050_s17, 4  ;;  %s12121_s2 = int_to_ptr.hbm [resolvable:$true] %s12120_s2 }
  0x77   : > { %v11773_v31 = vpack.i.bf16 %v12572_v27, %v12560_v24  ;;  %v8236_v50 = vld [vmem:[#allocation3 + $0x30] sm:$0xf0]  ;;  %v8346_v52 = vld [vmem:[#allocation3 + $0x100] sm:$0xf]  ;;  %v10878_v53 = vld [vmem:[#allocation3 + $0x10c] sm:$0x30]  ;;  %p12127_p5 = scmp.lt.s32.totalorder %s12121_s2, %s14091_s9 }
  0x78   : > { %1341 = vmatpush.bf16.msra.mxu0 %v8299_v4  ;;  %v8239_v51 = vor.u32 %v10848_v48, %v8236_v50  ;;  %v8348_v58 = vld [vmem:[#allocation3 + $0x110] sm:$0x30]  ;;  %v8218_v61 = vld [vmem:[#allocation3] sm:$0xf]  ;;  %v10846_v62 = vld [vmem:[#allocation3 + $0xc] sm:$0xf0] }
  0x79   : > { %v8219_v0 = vor.u32 %v10846_v62, %v8218_v61  ;;  %v10844_v1 = vld [vmem:[#allocation3 + $0x4] sm:$0xf]  ;;  %v8220_v2 = vld [vmem:[#allocation3 + $0x10] sm:$0xf0]  ;;  %v12582_v4 = vld [vmem:[%s12438_s14 + $0x98] sm:$0xff]  ;;  %s12122_s19 = scalar_lea.hbm %s12121_s2, 8 }
  0x7a   : > { %1479 = vmatpush.bf16.msra.mxu2 %v8303_v8  ;;  %v8223_v3 = vor.u32 %v10844_v1, %v8220_v2  ;;  %v12587_v6 = vld [vmem:[%s12438_s14 + $0xa0] sm:$0xff]  ;;  %v12590_v7 = vld [vmem:[%s12438_s14 + $0xa8] sm:$0xff]  ;;  %v12601_v10 = vld [vmem:[%s12438_s14 + $0xb0] sm:$0xff]  ;;  %p12123_p2 = scmp.ne.s32.totalorder %s12121_s2, %s12122_s19 }
  0x7b   : > { %v11783_v8 = vpack.i.bf16 %v12590_v7, %v12587_v6  ;;  %v11798_v9 = vpack.i.bf16 %v12587_v6, %v12582_v4  ;;  %v11813_v17 = vpack.i.bf16 %v12601_v10, %v12590_v7 }
  0x7c   : > { %11654 = vrot.lane.b32.xlu1 %v11653_v40, %s12204_s28  ;;  %1342 = vmatpush.bf16.msra.mxu0 %v8283_v11  ;;  %v12604_v11 = vld [vmem:[%s12438_s14 + $0xb8] sm:$0xff]  ;;  %p12124_p3 = pnand %p12123_p2, %p12299_p6 }
  0x7d   : > { %11649 = vrot.lane.b32.xlu0 %v11623_v36, %s12202_s22  ;;  %11659 = vrot.lane.b32.xlu2 %v11653_v40, %s12203_s1  ;;  %v8251_v36 = vor.u32 %v10854_v34, %v8250_v32  ;;  %v8252_v40 = vld [vmem:[#allocation3 + $0x50] sm:$0xf0] }
  0x7e   : > { %1480 = vmatpush.bf16.msra.mxu2 %v8287_v16  ;;  %v11803_v16 = vpack.i.bf16 %v12604_v11, %v12601_v10  ;;  %p12125_p4 = pneg %p12124_p3 }
  0x80   : > { %1343 = vmatpush.bf16.msra.mxu0 %v8267_v19 }
  0x82   : > { %1481 = vmatpush.bf16.msra.mxu2 %v8271_v21  ;;  %v600_v21 = vld [vmem:[%s12438_s14] sm:$0xff] }
  0x84   : > { %11669 = vrot.lane.b32.xlu1 %v11643_v39, %s12202_s22  ;;  %v10852_v39 = vld [vmem:[#allocation3 + $0x44] sm:$0xf]  ;;  %1344 = vmatpush.bf16.msra.mxu0 %v8251_v36 }
  0x85   : > { %11664 = vrot.lane.b32.xlu0 %v11663_v43, %s12205_s29  ;;  %11674 = vrot.lane.b32.xlu2 %v11673_v44, %s12204_s28 }
  0x8c   : > { %11684 = vrot.lane.b32.xlu1 %v11683_v47, %s12205_s29 }
  0x8d   : > { %11679 = vrot.lane.b32.xlu0 %v11673_v44, %s12203_s1  ;;  %11689 = vrot.lane.b32.xlu2 %v11663_v43, %s12202_s22  ;;  %v8255_v43 = vor.u32 %v10852_v39, %v8252_v40  ;;  %v8234_v44 = vld [vmem:[#allocation3 + $0x20] sm:$0xf] }
  0x8f   : > { %1482 = vmatpush.bf16.msra.mxu2 %v8255_v43 }
  0x93   : > { %1483 = vmatpush.bf16.msra.mxu2 %v8239_v51 }
  0x94   : > { %11699 = vrot.lane.b32.xlu1 %v11693_v54, %s12203_s1 }
  0x95   : > { %11694 = vrot.lane.b32.xlu0 %v11693_v54, %s12204_s28  ;;  %11704 = vrot.lane.b32.xlu2 %v11703_v57, %s12205_s29  ;;  %v10876_v54 = vld [vmem:[#allocation3 + $0x104] sm:$0xf] }
  0x96   : > { %v8351_v59 = vor.u32 %v10876_v54, %v8348_v58  ;;  %v624_v58 = vld [vmem:[%s12438_s14 + $0xc0] sm:$0xff] }
  0x97   : > { %1484 = vmatpush.bf16.msra.mxu2 %v8223_v3  ;;  %v12637_v61 = vpack.i.bf16 %v624_v58, %v12604_v11 }
  0x98   : > { %v1331_v63 = vsel %vm1326_vm0, %v8351_v59, 0 }
  0x99   : > { %1553 = vmatpush.bf16.msra.mxu3 %v1331_v63 }
  0x9c   : > { %11714 = vrot.lane.b32.xlu1 %v11713_v5, %s12204_s28 }
  0x9d   : > { %11709 = vrot.lane.b32.xlu0 %v11683_v47, %s12202_s22  ;;  %11719 = vrot.lane.b32.xlu2 %v11713_v5, %s12203_s1  ;;  %v10850_v47 = vld [vmem:[#allocation3 + $0x2c] sm:$0xf0]  ;;  %v11788_v5 = vpack.i.bf16 %v12582_v4, %v12572_v27 }
  0x9e   : > { %v8235_v49 = vor.u32 %v10850_v47, %v8234_v44 }
  0xa0   : > { %1345 = vmatpush.bf16.msra.mxu0 %v8235_v49 }
  0xa4   : > { %11729 = vrot.lane.b32.xlu1 %v11703_v57, %s12202_s22  ;;  %v8347_v57 = vor.u32 %v10878_v53, %v8346_v52  ;;  %1346 = vmatpush.bf16.msra.mxu0 %v8219_v0 }
  0xa5   : > { %11724 = vrot.lane.b32.xlu0 %v11723_v20, %s12205_s29  ;;  %11734 = vrot.lane.b32.xlu2 %v11733_v22, %s12204_s28 }
  0xa6   : > { %v1328_v60 = vsel %vm1326_vm0, %v8347_v57, 0 }
  0xa7   : > { %1415 = vmatpush.bf16.msra.mxu1 %v1328_v60 }
  0xac   : > { %11744 = vrot.lane.b32.xlu1 %v11743_v25, %s12205_s29 }
  0xad   : > { %11739 = vrot.lane.b32.xlu0 %v11733_v22, %s12203_s1  ;;  %11749 = vrot.lane.b32.xlu2 %v11723_v20, %s12202_s22 }
  0xb4   : > { %11759 = vrot.lane.b32.xlu1 %v11753_v26, %s12203_s1 }
  0xb5   : > { %11754 = vrot.lane.b32.xlu0 %v11753_v26, %s12204_s28  ;;  %11764 = vrot.lane.b32.xlu2 %v11788_v5, %s12205_s29 }
  0xbc   : > { %11774 = vrot.lane.b32.xlu1 %v11773_v31, %s12204_s28 }
  0xbd   : > { %11769 = vrot.lane.b32.xlu0 %v11743_v25, %s12202_s22  ;;  %11779 = vrot.lane.b32.xlu2 %v11773_v31, %s12203_s1 }
  0xc4   : > { %11789 = vrot.lane.b32.xlu1 %v11788_v5, %s12202_s22 }
  0xc5   : > { %11784 = vrot.lane.b32.xlu0 %v11783_v8, %s12205_s29  ;;  %11794 = vrot.lane.b32.xlu2 %v11798_v9, %s12204_s28 }
  0xc7   : > { %v11640_v18 = vpop.permute.xlu2 %11639 }
  0xc8   : > { %v11642_v54 = vunpack.i.h.bf16 %v11640_v18  ;;  %v11641_v57 = vunpack.i.l.bf16 %v11640_v18 }
  0xca   : > { %v947_v62 = vsel %vm943_vm1, %v12464_v29, %v11642_v54  ;;  %v946_v63 = vsel %vm943_vm1, %v12461_v28, %v11641_v57  ;;  %v8356_v54 = vld [vmem:[#allocation3 + $0x118] sm:$0x30]  ;;  %v10873_v57 = vld [vmem:[#allocation3 + $0xec] sm:$0xf] }
  0xcc   : > { %11804 = vrot.lane.b32.xlu1 %v11803_v16, %s12205_s29 }
  0xcd   : > { %11799 = vrot.lane.b32.xlu0 %v11798_v9, %s12203_s1  ;;  %11809 = vrot.lane.b32.xlu2 %v11783_v8, %s12202_s22 }
  0xcf   : > { %v11645_v52 = vpop.permute.xlu2 %11644 }
  0xd0   : > { %v11647_v29 = vunpack.i.h.bf16 %v11645_v52 }
  0xd4   : > { %11819 = vrot.lane.b32.xlu1 %v11813_v17, %s12203_s1 }
  0xd5   : > { %11814 = vrot.lane.b32.xlu0 %v11813_v17, %s12204_s28 }
  0xdc   : > { %11834 = vrot.lane.b32.xlu1 %v12637_v61, %s12204_s28 }
  0xdd   : > { %11829 = vrot.lane.b32.xlu0 %v11803_v16, %s12202_s22 }
  0xde   : > { %v11630_v12 = vpop.permute.xlu1 %11629 }
  0xdf   : > { %v11620_v13 = vpop.permute.xlu0 %11619  ;;  %v11632_v22 = vunpack.i.h.bf16 %v11630_v12  ;;  %v11631_v25 = vunpack.i.l.bf16 %v11630_v12  ;;  %v11646_v12 = vunpack.i.l.bf16 %v11645_v52  ;;  %v10877_v52 = vld [vmem:[#allocation3 + $0x10c] sm:$0xf] }
  0xe0   : > { %v11622_v19 = vunpack.i.h.bf16 %v11620_v13  ;;  %v11621_v20 = vunpack.i.l.bf16 %v11620_v13  ;;  %v11660_v13 = vpop.permute.xlu2 %11659 }
  0xe1   : > { %v12651_v16 = vpack.c.bf16 %v11647_v29, %v11646_v12 }
  0xe2   : > { %v945_v26 = vsel %vm943_vm1, %v12467_v30, %v11622_v19  ;;  %v944_v32 = vsel %vm943_vm1, %v600_v21, %v11621_v20  ;;  %v11662_v21 = vunpack.i.h.bf16 %v11660_v13 }
  0xe3   : > { %v969_v44 = vsel %vm968_vm2, %v944_v32, %v11631_v25  ;;  %v970_v47 = vsel %vm968_vm2, %v945_v26, %v11632_v22  ;;  %v11661_v22 = vunpack.i.l.bf16 %v11660_v13  ;;  %v12662_v26 = vld [vmem:[%s12438_s14 + $0xc8] sm:$0xff] }
  0xe4   : > { %v8354_v32 = vld [vmem:[#allocation3 + $0x108] sm:$0xf] }
  0xe6   : > { %v11635_v34 = vpop.permute.xlu1 %11634 }
  0xe7   : > { %v11625_v31 = vpop.permute.xlu0 %11624  ;;  %v11637_v36 = vunpack.i.h.bf16 %v11635_v34  ;;  %v11636_v39 = vunpack.i.l.bf16 %v11635_v34  ;;  %v10879_v34 = vld [vmem:[#allocation3 + $0x114] sm:$0x30] }
  0xe8   : > { %v11627_v40 = vunpack.i.h.bf16 %v11625_v31  ;;  %v11626_v43 = vunpack.i.l.bf16 %v11625_v31  ;;  %v11848_v31 = vpack.i.bf16 %v12662_v26, %v624_v58 }
  0xe9   : > { %v994_v30 = vsel %vm993_vm3, %v969_v44, %v11636_v39  ;;  %v995_v48 = vsel %vm993_vm3, %v970_v47, %v11637_v36  ;;  %v12668_v36 = vld [vmem:[%s12438_s14 + $0xd0] sm:$0xff]  ;;  %v8355_v44 = vor.u32 %v10879_v34, %v8354_v32  ;;  %v627_v47 = vld [vmem:[%s12438_s14 + $0xd8] sm:$0xff]  ;;  %v8322_v32 = vld [vmem:[#allocation3 + $0xc8] sm:$0xf]  ;;  %s12126_s14 = scalar_lea.hbm %s14091_s9, 16 }
  0xea   : > { %v12623_v49 = vpack.c.bf16 %v11627_v40, %v11626_v43  ;;  %v1019_v50 = vsel %vm1018_vm4, %v994_v30, %v11626_v43  ;;  %v1020_v51 = vsel %vm1018_vm4, %v995_v48, %v11627_v40  ;;  %v11675_v43 = vpop.permute.xlu2 %11674  ;;  %v8338_v30 = vld [vmem:[#allocation3 + $0xe8] sm:$0xf]  ;;  %v10875_v48 = vld [vmem:[#allocation3 + $0xf4] sm:$0xf0]  ;;  %11849 = vrot.lane.b32.xlu1 %v11848_v31, %s12202_s22  ;;  %11824 = vrot.lane.b32.xlu2 %v11848_v31, %s12205_s29  ;;  %p12128_p7 = scmp.lt.s32.totalorder %s12126_s14, %s12122_s19 }
  0xeb   : > { %v12627_v53 = vpack.c.bf16 %v1020_v51, %v1019_v50  ;;  %v949_v50 = vsel %vm943_vm1, %v12481_v35, %v11662_v21  ;;  %v948_v51 = vsel %vm943_vm1, %v12474_v33, %v11661_v22  ;;  %v1334_v58 = vsel %vm1326_vm0, %v8355_v44, 0  ;;  %v10871_v34 = vld [vmem:[#allocation3 + $0xd4] sm:$0xf0] }
  0xec   : > { %8360 = vmatmul.msk.bf16.vlgmr.msra.gmra.mxu1 %vm1289_vm5, %v12623_v49  ;;  %8372 = vmatmul.msk.bf16.vlgmr.msra.gmra.mxu3 %vm1289_vm5, %v12623_v49  ;;  %p12129_p8 = por %p12128_p7, %p12127_p5 }
  0xed   : > { %1347 = vmatmul.bf16.vlgmr.msra.gmra.mxu0 %v12627_v53  ;;  %1485 = vmatmul.bf16.vlgmr.msra.gmra.mxu2 %v12627_v53 }
  0xee   : > { %v11655_v60 = vpop.permute.xlu1 %11654  ;;  %1691 = vmatpush.bf16.msrb.mxu3 %v1334_v58  ;;  %p12130_p9 = pnand %p12129_p8, %p12125_p4 }
  0xef   : > { %v11650_v59 = vpop.permute.xlu0 %11649  ;;  %v11657_v2 = vunpack.i.h.bf16 %v11655_v60  ;;  %v11656_v3 = vunpack.i.l.bf16 %v11655_v60  ;;  %v8339_v60 = vor.u32 %v10875_v48, %v8338_v30 }
  0xf0   : > { %v11652_v0 = vunpack.i.h.bf16 %v11650_v59  ;;  %v11651_v1 = vunpack.i.l.bf16 %v11650_v59  ;;  %v11843_v59 = vpack.i.bf16 %v627_v47, %v12668_v36 }
  0xf1   : > { %1615 = vmatpush.bf16.msrb.mxu1 %v8339_v60 }
  0xf2   : > { %v972_v5 = vsel %vm968_vm2, %v947_v62, %v11652_v0  ;;  %v971_v9 = vsel %vm968_vm2, %v946_v63, %v11651_v1  ;;  %v8359_v62 = vor.u32 %v10877_v52, %v8356_v54  ;;  %v8340_v63 = vld [vmem:[#allocation3 + $0xf8] sm:$0xf0]  ;;  %v11677_v0 = vunpack.i.h.bf16 %v11675_v43  ;;  %11844 = vrot.lane.b32.xlu0 %v11843_v59, %s12205_s29  ;;  %11839 = vrot.lane.b32.xlu2 %v12637_v61, %s12203_s1 }
  0xf3   : > { %v996_v28 = vsel %vm993_vm3, %v971_v9, %v11656_v3  ;;  %v997_v17 = vsel %vm993_vm3, %v972_v5, %v11657_v2  ;;  %v11676_v1 = vunpack.i.l.bf16 %v11675_v43  ;;  %v8343_v3 = vor.u32 %v10873_v57, %v8340_v63 }
  0xf4   : > { %v1021_v8 = vsel %vm1018_vm4, %v996_v28, %v11646_v12  ;;  %v1022_v18 = vsel %vm1018_vm4, %v997_v17, %v11647_v29  ;;  %v1337_v2 = vsel %vm1326_vm0, %v8359_v62, 0  ;;  %v8323_v43 = vor.u32 %v10871_v34, %v8322_v32 }
  0xf5   : > { %v12655_v20 = vpack.c.bf16 %v1022_v18, %v1021_v8  ;;  %1829 = vmatpush.bf16.msrb.mxu2 %v1337_v2  ;;  %1753 = vmatpush.bf16.msrb.mxu0 %v8343_v3  ;;  %v11853_v52 = vpack.i.bf16 %v12668_v36, %v12662_v26 }
  0xf6   : > { %v11670_v25 = vpop.permute.xlu1 %11669  ;;  %1616 = vmatpush.bf16.msrb.mxu1 %v8323_v43 }
  0xf7   : > { %v11665_v19 = vpop.permute.xlu0 %11664  ;;  %v11672_v39 = vunpack.i.h.bf16 %v11670_v25  ;;  %v11671_v40 = vunpack.i.l.bf16 %v11670_v25 }
  0xf8   : > { %v11667_v5 = vunpack.i.h.bf16 %v11665_v19  ;;  %v11666_v9 = vunpack.i.l.bf16 %v11665_v19  ;;  %v11690_v19 = vpop.permute.xlu2 %11689 }
  0xf9   : > { %v974_v35 = vsel %vm968_vm2, %v949_v50, %v11672_v39  ;;  %v973_v33 = vsel %vm968_vm2, %v948_v51, %v11671_v40  ;;  %v11692_v31 = vunpack.i.h.bf16 %v11690_v19  ;;  %v11691_v39 = vunpack.i.l.bf16 %v11690_v19 }
  0xfa   : > { %v998_v12 = vsel %vm993_vm3, %v973_v33, %v11676_v1  ;;  %v999_v13 = vsel %vm993_vm3, %v974_v35, %v11677_v0  ;;  %v12685_v28 = vpack.c.bf16 %v11667_v5, %v11666_v9  ;;  %11854 = vrot.lane.b32.xlu2 %v11853_v52, %s12204_s28  ;;  %v10869_v1 = vld [vmem:[#allocation3 + $0xcc] sm:$0xf]  ;;  %v8324_v35 = vld [vmem:[#allocation3 + $0xd8] sm:$0xf0] }
  0xfb   : > { %v1024_v17 = vsel %vm1018_vm4, %v999_v13, %v11667_v5  ;;  %v1023_v8 = vsel %vm1018_vm4, %v998_v12, %v11666_v9  ;;  %v8327_v5 = vor.u32 %v10869_v1, %v8324_v35 }
  0xfc   : > { %8361 = vmatmul.msk.bf16.gmra.mxu1 %vm1289_vm5, %v12651_v16  ;;  %8373 = vmatmul.msk.bf16.gmra.mxu3 %vm1289_vm5, %v12651_v16  ;;  %v12689_v21 = vpack.c.bf16 %v1024_v17, %v1023_v8 }
  0xfd   : > { %1352 = vmatmul.bf16.gmra.mxu0 %v12655_v20  ;;  %1490 = vmatmul.bf16.gmra.mxu2 %v12655_v20 }
  0xfe   : > { %v11685_v18 = vpop.permute.xlu1 %11684  ;;  %1754 = vmatpush.bf16.msrb.mxu0 %v8327_v5 }
  0xff   : > { %v11680_v29 = vpop.permute.xlu0 %11679  ;;  %v11687_v54 = vunpack.i.h.bf16 %v11685_v18  ;;  %v11686_v57 = vunpack.i.l.bf16 %v11685_v18 }
 0x100   : > { %v11682_v22 = vunpack.i.h.bf16 %v11680_v29  ;;  %v11681_v25 = vunpack.i.l.bf16 %v11680_v29  ;;  %v11705_v62 = vpop.permute.xlu2 %11704 }
 0x101   : > { %v12709_v59 = vpack.c.bf16 %v11687_v54, %v11686_v57  ;;  %v11707_v18 = vunpack.i.h.bf16 %v11705_v62 }
 0x102   : > { %v951_v44 = vsel %vm943_vm1, %v12490_v38, %v11682_v22  ;;  %v950_v47 = vsel %vm943_vm1, %v12487_v37, %v11681_v25  ;;  %v11706_v22 = vunpack.i.l.bf16 %v11705_v62 }
 0x103   : > { %v975_v50 = vsel %vm968_vm2, %v950_v47, %v11691_v39  ;;  %v976_v51 = vsel %vm968_vm2, %v951_v44, %v11692_v31  ;;  %v8306_v47 = vld [vmem:[#allocation3 + $0xa8] sm:$0xf] }
 0x104   : > { %v12730_v34 = vpack.c.bf16 %v11707_v18, %v11706_v22 }
 0x106   : > { %v11700_v58 = vpop.permute.xlu1 %11699 }
 0x107   : > { %v11695_v40 = vpop.permute.xlu0 %11694  ;;  %v11702_v63 = vunpack.i.h.bf16 %v11700_v58  ;;  %v11701_v0 = vunpack.i.l.bf16 %v11700_v58 }
 0x108   : > { %v11697_v30 = vunpack.i.h.bf16 %v11695_v40  ;;  %v11696_v48 = vunpack.i.l.bf16 %v11695_v40  ;;  %v11720_v25 = vpop.permute.xlu2 %11719 }
 0x109   : > { %v953_v9 = vsel %vm943_vm1, %v12505_v42, %v11702_v63  ;;  %v952_v29 = vsel %vm943_vm1, %v12502_v41, %v11701_v0  ;;  %v11722_v39 = vunpack.i.h.bf16 %v11720_v25  ;;  %v11721_v40 = vunpack.i.l.bf16 %v11720_v25 }
 0x10a   : > { %v1000_v38 = vsel %vm993_vm3, %v975_v50, %v11696_v48  ;;  %v1001_v37 = vsel %vm993_vm3, %v976_v51, %v11697_v30  ;;  %v10867_v30 = vld [vmem:[#allocation3 + $0xb4] sm:$0xf0]  ;;  %v10865_v48 = vld [vmem:[#allocation3 + $0xac] sm:$0xf] }
 0x10b   : > { %v1025_v61 = vsel %vm1018_vm4, %v1000_v38, %v11686_v57  ;;  %v1026_v60 = vsel %vm1018_vm4, %v1001_v37, %v11687_v54  ;;  %v8307_v54 = vor.u32 %v10867_v30, %v8306_v47  ;;  %v8308_v57 = vld [vmem:[#allocation3 + $0xb8] sm:$0xf0]  ;;  %v955_v58 = vsel %vm943_vm1, %v12518_v46, %v11722_v39 }
 0x10c   : > { %8362 = vmatmul.msk.bf16.gmra.mxu1 %vm1289_vm5, %v12685_v28  ;;  %8374 = vmatmul.msk.bf16.gmra.mxu3 %vm1289_vm5, %v12685_v28  ;;  %v12718_v26 = vpack.c.bf16 %v1026_v60, %v1025_v61  ;;  %v954_v38 = vsel %vm943_vm1, %v12515_v45, %v11721_v40  ;;  %v8311_v37 = vor.u32 %v10865_v48, %v8308_v57  ;;  %v10863_v48 = vld [vmem:[#allocation3 + $0x94] sm:$0xf0] }
 0x10d   : > { %1357 = vmatmul.bf16.gmra.mxu0 %v12689_v21  ;;  %1495 = vmatmul.bf16.gmra.mxu2 %v12689_v21 }
 0x10e   : > { %v11715_v3 = vpop.permute.xlu1 %11714  ;;  %1617 = vmatpush.bf16.msrb.mxu1 %v8307_v54  ;;  %1755 = vmatpush.bf16.msrb.mxu0 %v8311_v37 }
 0x10f   : > { %v11710_v36 = vpop.permute.xlu0 %11709  ;;  %v11717_v12 = vunpack.i.h.bf16 %v11715_v3  ;;  %v11716_v13 = vunpack.i.l.bf16 %v11715_v3 }
 0x110   : > { %v11712_v33 = vunpack.i.h.bf16 %v11710_v36  ;;  %v11711_v2 = vunpack.i.l.bf16 %v11710_v36  ;;  %v11735_v52 = vpop.permute.xlu2 %11734 }
 0x111   : > { %v11737_v61 = vunpack.i.h.bf16 %v11735_v52  ;;  %v11736_v60 = vunpack.i.l.bf16 %v11735_v52 }
 0x112   : > { %v978_v17 = vsel %vm968_vm2, %v953_v9, %v11712_v33  ;;  %v977_v8 = vsel %vm968_vm2, %v952_v29, %v11711_v2 }
 0x113   : > { %v1002_v19 = vsel %vm993_vm3, %v977_v8, %v11716_v13  ;;  %v1003_v32 = vsel %vm993_vm3, %v978_v17, %v11717_v12 }
 0x114   : > { %v1027_v42 = vsel %vm1018_vm4, %v1002_v19, %v11706_v22  ;;  %v1028_v41 = vsel %vm1018_vm4, %v1003_v32, %v11707_v18 }
 0x115   : > { %v12738_v43 = vpack.c.bf16 %v1028_v41, %v1027_v42 }
 0x116   : > { %v11730_v44 = vpop.permute.xlu1 %11729 }
 0x117   : > { %v11725_v31 = vpop.permute.xlu0 %11724  ;;  %v11732_v50 = vunpack.i.h.bf16 %v11730_v44  ;;  %v11731_v51 = vunpack.i.l.bf16 %v11730_v44 }
 0x118   : > { %v11727_v0 = vunpack.i.h.bf16 %v11725_v31  ;;  %v11726_v36 = vunpack.i.l.bf16 %v11725_v31  ;;  %v11750_v12 = vpop.permute.xlu2 %11749 }
 0x119   : > { %v980_v62 = vsel %vm968_vm2, %v955_v58, %v11732_v50  ;;  %v979_v63 = vsel %vm968_vm2, %v954_v38, %v11731_v51  ;;  %v11752_v13 = vunpack.i.h.bf16 %v11750_v12  ;;  %v11751_v17 = vunpack.i.l.bf16 %v11750_v12 }
 0x11a   : > { %v1004_v35 = vsel %vm993_vm3, %v979_v63, %v11736_v60  ;;  %v1005_v33 = vsel %vm993_vm3, %v980_v62, %v11737_v61  ;;  %v12750_v46 = vpack.c.bf16 %v11727_v0, %v11726_v36  ;;  %v10861_v63 = vld [vmem:[#allocation3 + $0x8c] sm:$0xf] }
 0x11b   : > { %v1030_v45 = vsel %vm1018_vm4, %v1005_v33, %v11727_v0  ;;  %v1029_v2 = vsel %vm1018_vm4, %v1004_v35, %v11726_v36  ;;  %v8292_v0 = vld [vmem:[#allocation3 + $0x98] sm:$0xf0] }
 0x11c   : > { %8363 = vmatmul.msk.bf16.gmra.mxu1 %vm1289_vm5, %v12709_v59  ;;  %8375 = vmatmul.msk.bf16.gmra.mxu3 %vm1289_vm5, %v12709_v59  ;;  %v12754_v5 = vpack.c.bf16 %v1030_v45, %v1029_v2  ;;  %v8295_v36 = vor.u32 %v10861_v63, %v8292_v0 }
 0x11d   : > { %1362 = vmatmul.bf16.gmra.mxu0 %v12718_v26  ;;  %1500 = vmatmul.bf16.gmra.mxu2 %v12718_v26 }
 0x11e   : > { %v11745_v3 = vpop.permute.xlu1 %11744  ;;  %1756 = vmatpush.bf16.msrb.mxu0 %v8295_v36 }
 0x11f   : > { %v11740_v1 = vpop.permute.xlu0 %11739  ;;  %v11747_v41 = vunpack.i.h.bf16 %v11745_v3  ;;  %v11746_v31 = vunpack.i.l.bf16 %v11745_v3 }
 0x120   : > { %v11742_v9 = vunpack.i.h.bf16 %v11740_v1  ;;  %v11741_v29 = vunpack.i.l.bf16 %v11740_v1  ;;  %v11765_v51 = vpop.permute.xlu2 %11764 }
 0x121   : > { %v12770_v47 = vpack.c.bf16 %v11747_v41, %v11746_v31  ;;  %v11767_v2 = vunpack.i.h.bf16 %v11765_v51  ;;  %v11766_v3 = vunpack.i.l.bf16 %v11765_v51 }
 0x122   : > { %v957_v18 = vsel %vm943_vm1, %v12532_v56, %v11742_v9  ;;  %v956_v22 = vsel %vm943_vm1, %v12529_v55, %v11741_v29  ;;  %v8290_v55 = vld [vmem:[#allocation3 + $0x88] sm:$0xf] }
 0x123   : > { %v981_v32 = vsel %vm968_vm2, %v956_v22, %v11751_v17  ;;  %v982_v42 = vsel %vm968_vm2, %v957_v18, %v11752_v13  ;;  %v8291_v50 = vor.u32 %v10863_v48, %v8290_v55  ;;  %v12790_v12 = vpack.c.bf16 %v11767_v2, %v11766_v3 }
 0x125   : > { %1618 = vmatpush.bf16.msrb.mxu1 %v8291_v50  ;;  %v12808_v50 = vld [vmem:[#allocation6] sm:$0xf] }
 0x126   : > { %v11760_v39 = vpop.permute.xlu1 %11759 }
 0x127   : > { %v11755_v8 = vpop.permute.xlu0 %11754  ;;  %v11762_v52 = vunpack.i.h.bf16 %v11760_v39  ;;  %v11761_v54 = vunpack.i.l.bf16 %v11760_v39 }
 0x128   : > { %v11757_v25 = vunpack.i.h.bf16 %v11755_v8  ;;  %v11756_v19 = vunpack.i.l.bf16 %v11755_v8  ;;  %v11780_v9 = vpop.permute.xlu2 %11779 }
 0x129   : > { %v959_v60 = vsel %vm943_vm1, %v12547_v15, %v11762_v52  ;;  %v958_v62 = vsel %vm943_vm1, %v12544_v14, %v11761_v54  ;;  %v11782_v8 = vunpack.i.h.bf16 %v11780_v9  ;;  %v11781_v18 = vunpack.i.l.bf16 %v11780_v9  ;;  %v8274_v54 = vld [vmem:[#allocation3 + $0x68] sm:$0xf] }
 0x12a   : > { %v1006_v40 = vsel %vm993_vm3, %v981_v32, %v11756_v19  ;;  %v1007_v44 = vsel %vm993_vm3, %v982_v42, %v11757_v25 }
 0x12b   : > { %v1031_v56 = vsel %vm1018_vm4, %v1006_v40, %v11746_v31  ;;  %v1032_v30 = vsel %vm1018_vm4, %v1007_v44, %v11747_v41  ;;  %v961_v41 = vsel %vm943_vm1, %v12560_v24, %v11782_v8  ;;  %v960_v31 = vsel %vm943_vm1, %v12557_v23, %v11781_v18  ;;  %v10859_v24 = vld [vmem:[#allocation3 + $0x74] sm:$0xf0] }
 0x12c   : > { %8364 = vmatmul.msk.bf16.gmra.mxu1 %vm1289_vm5, %v12730_v34  ;;  %8376 = vmatmul.msk.bf16.gmra.mxu3 %vm1289_vm5, %v12730_v34  ;;  %v12778_v57 = vpack.c.bf16 %v1032_v30, %v1031_v56  ;;  %v12815_v23 = vperm.slane %v12808_v50, 0 }
 0x12d   : > { %1367 = vmatmul.bf16.gmra.mxu0 %v12738_v43  ;;  %1505 = vmatmul.bf16.gmra.mxu2 %v12738_v43 }
 0x12e   : > { %v11775_v61 = vpop.permute.xlu1 %11774 }
 0x12f   : > { %v11770_v58 = vpop.permute.xlu0 %11769  ;;  %v11777_v1 = vunpack.i.h.bf16 %v11775_v61  ;;  %v11776_v35 = vunpack.i.l.bf16 %v11775_v61  ;;  %v8276_v61 = vld [vmem:[#allocation3 + $0x78] sm:$0xf0] }
 0x130   : > { %v11772_v38 = vunpack.i.h.bf16 %v11770_v58  ;;  %v11771_v37 = vunpack.i.l.bf16 %v11770_v58  ;;  %v11795_v42 = vpop.permute.xlu2 %11794  ;;  %v8275_v58 = vor.u32 %v10859_v24, %v8274_v54 }
 0x131   : > { %v11797_v39 = vunpack.i.h.bf16 %v11795_v42  ;;  %v11796_v40 = vunpack.i.l.bf16 %v11795_v42 }
 0x132   : > { %v984_v33 = vsel %vm968_vm2, %v959_v60, %v11772_v38  ;;  %v983_v45 = vsel %vm968_vm2, %v958_v62, %v11771_v37  ;;  %v10857_v37 = vld [vmem:[#allocation3 + $0x6c] sm:$0xf]  ;;  %1619 = vmatpush.bf16.msrb.mxu1 %v8275_v58 }
 0x133   : > { %v1008_v29 = vsel %vm993_vm3, %v983_v45, %v11776_v35  ;;  %v1009_v15 = vsel %vm993_vm3, %v984_v33, %v11777_v1  ;;  %v8279_v0 = vor.u32 %v10857_v37, %v8276_v61 }
 0x134   : > { %v1033_v14 = vsel %vm1018_vm4, %v1008_v29, %v11766_v3  ;;  %v1034_v13 = vsel %vm1018_vm4, %v1009_v15, %v11767_v2  ;;  %v12831_v29 = vperm.slane %v12808_v50, 1 }
 0x135   : > { %v12798_v22 = vpack.c.bf16 %v1034_v13, %v1033_v14  ;;  %1757 = vmatpush.bf16.msrb.mxu0 %v8279_v0 }
 0x136   : > { %v11790_v25 = vpop.permute.xlu1 %11789 }
 0x137   : > { %v11785_v17 = vpop.permute.xlu0 %11784  ;;  %v11792_v19 = vunpack.i.h.bf16 %v11790_v25  ;;  %v11791_v32 = vunpack.i.l.bf16 %v11790_v25 }
 0x138   : > { %v11787_v30 = vunpack.i.h.bf16 %v11785_v17  ;;  %v11786_v55 = vunpack.i.l.bf16 %v11785_v17  ;;  %v11810_v3 = vpop.permute.xlu2 %11809 }
 0x139   : > { %v986_v44 = vsel %vm968_vm2, %v961_v41, %v11792_v19  ;;  %v985_v56 = vsel %vm968_vm2, %v960_v31, %v11791_v32  ;;  %v11812_v14 = vunpack.i.h.bf16 %v11810_v3  ;;  %v11811_v13 = vunpack.i.l.bf16 %v11810_v3 }
 0x13a   : > { %v1010_v51 = vsel %vm993_vm3, %v985_v56, %v11796_v40  ;;  %v1011_v52 = vsel %vm993_vm3, %v986_v44, %v11797_v39  ;;  %v12812_v38 = vpack.c.bf16 %v11787_v30, %v11786_v55 }
 0x13b   : > { %v1036_v60 = vsel %vm1018_vm4, %v1011_v52, %v11787_v30  ;;  %v1035_v62 = vsel %vm1018_vm4, %v1010_v51, %v11786_v55 }
 0x13c   : > { %8365 = vmatmul.msk.bf16.gmra.mxu1 %vm1289_vm5, %v12750_v46  ;;  %8377 = vmatmul.msk.bf16.gmra.mxu3 %vm1289_vm5, %v12750_v46  ;;  %v12819_v35 = vpack.c.bf16 %v1036_v60, %v1035_v62 }
 0x13d   : > { %1372 = vmatmul.bf16.gmra.mxu0 %v12754_v5  ;;  %1510 = vmatmul.bf16.gmra.mxu2 %v12754_v5 }
 0x13e   : > { %v11805_v36 = vpop.permute.xlu1 %11804 }
 0x13f   : > { %v11800_v48 = vpop.permute.xlu0 %11799  ;;  %v11806_v55 = vunpack.i.l.bf16 %v11805_v36 }
 0x140   : > { %v11802_v33 = vunpack.i.h.bf16 %v11800_v48  ;;  %v11801_v45 = vunpack.i.l.bf16 %v11800_v48 }
 0x142   : > { %v963_v8 = vsel %vm943_vm1, %v12582_v4, %v11802_v33  ;;  %v962_v18 = vsel %vm943_vm1, %v12572_v27, %v11801_v45  ;;  %v11807_v4 = vunpack.i.h.bf16 %v11805_v36 }
 0x143   : > { %v987_v31 = vsel %vm968_vm2, %v962_v18, %v11811_v13  ;;  %v988_v39 = vsel %vm968_vm2, %v963_v8, %v11812_v14  ;;  %v10855_v8 = vld [vmem:[#allocation3 + $0x54] sm:$0xf0] }
 0x144   : > { %v12847_v54 = vpack.c.bf16 %v11807_v4, %v11806_v55 }
 0x146   : > { %v11820_v30 = vpop.permute.xlu1 %11819 }
 0x147   : > { %v11815_v17 = vpop.permute.xlu0 %11814  ;;  %v11821_v0 = vunpack.i.l.bf16 %v11820_v30 }
 0x148   : > { %v11817_v42 = vunpack.i.h.bf16 %v11815_v17  ;;  %v11816_v41 = vunpack.i.l.bf16 %v11815_v17  ;;  %v8258_v17 = vld [vmem:[#allocation3 + $0x48] sm:$0xf] }
 0x14a   : > { %v1012_v27 = vsel %vm993_vm3, %v987_v31, %v11816_v41  ;;  %v1013_v48 = vsel %vm993_vm3, %v988_v39, %v11817_v42  ;;  %v10853_v42 = vld [vmem:[#allocation3 + $0x4c] sm:$0xf]  ;;  %v8260_v41 = vld [vmem:[#allocation3 + $0x58] sm:$0xf0] }
 0x14b   : > { %v1037_v37 = vsel %vm1018_vm4, %v1012_v27, %v11806_v55  ;;  %v1038_v61 = vsel %vm1018_vm4, %v1013_v48, %v11807_v4  ;;  %v10851_v48 = vld [vmem:[#allocation3 + $0x34] sm:$0xf0] }
 0x14c   : > { %8366 = vmatmul.msk.bf16.gmra.mxu1 %vm1289_vm5, %v12770_v47  ;;  %8378 = vmatmul.msk.bf16.gmra.mxu3 %vm1289_vm5, %v12770_v47 }
 0x14d   : > { %1377 = vmatmul.bf16.gmra.mxu0 %v12778_v57  ;;  %1515 = vmatmul.bf16.gmra.mxu2 %v12778_v57 }
 0x14e   : > { %v11835_v13 = vpop.permute.xlu1 %11834 }
 0x14f   : > { %v11830_v62 = vpop.permute.xlu0 %11829 }
 0x150   : > { %v11831_v14 = vunpack.i.l.bf16 %v11830_v62 }
 0x15c   : > { %8367 = vmatmul.msk.bf16.gmra.mxu1 %vm1289_vm5, %v12790_v12  ;;  %8379 = vmatmul.msk.bf16.gmra.mxu3 %vm1289_vm5, %v12790_v12 }
 0x15d   : > { %1382 = vmatmul.bf16.gmra.mxu0 %v12798_v22  ;;  %1520 = vmatmul.bf16.gmra.mxu2 %v12798_v22 }
 0x169   : > { %v1417_v63 = vpop.f32.mrf.mxu1 }
 0x16a   : > { %v1348_v1 = vpop.f32.mrf.mxu0 }
 0x16b   : > { %v1349_v2 = vadd.f32 %v1348_v1, %v12815_v23  ;;  %v11825_v1 = vpop.permute.xlu2 %11824 }
 0x16c   : > { %8368 = vmatmul.msk.bf16.gmra.mxu1 %vm1289_vm5, %v12812_v38  ;;  %8380 = vmatmul.msk.bf16.gmra.mxu3 %vm1289_vm5, %v12812_v38 }
 0x16d   : > { %v12826_v9 = vadd.f32 %v1417_v63, %v1349_v2  ;;  %1387 = vmatmul.bf16.gmra.mxu0 %v12819_v35  ;;  %1525 = vmatmul.bf16.gmra.mxu2 %v12819_v35  ;;  %v11822_v63 = vunpack.i.h.bf16 %v11820_v30  ;;  %v12859_v2 = vpack.c.bf16 %v1038_v61, %v1037_v37  ;;  %v8263_v30 = vor.u32 %v10853_v42, %v8260_v41 }
 0x16e   : > { %v11826_v37 = vunpack.i.l.bf16 %v11825_v1 }
 0x16f   : > { %v1555_v15 = vpop.f32.mrf.mxu3  ;;  %v965_v18 = vsel %vm943_vm1, %v12590_v7, %v11822_v63  ;;  %v8242_v7 = vld [vmem:[#allocation3 + $0x28] sm:$0xf]  ;;  %1758 = vmatpush.bf16.msrb.mxu0 %v8263_v30 }
 0x170   : > { %v1486_v19 = vpop.f32.mrf.mxu2 }
 0x171   : > { %v1419_v25 = vpop.f32.mrf.mxu1  ;;  %v1487_v32 = vadd.f32 %v1486_v19, %v12831_v29 }
 0x172   : > { %v1350_v40 = vpop.f32.mrf.mxu0 }
 0x173   : > { %v12840_v44 = vadd.f32 %v1555_v15, %v1487_v32  ;;  %v1351_v56 = vadd.f32 %v1350_v40, %v12815_v23  ;;  %v11832_v15 = vunpack.i.h.bf16 %v11830_v62  ;;  %v8259_v32 = vor.u32 %v10855_v8, %v8258_v17  ;;  %v8244_v62 = vld [vmem:[#allocation3 + $0x38] sm:$0xf0] }
 0x174   : > { %v11837_v40 = vunpack.i.h.bf16 %v11835_v13 }
 0x175   : > { %v12845_v51 = vadd.f32 %v1419_v25, %v1351_v56  ;;  %v964_v25 = vsel %vm943_vm1, %v12587_v6, %v11821_v0  ;;  %v11836_v56 = vunpack.i.l.bf16 %v11835_v13  ;;  %1620 = vmatpush.bf16.msrb.mxu1 %v8259_v32  ;;  %v990_v55 = vsel %vm968_vm2, %v965_v18, %v11832_v15  ;;  %v10847_v13 = vld [vmem:[#allocation3 + $0x14] sm:$0xf0]  ;;  %v8228_v32 = vld [vmem:[#allocation3 + $0x18] sm:$0xf0] }
 0x176   : > { %v989_v27 = vsel %vm968_vm2, %v964_v25, %v11831_v14  ;;  %v8243_v6 = vor.u32 %v10851_v48, %v8242_v7  ;;  %v1015_v0 = vsel %vm993_vm3, %v990_v55, %v11837_v40  ;;  %v8226_v14 = vld [vmem:[#allocation3 + $0x8] sm:$0xf]  ;;  %v11850_v7 = vpop.permute.xlu1 %11849 }
 0x177   : > { %v1557_v52 = vpop.f32.mrf.mxu3  ;;  %v1014_v63 = vsel %vm993_vm3, %v989_v27, %v11836_v56  ;;  %v8227_v8 = vor.u32 %v10847_v13, %v8226_v14  ;;  %v11845_v14 = vpop.permute.xlu0 %11844 }
 0x178   : > { %v1488_v58 = vpop.f32.mrf.mxu2 }
 0x179   : > { %v1422_v24 = vpop.f32.mrf.mxu1  ;;  %v1489_v60 = vadd.f32 %v1488_v58, %v12831_v29  ;;  %v11827_v58 = vunpack.i.h.bf16 %v11825_v1  ;;  %1621 = vmatpush.bf16.msrb.mxu1 %v8243_v6  ;;  %v1039_v1 = vsel %vm1018_vm4, %v1014_v63, %v11826_v37  ;;  %v11852_v6 = vunpack.i.h.bf16 %v11850_v7 }
 0x17a   : > { %v1353_v36 = vpop.f32.mrf.mxu0 }
 0x17b   : > { %v12852_v33 = vadd.f32 %v1557_v52, %v1489_v60  ;;  %v1354_v45 = vadd.f32 %v1353_v36, %v12815_v23  ;;  %v10849_v60 = vld [vmem:[#allocation3 + $0x2c] sm:$0xf]  ;;  %v11840_v36 = vpop.permute.xlu2 %11839  ;;  %v12879_v18 = vpack.c.bf16 %v11827_v58, %v11826_v37  ;;  %v1040_v25 = vsel %vm1018_vm4, %v1015_v0, %v11827_v58 }
 0x17c   : > { %8369 = vmatmul.msk.bf16.gmra.mxu1 %vm1289_vm5, %v12847_v54  ;;  %8381 = vmatmul.msk.bf16.gmra.mxu3 %vm1289_vm5, %v12847_v54  ;;  %v12884_v56 = vpack.c.bf16 %v1040_v25, %v1039_v1  ;;  %v11841_v55 = vunpack.i.l.bf16 %v11840_v36  ;;  %v11851_v58 = vunpack.i.l.bf16 %v11850_v7 }
 0x17d   : > { %v12861_v3 = vadd.f32 %v1422_v24, %v1354_v45  ;;  %1392 = vmatmul.bf16.gmra.mxu0 %v12859_v2  ;;  %1530 = vmatmul.bf16.gmra.mxu2 %v12859_v2  ;;  %v8247_v45 = vor.u32 %v10849_v60, %v8244_v62 }
 0x17e   : > { %1622 = vmatpush.bf16.msrb.mxu1 %v8227_v8  ;;  %v966_v60 = vsel %vm943_vm1, %v12601_v10, %v11841_v55 }
 0x17f   : > { %v1560_v19 = vpop.f32.mrf.mxu3  ;;  %1759 = vmatpush.bf16.msrb.mxu0 %v8247_v45 }
 0x180   : > { %v1491_v39 = vpop.f32.mrf.mxu2 }
 0x181   : > { %v1424_v31 = vpop.f32.mrf.mxu1  ;;  %v1492_v4 = vadd.f32 %v1491_v39, %v12831_v29 }
 0x182   : > { %v1355_v52 = vpop.f32.mrf.mxu0 }
 0x183   : > { %v12872_v24 = vadd.f32 %v1560_v19, %v1492_v4  ;;  %v1356_v61 = vadd.f32 %v1355_v52, %v12815_v23  ;;  %v10845_v19 = vld [vmem:[#allocation3 + $0xc] sm:$0xf]  ;;  %v11842_v4 = vunpack.i.h.bf16 %v11840_v36  ;;  %v11855_v37 = vpop.permute.xlu2 %11854 }
 0x184   : > { %v8231_v39 = vor.u32 %v10845_v19, %v8228_v32  ;;  %v11857_v36 = vunpack.i.h.bf16 %v11855_v37  ;;  %v11856_v45 = vunpack.i.l.bf16 %v11855_v37  ;;  %v11846_v19 = vunpack.i.l.bf16 %v11845_v14 }
 0x185   : > { %v12877_v15 = vadd.f32 %v1424_v31, %v1356_v61  ;;  %v967_v61 = vsel %vm943_vm1, %v12604_v11, %v11842_v4  ;;  %v11847_v11 = vunpack.i.h.bf16 %v11845_v14 }
 0x186   : > { %1760 = vmatpush.bf16.msrb.mxu0 %v8231_v39  ;;  %v992_v13 = vsel %vm968_vm2, %v967_v61, %v11852_v6 }
 0x187   : > { %v1562_v17 = vpop.f32.mrf.mxu3  ;;  %v1017_v32 = vsel %vm993_vm3, %v992_v13, %v11857_v36  ;;  %v12911_v39 = vpack.c.bf16 %v11847_v11, %v11846_v19 }
 0x188   : > { %v1493_v41 = vpop.f32.mrf.mxu2 }
 0x189   : > { %v1427_v42 = vpop.f32.mrf.mxu1  ;;  %v1494_v31 = vadd.f32 %v1493_v41, %v12831_v29 }
 0x18a   : > { %v1358_v40 = vpop.f32.mrf.mxu0 }
 0x18b   : > { %v12886_v30 = vadd.f32 %v1562_v17, %v1494_v31  ;;  %v1359_v27 = vadd.f32 %v1358_v40, %v12815_v23  ;;  %v991_v17 = vsel %vm968_vm2, %v966_v60, %v11851_v58  ;;  %v1042_v31 = vsel %vm1018_vm4, %v1017_v32, %v11847_v11 }
 0x18c   : > { %8370 = vmatmul.msk.bf16.gmra.mxu1 %vm1289_vm5, %v12879_v18  ;;  %8382 = vmatmul.msk.bf16.gmra.mxu3 %vm1289_vm5, %v12879_v18  ;;  %v1016_v10 = vsel %vm993_vm3, %v991_v17, %v11856_v45 }
 0x18d   : > { %v12893_v48 = vadd.f32 %v1427_v42, %v1359_v27  ;;  %1397 = vmatmul.bf16.gmra.mxu0 %v12884_v56  ;;  %1535 = vmatmul.bf16.gmra.mxu2 %v12884_v56  ;;  %v1041_v40 = vsel %vm1018_vm4, %v1016_v10, %v11846_v19 }
 0x18f   : > { %v1565_v52 = vpop.f32.mrf.mxu3 }
 0x190   : > { %v1496_v63 = vpop.f32.mrf.mxu2 }
 0x191   : > { %v1429_v62 = vpop.f32.mrf.mxu1  ;;  %v1497_v0 = vadd.f32 %v1496_v63, %v12831_v29 }
 0x192   : > { %v1360_v8 = vpop.f32.mrf.mxu0 }
 0x193   : > { %v12904_v1 = vadd.f32 %v1565_v52, %v1497_v0  ;;  %v1361_v25 = vadd.f32 %v1360_v8, %v12815_v23  ;;  %v12916_v52 = vpack.c.bf16 %v1042_v31, %v1041_v40 }
 0x195   : > { %v12909_v42 = vadd.f32 %v1429_v62, %v1361_v25 }
 0x197   : > { %v1567_v41 = vpop.f32.mrf.mxu3 }
 0x198   : > { %v1498_v55 = vpop.f32.mrf.mxu2 }
 0x199   : > { %v1432_v4 = vpop.f32.mrf.mxu1  ;;  %v1499_v27 = vadd.f32 %v1498_v55, %v12831_v29 }
 0x19a   : > { %v1363_v7 = vpop.f32.mrf.mxu0 }
 0x19b   : > { %v12918_v6 = vadd.f32 %v1567_v41, %v1499_v27  ;;  %v1364_v58 = vadd.f32 %v1363_v7, %v12815_v23 }
 0x19c   : > { %8371 = vmatmul.msk.bf16.gmra.mxu1 %vm1289_vm5, %v12911_v39  ;;  %8383 = vmatmul.msk.bf16.gmra.mxu3 %vm1289_vm5, %v12911_v39 }
 0x19d   : > { %v12925_v37 = vadd.f32 %v1432_v4, %v1364_v58  ;;  %1402 = vmatmul.bf16.gmra.mxu0 %v12916_v52  ;;  %1540 = vmatmul.bf16.gmra.mxu2 %v12916_v52 }
 0x19f   : > { %v1570_v61 = vpop.f32.mrf.mxu3 }
 0x1a0   : > { %v1501_v62 = vpop.f32.mrf.mxu2 }
 0x1a1   : > { %v1434_v60 = vpop.f32.mrf.mxu1  ;;  %v1502_v63 = vadd.f32 %v1501_v62, %v12831_v29 }
 0x1a2   : > { %v1365_v0 = vpop.f32.mrf.mxu0 }
 0x1a3   : > { %v12930_v36 = vadd.f32 %v1570_v61, %v1502_v63  ;;  %v1366_v45 = vadd.f32 %v1365_v0, %v12815_v23 }
 0x1a5   : > { %v12933_v14 = vadd.f32 %v1434_v60, %v1366_v45 }
 0x1a7   : > { %v1572_v13 = vpop.f32.mrf.mxu3 }
 0x1a8   : > { %v1503_v8 = vpop.f32.mrf.mxu2 }
 0x1a9   : > { %v1437_v17 = vpop.f32.mrf.mxu1  ;;  %v1504_v25 = vadd.f32 %v1503_v8, %v12831_v29  ;;  %v10942_v8 = vld [vmem:[#allocation8 + $0x1ec] sm:$0xf0] }
 0x1aa   : > { %v1368_v11 = vpop.f32.mrf.mxu0 }
 0x1ab   : > { %v12936_v19 = vadd.f32 %v1572_v13, %v1504_v25  ;;  %v1369_v10 = vadd.f32 %v1368_v11, %v12815_v23 }
 0x1ac   : > { %1623 = vmatmul.bf16.vlgmr.msrb.gmra.mxu1 %v12627_v53  ;;  %8384 = vmatmul.msk.bf16.vlgmr.msrb.gmra.mxu3 %vm1289_vm5, %v12623_v49 }
 0x1ad   : > { %v12942_v32 = vadd.f32 %v1437_v17, %v1369_v10  ;;  %1761 = vmatmul.bf16.vlgmr.msrb.gmra.mxu0 %v12627_v53  ;;  %8396 = vmatmul.msk.bf16.vlgmr.msrb.gmra.mxu2 %vm1289_vm5, %v12623_v49  ;;  %v8650_v17 = vld [vmem:[#allocation8 + $0x1e0] sm:$0xf] }
 0x1ae   : > { %v8651_v10 = vor.u32 %v10942_v8, %v8650_v17 }
 0x1af   : > { %v1575_v41 = vpop.f32.mrf.mxu3 }
 0x1b0   : > { %v1506_v40 = vpop.f32.mrf.mxu2  ;;  %4078 = vmatpush.bf16.msra.mxu3 %v8651_v10 }
 0x1b1   : > { %v1439_v31 = vpop.f32.mrf.mxu1  ;;  %v1507_v4 = vadd.f32 %v1506_v40, %v12831_v29 }
 0x1b2   : > { %v1370_v55 = vpop.f32.mrf.mxu0 }
 0x1b3   : > { %v12948_v27 = vadd.f32 %v1575_v41, %v1507_v4  ;;  %v1371_v7 = vadd.f32 %v1370_v55, %v12815_v23 }
 0x1b5   : > { %v12951_v58 = vadd.f32 %v1439_v31, %v1371_v7  ;;  %v8522_v7 = vld [vmem:[#allocation8 + $0xe0] sm:$0xf] }
 0x1b7   : > { %v1577_v61 = vpop.f32.mrf.mxu3 }
 0x1b8   : > { %v1508_v62 = vpop.f32.mrf.mxu2 }
 0x1b9   : > { %v1442_v60 = vpop.f32.mrf.mxu1  ;;  %v1509_v53 = vadd.f32 %v1508_v62, %v12831_v29 }
 0x1ba   : > { %v1373_v63 = vpop.f32.mrf.mxu0 }
 0x1bb   : > { %v12954_v0 = vadd.f32 %v1577_v61, %v1509_v53  ;;  %v1374_v49 = vadd.f32 %v1373_v63, %v12815_v23  ;;  %v10910_v61 = vld [vmem:[#allocation8 + $0xec] sm:$0xf0]  ;;  %v8906_v53 = vld [vmem:[#allocation8 + $0x3e0] sm:$0xf] }
 0x1bc   : > { %1628 = vmatmul.bf16.gmra.mxu1 %v12655_v20  ;;  %8385 = vmatmul.msk.bf16.gmra.mxu3 %vm1289_vm5, %v12651_v16  ;;  %v8523_v62 = vor.u32 %v10910_v61, %v8522_v7  ;;  %v11006_v63 = vld [vmem:[#allocation8 + $0x3ec] sm:$0xf0] }
 0x1bd   : > { %v12960_v45 = vadd.f32 %v1442_v60, %v1374_v49  ;;  %1766 = vmatmul.bf16.gmra.mxu0 %v12655_v20  ;;  %8397 = vmatmul.msk.bf16.gmra.mxu2 %vm1289_vm5, %v12651_v16  ;;  %v8778_v49 = vld [vmem:[#allocation8 + $0x2e0] sm:$0xf]  ;;  %v8907_v8 = vor.u32 %v11006_v63, %v8906_v53 }
 0x1be   : > { %4037 = vmatpush.bf16.msra.mxu1 %v8523_v62 }
 0x1bf   : > { %v1580_v13 = vpop.f32.mrf.mxu3  ;;  %4160 = vmatpush.bf16.msra.mxu2 %v8907_v8 }
 0x1c0   : > { %v1511_v11 = vpop.f32.mrf.mxu2 }
 0x1c1   : > { %v1444_v25 = vpop.f32.mrf.mxu1  ;;  %v1512_v41 = vadd.f32 %v1511_v11, %v12831_v29  ;;  %v10974_v11 = vld [vmem:[#allocation8 + $0x2ec] sm:$0xf0] }
 0x1c2   : > { %v1375_v31 = vpop.f32.mrf.mxu0 }
 0x1c3   : > { %v12966_v40 = vadd.f32 %v1580_v13, %v1512_v41  ;;  %v1376_v4 = vadd.f32 %v1375_v31, %v12815_v23  ;;  %v8779_v13 = vor.u32 %v10974_v11, %v8778_v49 }
 0x1c5   : > { %v12969_v55 = vadd.f32 %v1444_v25, %v1376_v4  ;;  %4119 = vmatpush.bf16.msra.mxu0 %v8779_v13 }
 0x1c7   : > { %v1582_v20 = vpop.f32.mrf.mxu3 }
 0x1c8   : > { %v1513_v60 = vpop.f32.mrf.mxu2 }
 0x1c9   : > { %v1447_v16 = vpop.f32.mrf.mxu1  ;;  %v1514_v17 = vadd.f32 %v1513_v60, %v12831_v29 }
 0x1ca   : > { %v1378_v10 = vpop.f32.mrf.mxu0 }
 0x1cb   : > { %v12972_v41 = vadd.f32 %v1582_v20, %v1514_v17  ;;  %v1379_v25 = vadd.f32 %v1378_v10, %v12815_v23  ;;  %v10938_v17 = vld [vmem:[#allocation8 + $0x1cc] sm:$0xf0] }
 0x1cc   : > { %1633 = vmatmul.bf16.gmra.mxu1 %v12689_v21  ;;  %8386 = vmatmul.msk.bf16.gmra.mxu3 %vm1289_vm5, %v12685_v28 }
 0x1cd   : > { %v12978_v31 = vadd.f32 %v1447_v16, %v1379_v25  ;;  %1771 = vmatmul.bf16.gmra.mxu0 %v12689_v21  ;;  %8398 = vmatmul.msk.bf16.gmra.mxu2 %vm1289_vm5, %v12685_v28  ;;  %v8634_v16 = vld [vmem:[#allocation8 + $0x1c0] sm:$0xf] }
 0x1ce   : > { %v8635_v11 = vor.u32 %v10938_v17, %v8634_v16  ;;  %v8890_v16 = vld [vmem:[#allocation8 + $0x3c0] sm:$0xf]  ;;  %v11002_v17 = vld [vmem:[#allocation8 + $0x3cc] sm:$0xf0] }
 0x1cf   : > { %v1585_v4 = vpop.f32.mrf.mxu3 }
 0x1d0   : > { %v1516_v20 = vpop.f32.mrf.mxu2  ;;  %4079 = vmatpush.bf16.msra.mxu3 %v8635_v11 }
 0x1d1   : > { %v1449_v7 = vpop.f32.mrf.mxu1  ;;  %v1517_v61 = vadd.f32 %v1516_v20, %v12831_v29  ;;  %v8506_v20 = vld [vmem:[#allocation8 + $0xc0] sm:$0xf] }
 0x1d2   : > { %v1380_v60 = vpop.f32.mrf.mxu0 }
 0x1d3   : > { %v12984_v62 = vadd.f32 %v1585_v4, %v1517_v61  ;;  %v1381_v53 = vadd.f32 %v1380_v60, %v12815_v23  ;;  %v10906_v61 = vld [vmem:[#allocation8 + $0xcc] sm:$0xf0] }
 0x1d5   : > { %14109 = vst [vmem:[#allocation26_spill] sm:$0xff] %v12984_v62  ;;  %v12987_v63 = vadd.f32 %v1449_v7, %v1381_v53 }
 0x1d7   : > { %14110 = vst [vmem:[#allocation27_spill] sm:$0xff] %v12987_v63  ;;  %v1587_v49 = vpop.f32.mrf.mxu3 }
 0x1d8   : > { %v1518_v21 = vpop.f32.mrf.mxu2 }
 0x1d9   : > { %v1452_v8 = vpop.f32.mrf.mxu1  ;;  %v1519_v28 = vadd.f32 %v1518_v21, %v12831_v29  ;;  %v8762_v21 = vld [vmem:[#allocation8 + $0x2c0] sm:$0xf] }
 0x1da   : > { %v1383_v10 = vpop.f32.mrf.mxu0 }
 0x1db   : > { %v12990_v13 = vadd.f32 %v1587_v49, %v1519_v28  ;;  %v1384_v25 = vadd.f32 %v1383_v10, %v12815_v23  ;;  %v8507_v49 = vor.u32 %v10906_v61, %v8506_v20  ;;  %v8891_v28 = vor.u32 %v11002_v17, %v8890_v16  ;;  %v10970_v10 = vld [vmem:[#allocation8 + $0x2cc] sm:$0xf0] }
 0x1dc   : > { %1638 = vmatmul.bf16.gmra.mxu1 %v12718_v26  ;;  %8387 = vmatmul.msk.bf16.gmra.mxu3 %vm1289_vm5, %v12709_v59  ;;  %v10934_v17 = vld [vmem:[#allocation8 + $0x1ac] sm:$0xf0] }
 0x1dd   : > { %14111 = vst [vmem:[#allocation28_spill] sm:$0xff] %v12990_v13  ;;  %v12996_v4 = vadd.f32 %v1452_v8, %v1384_v25  ;;  %1776 = vmatmul.bf16.gmra.mxu0 %v12718_v26  ;;  %8399 = vmatmul.msk.bf16.gmra.mxu2 %vm1289_vm5, %v12709_v59  ;;  %v8763_v25 = vor.u32 %v10970_v10, %v8762_v21 }
 0x1de   : > { %4038 = vmatpush.bf16.msra.mxu1 %v8507_v49  ;;  %4161 = vmatpush.bf16.msra.mxu2 %v8891_v28  ;;  %v8618_v49 = vld [vmem:[#allocation8 + $0x1a0] sm:$0xf] }
 0x1df   : > { %14112 = vst [vmem:[#allocation29_spill] sm:$0xff] %v12996_v4  ;;  %v1590_v7 = vpop.f32.mrf.mxu3  ;;  %4120 = vmatpush.bf16.msra.mxu0 %v8763_v25  ;;  %v8490_v25 = vld [vmem:[#allocation8 + $0xa0] sm:$0xf] }
 0x1e0   : > { %v1521_v53 = vpop.f32.mrf.mxu2 }
 0x1e1   : > { %v1454_v60 = vpop.f32.mrf.mxu1  ;;  %v1522_v11 = vadd.f32 %v1521_v53, %v12831_v29 }
 0x1e2   : > { %v1385_v8 = vpop.f32.mrf.mxu0 }
 0x1e3   : > { %v13002_v26 = vadd.f32 %v1590_v7, %v1522_v11  ;;  %v1386_v59 = vadd.f32 %v1385_v8, %v12815_v23 }
 0x1e5   : > { %v13005_v4 = vadd.f32 %v1454_v60, %v1386_v59  ;;  %v10902_v59 = vld [vmem:[#allocation8 + $0xac] sm:$0xf0] }
 0x1e7   : > { %v1592_v13 = vpop.f32.mrf.mxu3 }
 0x1e8   : > { %v1523_v61 = vpop.f32.mrf.mxu2 }
 0x1e9   : > { %v1457_v20 = vpop.f32.mrf.mxu1  ;;  %v1524_v63 = vadd.f32 %v1523_v61, %v12831_v29  ;;  %v8491_v61 = vor.u32 %v10902_v59, %v8490_v25 }
 0x1ea   : > { %v1388_v62 = vpop.f32.mrf.mxu0 }
 0x1eb   : > { %v13008_v53 = vadd.f32 %v1592_v13, %v1524_v63  ;;  %v1389_v16 = vadd.f32 %v1388_v62, %v12815_v23  ;;  %v8619_v13 = vor.u32 %v10934_v17, %v8618_v49  ;;  %4039 = vmatpush.bf16.msra.mxu1 %v8491_v61 }
 0x1ec   : > { %1643 = vmatmul.bf16.gmra.mxu1 %v12738_v43  ;;  %8388 = vmatmul.msk.bf16.gmra.mxu3 %vm1289_vm5, %v12730_v34 }
 0x1ed   : > { %14113 = vst [vmem:[#allocation30_spill] sm:$0xff] %v13008_v53  ;;  %v13014_v7 = vadd.f32 %v1457_v20, %v1389_v16  ;;  %1781 = vmatmul.bf16.gmra.mxu0 %v12738_v43  ;;  %8400 = vmatmul.msk.bf16.gmra.mxu2 %vm1289_vm5, %v12730_v34  ;;  %v8874_v16 = vld [vmem:[#allocation8 + $0x3a0] sm:$0xf] }
 0x1ee   : > { %4080 = vmatpush.bf16.msra.mxu3 %v8619_v13  ;;  %v8746_v53 = vld [vmem:[#allocation8 + $0x2a0] sm:$0xf] }
 0x1ef   : > { %14114 = vst [vmem:[#allocation31_spill] sm:$0xff] %v13014_v7  ;;  %v1595_v60 = vpop.f32.mrf.mxu3  ;;  %v10998_v7 = vld [vmem:[#allocation8 + $0x3ac] sm:$0xf0] }
 0x1f0   : > { %v1526_v63 = vpop.f32.mrf.mxu2  ;;  %v8875_v17 = vor.u32 %v10998_v7, %v8874_v16 }
 0x1f1   : > { %v1459_v21 = vpop.f32.mrf.mxu1  ;;  %v1527_v62 = vadd.f32 %v1526_v63, %v12831_v29  ;;  %v10966_v63 = vld [vmem:[#allocation8 + $0x2ac] sm:$0xf0] }
 0x1f2   : > { %v1390_v11 = vpop.f32.mrf.mxu0  ;;  %4162 = vmatpush.bf16.msra.mxu2 %v8875_v17 }
 0x1f3   : > { %v13020_v28 = vadd.f32 %v1595_v60, %v1527_v62  ;;  %v1391_v10 = vadd.f32 %v1390_v11, %v12815_v23  ;;  %v8747_v60 = vor.u32 %v10966_v63, %v8746_v53 }
 0x1f5   : > { %v13023_v8 = vadd.f32 %v1459_v21, %v1391_v10  ;;  %4121 = vmatpush.bf16.msra.mxu0 %v8747_v60 }
 0x1f7   : > { %v1597_v43 = vpop.f32.mrf.mxu3 }
 0x1f8   : > { %v1528_v20 = vpop.f32.mrf.mxu2 }
 0x1f9   : > { %v1462_v34 = vpop.f32.mrf.mxu1  ;;  %v1529_v49 = vadd.f32 %v1528_v20, %v12831_v29 }
 0x1fa   : > { %v1393_v13 = vpop.f32.mrf.mxu0 }
 0x1fb   : > { %v13026_v62 = vadd.f32 %v1597_v43, %v1529_v49  ;;  %v1394_v21 = vadd.f32 %v1393_v13, %v12815_v23  ;;  %v10930_v49 = vld [vmem:[#allocation8 + $0x18c] sm:$0xf0] }
 0x1fc   : > { %1648 = vmatmul.bf16.gmra.mxu1 %v12754_v5  ;;  %8389 = vmatmul.msk.bf16.gmra.mxu3 %vm1289_vm5, %v12750_v46 }
 0x1fd   : > { %v13032_v11 = vadd.f32 %v1462_v34, %v1394_v21  ;;  %1786 = vmatmul.bf16.gmra.mxu0 %v12754_v5  ;;  %8401 = vmatmul.msk.bf16.gmra.mxu2 %vm1289_vm5, %v12750_v46  ;;  %v8602_v34 = vld [vmem:[#allocation8 + $0x180] sm:$0xf] }
 0x1fe   : > { %v8603_v63 = vor.u32 %v10930_v49, %v8602_v34 }
 0x1ff   : > { %v1600_v7 = vpop.f32.mrf.mxu3 }
 0x200   : > { %v1531_v10 = vpop.f32.mrf.mxu2  ;;  %4081 = vmatpush.bf16.msra.mxu3 %v8603_v63 }
 0x201   : > { %v1464_v53 = vpop.f32.mrf.mxu1  ;;  %v1532_v43 = vadd.f32 %v1531_v10, %v12831_v29  ;;  %v10898_v10 = vld [vmem:[#allocation8 + $0x8c] sm:$0xf0] }
 0x202   : > { %v1395_v25 = vpop.f32.mrf.mxu0 }
 0x203   : > { %v13038_v59 = vadd.f32 %v1600_v7, %v1532_v43  ;;  %v1396_v20 = vadd.f32 %v1395_v25, %v12815_v23 }
 0x205   : > { %v13041_v61 = vadd.f32 %v1464_v53, %v1396_v20  ;;  %v8474_v53 = vld [vmem:[#allocation8 + $0x80] sm:$0xf] }
 0x206   : > { %v8475_v25 = vor.u32 %v10898_v10, %v8474_v53  ;;  %v8858_v20 = vld [vmem:[#allocation8 + $0x380] sm:$0xf] }
 0x207   : > { %14115 = vst [vmem:[#allocation32_spill] sm:$0xff] %v13041_v61  ;;  %v1602_v16 = vpop.f32.mrf.mxu3 }
 0x208   : > { %v1533_v5 = vpop.f32.mrf.mxu2  ;;  %4040 = vmatpush.bf16.msra.mxu1 %v8475_v25 }
 0x209   : > { %v1467_v17 = vpop.f32.mrf.mxu1  ;;  %v1534_v46 = vadd.f32 %v1533_v5, %v12831_v29 }
 0x20a   : > { %v1398_v13 = vpop.f32.mrf.mxu0 }
 0x20b   : > { %v13044_v60 = vadd.f32 %v1602_v16, %v1534_v46  ;;  %v1399_v21 = vadd.f32 %v1398_v13, %v12815_v23  ;;  %v10994_v16 = vld [vmem:[#allocation8 + $0x38c] sm:$0xf0]  ;;  %v8730_v13 = vld [vmem:[#allocation8 + $0x280] sm:$0xf] }
 0x20c   : > { %1653 = vmatmul.bf16.gmra.mxu1 %v12778_v57  ;;  %8390 = vmatmul.msk.bf16.gmra.mxu3 %vm1289_vm5, %v12770_v47  ;;  %v8859_v34 = vor.u32 %v10994_v16, %v8858_v20 }
 0x20d   : > { %14116 = vst [vmem:[#allocation33_spill] sm:$0xff] %v13044_v60  ;;  %v13050_v7 = vadd.f32 %v1467_v17, %v1399_v21  ;;  %1791 = vmatmul.bf16.gmra.mxu0 %v12778_v57  ;;  %8402 = vmatmul.msk.bf16.gmra.mxu2 %vm1289_vm5, %v12770_v47  ;;  %v10962_v47 = vld [vmem:[#allocation8 + $0x28c] sm:$0xf0] }
 0x20e   : > { %4163 = vmatpush.bf16.msra.mxu2 %v8859_v34  ;;  %v8731_v21 = vor.u32 %v10962_v47, %v8730_v13 }
 0x20f   : > { %14117 = vst [vmem:[#allocation34_spill] sm:$0xff] %v13050_v7  ;;  %v1605_v43 = vpop.f32.mrf.mxu3 }
 0x210   : > { %v1536_v5 = vpop.f32.mrf.mxu2  ;;  %4122 = vmatpush.bf16.msra.mxu0 %v8731_v21 }
 0x211   : > { %v1469_v49 = vpop.f32.mrf.mxu1  ;;  %v1537_v63 = vadd.f32 %v1536_v5, %v12831_v29 }
 0x212   : > { %v1400_v17 = vpop.f32.mrf.mxu0 }
 0x213   : > { %v13056_v46 = vadd.f32 %v1605_v43, %v1537_v63  ;;  %v1401_v57 = vadd.f32 %v1400_v17, %v12815_v23 }
 0x215   : > { %14118 = vst [vmem:[#allocation35_spill] sm:$0xff] %v13056_v46  ;;  %v13059_v7 = vadd.f32 %v1469_v49, %v1401_v57 }
 0x217   : > { %14119 = vst [vmem:[#allocation36_spill] sm:$0xff] %v13059_v7  ;;  %v1607_v53 = vpop.f32.mrf.mxu3 }
 0x218   : > { %v1538_v20 = vpop.f32.mrf.mxu2 }
 0x219   : > { %v1472_v10 = vpop.f32.mrf.mxu1  ;;  %v1539_v16 = vadd.f32 %v1538_v20, %v12831_v29  ;;  %v10926_v20 = vld [vmem:[#allocation8 + $0x16c] sm:$0xf0] }
 0x21a   : > { %v1403_v25 = vpop.f32.mrf.mxu0 }
 0x21b   : > { %v13062_v60 = vadd.f32 %v1607_v53, %v1539_v16  ;;  %v1404_v34 = vadd.f32 %v1403_v25, %v12815_v23 }
 0x21c   : > { %1658 = vmatmul.bf16.gmra.mxu1 %v12798_v22  ;;  %8391 = vmatmul.msk.bf16.gmra.mxu3 %vm1289_vm5, %v12790_v12 }
 0x21d   : > { %14120 = vst [vmem:[#allocation37_spill] sm:$0xff] %v13062_v60  ;;  %v13068_v43 = vadd.f32 %v1472_v10, %v1404_v34  ;;  %1796 = vmatmul.bf16.gmra.mxu0 %v12798_v22  ;;  %8403 = vmatmul.msk.bf16.gmra.mxu2 %vm1289_vm5, %v12790_v12  ;;  %v8586_v10 = vld [vmem:[#allocation8 + $0x160] sm:$0xf] }
 0x21e   : > { %v8587_v25 = vor.u32 %v10926_v20, %v8586_v10  ;;  %v8458_v34 = vld [vmem:[#allocation8 + $0x60] sm:$0xf]  ;;  %v13089_v20 = vperm.slane %v12808_v50, 2 }
 0x21f   : > { %14121 = vst [vmem:[#allocation38_spill] sm:$0xff] %v13068_v43  ;;  %v1610_v49 = vpop.f32.mrf.mxu3  ;;  %v10894_v43 = vld [vmem:[#allocation8 + $0x6c] sm:$0xf0]  ;;  %v8842_v60 = vld [vmem:[#allocation8 + $0x360] sm:$0xf] }
 0x220   : > { %v1541_v63 = vpop.f32.mrf.mxu2  ;;  %4082 = vmatpush.bf16.msra.mxu3 %v8587_v25 }
 0x221   : > { %v1474_v5 = vpop.f32.mrf.mxu1  ;;  %v1542_v17 = vadd.f32 %v1541_v63, %v12831_v29  ;;  %v8459_v63 = vor.u32 %v10894_v43, %v8458_v34 }
 0x222   : > { %v1405_v57 = vpop.f32.mrf.mxu0 }
 0x223   : > { %v13074_v13 = vadd.f32 %v1610_v49, %v1542_v17  ;;  %v1406_v47 = vadd.f32 %v1405_v57, %v12815_v23  ;;  %v10990_v49 = vld [vmem:[#allocation8 + $0x36c] sm:$0xf0]  ;;  %4041 = vmatpush.bf16.msra.mxu1 %v8459_v63 }
 0x224   : > { %v8843_v23 = vor.u32 %v10990_v49, %v8842_v60  ;;  %v13092_v60 = vperm.slane %v12808_v50, 3  ;;  %v1891_v50 = vmax.f32 %v12826_v9, 0.0 }
 0x225   : > { %14122 = vst [vmem:[#allocation39_spill] sm:$0xff] %v13074_v13  ;;  %v13077_v21 = vadd.f32 %v1474_v5, %v1406_v47  ;;  %v10958_v5 = vld [vmem:[#allocation8 + $0x26c] sm:$0xf0] }
 0x226   : > { %4164 = vmatpush.bf16.msra.mxu2 %v8843_v23 }
 0x227   : > { %14123 = vst [vmem:[#allocation40_spill] sm:$0xff] %v13077_v21  ;;  %v1612_v53 = vpop.f32.mrf.mxu3  ;;  %v1896_v21 = vmax.f32 %v12852_v33, 0.0 }
 0x228   : > { %v1543_v16 = vpop.f32.mrf.mxu2 }
 0x229   : > { %v1624_v22 = vpop.f32.mrf.mxu1  ;;  %v1544_v12 = vadd.f32 %v1543_v16, %v12831_v29  ;;  %v8714_v29 = vld [vmem:[#allocation8 + $0x260] sm:$0xf] }
 0x22a   : > { %v1762_v7 = vpop.f32.mrf.mxu0  ;;  %v8715_v43 = vor.u32 %v10958_v5, %v8714_v29 }
 0x22b   : > { %v13080_v17 = vadd.f32 %v1612_v53, %v1544_v12  ;;  %v1763_v49 = vadd.f32 %v1762_v7, %v13092_v60  ;;  %v8570_v7 = vld [vmem:[#allocation8 + $0x140] sm:$0xf] }
 0x22c   : > { %1663 = vmatmul.bf16.gmra.mxu1 %v12819_v35  ;;  %8392 = vmatmul.msk.bf16.gmra.mxu3 %vm1289_vm5, %v12812_v38 }
 0x22d   : > { %14124 = vst [vmem:[#allocation41_spill] sm:$0xff] %v13080_v17  ;;  %1801 = vmatmul.bf16.gmra.mxu0 %v12819_v35  ;;  %8404 = vmatmul.msk.bf16.gmra.mxu2 %vm1289_vm5, %v12812_v38  ;;  %v1625_v38 = vadd.f32 %v1624_v22, %v13089_v20  ;;  %v10890_v17 = vld [vmem:[#allocation8 + $0x4c] sm:$0xf0] }
 0x22e   : > { %4123 = vmatpush.bf16.msra.mxu0 %v8715_v43 }
 0x22f   : > { %v1693_v57 = vpop.f32.mrf.mxu3 }
 0x230   : > { %v1831_v53 = vpop.f32.mrf.mxu2  ;;  %v1694_v23 = vadd.f32 %v1693_v57, %v1625_v38  ;;  %v10922_v57 = vld [vmem:[#allocation8 + $0x14c] sm:$0xf0] }
 0x231   : > { %v1626_v47 = vpop.f32.mrf.mxu1  ;;  %v1832_v43 = vadd.f32 %v1831_v53, %v1763_v49  ;;  %v10986_v49 = vld [vmem:[#allocation8 + $0x34c] sm:$0xf0] }
 0x232   : > { %v1764_v10 = vpop.f32.mrf.mxu0  ;;  %v1627_v35 = vadd.f32 %v1626_v47, %v13089_v20 }
 0x233   : > { %v1765_v25 = vadd.f32 %v1764_v10, %v13092_v60  ;;  %v8442_v10 = vld [vmem:[#allocation8 + $0x40] sm:$0xf] }
 0x237   : > { %v1695_v16 = vpop.f32.mrf.mxu3 }
 0x238   : > { %v1696_v12 = vadd.f32 %v1695_v16, %v1627_v35  ;;  %v1833_v63 = vpop.f32.mrf.mxu2  ;;  %v1895_v35 = vmax.f32 %v12845_v51, 0.0  ;;  %v1893_v16 = vmax.f32 %v1694_v23, 0.0  ;;  %v10954_v23 = vld [vmem:[#allocation8 + $0x24c] sm:$0xf0] }
 0x239   : > { %v1629_v34 = vpop.f32.mrf.mxu1  ;;  %v1834_v29 = vadd.f32 %v1833_v63, %v1765_v25  ;;  %v8571_v63 = vor.u32 %v10922_v57, %v8570_v7 }
 0x23a   : > { %v1767_v5 = vpop.f32.mrf.mxu0  ;;  %v1897_v47 = vmax.f32 %v1696_v12, 0.0  ;;  %v1630_v22 = vadd.f32 %v1629_v34, %v13089_v20  ;;  %v8443_v12 = vor.u32 %v10890_v17, %v8442_v10  ;;  %v8826_v34 = vld [vmem:[#allocation8 + $0x340] sm:$0xf]  ;;  %v10886_v17 = vld [vmem:[#allocation8 + $0x2c] sm:$0xf0]  ;;  %v1892_v10 = vmax.f32 %v12840_v44, 0.0 }
 0x23b   : > { %v1898_v38 = vmax.f32 %v1834_v29, 0.0  ;;  %v1768_v9 = vadd.f32 %v1767_v5, %v13092_v60  ;;  %4083 = vmatpush.bf16.msra.mxu3 %v8571_v63  ;;  %v8827_v51 = vor.u32 %v10986_v49, %v8826_v34  ;;  %v1899_v29 = vmax.f32 %v12861_v3, 0.0  ;;  %v10918_v63 = vld [vmem:[#allocation8 + $0x12c] sm:$0xf0] }
 0x23c   : > { %1668 = vmatmul.bf16.gmra.mxu1 %v12859_v2  ;;  %8393 = vmatmul.msk.bf16.gmra.mxu3 %vm1289_vm5, %v12847_v54  ;;  %v1989_v13 = vmax.f32 %v1895_v35, %v1897_v47  ;;  %v8554_v35 = vld [vmem:[#allocation8 + $0x120] sm:$0xf]  ;;  %v1900_v34 = vmax.f32 %v12872_v24, 0.0 }
 0x23d   : > { %1806 = vmatmul.bf16.gmra.mxu0 %v12859_v2  ;;  %8405 = vmatmul.msk.bf16.gmra.mxu2 %vm1289_vm5, %v12847_v54  ;;  %v8698_v2 = vld [vmem:[#allocation8 + $0x240] sm:$0xf]  ;;  %v1894_v54 = vmax.f32 %v1832_v43, 0.0  ;;  %v1990_v33 = vmax.f32 %v1896_v21, %v1898_v38  ;;  %v10982_v38 = vld [vmem:[#allocation8 + $0x32c] sm:$0xf0] }
 0x23e   : > { %4042 = vmatpush.bf16.msra.mxu1 %v8443_v12  ;;  %v8699_v5 = vor.u32 %v10954_v23, %v8698_v2  ;;  %4165 = vmatpush.bf16.msra.mxu2 %v8827_v51  ;;  %v8410_v23 = vld [vmem:[#allocation8] sm:$0xf] }
 0x23f   : > { %v1698_v25 = vpop.f32.mrf.mxu3  ;;  %v13116_v12 = vmax.f32 %v1892_v10, %v1894_v54 }
 0x240   : > { %v1699_v53 = vadd.f32 %v1698_v25, %v1630_v22  ;;  %v1836_v61 = vpop.f32.mrf.mxu2  ;;  %v8426_v22 = vld [vmem:[#allocation8 + $0x20] sm:$0xf]  ;;  %v13111_v25 = vmax.f32 %v1891_v50, %v1893_v16  ;;  %4124 = vmatpush.bf16.msra.mxu0 %v8699_v5 }
 0x241   : > { %v1631_v46 = vpop.f32.mrf.mxu1  ;;  %v1837_v57 = vadd.f32 %v1836_v61, %v1768_v9  ;;  %v8427_v47 = vor.u32 %v10886_v17, %v8426_v22  ;;  %v8555_v61 = vor.u32 %v10918_v63, %v8554_v35  ;;  %v8682_v9 = vld [vmem:[#allocation8 + $0x220] sm:$0xf]  ;;  %v2036_v54 = vmax.f32 %v13116_v12, %v1990_v33  ;;  %v10946_v35 = vld [vmem:[#allocation8 + $0x20c] sm:$0xf0] }
 0x242   : > { %v1901_v7 = vmax.f32 %v1699_v53, 0.0  ;;  %v1769_v43 = vpop.f32.mrf.mxu0  ;;  %v10950_v53 = vld [vmem:[#allocation8 + $0x22c] sm:$0xf0]  ;;  %v2035_v44 = vmax.f32 %v13111_v25, %v1989_v13  ;;  %v1632_v21 = vadd.f32 %v1631_v46, %v13089_v20  ;;  %v8810_v16 = vld [vmem:[#allocation8 + $0x320] sm:$0xf] }
 0x243   : > { %v1902_v3 = vmax.f32 %v1837_v57, 0.0  ;;  %v8683_v50 = vor.u32 %v10950_v53, %v8682_v9  ;;  %4043 = vmatpush.bf16.msra.mxu1 %v8427_v47  ;;  %4084 = vmatpush.bf16.msra.mxu3 %v8555_v61  ;;  %v8811_v24 = vor.u32 %v10982_v38, %v8810_v16  ;;  %v1770_v57 = vadd.f32 %v1769_v43, %v13092_v60  ;;  %v10914_v46 = vld [vmem:[#allocation8 + $0x10c] sm:$0xf0]  ;;  %v8666_v47 = vld [vmem:[#allocation8 + $0x200] sm:$0xf] }
 0x244   : > { %v13114_v49 = vmax.f32 %v1899_v29, %v1901_v7  ;;  %v10882_v29 = vld [vmem:[#allocation8 + $0xc] sm:$0xf0]  ;;  %v8538_v7 = vld [vmem:[#allocation8 + $0x100] sm:$0xf]  ;;  %v8667_v9 = vor.u32 %v10946_v35, %v8666_v47  ;;  %v1903_v43 = vmax.f32 %v12877_v15, 0.0  ;;  %v1908_v47 = vmax.f32 %v12904_v1, 0.0 }
 0x245   : > { %v13121_v51 = vmax.f32 %v1900_v34, %v1902_v3  ;;  %v8411_v22 = vor.u32 %v10882_v29, %v8410_v23  ;;  %4125 = vmatpush.bf16.msra.mxu0 %v8683_v50  ;;  %4166 = vmatpush.bf16.msra.mxu2 %v8811_v24  ;;  %v8794_v63 = vld [vmem:[#allocation8 + $0x300] sm:$0xf]  ;;  %v8539_v61 = vor.u32 %v10914_v46, %v8538_v7  ;;  %v10978_v53 = vld [vmem:[#allocation8 + $0x30c] sm:$0xf0]  ;;  %v1907_v46 = vmax.f32 %v12893_v48, 0.0 }
 0x246   : > { %v2037_v2 = vmax.f32 %v1989_v13, %v13114_v49 }
 0x247   : > { %v1700_v5 = vpop.f32.mrf.mxu3  ;;  %v2038_v10 = vmax.f32 %v1990_v33, %v13121_v51  ;;  %4044 = vmatpush.bf16.msra.mxu1 %v8411_v22  ;;  %4085 = vmatpush.bf16.msra.mxu3 %v8539_v61  ;;  %v8795_v33 = vor.u32 %v10978_v53, %v8794_v63 }
 0x248   : > { %v13125_v17 = vpack.c.bf16 %v2037_v2, %v2035_v44  ;;  %v1701_v13 = vadd.f32 %v1700_v5, %v1632_v21  ;;  %v1838_v3 = vpop.f32.mrf.mxu2  ;;  %v1904_v21 = vmax.f32 %v12886_v30, 0.0 }
 0x249   : > { %v1634_v34 = vpop.f32.mrf.mxu1  ;;  %v13129_v16 = vpack.c.bf16 %v2038_v10, %v2036_v54  ;;  %v1839_v44 = vadd.f32 %v1838_v3, %v1770_v57  ;;  %4126 = vmatpush.bf16.msra.mxu0 %v8667_v9  ;;  %4167 = vmatpush.bf16.msra.mxu2 %v8795_v33 }
 0x24a   : > { %v1905_v38 = vmax.f32 %v1701_v13, 0.0  ;;  %v1772_v2 = vpop.f32.mrf.mxu0  ;;  %v1635_v23 = vadd.f32 %v1634_v34, %v13089_v20 }
 0x24b   : > { %v1906_v24 = vmax.f32 %v1839_v44, 0.0  ;;  %v1773_v54 = vadd.f32 %v1772_v2, %v13092_v60 }
 0x24c   : > { %v1993_v50 = vmax.f32 %v1903_v43, %v1905_v38  ;;  %1673 = vmatmul.bf16.gmra.mxu1 %v12884_v56  ;;  %8394 = vmatmul.msk.bf16.gmra.mxu3 %vm1289_vm5, %v12879_v18  ;;  %v1911_v38 = vmax.f32 %v12909_v42, 0.0 }
 0x24d   : > { %v1994_v29 = vmax.f32 %v1904_v21, %v1906_v24  ;;  %1811 = vmatmul.bf16.gmra.mxu0 %v12884_v56  ;;  %8406 = vmatmul.msk.bf16.gmra.mxu2 %vm1289_vm5, %v12879_v18  ;;  %v1912_v21 = vmax.f32 %v12918_v6, 0.0 }
 0x24e   : > { %v2039_v15 = vmax.f32 %v13114_v49, %v1993_v50 }
 0x24f   : > { %v1703_v30 = vpop.f32.mrf.mxu3  ;;  %v2040_v7 = vmax.f32 %v13121_v51, %v1994_v29 }
 0x250   : > { %v1704_v57 = vadd.f32 %v1703_v30, %v1635_v23  ;;  %v1841_v22 = vpop.f32.mrf.mxu2 }
 0x251   : > { %v1636_v5 = vpop.f32.mrf.mxu1  ;;  %v1842_v49 = vadd.f32 %v1841_v22, %v1773_v54 }
 0x252   : > { %v1909_v10 = vmax.f32 %v1704_v57, 0.0  ;;  %v1774_v13 = vpop.f32.mrf.mxu0  ;;  %v1637_v18 = vadd.f32 %v1636_v5, %v13089_v20  ;;  %v1915_v5 = vmax.f32 %v12925_v37, 0.0 }
 0x253   : > { %v1910_v56 = vmax.f32 %v1842_v49, 0.0  ;;  %v1775_v9 = vadd.f32 %v1774_v13, %v13092_v60  ;;  %v1916_v49 = vmax.f32 %v12930_v36, 0.0 }
 0x254   : > { %v1995_v35 = vmax.f32 %v1907_v46, %v1909_v10 }
 0x255   : > { %v1996_v34 = vmax.f32 %v1908_v47, %v1910_v56 }
 0x256   : > { %v2041_v63 = vmax.f32 %v1993_v50, %v1995_v35 }
 0x257   : > { %v1705_v3 = vpop.f32.mrf.mxu3  ;;  %v2042_v61 = vmax.f32 %v1994_v29, %v1996_v34 }
 0x258   : > { %v13145_v51 = vpack.c.bf16 %v2041_v63, %v2039_v15  ;;  %v1706_v53 = vadd.f32 %v1705_v3, %v1637_v18  ;;  %v1843_v48 = vpop.f32.mrf.mxu2 }
 0x259   : > { %v1639_v43 = vpop.f32.mrf.mxu1  ;;  %v13149_v44 = vpack.c.bf16 %v2042_v61, %v2040_v7  ;;  %v1844_v2 = vadd.f32 %v1843_v48, %v1775_v9  ;;  %v1919_v9 = vmax.f32 %v12933_v14, 0.0 }
 0x25a   : > { %v1913_v1 = vmax.f32 %v1706_v53, 0.0  ;;  %v1777_v33 = vpop.f32.mrf.mxu0  ;;  %v1640_v23 = vadd.f32 %v1639_v43, %v13089_v20 }
 0x25b   : > { %v1914_v24 = vmax.f32 %v1844_v2, 0.0  ;;  %v1778_v6 = vadd.f32 %v1777_v33, %v13092_v60 }
 0x25c   : > { %v1997_v50 = vmax.f32 %v1911_v38, %v1913_v1  ;;  %1678 = vmatmul.bf16.gmra.mxu1 %v12916_v52  ;;  %8395 = vmatmul.msk.bf16.gmra.mxu3 %vm1289_vm5, %v12911_v39  ;;  %v1920_v38 = vmax.f32 %v12936_v19, 0.0 }
 0x25d   : > { %v1998_v29 = vmax.f32 %v1912_v21, %v1914_v24  ;;  %1816 = vmatmul.bf16.gmra.mxu0 %v12916_v52  ;;  %8407 = vmatmul.msk.bf16.gmra.mxu2 %vm1289_vm5, %v12911_v39 }
 0x25e   : > { %v2043_v15 = vmax.f32 %v1995_v35, %v1997_v50 }
 0x25f   : > { %v1708_v42 = vpop.f32.mrf.mxu3  ;;  %v2044_v30 = vmax.f32 %v1996_v34, %v1998_v29 }
 0x260   : > { %v1709_v7 = vadd.f32 %v1708_v42, %v1640_v23  ;;  %v1846_v57 = vpop.f32.mrf.mxu2  ;;  %v1923_v42 = vmax.f32 %v12942_v32, 0.0 }
 0x261   : > { %v1641_v54 = vpop.f32.mrf.mxu1  ;;  %v1847_v46 = vadd.f32 %v1846_v57, %v1778_v6 }
 0x262   : > { %v1917_v22 = vmax.f32 %v1709_v7, 0.0  ;;  %v1779_v10 = vpop.f32.mrf.mxu0  ;;  %v1642_v35 = vadd.f32 %v1641_v54, %v13089_v20  ;;  %v1924_v54 = vmax.f32 %v12948_v27, 0.0 }
 0x263   : > { %v1918_v47 = vmax.f32 %v1847_v46, 0.0  ;;  %v1780_v34 = vadd.f32 %v1779_v10, %v13092_v60 }
 0x264   : > { %v1999_v13 = vmax.f32 %v1915_v5, %v1917_v22 }
 0x265   : > { %v2000_v39 = vmax.f32 %v1916_v49, %v1918_v47 }
 0x266   : > { %v2045_v52 = vmax.f32 %v1997_v50, %v1999_v13 }
 0x267   : > { %v1710_v56 = vpop.f32.mrf.mxu3  ;;  %v2046_v18 = vmax.f32 %v1998_v29, %v2000_v39 }
 0x268   : > { %v13163_v63 = vpack.c.bf16 %v2045_v52, %v2043_v15  ;;  %v1711_v3 = vadd.f32 %v1710_v56, %v1642_v35  ;;  %v1848_v37 = vpop.f32.mrf.mxu2  ;;  %v1927_v56 = vmax.f32 %v12951_v58, 0.0 }
 0x269   : > { %v1644_v61 = vpop.f32.mrf.mxu1  ;;  %v13167_v53 = vpack.c.bf16 %v2046_v18, %v2044_v30  ;;  %v1849_v43 = vadd.f32 %v1848_v37, %v1780_v34 }
 0x26a   : > { %v1921_v36 = vmax.f32 %v1711_v3, 0.0  ;;  %v1782_v48 = vpop.f32.mrf.mxu0  ;;  %v1645_v21 = vadd.f32 %v1644_v61, %v13089_v20  ;;  %v1928_v61 = vmax.f32 %v12954_v0, 0.0 }
 0x26b   : > { %v1922_v2 = vmax.f32 %v1849_v43, 0.0  ;;  %v1783_v15 = vadd.f32 %v1782_v48, %v13092_v60 }
 0x26c   : > { %v2001_v1 = vmax.f32 %v1919_v9, %v1921_v36  ;;  %4045 = vmatmul.bf16.vlgmr.msra.gmra.mxu1 %v13125_v17  ;;  %4086 = vmatmul.bf16.vlgmr.msra.gmra.mxu3 %v13129_v16 }
 0x26d   : > { %v2002_v50 = vmax.f32 %v1920_v38, %v1922_v2  ;;  %4127 = vmatmul.bf16.vlgmr.msra.gmra.mxu0 %v13145_v51  ;;  %4168 = vmatmul.bf16.vlgmr.msra.gmra.mxu2 %v13149_v44 }
 0x26e   : > { %v2047_v33 = vmax.f32 %v1999_v13, %v2001_v1 }
 0x26f   : > { %v1713_v14 = vpop.f32.mrf.mxu3  ;;  %v2048_v24 = vmax.f32 %v2000_v39, %v2002_v50 }
 0x270   : > { %v1714_v23 = vadd.f32 %v1713_v14, %v1645_v21  ;;  %v1851_v29 = vpop.f32.mrf.mxu2  ;;  %v1931_v21 = vmax.f32 %v12960_v45, 0.0 }
 0x271   : > { %v1646_v19 = vpop.f32.mrf.mxu1  ;;  %v1852_v6 = vadd.f32 %v1851_v29, %v1783_v15  ;;  %v1932_v15 = vmax.f32 %v12966_v40, 0.0 }
 0x272   : > { %v1925_v30 = vmax.f32 %v1714_v23, 0.0  ;;  %v1784_v7 = vpop.f32.mrf.mxu0  ;;  %v1647_v46 = vadd.f32 %v1646_v19, %v13089_v20 }
 0x273   : > { %v1926_v5 = vmax.f32 %v1852_v6, 0.0  ;;  %v1785_v52 = vadd.f32 %v1784_v7, %v13092_v60 }
 0x274   : > { %v2003_v57 = vmax.f32 %v1923_v42, %v1925_v30 }
 0x275   : > { %v2004_v10 = vmax.f32 %v1924_v54, %v1926_v5  ;;  %v9162_v5 = vld [vmem:[#allocation8 + $0x5e0] sm:$0xf] }
 0x276   : > { %v2049_v22 = vmax.f32 %v2001_v1, %v2003_v57 }
 0x277   : > { %v1715_v49 = vpop.f32.mrf.mxu3  ;;  %v2050_v47 = vmax.f32 %v2002_v50, %v2004_v10 }
 0x278   : > { %v13179_v13 = vpack.c.bf16 %v2049_v22, %v2047_v33  ;;  %v1716_v35 = vadd.f32 %v1715_v49, %v1647_v46  ;;  %v1853_v32 = vpop.f32.mrf.mxu2  ;;  %v11070_v22 = vld [vmem:[#allocation8 + $0x5ec] sm:$0xf0]  ;;  %v1935_v49 = vmax.f32 %v12969_v55, 0.0 }
 0x279   : > { %v1649_v39 = vpop.f32.mrf.mxu1  ;;  %v13183_v18 = vpack.c.bf16 %v2050_v47, %v2048_v24  ;;  %v1854_v34 = vadd.f32 %v1853_v32, %v1785_v52  ;;  %v9163_v40 = vor.u32 %v11070_v22, %v9162_v5  ;;  %v11038_v32 = vld [vmem:[#allocation8 + $0x4ec] sm:$0xf0] }
 0x27a   : > { %v1929_v27 = vmax.f32 %v1716_v35, 0.0  ;;  %v1787_v3 = vpop.f32.mrf.mxu0  ;;  %v1650_v43 = vadd.f32 %v1649_v39, %v13089_v20  ;;  %v9034_v39 = vld [vmem:[#allocation8 + $0x4e0] sm:$0xf] }
 0x27b   : > { %v1930_v9 = vmax.f32 %v1854_v34, 0.0  ;;  %v1788_v1 = vadd.f32 %v1787_v3, %v13092_v60  ;;  %4242 = vmatpush.bf16.msrb.mxu3 %v9163_v40  ;;  %v9418_v34 = vld [vmem:[#allocation8 + $0x7e0] sm:$0xf]  ;;  %v11134_v3 = vld [vmem:[#allocation8 + $0x7ec] sm:$0xf0] }
 0x27c   : > { %v2005_v37 = vmax.f32 %v1927_v56, %v1929_v27  ;;  %4049 = vmatmul.bf16.gmra.mxu1 %v13145_v51  ;;  %4090 = vmatmul.bf16.gmra.mxu3 %v13149_v44  ;;  %v9035_v27 = vor.u32 %v11038_v32, %v9034_v39  ;;  %v9419_v55 = vor.u32 %v11134_v3, %v9418_v34  ;;  %v11066_v40 = vld [vmem:[#allocation8 + $0x5cc] sm:$0xf0]  ;;  %v14126_v39 = vld [vmem:[#allocation27_spill] sm:$0xff] }
 0x27d   : > { %v2006_v48 = vmax.f32 %v1928_v61, %v1930_v9  ;;  %4131 = vmatmul.bf16.gmra.mxu0 %v13163_v63  ;;  %4172 = vmatmul.bf16.gmra.mxu2 %v13167_v53  ;;  %v1936_v61 = vmax.f32 %v12972_v41, 0.0  ;;  %v1943_v32 = vmax.f32 %v14126_v39, 0.0  ;;  %v9018_v3 = vld [vmem:[#allocation8 + $0x4c0] sm:$0xf] }
 0x27e   : > { %v2051_v36 = vmax.f32 %v2003_v57, %v2005_v37  ;;  %4201 = vmatpush.bf16.msrb.mxu1 %v9035_v27  ;;  %4324 = vmatpush.bf16.msrb.mxu2 %v9419_v55  ;;  %v9402_v55 = vld [vmem:[#allocation8 + $0x7c0] sm:$0xf] }
 0x27f   : > { %v1718_v58 = vpop.f32.mrf.mxu3  ;;  %v2052_v38 = vmax.f32 %v2004_v10, %v2006_v48 }
 0x280   : > { %v1719_v2 = vadd.f32 %v1718_v58, %v1650_v43  ;;  %v1856_v33 = vpop.f32.mrf.mxu2  ;;  %v9290_v58 = vld [vmem:[#allocation8 + $0x6e0] sm:$0xf] }
 0x281   : > { %v1651_v0 = vpop.f32.mrf.mxu1  ;;  %v1857_v14 = vadd.f32 %v1856_v33, %v1788_v1 }
 0x282   : > { %v1933_v50 = vmax.f32 %v1719_v2, 0.0  ;;  %v1789_v24 = vpop.f32.mrf.mxu0  ;;  %v1652_v42 = vadd.f32 %v1651_v0, %v13089_v20 }
 0x283   : > { %v1934_v19 = vmax.f32 %v1857_v14, 0.0  ;;  %v1790_v57 = vadd.f32 %v1789_v24, %v13092_v60  ;;  %v1939_v14 = vmax.f32 %v12978_v31, 0.0 }
 0x284   : > { %v2007_v23 = vmax.f32 %v1931_v21, %v1933_v50 }
 0x285   : > { %v13195_v30 = vmax.f32 %v1932_v15, %v1934_v19  ;;  %v14125_v19 = vld [vmem:[#allocation26_spill] sm:$0xff] }
 0x286   : > { %v2053_v29 = vmax.f32 %v2005_v37, %v2007_v23 }
 0x287   : > { %v1720_v6 = vpop.f32.mrf.mxu3  ;;  %v2054_v54 = vmax.f32 %v2006_v48, %v13195_v30 }
 0x288   : > { %v13197_v7 = vpack.c.bf16 %v2053_v29, %v2051_v36  ;;  %v1721_v45 = vadd.f32 %v1720_v6, %v1652_v42  ;;  %v1858_v10 = vpop.f32.mrf.mxu2  ;;  %v1940_v29 = vmax.f32 %v14125_v19, 0.0 }
 0x289   : > { %v1654_v46 = vpop.f32.mrf.mxu1  ;;  %v13202_v47 = vpack.c.bf16 %v2054_v54, %v2052_v38  ;;  %v1859_v35 = vadd.f32 %v1858_v10, %v1790_v57  ;;  %v11102_v38 = vld [vmem:[#allocation8 + $0x6ec] sm:$0xf0]  ;;  %v9146_v10 = vld [vmem:[#allocation8 + $0x5c0] sm:$0xf] }
 0x28a   : > { %v1937_v52 = vmax.f32 %v1721_v45, 0.0  ;;  %v1792_v56 = vpop.f32.mrf.mxu0  ;;  %v1655_v43 = vadd.f32 %v1654_v46, %v13089_v20  ;;  %v9291_v41 = vor.u32 %v11102_v38, %v9290_v58 }
 0x28b   : > { %v1938_v9 = vmax.f32 %v1859_v35, 0.0  ;;  %v1793_v0 = vadd.f32 %v1792_v56, %v13092_v60  ;;  %v9147_v35 = vor.u32 %v11066_v40, %v9146_v10 }
 0x28c   : > { %v2009_v37 = vmax.f32 %v1935_v49, %v1937_v52  ;;  %4053 = vmatmul.bf16.gmra.mxu1 %v13163_v63  ;;  %4094 = vmatmul.bf16.gmra.mxu3 %v13167_v53 }
 0x28d   : > { %v2010_v48 = vmax.f32 %v1936_v61, %v1938_v9  ;;  %4135 = vmatmul.bf16.gmra.mxu0 %v13179_v13  ;;  %4176 = vmatmul.bf16.gmra.mxu2 %v13183_v18  ;;  %v11034_v61 = vld [vmem:[#allocation8 + $0x4cc] sm:$0xf0] }
 0x28e   : > { %v2055_v36 = vmax.f32 %v2007_v23, %v2009_v37  ;;  %4283 = vmatpush.bf16.msrb.mxu0 %v9291_v41  ;;  %4243 = vmatpush.bf16.msrb.mxu3 %v9147_v35  ;;  %v9019_v9 = vor.u32 %v11034_v61, %v9018_v3 }
 0x28f   : > { %v1723_v1 = vpop.f32.mrf.mxu3  ;;  %v2056_v2 = vmax.f32 %v13195_v30, %v2010_v48 }
 0x290   : > { %v1724_v33 = vadd.f32 %v1723_v1, %v1655_v43  ;;  %v1861_v50 = vpop.f32.mrf.mxu2  ;;  %v14127_v43 = vld [vmem:[#allocation28_spill] sm:$0xff]  ;;  %4202 = vmatpush.bf16.msrb.mxu1 %v9019_v9 }
 0x291   : > { %v1656_v21 = vpop.f32.mrf.mxu1  ;;  %v1862_v15 = vadd.f32 %v1861_v50, %v1793_v0 }
 0x292   : > { %v1941_v24 = vmax.f32 %v1724_v33, 0.0  ;;  %v1794_v23 = vpop.f32.mrf.mxu0  ;;  %v1657_v57 = vadd.f32 %v1656_v21, %v13089_v20  ;;  %v9274_v33 = vld [vmem:[#allocation8 + $0x6c0] sm:$0xf]  ;;  %v11098_v21 = vld [vmem:[#allocation8 + $0x6cc] sm:$0xf0] }
 0x293   : > { %v1942_v6 = vmax.f32 %v1862_v15, 0.0  ;;  %v1795_v46 = vadd.f32 %v1794_v23, %v13092_v60 }
 0x294   : > { %v2011_v42 = vmax.f32 %v1939_v14, %v1941_v24  ;;  %v9275_v14 = vor.u32 %v11098_v21, %v9274_v33 }
 0x295   : > { %v13215_v45 = vmax.f32 %v1940_v29, %v1942_v6 }
 0x296   : > { %v2057_v54 = vmax.f32 %v2009_v37, %v2011_v42  ;;  %4284 = vmatpush.bf16.msrb.mxu0 %v9275_v14 }
 0x297   : > { %v1725_v30 = vpop.f32.mrf.mxu3  ;;  %v2058_v22 = vmax.f32 %v2010_v48, %v13215_v45  ;;  %v1944_v48 = vmax.f32 %v14127_v43, 0.0  ;;  %v9002_v43 = vld [vmem:[#allocation8 + $0x4a0] sm:$0xf] }
 0x298   : > { %v13217_v5 = vpack.c.bf16 %v2057_v54, %v2055_v36  ;;  %v1726_v31 = vadd.f32 %v1725_v30, %v1657_v57  ;;  %v1863_v52 = vpop.f32.mrf.mxu2  ;;  %v11130_v36 = vld [vmem:[#allocation8 + $0x7cc] sm:$0xf0] }
 0x299   : > { %v1659_v49 = vpop.f32.mrf.mxu1  ;;  %v13222_v56 = vpack.c.bf16 %v2058_v22, %v2056_v2  ;;  %v1864_v34 = vadd.f32 %v1863_v52, %v1795_v46  ;;  %v9403_v1 = vor.u32 %v11130_v36, %v9402_v55  ;;  %v1948_v22 = vmax.f32 %v13002_v26, 0.0 }
 0x29a   : > { %v1945_v27 = vmax.f32 %v1726_v31, 0.0  ;;  %v1797_v37 = vpop.f32.mrf.mxu0  ;;  %v1660_v2 = vadd.f32 %v1659_v49, %v13089_v20 }
 0x29b   : > { %v1946_v38 = vmax.f32 %v1864_v34, 0.0  ;;  %4325 = vmatpush.bf16.msrb.mxu2 %v9403_v1  ;;  %v1798_v15 = vadd.f32 %v1797_v37, %v13092_v60  ;;  %v11062_v34 = vld [vmem:[#allocation8 + $0x5ac] sm:$0xf0]  ;;  %v1951_v37 = vmax.f32 %v13005_v4, 0.0  ;;  %v9386_v1 = vld [vmem:[#allocation8 + $0x7a0] sm:$0xf] }
 0x29c   : > { %v2013_v58 = vmax.f32 %v1943_v32, %v1945_v27  ;;  %4057 = vmatmul.bf16.gmra.mxu1 %v13179_v13  ;;  %4098 = vmatmul.bf16.gmra.mxu3 %v13183_v18  ;;  %v9130_v27 = vld [vmem:[#allocation8 + $0x5a0] sm:$0xf] }
 0x29d   : > { %v2014_v0 = vmax.f32 %v1944_v48, %v1946_v38  ;;  %4139 = vmatmul.bf16.gmra.mxu0 %v13197_v7  ;;  %4180 = vmatmul.bf16.gmra.mxu2 %v13202_v47  ;;  %v9131_v61 = vor.u32 %v11062_v34, %v9130_v27  ;;  %v11030_v48 = vld [vmem:[#allocation8 + $0x4ac] sm:$0xf0]  ;;  %v9114_v34 = vld [vmem:[#allocation8 + $0x580] sm:$0xf] }
 0x29e   : > { %v2059_v41 = vmax.f32 %v2011_v42, %v2013_v58  ;;  %v14128_v42 = vld [vmem:[#allocation29_spill] sm:$0xff]  ;;  %v9003_v38 = vor.u32 %v11030_v48, %v9002_v43 }
 0x29f   : > { %v1728_v50 = vpop.f32.mrf.mxu3  ;;  %v2060_v24 = vmax.f32 %v13215_v45, %v2014_v0  ;;  %v1947_v6 = vmax.f32 %v14128_v42, 0.0  ;;  %4244 = vmatpush.bf16.msrb.mxu3 %v9131_v61 }
 0x2a0   : > { %v1729_v23 = vadd.f32 %v1728_v50, %v1660_v2  ;;  %v1866_v29 = vpop.f32.mrf.mxu2  ;;  %v14129_v2 = vld [vmem:[#allocation30_spill] sm:$0xff]  ;;  %4203 = vmatpush.bf16.msrb.mxu1 %v9003_v38 }
 0x2a1   : > { %v1661_v19 = vpop.f32.mrf.mxu1  ;;  %v1867_v57 = vadd.f32 %v1866_v29, %v1798_v15  ;;  %v9258_v15 = vld [vmem:[#allocation8 + $0x6a0] sm:$0xf] }
 0x2a2   : > { %v1949_v54 = vmax.f32 %v1729_v23, 0.0  ;;  %v1799_v30 = vpop.f32.mrf.mxu0  ;;  %v1662_v45 = vadd.f32 %v1661_v19, %v13089_v20  ;;  %v11094_v23 = vld [vmem:[#allocation8 + $0x6ac] sm:$0xf0]  ;;  %v9370_v38 = vld [vmem:[#allocation8 + $0x780] sm:$0xf] }
 0x2a3   : > { %v1950_v31 = vmax.f32 %v1867_v57, 0.0  ;;  %v1800_v39 = vadd.f32 %v1799_v30, %v13092_v60  ;;  %v9259_v29 = vor.u32 %v11094_v23, %v9258_v15 }
 0x2a4   : > { %v13234_v46 = vmax.f32 %v1947_v6, %v1949_v54 }
 0x2a5   : > { %v13238_v40 = vmax.f32 %v1948_v22, %v1950_v31  ;;  %4285 = vmatpush.bf16.msrb.mxu0 %v9259_v29  ;;  %v14130_v22 = vld [vmem:[#allocation31_spill] sm:$0xff] }
 0x2a6   : > { %v2061_v10 = vmax.f32 %v2013_v58, %v13234_v46 }
 0x2a7   : > { %v1730_v49 = vpop.f32.mrf.mxu3  ;;  %v2062_v35 = vmax.f32 %v2014_v0, %v13238_v40  ;;  %v1952_v0 = vmax.f32 %v14129_v2, 0.0 }
 0x2a8   : > { %v13240_v52 = vpack.c.bf16 %v2061_v10, %v2059_v41  ;;  %v1731_v32 = vadd.f32 %v1730_v49, %v1662_v45  ;;  %v1868_v3 = vpop.f32.mrf.mxu2  ;;  %v11126_v41 = vld [vmem:[#allocation8 + $0x7ac] sm:$0xf0]  ;;  %v1956_v49 = vmax.f32 %v13020_v28, 0.0 }
 0x2a9   : > { %v1664_v26 = vpop.f32.mrf.mxu1  ;;  %v13245_v9 = vpack.c.bf16 %v2062_v35, %v2060_v24  ;;  %v1869_v36 = vadd.f32 %v1868_v3, %v1800_v39  ;;  %v9387_v4 = vor.u32 %v11126_v41, %v9386_v1  ;;  %v8986_v3 = vld [vmem:[#allocation8 + $0x480] sm:$0xf]  ;;  %v11122_v1 = vld [vmem:[#allocation8 + $0x78c] sm:$0xf0] }
 0x2aa   : > { %v1953_v55 = vmax.f32 %v1731_v32, 0.0  ;;  %v1802_v58 = vpop.f32.mrf.mxu0  ;;  %v1665_v14 = vadd.f32 %v1664_v26, %v13089_v20  ;;  %v11058_v26 = vld [vmem:[#allocation8 + $0x58c] sm:$0xf0]  ;;  %v9242_v41 = vld [vmem:[#allocation8 + $0x680] sm:$0xf] }
 0x2ab   : > { %v1954_v21 = vmax.f32 %v1869_v36, 0.0  ;;  %4326 = vmatpush.bf16.msrb.mxu2 %v9387_v4  ;;  %v1803_v6 = vadd.f32 %v1802_v58, %v13092_v60  ;;  %v11026_v36 = vld [vmem:[#allocation8 + $0x48c] sm:$0xf0]  ;;  %v1959_v4 = vmax.f32 %v13023_v8, 0.0 }
 0x2ac   : > { %v2017_v33 = vmax.f32 %v1951_v37, %v1953_v55  ;;  %4061 = vmatmul.bf16.gmra.mxu1 %v13197_v7  ;;  %4102 = vmatmul.bf16.gmra.mxu3 %v13202_v47  ;;  %v9115_v55 = vor.u32 %v11058_v26, %v9114_v34  ;;  %v8987_v58 = vor.u32 %v11026_v36, %v8986_v3  ;;  %v8954_v34 = vld [vmem:[#allocation8 + $0x440] sm:$0xf]  ;;  %v11018_v26 = vld [vmem:[#allocation8 + $0x44c] sm:$0xf0] }
 0x2ad   : > { %v2018_v24 = vmax.f32 %v1952_v0, %v1954_v21  ;;  %4143 = vmatmul.bf16.gmra.mxu0 %v13217_v5  ;;  %4184 = vmatmul.bf16.gmra.mxu2 %v13222_v56  ;;  %v11090_v21 = vld [vmem:[#allocation8 + $0x68c] sm:$0xf0]  ;;  %v9082_v3 = vld [vmem:[#allocation8 + $0x540] sm:$0xf] }
 0x2ae   : > { %v2063_v50 = vmax.f32 %v13234_v46, %v2017_v33  ;;  %v1955_v46 = vmax.f32 %v14130_v22, 0.0  ;;  %4245 = vmatpush.bf16.msrb.mxu3 %v9115_v55  ;;  %4204 = vmatpush.bf16.msrb.mxu1 %v8987_v58  ;;  %v9243_v29 = vor.u32 %v11090_v21, %v9242_v41  ;;  %v11050_v55 = vld [vmem:[#allocation8 + $0x54c] sm:$0xf0]  ;;  %v9210_v58 = vld [vmem:[#allocation8 + $0x640] sm:$0xf]  ;;  %v1963_v21 = vmax.f32 %v13032_v11, 0.0 }
 0x2af   : > { %v1733_v19 = vpop.f32.mrf.mxu3  ;;  %v2064_v42 = vmax.f32 %v13238_v40, %v2018_v24  ;;  %v11078_v11 = vld [vmem:[#allocation8 + $0x62c] sm:$0xf0] }
 0x2b0   : > { %v1734_v54 = vadd.f32 %v1733_v19, %v1665_v14  ;;  %v1871_v30 = vpop.f32.mrf.mxu2  ;;  %v11022_v19 = vld [vmem:[#allocation8 + $0x46c] sm:$0xf0]  ;;  %4286 = vmatpush.bf16.msrb.mxu0 %v9243_v29 }
 0x2b1   : > { %v1666_v57 = vpop.f32.mrf.mxu1  ;;  %v1872_v10 = vadd.f32 %v1871_v30, %v1803_v6  ;;  %v1960_v30 = vmax.f32 %v13026_v62, 0.0 }
 0x2b2   : > { %v1957_v31 = vmax.f32 %v1734_v54, 0.0  ;;  %v1804_v45 = vpop.f32.mrf.mxu0  ;;  %v1667_v40 = vadd.f32 %v1666_v57, %v13089_v20  ;;  %v9098_v54 = vld [vmem:[#allocation8 + $0x560] sm:$0xf]  ;;  %v11054_v57 = vld [vmem:[#allocation8 + $0x56c] sm:$0xf0] }
 0x2b3   : > { %v1958_v39 = vmax.f32 %v1872_v10, 0.0  ;;  %v1805_v61 = vadd.f32 %v1804_v45, %v13092_v60  ;;  %v9099_v8 = vor.u32 %v11054_v57, %v9098_v54  ;;  %v11046_v54 = vld [vmem:[#allocation8 + $0x52c] sm:$0xf0]  ;;  %v1964_v57 = vmax.f32 %v13038_v59, 0.0  ;;  %v8922_v59 = vld [vmem:[#allocation8 + $0x400] sm:$0xf] }
 0x2b4   : > { %v13258_v35 = vmax.f32 %v1955_v46, %v1957_v31  ;;  %v11086_v31 = vld [vmem:[#allocation8 + $0x66c] sm:$0xf0] }
 0x2b5   : > { %v13262_v27 = vmax.f32 %v1956_v49, %v1958_v39  ;;  %v9354_v49 = vld [vmem:[#allocation8 + $0x760] sm:$0xf]  ;;  %v11118_v39 = vld [vmem:[#allocation8 + $0x76c] sm:$0xf0]  ;;  %4246 = vmatpush.bf16.msrb.mxu3 %v9099_v8 }
 0x2b6   : > { %v2065_v32 = vmax.f32 %v2017_v33, %v13258_v35  ;;  %v9371_v33 = vor.u32 %v11122_v1, %v9370_v38  ;;  %v11082_v38 = vld [vmem:[#allocation8 + $0x64c] sm:$0xf0]  ;;  %v9338_v1 = vld [vmem:[#allocation8 + $0x740] sm:$0xf] }
 0x2b7   : > { %v1735_v37 = vpop.f32.mrf.mxu3  ;;  %v2066_v28 = vmax.f32 %v2018_v24, %v13262_v27 }
 0x2b8   : > { %v13265_v43 = vpack.c.bf16 %v2065_v32, %v2063_v50  ;;  %v1736_v48 = vadd.f32 %v1735_v37, %v1667_v40  ;;  %v1873_v0 = vpop.f32.mrf.mxu2  ;;  %v8970_v50 = vld [vmem:[#allocation8 + $0x460] sm:$0xf]  ;;  %4327 = vmatpush.bf16.msrb.mxu2 %v9371_v33  ;;  %v9355_v40 = vor.u32 %v11118_v39, %v9354_v49  ;;  %v8955_v37 = vor.u32 %v11018_v26, %v8954_v34  ;;  %v11114_v33 = vld [vmem:[#allocation8 + $0x74c] sm:$0xf0] }
 0x2b9   : > { %v1669_v2 = vpop.f32.mrf.mxu1  ;;  %v13269_v14 = vpack.c.bf16 %v2066_v28, %v2064_v42  ;;  %v1874_v23 = vadd.f32 %v1873_v0, %v1805_v61  ;;  %v8971_v6 = vor.u32 %v11022_v19, %v8970_v50  ;;  %v9226_v42 = vld [vmem:[#allocation8 + $0x660] sm:$0xf]  ;;  %v9211_v0 = vor.u32 %v11082_v38, %v9210_v58  ;;  %v11014_v19 = vld [vmem:[#allocation8 + $0x42c] sm:$0xf0] }
 0x2ba   : > { %v1961_v15 = vmax.f32 %v1736_v48, 0.0  ;;  %v1807_v24 = vpop.f32.mrf.mxu0  ;;  %v1670_v10 = vadd.f32 %v1669_v2, %v13089_v20  ;;  %v9227_v45 = vor.u32 %v11086_v31, %v9226_v42  ;;  %v9083_v48 = vor.u32 %v11050_v55, %v9082_v3  ;;  %v8938_v50 = vld [vmem:[#allocation8 + $0x420] sm:$0xf]  ;;  %v11010_v26 = vld [vmem:[#allocation8 + $0x40c] sm:$0xf0] }
 0x2bb   : > { %v1962_v46 = vmax.f32 %v1874_v23, 0.0  ;;  %4205 = vmatpush.bf16.msrb.mxu1 %v8971_v6  ;;  %v9339_v23 = vor.u32 %v11114_v33, %v9338_v1  ;;  %v9066_v6 = vld [vmem:[#allocation8 + $0x520] sm:$0xf]  ;;  %v11042_v55 = vld [vmem:[#allocation8 + $0x50c] sm:$0xf0] }
 0x2bc   : > { %v13272_v22 = vmax.f32 %v1959_v4, %v1961_v15  ;;  %4065 = vmatmul.bf16.gmra.mxu1 %v13217_v5  ;;  %4106 = vmatmul.bf16.gmra.mxu3 %v13222_v56  ;;  %v9067_v8 = vor.u32 %v11046_v54, %v9066_v6  ;;  %v9194_v42 = vld [vmem:[#allocation8 + $0x620] sm:$0xf]  ;;  %v11074_v38 = vld [vmem:[#allocation8 + $0x60c] sm:$0xf0] }
 0x2bd   : > { %v13279_v62 = vmax.f32 %v1960_v30, %v1962_v46  ;;  %4147 = vmatmul.bf16.gmra.mxu0 %v13240_v52  ;;  %4188 = vmatmul.bf16.gmra.mxu2 %v13245_v9  ;;  %v9195_v31 = vor.u32 %v11078_v11, %v9194_v42  ;;  %v9050_v3 = vld [vmem:[#allocation8 + $0x500] sm:$0xf] }
 0x2be   : > { %v2067_v32 = vmax.f32 %v13258_v35, %v13272_v22  ;;  %v1808_v35 = vadd.f32 %v1807_v24, %v13092_v60  ;;  %4328 = vmatpush.bf16.msrb.mxu2 %v9355_v40  ;;  %4287 = vmatpush.bf16.msrb.mxu0 %v9227_v45  ;;  %v8939_v24 = vor.u32 %v11014_v19, %v8938_v50  ;;  %v11110_v45 = vld [vmem:[#allocation8 + $0x72c] sm:$0xf0]  ;;  %v9178_v58 = vld [vmem:[#allocation8 + $0x600] sm:$0xf] }
 0x2bf   : > { %v1738_v61 = vpop.f32.mrf.mxu3  ;;  %v2068_v36 = vmax.f32 %v13262_v27, %v13279_v62  ;;  %4206 = vmatpush.bf16.msrb.mxu1 %v8955_v37  ;;  %4247 = vmatpush.bf16.msrb.mxu3 %v9083_v48  ;;  %v8923_v37 = vor.u32 %v11010_v26, %v8922_v59  ;;  %v9306_v33 = vld [vmem:[#allocation8 + $0x700] sm:$0xf] }
 0x2c0   : > { %v1739_v28 = vadd.f32 %v1738_v61, %v1670_v10  ;;  %v1876_v2 = vpop.f32.mrf.mxu2  ;;  %v9322_v10 = vld [vmem:[#allocation8 + $0x720] sm:$0xf] }
 0x2c1   : > { %v1671_v41 = vpop.f32.mrf.mxu1  ;;  %v1877_v15 = vadd.f32 %v1876_v2, %v1808_v35  ;;  %v9323_v34 = vor.u32 %v11110_v45, %v9322_v10  ;;  %v9051_v2 = vor.u32 %v11042_v55, %v9050_v3  ;;  %v14133_v45 = vld [vmem:[#allocation34_spill] sm:$0xff]  ;;  %v14134_v59 = vld [vmem:[#allocation35_spill] sm:$0xff] }
 0x2c2   : > { %v1965_v4 = vmax.f32 %v1739_v28, 0.0  ;;  %v1809_v29 = vpop.f32.mrf.mxu0  ;;  %4329 = vmatpush.bf16.msrb.mxu2 %v9339_v23  ;;  %4288 = vmatpush.bf16.msrb.mxu0 %v9211_v0  ;;  %v1672_v39 = vadd.f32 %v1671_v41, %v13089_v20  ;;  %v9179_v0 = vor.u32 %v11074_v38, %v9178_v58  ;;  %v1972_v26 = vmax.f32 %v14134_v59, 0.0 }
 0x2c3   : > { %v1966_v46 = vmax.f32 %v1877_v15, 0.0  ;;  %4207 = vmatpush.bf16.msrb.mxu1 %v8939_v24  ;;  %4248 = vmatpush.bf16.msrb.mxu3 %v9067_v8  ;;  %v14132_v24 = vld [vmem:[#allocation33_spill] sm:$0xff] }
 0x2c4   : > { %v13288_v30 = vmax.f32 %v1963_v21, %v1965_v4  ;;  %v11106_v21 = vld [vmem:[#allocation8 + $0x70c] sm:$0xf0]  ;;  %v1968_v6 = vmax.f32 %v14132_v24, 0.0 }
 0x2c5   : > { %v13293_v40 = vmax.f32 %v1964_v57, %v1966_v46  ;;  %v14131_v4 = vld [vmem:[#allocation32_spill] sm:$0xff] }
 0x2c6   : > { %v2069_v49 = vmax.f32 %v13272_v22, %v13288_v30  ;;  %v1810_v22 = vadd.f32 %v1809_v29, %v13092_v60  ;;  %4330 = vmatpush.bf16.msrb.mxu2 %v9323_v34  ;;  %4289 = vmatpush.bf16.msrb.mxu0 %v9195_v31  ;;  %v1967_v15 = vmax.f32 %v14131_v4, 0.0  ;;  %v9307_v29 = vor.u32 %v11106_v21, %v9306_v33 }
 0x2c7   : > { %v1740_v61 = vpop.f32.mrf.mxu3  ;;  %v2070_v28 = vmax.f32 %v13279_v62, %v13293_v40  ;;  %4208 = vmatpush.bf16.msrb.mxu1 %v8923_v37  ;;  %4249 = vmatpush.bf16.msrb.mxu3 %v9051_v2  ;;  %v14135_v2 = vld [vmem:[#allocation36_spill] sm:$0xff] }
 0x2c8   : > { %v13295_v35 = vpack.c.bf16 %v2069_v49, %v2067_v32  ;;  %v1741_v48 = vadd.f32 %v1740_v61, %v1672_v39  ;;  %v1878_v41 = vpop.f32.mrf.mxu2  ;;  %v1971_v49 = vmax.f32 %v14133_v45, 0.0 }
 0x2c9   : > { %v1674_v1 = vpop.f32.mrf.mxu1  ;;  %v13304_v32 = vpack.c.bf16 %v2070_v28, %v2068_v36  ;;  %v1879_v50 = vadd.f32 %v1878_v41, %v1810_v22 }
 0x2ca   : > { %v1969_v23 = vmax.f32 %v1741_v48, 0.0  ;;  %v1812_v19 = vpop.f32.mrf.mxu0  ;;  %4290 = vmatpush.bf16.msrb.mxu0 %v9179_v0  ;;  %4331 = vmatpush.bf16.msrb.mxu2 %v9307_v29  ;;  %v1675_v62 = vadd.f32 %v1674_v1, %v13089_v20  ;;  %v1975_v0 = vmax.f32 %v14135_v2, 0.0 }
 0x2cb   : > { %v1970_v57 = vmax.f32 %v1879_v50, 0.0  ;;  %v1813_v42 = vadd.f32 %v1812_v19, %v13092_v60 }
 0x2cc   : > { %v2025_v54 = vmax.f32 %v1967_v15, %v1969_v23  ;;  %4069 = vmatmul.bf16.gmra.mxu1 %v13240_v52  ;;  %4110 = vmatmul.bf16.gmra.mxu3 %v13245_v9  ;;  %v14136_v23 = vld [vmem:[#allocation37_spill] sm:$0xff] }
 0x2cd   : > { %v2026_v36 = vmax.f32 %v1968_v6, %v1970_v57  ;;  %4151 = vmatmul.bf16.gmra.mxu0 %v13265_v43  ;;  %4192 = vmatmul.bf16.gmra.mxu2 %v13269_v14  ;;  %v1976_v50 = vmax.f32 %v14136_v23, 0.0 }
 0x2ce   : > { %v2071_v27 = vmax.f32 %v13288_v30, %v2025_v54 }
 0x2cf   : > { %v1743_v46 = vpop.f32.mrf.mxu3  ;;  %v2072_v8 = vmax.f32 %v13293_v40, %v2026_v36 }
 0x2d0   : > { %v1744_v11 = vadd.f32 %v1743_v46, %v1675_v62  ;;  %v1881_v10 = vpop.f32.mrf.mxu2 }
 0x2d1   : > { %v1676_v31 = vpop.f32.mrf.mxu1  ;;  %v1882_v34 = vadd.f32 %v1881_v10, %v1813_v42  ;;  %v14137_v42 = vld [vmem:[#allocation38_spill] sm:$0xff] }
 0x2d2   : > { %v1973_v39 = vmax.f32 %v1744_v11, 0.0  ;;  %v1814_v30 = vpop.f32.mrf.mxu0  ;;  %v1677_v55 = vadd.f32 %v1676_v31, %v13089_v20  ;;  %v1979_v11 = vmax.f32 %v14137_v42, 0.0 }
 0x2d3   : > { %v1974_v61 = vmax.f32 %v1882_v34, 0.0  ;;  %v1815_v58 = vadd.f32 %v1814_v30, %v13092_v60 }
 0x2d4   : > { %v2027_v3 = vmax.f32 %v1971_v49, %v1973_v39  ;;  %v14138_v49 = vld [vmem:[#allocation39_spill] sm:$0xff] }
 0x2d5   : > { %v2028_v28 = vmax.f32 %v1972_v26, %v1974_v61  ;;  %v1980_v39 = vmax.f32 %v14138_v49, 0.0  ;;  %v2427_v61 = vld [vmem:[#allocation9] sm:$0xf] }
 0x2d6   : > { %v2073_v37 = vmax.f32 %v2025_v54, %v2027_v3 }
 0x2d7   : > { %v1745_v22 = vpop.f32.mrf.mxu3  ;;  %v2074_v48 = vmax.f32 %v2026_v36, %v2028_v28 }
 0x2d8   : > { %v13318_v40 = vpack.c.bf16 %v2073_v37, %v2071_v27  ;;  %v1746_v38 = vadd.f32 %v1745_v22, %v1677_v55  ;;  %v1883_v41 = vpop.f32.mrf.mxu2 }
 0x2d9   : > { %v1679_v1 = vpop.f32.mrf.mxu1  ;;  %v13322_v33 = vpack.c.bf16 %v2074_v48, %v2072_v8  ;;  %v1884_v4 = vadd.f32 %v1883_v41, %v1815_v58  ;;  %v14139_v41 = vld [vmem:[#allocation40_spill] sm:$0xff] }
 0x2da   : > { %v1977_v21 = vmax.f32 %v1746_v38, 0.0  ;;  %v1817_v15 = vpop.f32.mrf.mxu0  ;;  %v1680_v6 = vadd.f32 %v1679_v1, %v13089_v20  ;;  %v13337_v38 = vperm.slane %v2427_v61, 0  ;;  %v1983_v2 = vmax.f32 %v14139_v41, 0.0  ;;  %v10940_v41 = vld [vmem:[#allocation8 + $0x1e4] sm:$0xf] }
 0x2db   : > { %v1978_v29 = vmax.f32 %v1884_v4, 0.0  ;;  %v1818_v62 = vadd.f32 %v1817_v15, %v13092_v60  ;;  %v14140_v15 = vld [vmem:[#allocation41_spill] sm:$0xff] }
 0x2dc   : > { %v2029_v19 = vmax.f32 %v1975_v0, %v1977_v21  ;;  %4073 = vmatmul.bf16.gmra.mxu1 %v13265_v43  ;;  %4114 = vmatmul.bf16.gmra.mxu3 %v13269_v14  ;;  %v1984_v23 = vmax.f32 %v14140_v15, 0.0  ;;  %v10908_v15 = vld [vmem:[#allocation8 + $0xe4] sm:$0xf] }
 0x2dd   : > { %v2030_v54 = vmax.f32 %v1976_v50, %v1978_v29  ;;  %4155 = vmatmul.bf16.gmra.mxu0 %v13295_v35  ;;  %4196 = vmatmul.bf16.gmra.mxu2 %v13304_v32 }
 0x2de   : > { %v2075_v24 = vmax.f32 %v2027_v3, %v2029_v19 }
 0x2df   : > { %v1748_v57 = vpop.f32.mrf.mxu3  ;;  %v2076_v27 = vmax.f32 %v2028_v28, %v2030_v54 }
 0x2e0   : > { %v1749_v36 = vadd.f32 %v1748_v57, %v1680_v6  ;;  %v1886_v8 = vpop.f32.mrf.mxu2 }
 0x2e1   : > { %v1681_v46 = vpop.f32.mrf.mxu1  ;;  %v1887_v10 = vadd.f32 %v1886_v8, %v1818_v62 }
 0x2e2   : > { %v1981_v31 = vmax.f32 %v1749_v36, 0.0  ;;  %v1819_v45 = vpop.f32.mrf.mxu0  ;;  %v1682_v26 = vadd.f32 %v1681_v46, %v13089_v20 }
 0x2e3   : > { %v1982_v30 = vmax.f32 %v1887_v10, 0.0  ;;  %v1820_v22 = vadd.f32 %v1819_v45, %v13092_v60 }
 0x2e4   : > { %v2031_v34 = vmax.f32 %v1979_v11, %v1981_v31 }
 0x2e5   : > { %v2032_v3 = vmax.f32 %v1980_v39, %v1982_v30 }
 0x2e6   : > { %v2077_v59 = vmax.f32 %v2029_v19, %v2031_v34 }
 0x2e7   : > { %v1750_v37 = vpop.f32.mrf.mxu3  ;;  %v2078_v28 = vmax.f32 %v2030_v54, %v2032_v3 }
 0x2e8   : > { %v13334_v55 = vpack.c.bf16 %v2077_v59, %v2075_v24  ;;  %v1751_v48 = vadd.f32 %v1750_v37, %v1682_v26  ;;  %v1888_v58 = vpop.f32.mrf.mxu2  ;;  %v9674_v59 = vld [vmem:[#allocation8 + $0x9e0] sm:$0xf]  ;;  %v11198_v26 = vld [vmem:[#allocation8 + $0x9ec] sm:$0xf0] }
 0x2e9   : > { %v4046_v1 = vpop.f32.mrf.mxu1  ;;  %v13340_v0 = vpack.c.bf16 %v2078_v28, %v2076_v27  ;;  %v1889_v4 = vadd.f32 %v1888_v58, %v1820_v22  ;;  %v9675_v37 = vor.u32 %v11198_v26, %v9674_v59  ;;  %v9546_v58 = vld [vmem:[#allocation8 + $0x8e0] sm:$0xf]  ;;  %v10904_v26 = vld [vmem:[#allocation8 + $0xc4] sm:$0xf] }
 0x2ea   : > { %v1985_v21 = vmax.f32 %v1751_v48, 0.0  ;;  %v4128_v20 = vpop.f32.mrf.mxu0  ;;  %v4047_v60 = vadd.f32 %v4046_v1, %v13337_v38  ;;  %v11166_v1 = vld [vmem:[#allocation8 + $0x8ec] sm:$0xf0] }
 0x2eb   : > { %v1986_v19 = vmax.f32 %v1889_v4, 0.0  ;;  %4406 = vmatpush.bf16.msra.mxu3 %v9675_v37 }
 0x2ec   : > { %v2033_v50 = vmax.f32 %v1983_v2, %v1985_v21  ;;  %4209 = vmatmul.bf16.vlgmr.msrb.gmra.mxu1 %v13163_v63  ;;  %4250 = vmatmul.bf16.vlgmr.msrb.gmra.mxu3 %v13167_v53  ;;  %v9547_v2 = vor.u32 %v11166_v1, %v9546_v58  ;;  %v8652_v21 = vld [vmem:[#allocation8 + $0x1f0] sm:$0xf0] }
 0x2ed   : > { %v2034_v6 = vmax.f32 %v1984_v23, %v1986_v19  ;;  %4291 = vmatmul.bf16.vlgmr.msrb.gmra.mxu0 %v13179_v13  ;;  %4332 = vmatmul.bf16.vlgmr.msrb.gmra.mxu2 %v13183_v18  ;;  %v8655_v4 = vor.u32 %v10940_v41, %v8652_v21  ;;  %v8524_v23 = vld [vmem:[#allocation8 + $0xf0] sm:$0xf0]  ;;  %v11190_v21 = vld [vmem:[#allocation8 + $0x9ac] sm:$0xf0] }
 0x2ee   : > { %v2079_v29 = vmax.f32 %v2031_v34, %v2033_v50  ;;  %v2081_v24 = vmax.f32 %v2033_v50, %v13111_v25  ;;  %4365 = vmatpush.bf16.msra.mxu1 %v9547_v2  ;;  %v8527_v50 = vor.u32 %v10908_v15, %v8524_v23  ;;  %v9642_v2 = vld [vmem:[#allocation8 + $0x9a0] sm:$0xf] }
 0x2ef   : > { %v4087_v54 = vpop.f32.mrf.mxu3  ;;  %v2080_v57 = vmax.f32 %v2032_v3, %v2034_v6  ;;  %v2082_v27 = vmax.f32 %v2034_v6, %v13116_v12  ;;  %4488 = vmatpush.bf16.msra.mxu2 %v8655_v4  ;;  %v9643_v15 = vor.u32 %v11190_v21, %v9642_v2  ;;  %v8604_v2 = vld [vmem:[#allocation8 + $0x190] sm:$0xf0] }
 0x2f0   : > { %v4088_v62 = vadd.f32 %v4087_v54, %v4047_v60  ;;  %v13350_v36 = vpack.c.bf16 %v2081_v24, %v2079_v29  ;;  %v4169_v8 = vpop.f32.mrf.mxu2  ;;  %4447 = vmatpush.bf16.msra.mxu0 %v8527_v50 }
 0x2f1   : > { %v4048_v46 = vpop.f32.mrf.mxu1  ;;  %v13352_v11 = vpack.c.bf16 %v2082_v27, %v2080_v57  ;;  %v9658_v57 = vld [vmem:[#allocation8 + $0x9c0] sm:$0xf]  ;;  %v11194_v27 = vld [vmem:[#allocation8 + $0x9cc] sm:$0xf0] }
 0x2f2   : > { %v4129_v42 = vadd.f32 %v4128_v20, %v4088_v62  ;;  %v4130_v31 = vpop.f32.mrf.mxu0 }
 0x2f4   : > { %v13354_v10 = vadd.f32 %v4169_v8, %v4129_v42  ;;  %v9659_v8 = vor.u32 %v11194_v27, %v9658_v57 }
 0x2f6   : > { %4407 = vmatpush.bf16.msra.mxu3 %v9659_v8 }
 0x2f7   : > { %v4089_v25 = vpop.f32.mrf.mxu3 }
 0x2f8   : > { %v4171_v49 = vpop.f32.mrf.mxu2 }
 0x2f9   : > { %v4050_v45 = vpop.f32.mrf.mxu1  ;;  %v11162_v49 = vld [vmem:[#allocation8 + $0x8cc] sm:$0xf0] }
 0x2fa   : > { %v4132_v39 = vpop.f32.mrf.mxu0  ;;  %v4051_v12 = vadd.f32 %v4050_v45, %v13337_v38  ;;  %v9530_v45 = vld [vmem:[#allocation8 + $0x8c0] sm:$0xf]  ;;  %4408 = vmatpush.bf16.msra.mxu3 %v9643_v15  ;;  %v8476_v15 = vld [vmem:[#allocation8 + $0x90] sm:$0xf0] }
 0x2fc   : > { %4213 = vmatmul.bf16.gmra.mxu1 %v13179_v13  ;;  %4254 = vmatmul.bf16.gmra.mxu3 %v13183_v18 }
 0x2fd   : > { %4295 = vmatmul.bf16.gmra.mxu0 %v13197_v7  ;;  %4336 = vmatmul.bf16.gmra.mxu2 %v13202_v47 }
 0x2ff   : > { %v4091_v34 = vpop.f32.mrf.mxu3 }
 0x300   : > { %v4092_v30 = vadd.f32 %v4091_v34, %v4051_v12  ;;  %v4173_v61 = vpop.f32.mrf.mxu2  ;;  %v9531_v12 = vor.u32 %v11162_v49, %v9530_v45  ;;  %v8636_v34 = vld [vmem:[#allocation8 + $0x1d0] sm:$0xf0] }
 0x301   : > { %v4052_v3 = vpop.f32.mrf.mxu1 }
 0x302   : > { %v4133_v28 = vadd.f32 %v4132_v39, %v4092_v30  ;;  %v4134_v22 = vpop.f32.mrf.mxu0  ;;  %v10936_v39 = vld [vmem:[#allocation8 + $0x1c4] sm:$0xf]  ;;  %4366 = vmatpush.bf16.msra.mxu1 %v9531_v12  ;;  %v8508_v3 = vld [vmem:[#allocation8 + $0xd0] sm:$0xf0] }
 0x303   : > { %v8639_v30 = vor.u32 %v10936_v39, %v8636_v34  ;;  %v9626_v34 = vld [vmem:[#allocation8 + $0x980] sm:$0xf] }
 0x304   : > { %v13361_v48 = vadd.f32 %v4173_v61, %v4133_v28  ;;  %v8511_v61 = vor.u32 %v10904_v26, %v8508_v3 }
 0x305   : > { %4489 = vmatpush.bf16.msra.mxu2 %v8639_v30  ;;  %v11186_v30 = vld [vmem:[#allocation8 + $0x98c] sm:$0xf0] }
 0x306   : > { %4448 = vmatpush.bf16.msra.mxu0 %v8511_v61  ;;  %v9627_v3 = vor.u32 %v11186_v30, %v9626_v34  ;;  %v11146_v34 = vld [vmem:[#allocation8 + $0x84c] sm:$0xf0]  ;;  %v9594_v30 = vld [vmem:[#allocation8 + $0x940] sm:$0xf] }
 0x307   : > { %v4093_v20 = vpop.f32.mrf.mxu3 }
 0x308   : > { %v4175_v60 = vpop.f32.mrf.mxu2  ;;  %4409 = vmatpush.bf16.msra.mxu3 %v9627_v3  ;;  %v11178_v3 = vld [vmem:[#allocation8 + $0x94c] sm:$0xf0] }
 0x309   : > { %v4054_v19 = vpop.f32.mrf.mxu1  ;;  %v9514_v60 = vld [vmem:[#allocation8 + $0x8a0] sm:$0xf] }
 0x30a   : > { %v4136_v29 = vpop.f32.mrf.mxu0  ;;  %v4055_v24 = vadd.f32 %v4054_v19, %v13337_v38 }
 0x30c   : > { %4217 = vmatmul.bf16.gmra.mxu1 %v13197_v7  ;;  %4258 = vmatmul.bf16.gmra.mxu3 %v13202_v47 }
 0x30d   : > { %4299 = vmatmul.bf16.gmra.mxu0 %v13217_v5  ;;  %4340 = vmatmul.bf16.gmra.mxu2 %v13222_v56 }
 0x30f   : > { %v4095_v6 = vpop.f32.mrf.mxu3 }
 0x310   : > { %v4096_v54 = vadd.f32 %v4095_v6, %v4055_v24  ;;  %v4177_v46 = vpop.f32.mrf.mxu2  ;;  %v10932_v24 = vld [vmem:[#allocation8 + $0x1a4] sm:$0xf] }
 0x311   : > { %v4056_v62 = vpop.f32.mrf.mxu1 }
 0x312   : > { %v4137_v42 = vadd.f32 %v4136_v29, %v4096_v54  ;;  %v4138_v31 = vpop.f32.mrf.mxu0  ;;  %v11158_v29 = vld [vmem:[#allocation8 + $0x8ac] sm:$0xf0]  ;;  %v8620_v54 = vld [vmem:[#allocation8 + $0x1b0] sm:$0xf0]  ;;  %v10900_v62 = vld [vmem:[#allocation8 + $0xa4] sm:$0xf] }
 0x313   : > { %v9515_v6 = vor.u32 %v11158_v29, %v9514_v60  ;;  %v8623_v57 = vor.u32 %v10932_v24, %v8620_v54  ;;  %v9482_v29 = vld [vmem:[#allocation8 + $0x860] sm:$0xf]  ;;  %v11150_v24 = vld [vmem:[#allocation8 + $0x86c] sm:$0xf0] }
 0x314   : > { %v13368_v25 = vadd.f32 %v4177_v46, %v4137_v42  ;;  %v8492_v46 = vld [vmem:[#allocation8 + $0xb0] sm:$0xf0] }
 0x315   : > { %4367 = vmatpush.bf16.msra.mxu1 %v9515_v6  ;;  %4490 = vmatpush.bf16.msra.mxu2 %v8623_v57  ;;  %v8495_v8 = vor.u32 %v10900_v62, %v8492_v46  ;;  %v9610_v6 = vld [vmem:[#allocation8 + $0x960] sm:$0xf]  ;;  %v9483_v57 = vor.u32 %v11150_v24, %v9482_v29  ;;  %v10892_v46 = vld [vmem:[#allocation8 + $0x64] sm:$0xf] }
 0x317   : > { %v4097_v59 = vpop.f32.mrf.mxu3  ;;  %4449 = vmatpush.bf16.msra.mxu0 %v8495_v8  ;;  %v8460_v8 = vld [vmem:[#allocation8 + $0x70] sm:$0xf0] }
 0x318   : > { %v4179_v28 = vpop.f32.mrf.mxu2 }
 0x319   : > { %v4058_v37 = vpop.f32.mrf.mxu1 }
 0x31a   : > { %v4140_v22 = vpop.f32.mrf.mxu0  ;;  %v4059_v58 = vadd.f32 %v4058_v37, %v13337_v38 }
 0x31c   : > { %4221 = vmatmul.bf16.gmra.mxu1 %v13217_v5  ;;  %4262 = vmatmul.bf16.gmra.mxu3 %v13222_v56 }
 0x31d   : > { %4303 = vmatmul.bf16.gmra.mxu0 %v13240_v52  ;;  %4344 = vmatmul.bf16.gmra.mxu2 %v13245_v9 }
 0x31f   : > { %v4099_v1 = vpop.f32.mrf.mxu3 }
 0x320   : > { %v4100_v41 = vadd.f32 %v4099_v1, %v4059_v58  ;;  %v4181_v20 = vpop.f32.mrf.mxu2  ;;  %v11154_v58 = vld [vmem:[#allocation8 + $0x88c] sm:$0xf0]  ;;  %v10928_v1 = vld [vmem:[#allocation8 + $0x184] sm:$0xf] }
 0x321   : > { %v4060_v4 = vpop.f32.mrf.mxu1  ;;  %v8607_v21 = vor.u32 %v10928_v1, %v8604_v2  ;;  %v10920_v1 = vld [vmem:[#allocation8 + $0x144] sm:$0xf] }
 0x322   : > { %v4141_v23 = vadd.f32 %v4140_v22, %v4100_v41  ;;  %v4142_v50 = vpop.f32.mrf.mxu0  ;;  %v9498_v22 = vld [vmem:[#allocation8 + $0x880] sm:$0xf] }
 0x323   : > { %v9499_v41 = vor.u32 %v11154_v58, %v9498_v22  ;;  %4491 = vmatpush.bf16.msra.mxu2 %v8607_v21  ;;  %v10888_v22 = vld [vmem:[#allocation8 + $0x44] sm:$0xf]  ;;  %v8444_v58 = vld [vmem:[#allocation8 + $0x50] sm:$0xf0] }
 0x324   : > { %v13375_v19 = vadd.f32 %v4181_v20, %v4141_v23  ;;  %v10896_v20 = vld [vmem:[#allocation8 + $0x84] sm:$0xf]  ;;  %v8447_v21 = vor.u32 %v10888_v22, %v8444_v58 }
 0x325   : > { %4368 = vmatpush.bf16.msra.mxu1 %v9499_v41  ;;  %v8479_v23 = vor.u32 %v10896_v20, %v8476_v15 }
 0x327   : > { %v4101_v27 = vpop.f32.mrf.mxu3  ;;  %4450 = vmatpush.bf16.msra.mxu0 %v8479_v23  ;;  %v9450_v23 = vld [vmem:[#allocation8 + $0x820] sm:$0xf] }
 0x328   : > { %v4183_v31 = vpop.f32.mrf.mxu2  ;;  %v11182_v27 = vld [vmem:[#allocation8 + $0x96c] sm:$0xf0] }
 0x329   : > { %v4062_v42 = vpop.f32.mrf.mxu1  ;;  %v9611_v62 = vor.u32 %v11182_v27, %v9610_v6  ;;  %4369 = vmatpush.bf16.msra.mxu1 %v9483_v57  ;;  %v8463_v31 = vor.u32 %v10892_v46, %v8460_v8  ;;  %v11174_v6 = vld [vmem:[#allocation8 + $0x92c] sm:$0xf0]  ;;  %v8428_v46 = vld [vmem:[#allocation8 + $0x30] sm:$0xf0]  ;;  %v10916_v8 = vld [vmem:[#allocation8 + $0x124] sm:$0xf] }
 0x32a   : > { %v4144_v45 = vpop.f32.mrf.mxu0  ;;  %v4063_v49 = vadd.f32 %v4062_v42, %v13337_v38  ;;  %v10924_v42 = vld [vmem:[#allocation8 + $0x164] sm:$0xf] }
 0x32b   : > { %4410 = vmatpush.bf16.msra.mxu3 %v9611_v62  ;;  %4451 = vmatpush.bf16.msra.mxu0 %v8463_v31  ;;  %v10884_v62 = vld [vmem:[#allocation8 + $0x24] sm:$0xf]  ;;  %v8556_v31 = vld [vmem:[#allocation8 + $0x130] sm:$0xf0] }
 0x32c   : > { %4225 = vmatmul.bf16.gmra.mxu1 %v13240_v52  ;;  %4266 = vmatmul.bf16.gmra.mxu3 %v13245_v9 }
 0x32d   : > { %4307 = vmatmul.bf16.gmra.mxu0 %v13265_v43  ;;  %4348 = vmatmul.bf16.gmra.mxu2 %v13269_v14 }
 0x32f   : > { %v4103_v39 = vpop.f32.mrf.mxu3  ;;  %4452 = vmatpush.bf16.msra.mxu0 %v8447_v21 }
 0x330   : > { %v4104_v12 = vadd.f32 %v4103_v39, %v4063_v49  ;;  %v4185_v26 = vpop.f32.mrf.mxu2 }
 0x331   : > { %v4064_v59 = vpop.f32.mrf.mxu1 }
 0x332   : > { %v4145_v61 = vadd.f32 %v4144_v45, %v4104_v12  ;;  %v4146_v37 = vpop.f32.mrf.mxu0  ;;  %v8588_v45 = vld [vmem:[#allocation8 + $0x170] sm:$0xf0]  ;;  %v9466_v12 = vld [vmem:[#allocation8 + $0x840] sm:$0xf] }
 0x333   : > { %v8591_v39 = vor.u32 %v10924_v42, %v8588_v45  ;;  %v9595_v37 = vor.u32 %v11178_v3, %v9594_v30  ;;  %v8431_v42 = vor.u32 %v10884_v62, %v8428_v46  ;;  %v9434_v45 = vld [vmem:[#allocation8 + $0x800] sm:$0xf]  ;;  %v11170_v30 = vld [vmem:[#allocation8 + $0x90c] sm:$0xf0]  ;;  %v8412_v3 = vld [vmem:[#allocation8 + $0x10] sm:$0xf0] }
 0x334   : > { %v13382_v28 = vadd.f32 %v4185_v26, %v4145_v61  ;;  %v9467_v26 = vor.u32 %v11146_v34, %v9466_v12 }
 0x335   : > { %4492 = vmatpush.bf16.msra.mxu2 %v8591_v39  ;;  %4411 = vmatpush.bf16.msra.mxu3 %v9595_v37  ;;  %v9562_v39 = vld [vmem:[#allocation8 + $0x900] sm:$0xf] }
 0x336   : > { %4370 = vmatpush.bf16.msra.mxu1 %v9467_v26  ;;  %4453 = vmatpush.bf16.msra.mxu0 %v8431_v42  ;;  %v10880_v26 = vld [vmem:[#allocation8 + $0x4] sm:$0xf] }
 0x337   : > { %v4105_v4 = vpop.f32.mrf.mxu3  ;;  %v8415_v58 = vor.u32 %v10880_v26, %v8412_v3 }
 0x338   : > { %v4187_v60 = vpop.f32.mrf.mxu2  ;;  %v8572_v4 = vld [vmem:[#allocation8 + $0x150] sm:$0xf0] }
 0x339   : > { %v4066_v50 = vpop.f32.mrf.mxu1  ;;  %v8575_v15 = vor.u32 %v10920_v1, %v8572_v4  ;;  %v9578_v60 = vld [vmem:[#allocation8 + $0x920] sm:$0xf]  ;;  %v8540_v1 = vld [vmem:[#allocation8 + $0x110] sm:$0xf0] }
 0x33a   : > { %v4148_v54 = vpop.f32.mrf.mxu0  ;;  %v4067_v49 = vadd.f32 %v4066_v50, %v13337_v38  ;;  %v11142_v50 = vld [vmem:[#allocation8 + $0x82c] sm:$0xf0]  ;;  %v9579_v27 = vor.u32 %v11174_v6, %v9578_v60  ;;  %4454 = vmatpush.bf16.msra.mxu0 %v8415_v58 }
 0x33b   : > { %v9451_v24 = vor.u32 %v11142_v50, %v9450_v23  ;;  %4493 = vmatpush.bf16.msra.mxu2 %v8575_v15 }
 0x33c   : > { %4229 = vmatmul.bf16.gmra.mxu1 %v13265_v43  ;;  %4270 = vmatmul.bf16.gmra.mxu3 %v13269_v14 }
 0x33d   : > { %4311 = vmatmul.bf16.gmra.mxu0 %v13295_v35  ;;  %4352 = vmatmul.bf16.gmra.mxu2 %v13304_v32 }
 0x33e   : > { %4371 = vmatpush.bf16.msra.mxu1 %v9451_v24  ;;  %4412 = vmatpush.bf16.msra.mxu3 %v9579_v27 }
 0x33f   : > { %v4107_v59 = vpop.f32.mrf.mxu3 }
 0x340   : > { %v4108_v61 = vadd.f32 %v4107_v59, %v4067_v49  ;;  %v4189_v2 = vpop.f32.mrf.mxu2  ;;  %v11138_v49 = vld [vmem:[#allocation8 + $0x80c] sm:$0xf0]  ;;  %v9563_v59 = vor.u32 %v11170_v30, %v9562_v39 }
 0x341   : > { %v4068_v41 = vpop.f32.mrf.mxu1  ;;  %v9435_v34 = vor.u32 %v11138_v49, %v9434_v45 }
 0x342   : > { %v4149_v20 = vadd.f32 %v4148_v54, %v4108_v61  ;;  %v4150_v29 = vpop.f32.mrf.mxu0  ;;  %v8559_v54 = vor.u32 %v10916_v8, %v8556_v31  ;;  %v10912_v61 = vld [vmem:[#allocation8 + $0x104] sm:$0xf]  ;;  %4413 = vmatpush.bf16.msra.mxu3 %v9563_v59 }
 0x343   : > { %4372 = vmatpush.bf16.msra.mxu1 %v9435_v34  ;;  %v8543_v41 = vor.u32 %v10912_v61, %v8540_v1 }
 0x344   : > { %v13389_v57 = vadd.f32 %v4189_v2, %v4149_v20  ;;  %4494 = vmatpush.bf16.msra.mxu2 %v8559_v54 }
 0x347   : > { %v4109_v12 = vpop.f32.mrf.mxu3 }
 0x348   : > { %v4191_v22 = vpop.f32.mrf.mxu2  ;;  %4495 = vmatpush.bf16.msra.mxu2 %v8543_v41 }
 0x349   : > { %v4070_v37 = vpop.f32.mrf.mxu1 }
 0x34a   : > { %v4152_v2 = vpop.f32.mrf.mxu0  ;;  %v4071_v21 = vadd.f32 %v4070_v37, %v13337_v38 }
 0x34c   : > { %4233 = vmatmul.bf16.gmra.mxu1 %v13295_v35  ;;  %4274 = vmatmul.bf16.gmra.mxu3 %v13304_v32 }
 0x34d   : > { %4315 = vmatmul.bf16.gmra.mxu0 %v13318_v40  ;;  %4356 = vmatmul.bf16.gmra.mxu2 %v13322_v33 }
 0x34f   : > { %v4111_v4 = vpop.f32.mrf.mxu3 }
 0x350   : > { %v4112_v20 = vadd.f32 %v4111_v4, %v4071_v21  ;;  %v4193_v23 = vpop.f32.mrf.mxu2 }
 0x351   : > { %v4072_v15 = vpop.f32.mrf.mxu1 }
 0x352   : > { %v4153_v50 = vadd.f32 %v4152_v2, %v4112_v20  ;;  %v4154_v60 = vpop.f32.mrf.mxu0 }
 0x354   : > { %v13396_v29 = vadd.f32 %v4193_v23, %v4153_v50  ;;  %v11004_v23 = vld [vmem:[#allocation8 + $0x3e4] sm:$0xf]  ;;  %v8908_v50 = vld [vmem:[#allocation8 + $0x3f0] sm:$0xf0] }
 0x357   : > { %v4113_v24 = vpop.f32.mrf.mxu3 }
 0x358   : > { %v4195_v27 = vpop.f32.mrf.mxu2 }
 0x359   : > { %v4074_v6 = vpop.f32.mrf.mxu1 }
 0x35a   : > { %v4156_v62 = vpop.f32.mrf.mxu0  ;;  %v4075_v46 = vadd.f32 %v4074_v6, %v13337_v38  ;;  %v8911_v6 = vor.u32 %v11004_v23, %v8908_v50  ;;  %v11064_v23 = vld [vmem:[#allocation8 + $0x5c4] sm:$0xf] }
 0x35c   : > { %4237 = vmatmul.bf16.gmra.mxu1 %v13318_v40  ;;  %4278 = vmatmul.bf16.gmra.mxu3 %v13322_v33 }
 0x35d   : > { %4319 = vmatmul.bf16.gmra.mxu0 %v13334_v55  ;;  %4360 = vmatmul.bf16.gmra.mxu2 %v13340_v0 }
 0x35e   : > { %4570 = vmatpush.bf16.msrb.mxu3 %v8911_v6 }
 0x35f   : > { %v4115_v8 = vpop.f32.mrf.mxu3 }
 0x360   : > { %v4116_v42 = vadd.f32 %v4115_v8, %v4075_v46  ;;  %v4197_v54 = vpop.f32.mrf.mxu2  ;;  %v10972_v46 = vld [vmem:[#allocation8 + $0x2e4] sm:$0xf]  ;;  %v8780_v8 = vld [vmem:[#allocation8 + $0x2f0] sm:$0xf0] }
 0x361   : > { %v4076_v31 = vpop.f32.mrf.mxu1 }
 0x362   : > { %v4157_v45 = vadd.f32 %v4156_v62, %v4116_v42  ;;  %v4158_v49 = vpop.f32.mrf.mxu0  ;;  %v11068_v42 = vld [vmem:[#allocation8 + $0x5e4] sm:$0xf]  ;;  %v8783_v31 = vor.u32 %v10972_v46, %v8780_v8 }
 0x364   : > { %v13403_v39 = vadd.f32 %v4197_v54, %v4157_v45  ;;  %v9164_v54 = vld [vmem:[#allocation8 + $0x5f0] sm:$0xf0]  ;;  %4529 = vmatpush.bf16.msrb.mxu1 %v8783_v31 }
 0x365   : > { %v9167_v45 = vor.u32 %v11068_v42, %v9164_v54 }
 0x367   : > { %v4117_v12 = vpop.f32.mrf.mxu3  ;;  %4652 = vmatpush.bf16.msrb.mxu2 %v9167_v45 }
 0x368   : > { %v4199_v34 = vpop.f32.mrf.mxu2  ;;  %v11036_v12 = vld [vmem:[#allocation8 + $0x4e4] sm:$0xf] }
 0x369   : > { %v4210_v30 = vpop.f32.mrf.mxu1  ;;  %v9036_v34 = vld [vmem:[#allocation8 + $0x4f0] sm:$0xf0] }
 0x36a   : > { %v4211_v59 = vadd.f32 %v4210_v30, %v13354_v10  ;;  %v4292_v26 = vpop.f32.mrf.mxu0  ;;  %v9039_v30 = vor.u32 %v11036_v12, %v9036_v34  ;;  %v10996_v12 = vld [vmem:[#allocation8 + $0x3a4] sm:$0xf]  ;;  %v8876_v34 = vld [vmem:[#allocation8 + $0x3b0] sm:$0xf0] }
 0x36c   : > { %4373 = vmatmul.bf16.vlgmr.msra.gmra.mxu1 %v13197_v7  ;;  %4414 = vmatmul.bf16.vlgmr.msra.gmra.mxu3 %v13202_v47 }
 0x36d   : > { %4455 = vmatmul.bf16.vlgmr.msra.gmra.mxu0 %v13125_v17  ;;  %4496 = vmatmul.bf16.vlgmr.msra.gmra.mxu2 %v13129_v16 }
 0x36e   : > { %4611 = vmatpush.bf16.msrb.mxu0 %v9039_v30 }
 0x36f   : > { %v4251_v38 = vpop.f32.mrf.mxu3 }
 0x370   : > { %v4252_v3 = vadd.f32 %v4251_v38, %v4211_v59  ;;  %v4333_v37 = vpop.f32.mrf.mxu2 }
 0x371   : > { %v4212_v61 = vpop.f32.mrf.mxu1 }
 0x372   : > { %v4293_v22 = vadd.f32 %v4292_v26, %v4252_v3  ;;  %v4294_v58 = vpop.f32.mrf.mxu0 }
 0x373   : > { %v8892_v58 = vld [vmem:[#allocation8 + $0x3d0] sm:$0xf0] }
 0x374   : > { %v13410_v1 = vadd.f32 %v4333_v37, %v4293_v22  ;;  %v11000_v22 = vld [vmem:[#allocation8 + $0x3c4] sm:$0xf] }
 0x377   : > { %v4253_v41 = vpop.f32.mrf.mxu3 }
 0x378   : > { %v4335_v10 = vpop.f32.mrf.mxu2 }
 0x379   : > { %v4214_v2 = vpop.f32.mrf.mxu1  ;;  %v8895_v10 = vor.u32 %v11000_v22, %v8892_v58  ;;  %v11060_v22 = vld [vmem:[#allocation8 + $0x5a4] sm:$0xf] }
 0x37a   : > { %v4215_v21 = vadd.f32 %v4214_v2, %v13361_v48  ;;  %v4296_v4 = vpop.f32.mrf.mxu0 }
 0x37b   : > { %4571 = vmatpush.bf16.msrb.mxu3 %v8895_v10 }
 0x37c   : > { %4377 = vmatmul.bf16.gmra.mxu1 %v13217_v5  ;;  %4418 = vmatmul.bf16.gmra.mxu3 %v13222_v56 }
 0x37d   : > { %4459 = vmatmul.bf16.gmra.mxu0 %v13145_v51  ;;  %4500 = vmatmul.bf16.gmra.mxu2 %v13149_v44 }
 0x37f   : > { %v4255_v20 = vpop.f32.mrf.mxu3 }
 0x380   : > { %v4256_v15 = vadd.f32 %v4255_v20, %v4215_v21  ;;  %v4337_v24 = vpop.f32.mrf.mxu2  ;;  %v10968_v20 = vld [vmem:[#allocation8 + $0x2c4] sm:$0xf] }
 0x381   : > { %v4216_v60 = vpop.f32.mrf.mxu1 }
 0x382   : > { %v4297_v27 = vadd.f32 %v4296_v4, %v4256_v15  ;;  %v4298_v62 = vpop.f32.mrf.mxu0  ;;  %v8764_v15 = vld [vmem:[#allocation8 + $0x2d0] sm:$0xf0] }
 0x383   : > { %v8767_v50 = vor.u32 %v10968_v20, %v8764_v15  ;;  %v9148_v60 = vld [vmem:[#allocation8 + $0x5d0] sm:$0xf0] }
 0x384   : > { %v13417_v48 = vadd.f32 %v4337_v24, %v4297_v27  ;;  %v9151_v24 = vor.u32 %v11064_v23, %v9148_v60  ;;  %v11032_v27 = vld [vmem:[#allocation8 + $0x4c4] sm:$0xf]  ;;  %v9020_v62 = vld [vmem:[#allocation8 + $0x4d0] sm:$0xf0] }
 0x385   : > { %4530 = vmatpush.bf16.msrb.mxu1 %v8767_v50  ;;  %v9023_v46 = vor.u32 %v11032_v27, %v9020_v62  ;;  %v10992_v27 = vld [vmem:[#allocation8 + $0x384] sm:$0xf]  ;;  %v8860_v62 = vld [vmem:[#allocation8 + $0x390] sm:$0xf0] }
 0x386   : > { %4653 = vmatpush.bf16.msrb.mxu2 %v9151_v24 }
 0x387   : > { %v4257_v49 = vpop.f32.mrf.mxu3  ;;  %4612 = vmatpush.bf16.msrb.mxu0 %v9023_v46 }
 0x388   : > { %v4339_v26 = vpop.f32.mrf.mxu2 }
 0x389   : > { %v4218_v59 = vpop.f32.mrf.mxu1  ;;  %v8879_v26 = vor.u32 %v10996_v12, %v8876_v34  ;;  %v11056_v12 = vld [vmem:[#allocation8 + $0x584] sm:$0xf] }
 0x38a   : > { %v4219_v38 = vadd.f32 %v4218_v59, %v13368_v25  ;;  %v4300_v3 = vpop.f32.mrf.mxu0 }
 0x38b   : > { %4572 = vmatpush.bf16.msrb.mxu3 %v8879_v26 }
 0x38c   : > { %4381 = vmatmul.bf16.gmra.mxu1 %v13240_v52  ;;  %4422 = vmatmul.bf16.gmra.mxu3 %v13245_v9 }
 0x38d   : > { %4463 = vmatmul.bf16.gmra.mxu0 %v13163_v63  ;;  %4504 = vmatmul.bf16.gmra.mxu2 %v13167_v53 }
 0x38f   : > { %v4259_v61 = vpop.f32.mrf.mxu3 }
 0x390   : > { %v4260_v37 = vadd.f32 %v4259_v61, %v4219_v38  ;;  %v4341_v2 = vpop.f32.mrf.mxu2  ;;  %v10964_v61 = vld [vmem:[#allocation8 + $0x2a4] sm:$0xf] }
 0x391   : > { %v4220_v41 = vpop.f32.mrf.mxu1 }
 0x392   : > { %v4301_v21 = vadd.f32 %v4300_v3, %v4260_v37  ;;  %v4302_v4 = vpop.f32.mrf.mxu0  ;;  %v8748_v37 = vld [vmem:[#allocation8 + $0x2b0] sm:$0xf0] }
 0x393   : > { %v8751_v58 = vor.u32 %v10964_v61, %v8748_v37  ;;  %v9132_v41 = vld [vmem:[#allocation8 + $0x5b0] sm:$0xf0] }
 0x394   : > { %v13424_v25 = vadd.f32 %v4341_v2, %v4301_v21  ;;  %v9135_v2 = vor.u32 %v11060_v22, %v9132_v41  ;;  %v11028_v21 = vld [vmem:[#allocation8 + $0x4a4] sm:$0xf]  ;;  %v9004_v4 = vld [vmem:[#allocation8 + $0x4b0] sm:$0xf0] }
 0x395   : > { %4531 = vmatpush.bf16.msrb.mxu1 %v8751_v58  ;;  %v9007_v20 = vor.u32 %v11028_v21, %v9004_v4  ;;  %v10956_v41 = vld [vmem:[#allocation8 + $0x264] sm:$0xf] }
 0x396   : > { %4654 = vmatpush.bf16.msrb.mxu2 %v9135_v2  ;;  %v8716_v2 = vld [vmem:[#allocation8 + $0x270] sm:$0xf0] }
 0x397   : > { %v4261_v6 = vpop.f32.mrf.mxu3  ;;  %4613 = vmatpush.bf16.msrb.mxu0 %v9007_v20  ;;  %v8719_v4 = vor.u32 %v10956_v41, %v8716_v2  ;;  %v8844_v20 = vld [vmem:[#allocation8 + $0x370] sm:$0xf0]  ;;  %v10980_v41 = vld [vmem:[#allocation8 + $0x324] sm:$0xf] }
 0x398   : > { %v4343_v42 = vpop.f32.mrf.mxu2 }
 0x399   : > { %v4222_v8 = vpop.f32.mrf.mxu1  ;;  %v8863_v42 = vor.u32 %v10992_v27, %v8860_v62  ;;  %v10952_v27 = vld [vmem:[#allocation8 + $0x244] sm:$0xf]  ;;  %v8700_v62 = vld [vmem:[#allocation8 + $0x250] sm:$0xf0] }
 0x39a   : > { %v4223_v31 = vadd.f32 %v4222_v8, %v13375_v19  ;;  %v4304_v54 = vpop.f32.mrf.mxu0 }
 0x39b   : > { %4573 = vmatpush.bf16.msrb.mxu3 %v8863_v42  ;;  %v8703_v42 = vor.u32 %v10952_v27, %v8700_v62  ;;  %v10976_v27 = vld [vmem:[#allocation8 + $0x304] sm:$0xf] }
 0x39c   : > { %4385 = vmatmul.bf16.gmra.mxu1 %v13265_v43  ;;  %4426 = vmatmul.bf16.gmra.mxu3 %v13269_v14 }
 0x39d   : > { %4467 = vmatmul.bf16.gmra.mxu0 %v13179_v13  ;;  %4508 = vmatmul.bf16.gmra.mxu2 %v13183_v18 }
 0x39f   : > { %v4263_v45 = vpop.f32.mrf.mxu3 }
 0x3a0   : > { %v4264_v49 = vadd.f32 %v4263_v45, %v4223_v31  ;;  %v4345_v59 = vpop.f32.mrf.mxu2  ;;  %v10960_v45 = vld [vmem:[#allocation8 + $0x284] sm:$0xf] }
 0x3a1   : > { %v4224_v30 = vpop.f32.mrf.mxu1 }
 0x3a2   : > { %v4305_v38 = vadd.f32 %v4304_v54, %v4264_v49  ;;  %v4306_v3 = vpop.f32.mrf.mxu0  ;;  %v8732_v49 = vld [vmem:[#allocation8 + $0x290] sm:$0xf0] }
 0x3a3   : > { %v8735_v34 = vor.u32 %v10960_v45, %v8732_v49  ;;  %v9116_v30 = vld [vmem:[#allocation8 + $0x590] sm:$0xf0]  ;;  %v11016_v49 = vld [vmem:[#allocation8 + $0x444] sm:$0xf] }
 0x3a4   : > { %v13431_v19 = vadd.f32 %v4345_v59, %v4305_v38  ;;  %v9119_v59 = vor.u32 %v11056_v12, %v9116_v30  ;;  %v11024_v38 = vld [vmem:[#allocation8 + $0x484] sm:$0xf]  ;;  %v8988_v3 = vld [vmem:[#allocation8 + $0x490] sm:$0xf0] }
 0x3a5   : > { %4532 = vmatpush.bf16.msrb.mxu1 %v8735_v34  ;;  %v8991_v61 = vor.u32 %v11024_v38, %v8988_v3  ;;  %v8956_v12 = vld [vmem:[#allocation8 + $0x450] sm:$0xf0]  ;;  %v11048_v34 = vld [vmem:[#allocation8 + $0x544] sm:$0xf] }
 0x3a6   : > { %4655 = vmatpush.bf16.msrb.mxu2 %v9119_v59  ;;  %v9084_v38 = vld [vmem:[#allocation8 + $0x550] sm:$0xf0] }
 0x3a7   : > { %v4265_v10 = vpop.f32.mrf.mxu3  ;;  %4614 = vmatpush.bf16.msrb.mxu0 %v8991_v61  ;;  %v9087_v61 = vor.u32 %v11048_v34, %v9084_v38 }
 0x3a8   : > { %v4347_v23 = vpop.f32.mrf.mxu2  ;;  %v10988_v10 = vld [vmem:[#allocation8 + $0x364] sm:$0xf] }
 0x3a9   : > { %v4226_v15 = vpop.f32.mrf.mxu1  ;;  %v11020_v23 = vld [vmem:[#allocation8 + $0x464] sm:$0xf]  ;;  %4533 = vmatpush.bf16.msrb.mxu1 %v8719_v4 }
 0x3aa   : > { %v4227_v50 = vadd.f32 %v4226_v15, %v13382_v28  ;;  %v4308_v60 = vpop.f32.mrf.mxu0  ;;  %v8847_v15 = vor.u32 %v10988_v10, %v8844_v20 }
 0x3ac   : > { %4389 = vmatmul.bf16.gmra.mxu1 %v13295_v35  ;;  %4430 = vmatmul.bf16.gmra.mxu3 %v13304_v32 }
 0x3ad   : > { %4471 = vmatmul.bf16.gmra.mxu0 %v13197_v7  ;;  %4512 = vmatmul.bf16.gmra.mxu2 %v13202_v47 }
 0x3ae   : > { %4574 = vmatpush.bf16.msrb.mxu3 %v8847_v15  ;;  %4534 = vmatpush.bf16.msrb.mxu1 %v8703_v42  ;;  %v11012_v15 = vld [vmem:[#allocation8 + $0x424] sm:$0xf] }
 0x3af   : > { %v4267_v24 = vpop.f32.mrf.mxu3 }
 0x3b0   : > { %v4268_v6 = vadd.f32 %v4267_v24, %v4227_v50  ;;  %v4349_v8 = vpop.f32.mrf.mxu2  ;;  %v8972_v50 = vld [vmem:[#allocation8 + $0x470] sm:$0xf0] }
 0x3b1   : > { %v4228_v46 = vpop.f32.mrf.mxu1  ;;  %v8975_v24 = vor.u32 %v11020_v23, %v8972_v50  ;;  %v8940_v23 = vld [vmem:[#allocation8 + $0x430] sm:$0xf0]  ;;  %v11044_v50 = vld [vmem:[#allocation8 + $0x524] sm:$0xf] }
 0x3b2   : > { %v4309_v31 = vadd.f32 %v4308_v60, %v4268_v6  ;;  %v4310_v54 = vpop.f32.mrf.mxu0  ;;  %v11052_v60 = vld [vmem:[#allocation8 + $0x564] sm:$0xf]  ;;  %v9100_v6 = vld [vmem:[#allocation8 + $0x570] sm:$0xf0] }
 0x3b3   : > { %v10984_v46 = vld [vmem:[#allocation8 + $0x344] sm:$0xf]  ;;  %4615 = vmatpush.bf16.msrb.mxu0 %v8975_v24  ;;  %v9068_v24 = vld [vmem:[#allocation8 + $0x530] sm:$0xf0] }
 0x3b4   : > { %v13438_v28 = vadd.f32 %v4349_v8, %v4309_v31  ;;  %v8828_v31 = vld [vmem:[#allocation8 + $0x350] sm:$0xf0] }
 0x3b5   : > { %v8831_v45 = vor.u32 %v10984_v46, %v8828_v31  ;;  %v11008_v31 = vld [vmem:[#allocation8 + $0x404] sm:$0xf] }
 0x3b7   : > { %v4269_v26 = vpop.f32.mrf.mxu3  ;;  %4575 = vmatpush.bf16.msrb.mxu3 %v8831_v45  ;;  %v11040_v45 = vld [vmem:[#allocation8 + $0x504] sm:$0xf] }
 0x3b8   : > { %v4351_v22 = vpop.f32.mrf.mxu2  ;;  %v8959_v26 = vor.u32 %v11016_v49, %v8956_v12 }
 0x3b9   : > { %v4230_v37 = vpop.f32.mrf.mxu1  ;;  %v8684_v22 = vld [vmem:[#allocation8 + $0x230] sm:$0xf0] }
 0x3ba   : > { %v4231_v58 = vadd.f32 %v4230_v37, %v13389_v57  ;;  %v4312_v21 = vpop.f32.mrf.mxu0  ;;  %v9103_v57 = vor.u32 %v11052_v60, %v9100_v6  ;;  %v10948_v37 = vld [vmem:[#allocation8 + $0x224] sm:$0xf]  ;;  %4616 = vmatpush.bf16.msrb.mxu0 %v8959_v26  ;;  %v8943_v60 = vor.u32 %v11012_v15, %v8940_v23 }
 0x3bb   : > { %v8687_v10 = vor.u32 %v10948_v37, %v8684_v22  ;;  %v10944_v6 = vld [vmem:[#allocation8 + $0x204] sm:$0xf] }
 0x3bc   : > { %4393 = vmatmul.bf16.gmra.mxu1 %v13318_v40  ;;  %4434 = vmatmul.bf16.gmra.mxu3 %v13322_v33 }
 0x3bd   : > { %4475 = vmatmul.bf16.gmra.mxu0 %v13217_v5  ;;  %4516 = vmatmul.bf16.gmra.mxu2 %v13222_v56 }
 0x3be   : > { %4656 = vmatpush.bf16.msrb.mxu2 %v9103_v57  ;;  %4535 = vmatpush.bf16.msrb.mxu1 %v8687_v10  ;;  %v8668_v57 = vld [vmem:[#allocation8 + $0x210] sm:$0xf0] }
 0x3bf   : > { %v4271_v8 = vpop.f32.mrf.mxu3  ;;  %4617 = vmatpush.bf16.msrb.mxu0 %v8943_v60  ;;  %v8671_v46 = vor.u32 %v10944_v6, %v8668_v57 }
 0x3c0   : > { %v4272_v54 = vadd.f32 %v4271_v8, %v4231_v58  ;;  %v4353_v59 = vpop.f32.mrf.mxu2  ;;  %v8812_v58 = vld [vmem:[#allocation8 + $0x330] sm:$0xf0] }
 0x3c1   : > { %v4232_v30 = vpop.f32.mrf.mxu1  ;;  %v8815_v20 = vor.u32 %v10980_v41, %v8812_v58  ;;  %v8796_v8 = vld [vmem:[#allocation8 + $0x310] sm:$0xf0] }
 0x3c2   : > { %v4313_v3 = vadd.f32 %v4312_v21, %v4272_v54  ;;  %v4314_v2 = vpop.f32.mrf.mxu0  ;;  %4657 = vmatpush.bf16.msrb.mxu2 %v9087_v61  ;;  %v9071_v21 = vor.u32 %v11044_v50, %v9068_v24  ;;  %v8799_v42 = vor.u32 %v10976_v27, %v8796_v8  ;;  %v8924_v54 = vld [vmem:[#allocation8 + $0x410] sm:$0xf0]  ;;  %4536 = vmatpush.bf16.msrb.mxu1 %v8671_v46 }
 0x3c3   : > { %4576 = vmatpush.bf16.msrb.mxu3 %v8815_v20  ;;  %v8927_v34 = vor.u32 %v11008_v31, %v8924_v54  ;;  %v9052_v30 = vld [vmem:[#allocation8 + $0x510] sm:$0xf0]  ;;  %v11863_v31 = vld [vmem:[#allocation9] sm:$0xf] }
 0x3c4   : > { %v13445_v4 = vadd.f32 %v4353_v59, %v4313_v3  ;;  %v9055_v26 = vor.u32 %v11040_v45, %v9052_v30  ;;  %v13462_v54 = vperm.slane %v11863_v31, 1 }
 0x3c5   : > { %4618 = vmatpush.bf16.msrb.mxu0 %v8927_v34 }
 0x3c6   : > { %4658 = vmatpush.bf16.msrb.mxu2 %v9071_v21 }
 0x3c7   : > { %v4273_v62 = vpop.f32.mrf.mxu3  ;;  %4577 = vmatpush.bf16.msrb.mxu3 %v8799_v42 }
 0x3c8   : > { %v4355_v12 = vpop.f32.mrf.mxu2 }
 0x3c9   : > { %v4234_v49 = vpop.f32.mrf.mxu1 }
 0x3ca   : > { %v4235_v59 = vadd.f32 %v4234_v49, %v13396_v29  ;;  %v4316_v38 = vpop.f32.mrf.mxu0  ;;  %4659 = vmatpush.bf16.msrb.mxu2 %v9055_v26 }
 0x3cc   : > { %4397 = vmatmul.bf16.gmra.mxu1 %v13334_v55  ;;  %4438 = vmatmul.bf16.gmra.mxu3 %v13340_v0 }
 0x3cd   : > { %4479 = vmatmul.bf16.gmra.mxu0 %v13240_v52  ;;  %4520 = vmatmul.bf16.gmra.mxu2 %v13245_v9 }
 0x3cf   : > { %v4275_v3 = vpop.f32.mrf.mxu3 }
 0x3d0   : > { %v4276_v61 = vadd.f32 %v4275_v3, %v4235_v59  ;;  %v4357_v22 = vpop.f32.mrf.mxu2 }
 0x3d1   : > { %v4236_v37 = vpop.f32.mrf.mxu1 }
 0x3d2   : > { %v4317_v41 = vadd.f32 %v4316_v38, %v4276_v61  ;;  %v4318_v2 = vpop.f32.mrf.mxu0 }
 0x3d4   : > { %v13452_v29 = vadd.f32 %v4357_v22, %v4317_v41 }
 0x3d7   : > { %v4277_v10 = vpop.f32.mrf.mxu3 }
 0x3d8   : > { %v4359_v20 = vpop.f32.mrf.mxu2 }
 0x3d9   : > { %v4238_v58 = vpop.f32.mrf.mxu1 }
 0x3da   : > { %v4239_v15 = vadd.f32 %v4238_v58, %v13403_v39  ;;  %v4320_v23 = vpop.f32.mrf.mxu0 }
 0x3dc   : > { %4401 = vmatmul.bf16.gmra.mxu1 %v13350_v36  ;;  %4442 = vmatmul.bf16.gmra.mxu3 %v13352_v11 }
 0x3dd   : > { %4483 = vmatmul.bf16.gmra.mxu0 %v13265_v43  ;;  %4524 = vmatmul.bf16.gmra.mxu2 %v13269_v14 }
 0x3df   : > { %v4279_v50 = vpop.f32.mrf.mxu3 }
 0x3e0   : > { %v4280_v60 = vadd.f32 %v4279_v50, %v4239_v15  ;;  %v4361_v21 = vpop.f32.mrf.mxu2  ;;  %v11132_v15 = vld [vmem:[#allocation8 + $0x7e4] sm:$0xf] }
 0x3e1   : > { %v4240_v24 = vpop.f32.mrf.mxu1 }
 0x3e2   : > { %v4321_v6 = vadd.f32 %v4320_v23, %v4280_v60  ;;  %v4322_v57 = vpop.f32.mrf.mxu0  ;;  %v11100_v60 = vld [vmem:[#allocation8 + $0x6e4] sm:$0xf]  ;;  %v9292_v24 = vld [vmem:[#allocation8 + $0x6f0] sm:$0xf0] }
 0x3e3   : > { %v9676_v57 = vld [vmem:[#allocation8 + $0x9f0] sm:$0xf0] }
 0x3e4   : > { %v13459_v27 = vadd.f32 %v4361_v21, %v4321_v6  ;;  %v11196_v21 = vld [vmem:[#allocation8 + $0x9e4] sm:$0xf]  ;;  %v9295_v6 = vor.u32 %v11100_v60, %v9292_v24 }
 0x3e5   : > { %v11160_v24 = vld [vmem:[#allocation8 + $0x8c4] sm:$0xf] }
 0x3e6   : > { %4693 = vmatpush.bf16.msra.mxu1 %v9295_v6 }
 0x3e7   : > { %v4281_v62 = vpop.f32.mrf.mxu3 }
 0x3e8   : > { %v4363_v46 = vpop.f32.mrf.mxu2  ;;  %v9679_v62 = vor.u32 %v11196_v21, %v9676_v57  ;;  %v9532_v21 = vld [vmem:[#allocation8 + $0x8d0] sm:$0xf0] }
 0x3e9   : > { %v4374_v39 = vpop.f32.mrf.mxu1  ;;  %v9535_v6 = vor.u32 %v11160_v24, %v9532_v21 }
 0x3ea   : > { %v4375_v8 = vadd.f32 %v4374_v39, %v13410_v1  ;;  %v4456_v42 = vpop.f32.mrf.mxu0  ;;  %4816 = vmatpush.bf16.msra.mxu2 %v9679_v62  ;;  %v11164_v39 = vld [vmem:[#allocation8 + $0x8e4] sm:$0xf] }
 0x3eb   : > { %v4457_v49 = vadd.f32 %v4456_v42, %v13462_v54 }
 0x3ec   : > { %4537 = vmatmul.bf16.vlgmr.msrb.gmra.mxu1 %v13145_v51  ;;  %4578 = vmatmul.bf16.vlgmr.msrb.gmra.mxu3 %v13149_v44 }
 0x3ed   : > { %4619 = vmatmul.bf16.vlgmr.msrb.gmra.mxu0 %v13163_v63  ;;  %4660 = vmatmul.bf16.vlgmr.msrb.gmra.mxu2 %v13167_v53 }
 0x3ef   : > { %v4415_v45 = vpop.f32.mrf.mxu3 }
 0x3f0   : > { %v13469_v12 = vadd.f32 %v4415_v45, %v4375_v8  ;;  %v4497_v30 = vpop.f32.mrf.mxu2  ;;  %v9548_v8 = vld [vmem:[#allocation8 + $0x8f0] sm:$0xf0] }
 0x3f1   : > { %v4376_v34 = vpop.f32.mrf.mxu1  ;;  %v13471_v1 = vadd.f32 %v4497_v30, %v4457_v49  ;;  %v9551_v42 = vor.u32 %v11164_v39, %v9548_v8 }
 0x3f2   : > { %v4458_v59 = vpop.f32.mrf.mxu0 }
 0x3f3   : > { %4775 = vmatpush.bf16.msra.mxu0 %v9551_v42 }
 0x3f7   : > { %v4417_v26 = vpop.f32.mrf.mxu3  ;;  %4776 = vmatpush.bf16.msra.mxu0 %v9535_v6 }
 0x3f8   : > { %v4499_v3 = vpop.f32.mrf.mxu2 }
 0x3f9   : > { %v4378_v38 = vpop.f32.mrf.mxu1 }
 0x3fa   : > { %v4379_v61 = vadd.f32 %v4378_v38, %v13417_v48  ;;  %v4460_v37 = vpop.f32.mrf.mxu0  ;;  %v9420_v48 = vld [vmem:[#allocation8 + $0x7f0] sm:$0xf0] }
 0x3fb   : > { %v4461_v41 = vadd.f32 %v4460_v37, %v13462_v54  ;;  %v9423_v50 = vor.u32 %v11132_v15, %v9420_v48  ;;  %v9404_v37 = vld [vmem:[#allocation8 + $0x7d0] sm:$0xf0]  ;;  %v11192_v15 = vld [vmem:[#allocation8 + $0x9c4] sm:$0xf] }
 0x3fc   : > { %4541 = vmatmul.bf16.gmra.mxu1 %v13163_v63  ;;  %4582 = vmatmul.bf16.gmra.mxu3 %v13167_v53 }
 0x3fd   : > { %4623 = vmatmul.bf16.gmra.mxu0 %v13179_v13  ;;  %4664 = vmatmul.bf16.gmra.mxu2 %v13183_v18 }
 0x3fe   : > { %4734 = vmatpush.bf16.msra.mxu3 %v9423_v50 }
 0x3ff   : > { %v4419_v22 = vpop.f32.mrf.mxu3 }
 0x400   : > { %v13479_v2 = vadd.f32 %v4419_v22, %v4379_v61  ;;  %v4501_v58 = vpop.f32.mrf.mxu2 }
 0x401   : > { %v4380_v10 = vpop.f32.mrf.mxu1  ;;  %v13481_v20 = vadd.f32 %v4501_v58, %v4461_v41  ;;  %v9276_v58 = vld [vmem:[#allocation8 + $0x6d0] sm:$0xf0] }
 0x402   : > { %v4462_v23 = vpop.f32.mrf.mxu0  ;;  %v11096_v10 = vld [vmem:[#allocation8 + $0x6c4] sm:$0xf] }
 0x403   : > { %v9279_v48 = vor.u32 %v11096_v10, %v9276_v58  ;;  %v9660_v23 = vld [vmem:[#allocation8 + $0x9d0] sm:$0xf0] }
 0x404   : > { %v9663_v50 = vor.u32 %v11192_v15, %v9660_v23  ;;  %v11156_v15 = vld [vmem:[#allocation8 + $0x8a4] sm:$0xf] }
 0x405   : > { %4694 = vmatpush.bf16.msra.mxu1 %v9279_v48  ;;  %v9516_v48 = vld [vmem:[#allocation8 + $0x8b0] sm:$0xf0] }
 0x406   : > { %4817 = vmatpush.bf16.msra.mxu2 %v9663_v50  ;;  %v9519_v23 = vor.u32 %v11156_v15, %v9516_v48 }
 0x407   : > { %v4421_v46 = vpop.f32.mrf.mxu3 }
 0x408   : > { %v4503_v45 = vpop.f32.mrf.mxu2  ;;  %4777 = vmatpush.bf16.msra.mxu0 %v9519_v23  ;;  %v11084_v23 = vld [vmem:[#allocation8 + $0x664] sm:$0xf] }
 0x409   : > { %v4382_v31 = vpop.f32.mrf.mxu1 }
 0x40a   : > { %v4383_v49 = vadd.f32 %v4382_v31, %v13424_v25  ;;  %v4464_v34 = vpop.f32.mrf.mxu0  ;;  %v11128_v25 = vld [vmem:[#allocation8 + $0x7c4] sm:$0xf] }
 0x40b   : > { %v4465_v59 = vadd.f32 %v4464_v34, %v13462_v54  ;;  %v9407_v41 = vor.u32 %v11128_v25, %v9404_v37  ;;  %v9260_v25 = vld [vmem:[#allocation8 + $0x6b0] sm:$0xf0]  ;;  %v11188_v37 = vld [vmem:[#allocation8 + $0x9a4] sm:$0xf] }
 0x40c   : > { %4545 = vmatmul.bf16.gmra.mxu1 %v13179_v13  ;;  %4586 = vmatmul.bf16.gmra.mxu3 %v13183_v18 }
 0x40d   : > { %4627 = vmatmul.bf16.gmra.mxu0 %v13197_v7  ;;  %4668 = vmatmul.bf16.gmra.mxu2 %v13202_v47 }
 0x40e   : > { %4735 = vmatpush.bf16.msra.mxu3 %v9407_v41  ;;  %v9644_v41 = vld [vmem:[#allocation8 + $0x9b0] sm:$0xf0] }
 0x40f   : > { %v4423_v30 = vpop.f32.mrf.mxu3  ;;  %v9647_v10 = vor.u32 %v11188_v37, %v9644_v41  ;;  %v9500_v41 = vld [vmem:[#allocation8 + $0x890] sm:$0xf0] }
 0x410   : > { %v13489_v26 = vadd.f32 %v4423_v30, %v4383_v49  ;;  %v4505_v3 = vpop.f32.mrf.mxu2  ;;  %v9388_v30 = vld [vmem:[#allocation8 + $0x7b0] sm:$0xf0] }
 0x411   : > { %v4384_v38 = vpop.f32.mrf.mxu1  ;;  %v13491_v61 = vadd.f32 %v4505_v3, %v4465_v59  ;;  %v11092_v3 = vld [vmem:[#allocation8 + $0x6a4] sm:$0xf]  ;;  %4818 = vmatpush.bf16.msra.mxu2 %v9647_v10 }
 0x412   : > { %v4466_v22 = vpop.f32.mrf.mxu0 }
 0x413   : > { %v9263_v22 = vor.u32 %v11092_v3, %v9260_v25  ;;  %v9628_v3 = vld [vmem:[#allocation8 + $0x990] sm:$0xf0] }
 0x415   : > { %4695 = vmatpush.bf16.msra.mxu1 %v9263_v22  ;;  %v11152_v22 = vld [vmem:[#allocation8 + $0x884] sm:$0xf] }
 0x416   : > { %v9503_v10 = vor.u32 %v11152_v22, %v9500_v41  ;;  %v11144_v41 = vld [vmem:[#allocation8 + $0x844] sm:$0xf] }
 0x417   : > { %v4425_v60 = vpop.f32.mrf.mxu3 }
 0x418   : > { %v4507_v62 = vpop.f32.mrf.mxu2  ;;  %4778 = vmatpush.bf16.msra.mxu0 %v9503_v10  ;;  %v9468_v10 = vld [vmem:[#allocation8 + $0x850] sm:$0xf0] }
 0x419   : > { %v4386_v57 = vpop.f32.mrf.mxu1 }
 0x41a   : > { %v4387_v46 = vadd.f32 %v4386_v57, %v13431_v19  ;;  %v4468_v39 = vpop.f32.mrf.mxu0  ;;  %v11124_v19 = vld [vmem:[#allocation8 + $0x7a4] sm:$0xf] }
 0x41b   : > { %v4469_v42 = vadd.f32 %v4468_v39, %v13462_v54  ;;  %v9391_v38 = vor.u32 %v11124_v19, %v9388_v30  ;;  %v11088_v19 = vld [vmem:[#allocation8 + $0x684] sm:$0xf]  ;;  %v9244_v30 = vld [vmem:[#allocation8 + $0x690] sm:$0xf0] }
 0x41c   : > { %4549 = vmatmul.bf16.gmra.mxu1 %v13197_v7  ;;  %4590 = vmatmul.bf16.gmra.mxu3 %v13202_v47 }
 0x41d   : > { %4631 = vmatmul.bf16.gmra.mxu0 %v13217_v5  ;;  %4672 = vmatmul.bf16.gmra.mxu2 %v13222_v56 }
 0x41e   : > { %4736 = vmatpush.bf16.msra.mxu3 %v9391_v38  ;;  %v9247_v38 = vor.u32 %v11088_v19, %v9244_v30  ;;  %v9212_v19 = vld [vmem:[#allocation8 + $0x650] sm:$0xf0]  ;;  %v11112_v30 = vld [vmem:[#allocation8 + $0x744] sm:$0xf] }
 0x41f   : > { %v4427_v8 = vpop.f32.mrf.mxu3 }
 0x420   : > { %v13499_v31 = vadd.f32 %v4427_v8, %v4387_v46  ;;  %v4509_v49 = vpop.f32.mrf.mxu2  ;;  %4696 = vmatpush.bf16.msra.mxu1 %v9247_v38 }
 0x421   : > { %v4388_v45 = vpop.f32.mrf.mxu1  ;;  %v13501_v34 = vadd.f32 %v4509_v49, %v4469_v42  ;;  %v9372_v42 = vld [vmem:[#allocation8 + $0x790] sm:$0xf0] }
 0x422   : > { %v4470_v59 = vpop.f32.mrf.mxu0 }
 0x423   : > { %v11184_v59 = vld [vmem:[#allocation8 + $0x984] sm:$0xf] }
 0x424   : > { %v9631_v25 = vor.u32 %v11184_v59, %v9628_v3  ;;  %v9340_v3 = vld [vmem:[#allocation8 + $0x750] sm:$0xf0] }
 0x425   : > { %v9343_v22 = vor.u32 %v11112_v30, %v9340_v3  ;;  %v9580_v30 = vld [vmem:[#allocation8 + $0x930] sm:$0xf0] }
 0x426   : > { %4819 = vmatpush.bf16.msra.mxu2 %v9631_v25  ;;  %v9180_v3 = vld [vmem:[#allocation8 + $0x610] sm:$0xf0] }
 0x427   : > { %v4429_v58 = vpop.f32.mrf.mxu3 }
 0x428   : > { %v4511_v60 = vpop.f32.mrf.mxu2 }
 0x429   : > { %v4390_v50 = vpop.f32.mrf.mxu1  ;;  %v11116_v60 = vld [vmem:[#allocation8 + $0x764] sm:$0xf] }
 0x42a   : > { %v4391_v24 = vadd.f32 %v4390_v50, %v13438_v28  ;;  %v4472_v21 = vpop.f32.mrf.mxu0  ;;  %v11120_v28 = vld [vmem:[#allocation8 + $0x784] sm:$0xf]  ;;  %v9228_v50 = vld [vmem:[#allocation8 + $0x670] sm:$0xf0] }
 0x42b   : > { %v4473_v57 = vadd.f32 %v4472_v21, %v13462_v54  ;;  %v9375_v49 = vor.u32 %v11120_v28, %v9372_v42  ;;  %v9231_v21 = vor.u32 %v11084_v23, %v9228_v50  ;;  %v11180_v28 = vld [vmem:[#allocation8 + $0x964] sm:$0xf]  ;;  %v9471_v50 = vor.u32 %v11144_v41, %v9468_v10  ;;  %v9308_v10 = vld [vmem:[#allocation8 + $0x710] sm:$0xf0] }
 0x42c   : > { %4553 = vmatmul.bf16.gmra.mxu1 %v13217_v5  ;;  %4594 = vmatmul.bf16.gmra.mxu3 %v13222_v56 }
 0x42d   : > { %4635 = vmatmul.bf16.gmra.mxu0 %v13240_v52  ;;  %4676 = vmatmul.bf16.gmra.mxu2 %v13245_v9 }
 0x42e   : > { %4737 = vmatpush.bf16.msra.mxu3 %v9375_v49  ;;  %4697 = vmatpush.bf16.msra.mxu1 %v9231_v21  ;;  %v11080_v49 = vld [vmem:[#allocation8 + $0x644] sm:$0xf] }
 0x42f   : > { %v4431_v6 = vpop.f32.mrf.mxu3  ;;  %v9215_v38 = vor.u32 %v11080_v49, %v9212_v19  ;;  %v11172_v49 = vld [vmem:[#allocation8 + $0x924] sm:$0xf] }
 0x430   : > { %v13509_v62 = vadd.f32 %v4431_v6, %v4391_v24  ;;  %v4513_v39 = vpop.f32.mrf.mxu2  ;;  %v9356_v6 = vld [vmem:[#allocation8 + $0x770] sm:$0xf0] }
 0x431   : > { %v4392_v46 = vpop.f32.mrf.mxu1  ;;  %v13511_v8 = vadd.f32 %v4513_v39, %v4473_v57  ;;  %v9359_v57 = vor.u32 %v11116_v60, %v9356_v6  ;;  %v9484_v39 = vld [vmem:[#allocation8 + $0x870] sm:$0xf0] }
 0x432   : > { %v4474_v45 = vpop.f32.mrf.mxu0  ;;  %v11148_v46 = vld [vmem:[#allocation8 + $0x864] sm:$0xf]  ;;  %4698 = vmatpush.bf16.msra.mxu1 %v9215_v38  ;;  %v9596_v60 = vld [vmem:[#allocation8 + $0x950] sm:$0xf0] }
 0x433   : > { %v9487_v42 = vor.u32 %v11148_v46, %v9484_v39  ;;  %v9612_v45 = vld [vmem:[#allocation8 + $0x970] sm:$0xf0]  ;;  %4738 = vmatpush.bf16.msra.mxu3 %v9359_v57  ;;  %v11076_v57 = vld [vmem:[#allocation8 + $0x624] sm:$0xf] }
 0x434   : > { %v9196_v46 = vld [vmem:[#allocation8 + $0x630] sm:$0xf0]  ;;  %v11072_v38 = vld [vmem:[#allocation8 + $0x604] sm:$0xf] }
 0x435   : > { %4779 = vmatpush.bf16.msra.mxu0 %v9487_v42 }
 0x437   : > { %v4433_v37 = vpop.f32.mrf.mxu3  ;;  %4739 = vmatpush.bf16.msra.mxu3 %v9343_v22  ;;  %v9183_v22 = vor.u32 %v11072_v38, %v9180_v3 }
 0x438   : > { %v4515_v15 = vpop.f32.mrf.mxu2 }
 0x439   : > { %v4394_v58 = vpop.f32.mrf.mxu1  ;;  %4780 = vmatpush.bf16.msra.mxu0 %v9471_v50  ;;  %v11168_v50 = vld [vmem:[#allocation8 + $0x904] sm:$0xf] }
 0x43a   : > { %v4395_v48 = vadd.f32 %v4394_v58, %v13445_v4  ;;  %v4476_v24 = vpop.f32.mrf.mxu0  ;;  %v9615_v4 = vor.u32 %v11180_v28, %v9612_v45  ;;  %v11176_v58 = vld [vmem:[#allocation8 + $0x944] sm:$0xf]  ;;  %v9324_v28 = vld [vmem:[#allocation8 + $0x730] sm:$0xf0] }
 0x43b   : > { %v4477_v25 = vadd.f32 %v4476_v24, %v13462_v54  ;;  %v9599_v6 = vor.u32 %v11176_v58, %v9596_v60  ;;  %v11108_v24 = vld [vmem:[#allocation8 + $0x724] sm:$0xf] }
 0x43c   : > { %4557 = vmatmul.bf16.gmra.mxu1 %v13240_v52  ;;  %4598 = vmatmul.bf16.gmra.mxu3 %v13245_v9  ;;  %v9327_v42 = vor.u32 %v11108_v24, %v9324_v28  ;;  %v11140_v45 = vld [vmem:[#allocation8 + $0x824] sm:$0xf] }
 0x43d   : > { %4639 = vmatmul.bf16.gmra.mxu0 %v13265_v43  ;;  %4680 = vmatmul.bf16.gmra.mxu2 %v13269_v14 }
 0x43e   : > { %4820 = vmatpush.bf16.msra.mxu2 %v9615_v4  ;;  %v9452_v4 = vld [vmem:[#allocation8 + $0x830] sm:$0xf0]  ;;  %4740 = vmatpush.bf16.msra.mxu3 %v9327_v42 }
 0x43f   : > { %v4435_v59 = vpop.f32.mrf.mxu3  ;;  %v9455_v19 = vor.u32 %v11140_v45, %v9452_v4 }
 0x440   : > { %v13519_v37 = vadd.f32 %v4435_v59, %v4395_v48  ;;  %v4517_v23 = vpop.f32.mrf.mxu2  ;;  %v9199_v48 = vor.u32 %v11076_v57, %v9196_v46  ;;  %v9583_v59 = vor.u32 %v11172_v49, %v9580_v30  ;;  %v9564_v46 = vld [vmem:[#allocation8 + $0x910] sm:$0xf0] }
 0x441   : > { %v4396_v15 = vpop.f32.mrf.mxu1  ;;  %v13521_v21 = vadd.f32 %v4517_v23, %v4477_v25  ;;  %v11104_v25 = vld [vmem:[#allocation8 + $0x704] sm:$0xf]  ;;  %4781 = vmatpush.bf16.msra.mxu0 %v9455_v19  ;;  %v9436_v23 = vld [vmem:[#allocation8 + $0x810] sm:$0xf0] }
 0x442   : > { %v4478_v39 = vpop.f32.mrf.mxu0  ;;  %4821 = vmatpush.bf16.msra.mxu2 %v9599_v6  ;;  %4699 = vmatpush.bf16.msra.mxu1 %v9199_v48  ;;  %v9311_v58 = vor.u32 %v11104_v25, %v9308_v10  ;;  %v11136_v15 = vld [vmem:[#allocation8 + $0x804] sm:$0xf]  ;;  %v9567_v48 = vor.u32 %v11168_v50, %v9564_v46 }
 0x443   : > { %v9439_v57 = vor.u32 %v11136_v15, %v9436_v23 }
 0x444   : > { %4741 = vmatpush.bf16.msra.mxu3 %v9311_v58 }
 0x445   : > { %4782 = vmatpush.bf16.msra.mxu0 %v9439_v57 }
 0x446   : > { %4822 = vmatpush.bf16.msra.mxu2 %v9583_v59  ;;  %4700 = vmatpush.bf16.msra.mxu1 %v9183_v22 }
 0x447   : > { %v4437_v41 = vpop.f32.mrf.mxu3 }
 0x448   : > { %v4519_v6 = vpop.f32.mrf.mxu2 }
 0x449   : > { %v4398_v60 = vpop.f32.mrf.mxu1 }
 0x44a   : > { %v4399_v39 = vadd.f32 %v4398_v60, %v13452_v29  ;;  %v4480_v24 = vpop.f32.mrf.mxu0  ;;  %4823 = vmatpush.bf16.msra.mxu2 %v9567_v48 }
 0x44b   : > { %v4481_v42 = vadd.f32 %v4480_v24, %v13462_v54 }
 0x44c   : > { %4561 = vmatmul.bf16.gmra.mxu1 %v13265_v43  ;;  %4602 = vmatmul.bf16.gmra.mxu3 %v13269_v14 }
 0x44d   : > { %4643 = vmatmul.bf16.gmra.mxu0 %v13295_v35  ;;  %4684 = vmatmul.bf16.gmra.mxu2 %v13304_v32 }
 0x44f   : > { %v4439_v28 = vpop.f32.mrf.mxu3 }
 0x450   : > { %v13529_v45 = vadd.f32 %v4439_v28, %v4399_v39  ;;  %v4521_v29 = vpop.f32.mrf.mxu2 }
 0x451   : > { %v4400_v4 = vpop.f32.mrf.mxu1  ;;  %v13531_v49 = vadd.f32 %v4521_v29, %v4481_v42 }
 0x452   : > { %v4482_v19 = vpop.f32.mrf.mxu0 }
 0x457   : > { %v4441_v30 = vpop.f32.mrf.mxu3 }
 0x458   : > { %v4523_v38 = vpop.f32.mrf.mxu2 }
 0x459   : > { %v4402_v59 = vpop.f32.mrf.mxu1 }
 0x45a   : > { %v4403_v3 = vadd.f32 %v4402_v59, %v13459_v27  ;;  %v4484_v25 = vpop.f32.mrf.mxu0 }
 0x45b   : > { %v4485_v22 = vadd.f32 %v4484_v25, %v13462_v54  ;;  %v8658_v25 = vld [vmem:[#allocation8 + $0x1e8] sm:$0xf] }
 0x45c   : > { %4565 = vmatmul.bf16.gmra.mxu1 %v13295_v35  ;;  %4606 = vmatmul.bf16.gmra.mxu3 %v13304_v32 }
 0x45d   : > { %4647 = vmatmul.bf16.gmra.mxu0 %v13318_v40  ;;  %4688 = vmatmul.bf16.gmra.mxu2 %v13322_v33 }
 0x45f   : > { %v4443_v41 = vpop.f32.mrf.mxu3 }
 0x460   : > { %v13539_v10 = vadd.f32 %v4443_v41, %v4403_v3  ;;  %v4525_v15 = vpop.f32.mrf.mxu2  ;;  %v10943_v41 = vld [vmem:[#allocation8 + $0x1f4] sm:$0xf0] }
 0x461   : > { %v4404_v58 = vpop.f32.mrf.mxu1  ;;  %v13541_v23 = vadd.f32 %v4525_v15, %v4485_v22  ;;  %v8659_v15 = vor.u32 %v10943_v41, %v8658_v25  ;;  %v10939_v25 = vld [vmem:[#allocation8 + $0x1d4] sm:$0xf0] }
 0x462   : > { %v4486_v50 = vpop.f32.mrf.mxu0 }
 0x463   : > { %4898 = vmatpush.bf16.msrb.mxu3 %v8659_v15 }
 0x467   : > { %v4445_v27 = vpop.f32.mrf.mxu3 }
 0x468   : > { %v4527_v60 = vpop.f32.mrf.mxu2 }
 0x469   : > { %v4538_v6 = vpop.f32.mrf.mxu1  ;;  %v8530_v60 = vld [vmem:[#allocation8 + $0xe8] sm:$0xf] }
 0x46a   : > { %v4539_v57 = vadd.f32 %v4538_v6, %v13471_v1  ;;  %v4620_v46 = vpop.f32.mrf.mxu0  ;;  %v10911_v6 = vld [vmem:[#allocation8 + $0xf4] sm:$0xf0] }
 0x46c   : > { %4701 = vmatmul.bf16.vlgmr.msra.gmra.mxu1 %v13179_v13  ;;  %4742 = vmatmul.bf16.vlgmr.msra.gmra.mxu3 %v13183_v18 }
 0x46d   : > { %4783 = vmatmul.bf16.vlgmr.msra.gmra.mxu0 %v13197_v7  ;;  %4824 = vmatmul.bf16.vlgmr.msra.gmra.mxu2 %v13202_v47 }
 0x46f   : > { %v4579_v54 = vpop.f32.mrf.mxu3 }
 0x470   : > { %v4580_v39 = vadd.f32 %v4579_v54, %v4539_v57  ;;  %v4661_v24 = vpop.f32.mrf.mxu2  ;;  %v8914_v57 = vld [vmem:[#allocation8 + $0x3e8] sm:$0xf]  ;;  %v11007_v54 = vld [vmem:[#allocation8 + $0x3f4] sm:$0xf0] }
 0x471   : > { %v4540_v48 = vpop.f32.mrf.mxu1 }
 0x472   : > { %v4621_v28 = vadd.f32 %v4620_v46, %v4580_v39  ;;  %v4622_v42 = vpop.f32.mrf.mxu0  ;;  %v8531_v46 = vor.u32 %v10911_v6, %v8530_v60  ;;  %v8915_v39 = vor.u32 %v11007_v54, %v8914_v57  ;;  %v10907_v60 = vld [vmem:[#allocation8 + $0xd4] sm:$0xf0]  ;;  %v8898_v6 = vld [vmem:[#allocation8 + $0x3c8] sm:$0xf] }
 0x474   : > { %v13548_v4 = vadd.f32 %v4661_v24, %v4621_v28  ;;  %4857 = vmatpush.bf16.msrb.mxu1 %v8531_v46  ;;  %v8786_v24 = vld [vmem:[#allocation8 + $0x2e8] sm:$0xf]  ;;  %v10975_v28 = vld [vmem:[#allocation8 + $0x2f4] sm:$0xf0]  ;;  %4980 = vmatpush.bf16.msrb.mxu2 %v8915_v39 }
 0x475   : > { %v8787_v42 = vor.u32 %v10975_v28, %v8786_v24  ;;  %v11003_v46 = vld [vmem:[#allocation8 + $0x3d4] sm:$0xf0] }
 0x476   : > { %v8899_v54 = vor.u32 %v11003_v46, %v8898_v6  ;;  %v10971_v24 = vld [vmem:[#allocation8 + $0x2d4] sm:$0xf0] }
 0x477   : > { %v4581_v29 = vpop.f32.mrf.mxu3  ;;  %4939 = vmatpush.bf16.msrb.mxu0 %v8787_v42 }
 0x478   : > { %v4663_v1 = vpop.f32.mrf.mxu2  ;;  %4981 = vmatpush.bf16.msrb.mxu2 %v8899_v54 }
 0x479   : > { %v4542_v19 = vpop.f32.mrf.mxu1 }
 0x47a   : > { %v4543_v30 = vadd.f32 %v4542_v19, %v13481_v20  ;;  %v4624_v59 = vpop.f32.mrf.mxu0 }
 0x47c   : > { %4705 = vmatmul.bf16.gmra.mxu1 %v13197_v7  ;;  %4746 = vmatmul.bf16.gmra.mxu3 %v13202_v47 }
 0x47d   : > { %4787 = vmatmul.bf16.gmra.mxu0 %v13217_v5  ;;  %4828 = vmatmul.bf16.gmra.mxu2 %v13222_v56 }
 0x47f   : > { %v4583_v38 = vpop.f32.mrf.mxu3 }
 0x480   : > { %v4584_v3 = vadd.f32 %v4583_v38, %v4543_v30  ;;  %v4665_v58 = vpop.f32.mrf.mxu2 }
 0x481   : > { %v4544_v22 = vpop.f32.mrf.mxu1 }
 0x482   : > { %v4625_v50 = vadd.f32 %v4624_v59, %v4584_v3  ;;  %v4626_v27 = vpop.f32.mrf.mxu0  ;;  %v8642_v3 = vld [vmem:[#allocation8 + $0x1c8] sm:$0xf] }
 0x483   : > { %v8514_v27 = vld [vmem:[#allocation8 + $0xc8] sm:$0xf] }
 0x484   : > { %v13555_v20 = vadd.f32 %v4665_v58, %v4625_v50  ;;  %v8643_v58 = vor.u32 %v10939_v25, %v8642_v3  ;;  %v8515_v57 = vor.u32 %v10907_v60, %v8514_v27  ;;  %v10935_v3 = vld [vmem:[#allocation8 + $0x1b4] sm:$0xf0]  ;;  %v8882_v60 = vld [vmem:[#allocation8 + $0x3a8] sm:$0xf] }
 0x485   : > { %v10903_v27 = vld [vmem:[#allocation8 + $0xb4] sm:$0xf0] }
 0x486   : > { %4899 = vmatpush.bf16.msrb.mxu3 %v8643_v58  ;;  %4858 = vmatpush.bf16.msrb.mxu1 %v8515_v57  ;;  %v10999_v57 = vld [vmem:[#allocation8 + $0x3b4] sm:$0xf0] }
 0x487   : > { %v4585_v48 = vpop.f32.mrf.mxu3  ;;  %v8883_v46 = vor.u32 %v10999_v57, %v8882_v60 }
 0x488   : > { %v4667_v19 = vpop.f32.mrf.mxu2  ;;  %v8770_v48 = vld [vmem:[#allocation8 + $0x2c8] sm:$0xf] }
 0x489   : > { %v4546_v29 = vpop.f32.mrf.mxu1  ;;  %v8771_v28 = vor.u32 %v10971_v24, %v8770_v48  ;;  %v10967_v48 = vld [vmem:[#allocation8 + $0x2b4] sm:$0xf0]  ;;  %4982 = vmatpush.bf16.msrb.mxu2 %v8883_v46 }
 0x48a   : > { %v4547_v1 = vadd.f32 %v4546_v29, %v13491_v61  ;;  %v4628_v30 = vpop.f32.mrf.mxu0 }
 0x48b   : > { %4940 = vmatpush.bf16.msrb.mxu0 %v8771_v28 }
 0x48c   : > { %4709 = vmatmul.bf16.gmra.mxu1 %v13217_v5  ;;  %4750 = vmatmul.bf16.gmra.mxu3 %v13222_v56 }
 0x48d   : > { %4791 = vmatmul.bf16.gmra.mxu0 %v13240_v52  ;;  %4832 = vmatmul.bf16.gmra.mxu2 %v13245_v9 }
 0x48f   : > { %v4587_v59 = vpop.f32.mrf.mxu3 }
 0x490   : > { %v4588_v38 = vadd.f32 %v4587_v59, %v4547_v1  ;;  %v4669_v22 = vpop.f32.mrf.mxu2 }
 0x491   : > { %v4548_v41 = vpop.f32.mrf.mxu1 }
 0x492   : > { %v4629_v15 = vadd.f32 %v4628_v30, %v4588_v38  ;;  %v4630_v50 = vpop.f32.mrf.mxu0  ;;  %v8626_v38 = vld [vmem:[#allocation8 + $0x1a8] sm:$0xf] }
 0x493   : > { %v8498_v50 = vld [vmem:[#allocation8 + $0xa8] sm:$0xf] }
 0x494   : > { %v13562_v61 = vadd.f32 %v4669_v22, %v4629_v15  ;;  %v8627_v22 = vor.u32 %v10935_v3, %v8626_v38  ;;  %v8499_v6 = vor.u32 %v10903_v27, %v8498_v50  ;;  %v10931_v38 = vld [vmem:[#allocation8 + $0x194] sm:$0xf0]  ;;  %v8866_v27 = vld [vmem:[#allocation8 + $0x388] sm:$0xf] }
 0x495   : > { %v10899_v50 = vld [vmem:[#allocation8 + $0x94] sm:$0xf0] }
 0x496   : > { %4900 = vmatpush.bf16.msrb.mxu3 %v8627_v22  ;;  %4859 = vmatpush.bf16.msrb.mxu1 %v8499_v6  ;;  %v10995_v6 = vld [vmem:[#allocation8 + $0x394] sm:$0xf0] }
 0x497   : > { %v4589_v39 = vpop.f32.mrf.mxu3  ;;  %v8867_v57 = vor.u32 %v10995_v6, %v8866_v27  ;;  %v10891_v27 = vld [vmem:[#allocation8 + $0x54] sm:$0xf0] }
 0x498   : > { %v4671_v29 = vpop.f32.mrf.mxu2  ;;  %v8754_v39 = vld [vmem:[#allocation8 + $0x2a8] sm:$0xf] }
 0x499   : > { %v4550_v42 = vpop.f32.mrf.mxu1  ;;  %v8755_v24 = vor.u32 %v10967_v48, %v8754_v39  ;;  %v10963_v39 = vld [vmem:[#allocation8 + $0x294] sm:$0xf0]  ;;  %4983 = vmatpush.bf16.msrb.mxu2 %v8867_v57 }
 0x49a   : > { %v4551_v19 = vadd.f32 %v4550_v42, %v13501_v34  ;;  %v4632_v1 = vpop.f32.mrf.mxu0 }
 0x49b   : > { %4941 = vmatpush.bf16.msrb.mxu0 %v8755_v24 }
 0x49c   : > { %4713 = vmatmul.bf16.gmra.mxu1 %v13240_v52  ;;  %4754 = vmatmul.bf16.gmra.mxu3 %v13245_v9 }
 0x49d   : > { %4795 = vmatmul.bf16.gmra.mxu0 %v13265_v43  ;;  %4836 = vmatmul.bf16.gmra.mxu2 %v13269_v14 }
 0x49f   : > { %v4591_v30 = vpop.f32.mrf.mxu3 }
 0x4a0   : > { %v4592_v59 = vadd.f32 %v4591_v30, %v4551_v19  ;;  %v4673_v41 = vpop.f32.mrf.mxu2 }
 0x4a1   : > { %v4552_v25 = vpop.f32.mrf.mxu1 }
 0x4a2   : > { %v4633_v58 = vadd.f32 %v4632_v1, %v4592_v59  ;;  %v4634_v15 = vpop.f32.mrf.mxu0  ;;  %v8610_v59 = vld [vmem:[#allocation8 + $0x188] sm:$0xf] }
 0x4a3   : > { %v8482_v15 = vld [vmem:[#allocation8 + $0x88] sm:$0xf] }
 0x4a4   : > { %v13569_v34 = vadd.f32 %v4673_v41, %v4633_v58  ;;  %v8611_v41 = vor.u32 %v10931_v38, %v8610_v59  ;;  %v8483_v60 = vor.u32 %v10899_v50, %v8482_v15  ;;  %v10927_v38 = vld [vmem:[#allocation8 + $0x174] sm:$0xf0]  ;;  %v8450_v50 = vld [vmem:[#allocation8 + $0x48] sm:$0xf] }
 0x4a5   : > { %v10991_v15 = vld [vmem:[#allocation8 + $0x374] sm:$0xf0]  ;;  %v8451_v57 = vor.u32 %v10891_v27, %v8450_v50  ;;  %v8690_v27 = vld [vmem:[#allocation8 + $0x228] sm:$0xf] }
 0x4a6   : > { %4901 = vmatpush.bf16.msrb.mxu3 %v8611_v41  ;;  %4860 = vmatpush.bf16.msrb.mxu1 %v8483_v60  ;;  %v10959_v41 = vld [vmem:[#allocation8 + $0x274] sm:$0xf0]  ;;  %v8578_v60 = vld [vmem:[#allocation8 + $0x148] sm:$0xf] }
 0x4a7   : > { %v4593_v54 = vpop.f32.mrf.mxu3 }
 0x4a8   : > { %v4675_v42 = vpop.f32.mrf.mxu2  ;;  %v8738_v54 = vld [vmem:[#allocation8 + $0x288] sm:$0xf] }
 0x4a9   : > { %v4554_v28 = vpop.f32.mrf.mxu1  ;;  %v8739_v48 = vor.u32 %v10963_v39, %v8738_v54 }
 0x4aa   : > { %v4555_v29 = vadd.f32 %v4554_v28, %v13511_v8  ;;  %v4636_v19 = vpop.f32.mrf.mxu0 }
 0x4ab   : > { %4942 = vmatpush.bf16.msrb.mxu0 %v8739_v48  ;;  %v8706_v48 = vld [vmem:[#allocation8 + $0x248] sm:$0xf] }
 0x4ac   : > { %4717 = vmatmul.bf16.gmra.mxu1 %v13265_v43  ;;  %4758 = vmatmul.bf16.gmra.mxu3 %v13269_v14 }
 0x4ad   : > { %4799 = vmatmul.bf16.gmra.mxu0 %v13295_v35  ;;  %4840 = vmatmul.bf16.gmra.mxu2 %v13304_v32 }
 0x4af   : > { %v4595_v1 = vpop.f32.mrf.mxu3 }
 0x4b0   : > { %v4596_v30 = vadd.f32 %v4595_v1, %v4555_v29  ;;  %v4677_v25 = vpop.f32.mrf.mxu2  ;;  %v8466_v29 = vld [vmem:[#allocation8 + $0x68] sm:$0xf] }
 0x4b1   : > { %v4556_v3 = vpop.f32.mrf.mxu1  ;;  %v8594_v1 = vld [vmem:[#allocation8 + $0x168] sm:$0xf] }
 0x4b2   : > { %v4637_v22 = vadd.f32 %v4636_v19, %v4596_v30  ;;  %v4638_v58 = vpop.f32.mrf.mxu0  ;;  %v10895_v19 = vld [vmem:[#allocation8 + $0x74] sm:$0xf0]  ;;  %v8595_v3 = vor.u32 %v10927_v38, %v8594_v1 }
 0x4b3   : > { %v8467_v59 = vor.u32 %v10895_v19, %v8466_v29 }
 0x4b4   : > { %v13576_v8 = vadd.f32 %v4677_v25, %v4637_v22  ;;  %v8722_v25 = vld [vmem:[#allocation8 + $0x268] sm:$0xf]  ;;  %4902 = vmatpush.bf16.msrb.mxu3 %v8595_v3 }
 0x4b5   : > { %v8850_v22 = vld [vmem:[#allocation8 + $0x368] sm:$0xf]  ;;  %4861 = vmatpush.bf16.msrb.mxu1 %v8467_v59  ;;  %v8723_v58 = vor.u32 %v10959_v41, %v8722_v25  ;;  %v10987_v59 = vld [vmem:[#allocation8 + $0x354] sm:$0xf0] }
 0x4b6   : > { %v8434_v41 = vld [vmem:[#allocation8 + $0x28] sm:$0xf] }
 0x4b7   : > { %v4597_v46 = vpop.f32.mrf.mxu3  ;;  %4943 = vmatpush.bf16.msrb.mxu0 %v8723_v58 }
 0x4b8   : > { %v4679_v28 = vpop.f32.mrf.mxu2  ;;  %v10923_v46 = vld [vmem:[#allocation8 + $0x154] sm:$0xf0] }
 0x4b9   : > { %v4558_v24 = vpop.f32.mrf.mxu1  ;;  %v8579_v39 = vor.u32 %v10923_v46, %v8578_v60  ;;  %v8834_v28 = vld [vmem:[#allocation8 + $0x348] sm:$0xf]  ;;  %4862 = vmatpush.bf16.msrb.mxu1 %v8451_v57  ;;  %v10951_v60 = vld [vmem:[#allocation8 + $0x234] sm:$0xf0] }
 0x4ba   : > { %v4559_v42 = vadd.f32 %v4558_v24, %v13521_v21  ;;  %v4640_v30 = vpop.f32.mrf.mxu0  ;;  %v8851_v21 = vor.u32 %v10991_v15, %v8850_v22  ;;  %v10955_v24 = vld [vmem:[#allocation8 + $0x254] sm:$0xf0]  ;;  %v8835_v25 = vor.u32 %v10987_v59, %v8834_v28  ;;  %v8562_v15 = vld [vmem:[#allocation8 + $0x128] sm:$0xf]  ;;  %v8691_v57 = vor.u32 %v10951_v60, %v8690_v27 }
 0x4bb   : > { %v8707_v1 = vor.u32 %v10955_v24, %v8706_v48  ;;  %v10887_v22 = vld [vmem:[#allocation8 + $0x34] sm:$0xf0]  ;;  %4903 = vmatpush.bf16.msrb.mxu3 %v8579_v39  ;;  %v8546_v24 = vld [vmem:[#allocation8 + $0x108] sm:$0xf] }
 0x4bc   : > { %4721 = vmatmul.bf16.gmra.mxu1 %v13295_v35  ;;  %4762 = vmatmul.bf16.gmra.mxu3 %v13304_v32  ;;  %v8435_v58 = vor.u32 %v10887_v22, %v8434_v41  ;;  %v10983_v46 = vld [vmem:[#allocation8 + $0x334] sm:$0xf0] }
 0x4bd   : > { %4803 = vmatmul.bf16.gmra.mxu0 %v13318_v40  ;;  %4844 = vmatmul.bf16.gmra.mxu2 %v13322_v33  ;;  %v10883_v48 = vld [vmem:[#allocation8 + $0x14] sm:$0xf0] }
 0x4be   : > { %4984 = vmatpush.bf16.msrb.mxu2 %v8851_v21  ;;  %4944 = vmatpush.bf16.msrb.mxu0 %v8707_v1  ;;  %v8674_v1 = vld [vmem:[#allocation8 + $0x208] sm:$0xf]  ;;  %v10947_v59 = vld [vmem:[#allocation8 + $0x214] sm:$0xf0] }
 0x4bf   : > { %v4599_v6 = vpop.f32.mrf.mxu3  ;;  %4863 = vmatpush.bf16.msrb.mxu1 %v8435_v58  ;;  %v8675_v22 = vor.u32 %v10947_v59, %v8674_v1 }
 0x4c0   : > { %v4600_v54 = vadd.f32 %v4599_v6, %v4559_v42  ;;  %v4681_v19 = vpop.f32.mrf.mxu2  ;;  %v10919_v42 = vld [vmem:[#allocation8 + $0x134] sm:$0xf0]  ;;  %v8818_v6 = vld [vmem:[#allocation8 + $0x328] sm:$0xf] }
 0x4c1   : > { %v4560_v29 = vpop.f32.mrf.mxu1  ;;  %v8563_v50 = vor.u32 %v10919_v42, %v8562_v15  ;;  %v10979_v15 = vld [vmem:[#allocation8 + $0x314] sm:$0xf0] }
 0x4c2   : > { %v4641_v38 = vadd.f32 %v4640_v30, %v4600_v54  ;;  %v4642_v3 = vpop.f32.mrf.mxu0  ;;  %4985 = vmatpush.bf16.msrb.mxu2 %v8835_v25  ;;  %v8819_v30 = vor.u32 %v10983_v46, %v8818_v6  ;;  %v8418_v54 = vld [vmem:[#allocation8 + $0x8] sm:$0xf]  ;;  %4945 = vmatpush.bf16.msrb.mxu0 %v8691_v57  ;;  %v10915_v29 = vld [vmem:[#allocation8 + $0x114] sm:$0xf0] }
 0x4c3   : > { %4904 = vmatpush.bf16.msrb.mxu3 %v8563_v50  ;;  %v8419_v39 = vor.u32 %v10883_v48, %v8418_v54 }
 0x4c4   : > { %v13583_v21 = vadd.f32 %v4681_v19, %v4641_v38  ;;  %v8547_v19 = vor.u32 %v10915_v29, %v8546_v24  ;;  %v8802_v38 = vld [vmem:[#allocation8 + $0x308] sm:$0xf] }
 0x4c5   : > { %4864 = vmatpush.bf16.msrb.mxu1 %v8419_v39  ;;  %v8803_v58 = vor.u32 %v10979_v15, %v8802_v38 }
 0x4c6   : > { %4986 = vmatpush.bf16.msrb.mxu2 %v8819_v30  ;;  %4946 = vmatpush.bf16.msrb.mxu0 %v8675_v22 }
 0x4c7   : > { %v4601_v28 = vpop.f32.mrf.mxu3  ;;  %4905 = vmatpush.bf16.msrb.mxu3 %v8547_v19 }
 0x4c8   : > { %v4683_v41 = vpop.f32.mrf.mxu2 }
 0x4c9   : > { %v4562_v25 = vpop.f32.mrf.mxu1 }
 0x4ca   : > { %v4563_v3 = vadd.f32 %v4562_v25, %v13531_v49  ;;  %v4644_v42 = vpop.f32.mrf.mxu0  ;;  %4987 = vmatpush.bf16.msrb.mxu2 %v8803_v58 }
 0x4cc   : > { %4725 = vmatmul.bf16.gmra.mxu1 %v13318_v40  ;;  %4766 = vmatmul.bf16.gmra.mxu3 %v13322_v33 }
 0x4cd   : > { %4807 = vmatmul.bf16.gmra.mxu0 %v13334_v55  ;;  %4848 = vmatmul.bf16.gmra.mxu2 %v13340_v0 }
 0x4cf   : > { %v4603_v50 = vpop.f32.mrf.mxu3 }
 0x4d0   : > { %v4604_v27 = vadd.f32 %v4603_v50, %v4563_v3  ;;  %v4685_v6 = vpop.f32.mrf.mxu2 }
 0x4d1   : > { %v4564_v60 = vpop.f32.mrf.mxu1 }
 0x4d2   : > { %v4645_v57 = vadd.f32 %v4644_v42, %v4604_v27  ;;  %v4646_v46 = vpop.f32.mrf.mxu0 }
 0x4d4   : > { %v13590_v49 = vadd.f32 %v4685_v6, %v4645_v57 }
 0x4d7   : > { %v4605_v30 = vpop.f32.mrf.mxu3 }
 0x4d8   : > { %v4687_v48 = vpop.f32.mrf.mxu2 }
 0x4d9   : > { %v4566_v54 = vpop.f32.mrf.mxu1 }
 0x4da   : > { %v4567_v24 = vadd.f32 %v4566_v54, %v13541_v23  ;;  %v4648_v28 = vpop.f32.mrf.mxu0 }
 0x4dc   : > { %4729 = vmatmul.bf16.gmra.mxu1 %v13334_v55  ;;  %4770 = vmatmul.bf16.gmra.mxu3 %v13340_v0 }
 0x4dd   : > { %4811 = vmatmul.bf16.gmra.mxu0 %v13350_v36  ;;  %4852 = vmatmul.bf16.gmra.mxu2 %v13352_v11 }
 0x4df   : > { %v4607_v39 = vpop.f32.mrf.mxu3 }
 0x4e0   : > { %v4608_v29 = vadd.f32 %v4607_v39, %v4567_v24  ;;  %v4689_v1 = vpop.f32.mrf.mxu2  ;;  %v9170_v39 = vld [vmem:[#allocation8 + $0x5e8] sm:$0xf] }
 0x4e1   : > { %v4568_v19 = vpop.f32.mrf.mxu1 }
 0x4e2   : > { %v4649_v59 = vadd.f32 %v4648_v28, %v4608_v29  ;;  %v4650_v38 = vpop.f32.mrf.mxu0  ;;  %v11071_v29 = vld [vmem:[#allocation8 + $0x5f4] sm:$0xf0] }
 0x4e4   : > { %v13597_v25 = vadd.f32 %v4689_v1, %v4649_v59  ;;  %v9171_v59 = vor.u32 %v11071_v29, %v9170_v39  ;;  %v11067_v39 = vld [vmem:[#allocation8 + $0x5d4] sm:$0xf0] }
 0x4e6   : > { %5062 = vmatpush.bf16.msra.mxu3 %v9171_v59 }
 0x4e7   : > { %v4609_v41 = vpop.f32.mrf.mxu3 }
 0x4e8   : > { %v4691_v22 = vpop.f32.mrf.mxu2 }
 0x4e9   : > { %v4702_v23 = vpop.f32.mrf.mxu1  ;;  %v9042_v22 = vld [vmem:[#allocation8 + $0x4e8] sm:$0xf] }
 0x4ea   : > { %v4703_v15 = vadd.f32 %v4702_v23, %v13548_v4  ;;  %v4784_v3 = vpop.f32.mrf.mxu0  ;;  %v11039_v23 = vld [vmem:[#allocation8 + $0x4f4] sm:$0xf0] }
 0x4ec   : > { %4865 = vmatmul.bf16.vlgmr.msrb.gmra.mxu1 %v13125_v17  ;;  %4906 = vmatmul.bf16.vlgmr.msrb.gmra.mxu3 %v13129_v16 }
 0x4ed   : > { %4947 = vmatmul.bf16.vlgmr.msrb.gmra.mxu0 %v13145_v51  ;;  %4988 = vmatmul.bf16.vlgmr.msrb.gmra.mxu2 %v13149_v44 }
 0x4ef   : > { %v4743_v58 = vpop.f32.mrf.mxu3 }
 0x4f0   : > { %v4744_v42 = vadd.f32 %v4743_v58, %v4703_v15  ;;  %v4825_v27 = vpop.f32.mrf.mxu2  ;;  %v9426_v58 = vld [vmem:[#allocation8 + $0x7e8] sm:$0xf] }
 0x4f1   : > { %v4704_v50 = vpop.f32.mrf.mxu1 }
 0x4f2   : > { %v4785_v60 = vadd.f32 %v4784_v3, %v4744_v42  ;;  %v4786_v6 = vpop.f32.mrf.mxu0  ;;  %v9043_v3 = vor.u32 %v11039_v23, %v9042_v22  ;;  %v11135_v42 = vld [vmem:[#allocation8 + $0x7f4] sm:$0xf0]  ;;  %v9298_v50 = vld [vmem:[#allocation8 + $0x6e8] sm:$0xf] }
 0x4f3   : > { %v11035_v22 = vld [vmem:[#allocation8 + $0x4d4] sm:$0xf0] }
 0x4f4   : > { %v13604_v57 = vadd.f32 %v4825_v27, %v4785_v60  ;;  %v9427_v27 = vor.u32 %v11135_v42, %v9426_v58  ;;  %v11103_v60 = vld [vmem:[#allocation8 + $0x6f4] sm:$0xf0]  ;;  %5021 = vmatpush.bf16.msra.mxu1 %v9043_v3  ;;  %v9410_v3 = vld [vmem:[#allocation8 + $0x7c8] sm:$0xf] }
 0x4f5   : > { %v11131_v58 = vld [vmem:[#allocation8 + $0x7d4] sm:$0xf0]  ;;  %v9282_v42 = vld [vmem:[#allocation8 + $0x6c8] sm:$0xf] }
 0x4f6   : > { %5144 = vmatpush.bf16.msra.mxu2 %v9427_v27  ;;  %v11099_v27 = vld [vmem:[#allocation8 + $0x6d4] sm:$0xf0] }
 0x4f7   : > { %v4745_v46 = vpop.f32.mrf.mxu3 }
 0x4f8   : > { %v4827_v4 = vpop.f32.mrf.mxu2 }
 0x4f9   : > { %v4706_v30 = vpop.f32.mrf.mxu1 }
 0x4fa   : > { %v4707_v54 = vadd.f32 %v4706_v30, %v13555_v20  ;;  %v4788_v48 = vpop.f32.mrf.mxu0  ;;  %v9299_v30 = vor.u32 %v11103_v60, %v9298_v50  ;;  %v9411_v50 = vor.u32 %v11131_v58, %v9410_v3  ;;  %v11127_v3 = vld [vmem:[#allocation8 + $0x7b4] sm:$0xf0]  ;;  %v9266_v58 = vld [vmem:[#allocation8 + $0x6a8] sm:$0xf] }
 0x4fc   : > { %4869 = vmatmul.bf16.gmra.mxu1 %v13145_v51  ;;  %4910 = vmatmul.bf16.gmra.mxu3 %v13149_v44 }
 0x4fd   : > { %4951 = vmatmul.bf16.gmra.mxu0 %v13163_v63  ;;  %4992 = vmatmul.bf16.gmra.mxu2 %v13167_v53 }
 0x4fe   : > { %5103 = vmatpush.bf16.msra.mxu0 %v9299_v30  ;;  %5145 = vmatpush.bf16.msra.mxu2 %v9411_v50  ;;  %v11095_v50 = vld [vmem:[#allocation8 + $0x6b4] sm:$0xf0] }
 0x4ff   : > { %v4747_v24 = vpop.f32.mrf.mxu3 }
 0x500   : > { %v4748_v28 = vadd.f32 %v4747_v24, %v4707_v54  ;;  %v4829_v1 = vpop.f32.mrf.mxu2 }
 0x501   : > { %v4708_v19 = vpop.f32.mrf.mxu1 }
 0x502   : > { %v4789_v38 = vadd.f32 %v4788_v48, %v4748_v28  ;;  %v4790_v41 = vpop.f32.mrf.mxu0  ;;  %v9154_v28 = vld [vmem:[#allocation8 + $0x5c8] sm:$0xf] }
 0x503   : > { %v9026_v41 = vld [vmem:[#allocation8 + $0x4c8] sm:$0xf] }
 0x504   : > { %v13611_v20 = vadd.f32 %v4829_v1, %v4789_v38  ;;  %v9155_v1 = vor.u32 %v11067_v39, %v9154_v28  ;;  %v11063_v28 = vld [vmem:[#allocation8 + $0x5b4] sm:$0xf0] }
 0x506   : > { %14141 = vst [vmem:[#allocation26_spill] sm:$0xff] %v13611_v20  ;;  %5063 = vmatpush.bf16.msra.mxu3 %v9155_v1  ;;  %v9586_v20 = vld [vmem:[#allocation8 + $0x928] sm:$0xf] }
 0x507   : > { %v4749_v15 = vpop.f32.mrf.mxu3 }
 0x508   : > { %v4831_v46 = vpop.f32.mrf.mxu2  ;;  %v9027_v15 = vor.u32 %v11035_v22, %v9026_v41  ;;  %v11031_v41 = vld [vmem:[#allocation8 + $0x4b4] sm:$0xf0] }
 0x509   : > { %v4710_v6 = vpop.f32.mrf.mxu1  ;;  %v9283_v46 = vor.u32 %v11099_v27, %v9282_v42 }
 0x50a   : > { %v4711_v4 = vadd.f32 %v4710_v6, %v13562_v61  ;;  %v4792_v54 = vpop.f32.mrf.mxu0  ;;  %5022 = vmatpush.bf16.msra.mxu1 %v9027_v15  ;;  %v9394_v15 = vld [vmem:[#allocation8 + $0x7a8] sm:$0xf] }
 0x50b   : > { %5104 = vmatpush.bf16.msra.mxu0 %v9283_v46  ;;  %v9395_v42 = vor.u32 %v11127_v3, %v9394_v15  ;;  %v11123_v15 = vld [vmem:[#allocation8 + $0x794] sm:$0xf0]  ;;  %v9250_v3 = vld [vmem:[#allocation8 + $0x688] sm:$0xf] }
 0x50c   : > { %4873 = vmatmul.bf16.gmra.mxu1 %v13163_v63  ;;  %4914 = vmatmul.bf16.gmra.mxu3 %v13167_v53 }
 0x50d   : > { %4955 = vmatmul.bf16.gmra.mxu0 %v13179_v13  ;;  %4996 = vmatmul.bf16.gmra.mxu2 %v13183_v18 }
 0x50e   : > { %5146 = vmatpush.bf16.msra.mxu2 %v9395_v42  ;;  %v11091_v42 = vld [vmem:[#allocation8 + $0x694] sm:$0xf0] }
 0x50f   : > { %v4751_v48 = vpop.f32.mrf.mxu3 }
 0x510   : > { %v4752_v24 = vadd.f32 %v4751_v48, %v4711_v4  ;;  %v4833_v19 = vpop.f32.mrf.mxu2 }
 0x511   : > { %v4712_v29 = vpop.f32.mrf.mxu1 }
 0x512   : > { %v4793_v59 = vadd.f32 %v4792_v54, %v4752_v24  ;;  %v4794_v61 = vpop.f32.mrf.mxu0  ;;  %v9138_v24 = vld [vmem:[#allocation8 + $0x5a8] sm:$0xf] }
 0x513   : > { %v9010_v61 = vld [vmem:[#allocation8 + $0x4a8] sm:$0xf] }
 0x514   : > { %v13618_v38 = vadd.f32 %v4833_v19, %v4793_v59  ;;  %v9139_v19 = vor.u32 %v11063_v28, %v9138_v24  ;;  %v11059_v24 = vld [vmem:[#allocation8 + $0x594] sm:$0xf0] }
 0x516   : > { %14142 = vst [vmem:[#allocation27_spill] sm:$0xff] %v13618_v38  ;;  %5064 = vmatpush.bf16.msra.mxu3 %v9139_v19  ;;  %v11143_v38 = vld [vmem:[#allocation8 + $0x834] sm:$0xf0] }
 0x517   : > { %v4753_v23 = vpop.f32.mrf.mxu3 }
 0x518   : > { %v4835_v6 = vpop.f32.mrf.mxu2  ;;  %v9011_v23 = vor.u32 %v11031_v41, %v9010_v61  ;;  %v11027_v61 = vld [vmem:[#allocation8 + $0x494] sm:$0xf0] }
 0x519   : > { %v4714_v60 = vpop.f32.mrf.mxu1  ;;  %v9267_v6 = vor.u32 %v11095_v50, %v9266_v58 }
 0x51a   : > { %v4715_v30 = vadd.f32 %v4714_v60, %v13569_v34  ;;  %v4796_v4 = vpop.f32.mrf.mxu0  ;;  %5023 = vmatpush.bf16.msra.mxu1 %v9011_v23  ;;  %v9378_v23 = vld [vmem:[#allocation8 + $0x788] sm:$0xf] }
 0x51b   : > { %5105 = vmatpush.bf16.msra.mxu0 %v9267_v6  ;;  %v9379_v58 = vor.u32 %v11123_v15, %v9378_v23 }
 0x51c   : > { %4877 = vmatmul.bf16.gmra.mxu1 %v13179_v13  ;;  %4918 = vmatmul.bf16.gmra.mxu3 %v13183_v18 }
 0x51d   : > { %4959 = vmatmul.bf16.gmra.mxu0 %v13197_v7  ;;  %5000 = vmatmul.bf16.gmra.mxu2 %v13202_v47 }
 0x51e   : > { %5147 = vmatpush.bf16.msra.mxu2 %v9379_v58 }
 0x51f   : > { %v4755_v54 = vpop.f32.mrf.mxu3 }
 0x520   : > { %v4756_v48 = vadd.f32 %v4755_v54, %v4715_v30  ;;  %v4837_v29 = vpop.f32.mrf.mxu2 }
 0x521   : > { %v4716_v39 = vpop.f32.mrf.mxu1 }
 0x522   : > { %v4797_v1 = vadd.f32 %v4796_v4, %v4756_v48  ;;  %v4798_v34 = vpop.f32.mrf.mxu0  ;;  %v9122_v48 = vld [vmem:[#allocation8 + $0x588] sm:$0xf] }
 0x523   : > { %v8994_v34 = vld [vmem:[#allocation8 + $0x488] sm:$0xf] }
 0x524   : > { %v13625_v59 = vadd.f32 %v4837_v29, %v4797_v1  ;;  %v9123_v29 = vor.u32 %v11059_v24, %v9122_v48  ;;  %v11055_v24 = vld [vmem:[#allocation8 + $0x574] sm:$0xf0] }
 0x526   : > { %14143 = vst [vmem:[#allocation28_spill] sm:$0xff] %v13625_v59  ;;  %5065 = vmatpush.bf16.msra.mxu3 %v9123_v29  ;;  %v11087_v29 = vld [vmem:[#allocation8 + $0x674] sm:$0xf0]  ;;  %v9458_v59 = vld [vmem:[#allocation8 + $0x828] sm:$0xf] }
 0x527   : > { %v4757_v22 = vpop.f32.mrf.mxu3 }
 0x528   : > { %v4839_v60 = vpop.f32.mrf.mxu2  ;;  %v8995_v22 = vor.u32 %v11027_v61, %v8994_v34  ;;  %v11119_v34 = vld [vmem:[#allocation8 + $0x774] sm:$0xf0]  ;;  %v8962_v61 = vld [vmem:[#allocation8 + $0x448] sm:$0xf] }
 0x529   : > { %v4718_v27 = vpop.f32.mrf.mxu1  ;;  %v9251_v60 = vor.u32 %v11091_v42, %v9250_v3  ;;  %v11051_v3 = vld [vmem:[#allocation8 + $0x554] sm:$0xf0] }
 0x52a   : > { %v4719_v46 = vadd.f32 %v4718_v27, %v13576_v8  ;;  %v4800_v30 = vpop.f32.mrf.mxu0  ;;  %5024 = vmatpush.bf16.msra.mxu1 %v8995_v22  ;;  %v9090_v22 = vld [vmem:[#allocation8 + $0x548] sm:$0xf] }
 0x52b   : > { %5106 = vmatpush.bf16.msra.mxu0 %v9251_v60  ;;  %v9091_v42 = vor.u32 %v11051_v3, %v9090_v22  ;;  %v9346_v60 = vld [vmem:[#allocation8 + $0x748] sm:$0xf]  ;;  %v11079_v22 = vld [vmem:[#allocation8 + $0x634] sm:$0xf0] }
 0x52c   : > { %4881 = vmatmul.bf16.gmra.mxu1 %v13197_v7  ;;  %4922 = vmatmul.bf16.gmra.mxu3 %v13202_v47  ;;  %v11111_v3 = vld [vmem:[#allocation8 + $0x734] sm:$0xf0] }
 0x52d   : > { %4963 = vmatmul.bf16.gmra.mxu0 %v13217_v5  ;;  %5004 = vmatmul.bf16.gmra.mxu2 %v13222_v56 }
 0x52f   : > { %v4759_v4 = vpop.f32.mrf.mxu3 }
 0x530   : > { %v4760_v54 = vadd.f32 %v4759_v4, %v4719_v46  ;;  %v4841_v39 = vpop.f32.mrf.mxu2  ;;  %v8978_v46 = vld [vmem:[#allocation8 + $0x468] sm:$0xf] }
 0x531   : > { %v4720_v28 = vpop.f32.mrf.mxu1  ;;  %v9106_v4 = vld [vmem:[#allocation8 + $0x568] sm:$0xf] }
 0x532   : > { %v4801_v19 = vadd.f32 %v4800_v30, %v4760_v54  ;;  %v4802_v8 = vpop.f32.mrf.mxu0  ;;  %v11023_v30 = vld [vmem:[#allocation8 + $0x474] sm:$0xf0]  ;;  %v9107_v28 = vor.u32 %v11055_v24, %v9106_v4 }
 0x533   : > { %v8979_v48 = vor.u32 %v11023_v30, %v8978_v46 }
 0x534   : > { %v13632_v1 = vadd.f32 %v4841_v39, %v4801_v19  ;;  %v9234_v39 = vld [vmem:[#allocation8 + $0x668] sm:$0xf]  ;;  %5066 = vmatpush.bf16.msra.mxu3 %v9107_v28 }
 0x535   : > { %v9362_v19 = vld [vmem:[#allocation8 + $0x768] sm:$0xf]  ;;  %5025 = vmatpush.bf16.msra.mxu1 %v8979_v48  ;;  %v9235_v8 = vor.u32 %v11087_v29, %v9234_v39  ;;  %v11115_v48 = vld [vmem:[#allocation8 + $0x754] sm:$0xf0] }
 0x536   : > { %14144 = vst [vmem:[#allocation29_spill] sm:$0xff] %v13632_v1  ;;  %v9347_v39 = vor.u32 %v11115_v48, %v9346_v60  ;;  %v8946_v29 = vld [vmem:[#allocation8 + $0x428] sm:$0xf]  ;;  %v11075_v48 = vld [vmem:[#allocation8 + $0x614] sm:$0xf0] }
 0x537   : > { %v4761_v41 = vpop.f32.mrf.mxu3  ;;  %5107 = vmatpush.bf16.msra.mxu0 %v9235_v8  ;;  %v9058_v60 = vld [vmem:[#allocation8 + $0x508] sm:$0xf]  ;;  %v8580_v1 = vld [vmem:[#allocation8 + $0x158] sm:$0xf0] }
 0x538   : > { %v4843_v27 = vpop.f32.mrf.mxu2  ;;  %v11019_v41 = vld [vmem:[#allocation8 + $0x454] sm:$0xf0]  ;;  %5067 = vmatpush.bf16.msra.mxu3 %v9091_v42 }
 0x539   : > { %v4722_v50 = vpop.f32.mrf.mxu1  ;;  %v8963_v15 = vor.u32 %v11019_v41, %v8962_v61  ;;  %v11083_v27 = vld [vmem:[#allocation8 + $0x654] sm:$0xf0]  ;;  %v9202_v41 = vld [vmem:[#allocation8 + $0x628] sm:$0xf] }
 0x53a   : > { %v4723_v6 = vadd.f32 %v4722_v50, %v13583_v21  ;;  %v4804_v54 = vpop.f32.mrf.mxu0  ;;  %v9363_v21 = vor.u32 %v11119_v34, %v9362_v19  ;;  %v9218_v50 = vld [vmem:[#allocation8 + $0x648] sm:$0xf]  ;;  %v11015_v19 = vld [vmem:[#allocation8 + $0x434] sm:$0xf0] }
 0x53b   : > { %5026 = vmatpush.bf16.msra.mxu1 %v8963_v15  ;;  %v9219_v4 = vor.u32 %v11083_v27, %v9218_v50  ;;  %v9074_v34 = vld [vmem:[#allocation8 + $0x528] sm:$0xf]  ;;  %v8947_v8 = vor.u32 %v11015_v19, %v8946_v29  ;;  %v9203_v15 = vor.u32 %v11079_v22, %v9202_v41  ;;  %v11011_v50 = vld [vmem:[#allocation8 + $0x414] sm:$0xf0] }
 0x53c   : > { %4885 = vmatmul.bf16.gmra.mxu1 %v13217_v5  ;;  %4926 = vmatmul.bf16.gmra.mxu3 %v13222_v56  ;;  %v9314_v19 = vld [vmem:[#allocation8 + $0x708] sm:$0xf] }
 0x53d   : > { %4967 = vmatmul.bf16.gmra.mxu0 %v13240_v52  ;;  %5008 = vmatmul.bf16.gmra.mxu2 %v13245_v9 }
 0x53e   : > { %5148 = vmatpush.bf16.msra.mxu2 %v9363_v21  ;;  %5108 = vmatpush.bf16.msra.mxu0 %v9219_v4  ;;  %v9186_v4 = vld [vmem:[#allocation8 + $0x608] sm:$0xf] }
 0x53f   : > { %v4763_v23 = vpop.f32.mrf.mxu3  ;;  %5027 = vmatpush.bf16.msra.mxu1 %v8947_v8  ;;  %v9187_v29 = vor.u32 %v11075_v48, %v9186_v4 }
 0x540   : > { %v4764_v58 = vadd.f32 %v4763_v23, %v4723_v6  ;;  %v4845_v30 = vpop.f32.mrf.mxu2  ;;  %v11047_v6 = vld [vmem:[#allocation8 + $0x534] sm:$0xf0]  ;;  %v9330_v23 = vld [vmem:[#allocation8 + $0x728] sm:$0xf] }
 0x541   : > { %v4724_v46 = vpop.f32.mrf.mxu1  ;;  %v9075_v61 = vor.u32 %v11047_v6, %v9074_v34  ;;  %v11107_v34 = vld [vmem:[#allocation8 + $0x714] sm:$0xf0] }
 0x542   : > { %v4805_v24 = vadd.f32 %v4804_v54, %v4764_v58  ;;  %v4806_v28 = vpop.f32.mrf.mxu0  ;;  %5149 = vmatpush.bf16.msra.mxu2 %v9347_v39  ;;  %v9331_v54 = vor.u32 %v11111_v3, %v9330_v23  ;;  %v8930_v58 = vld [vmem:[#allocation8 + $0x408] sm:$0xf]  ;;  %5109 = vmatpush.bf16.msra.mxu0 %v9203_v15  ;;  %v11043_v46 = vld [vmem:[#allocation8 + $0x514] sm:$0xf0]  ;;  %v9315_v8 = vor.u32 %v11107_v34, %v9314_v19  ;;  %v11864_v34 = vld [vmem:[#allocation9] sm:$0xf] }
 0x543   : > { %5068 = vmatpush.bf16.msra.mxu3 %v9075_v61  ;;  %v8931_v42 = vor.u32 %v11011_v50, %v8930_v58 }
 0x544   : > { %v13639_v21 = vadd.f32 %v4845_v30, %v4805_v24  ;;  %v9059_v30 = vor.u32 %v11043_v46, %v9058_v60 }
 0x545   : > { %5028 = vmatpush.bf16.msra.mxu1 %v8931_v42 }
 0x546   : > { %14145 = vst [vmem:[#allocation30_spill] sm:$0xff] %v13639_v21  ;;  %5150 = vmatpush.bf16.msra.mxu2 %v9331_v54  ;;  %5110 = vmatpush.bf16.msra.mxu0 %v9187_v29 }
 0x547   : > { %v4765_v27 = vpop.f32.mrf.mxu3  ;;  %5069 = vmatpush.bf16.msra.mxu3 %v9059_v30 }
 0x548   : > { %v4847_v39 = vpop.f32.mrf.mxu2 }
 0x549   : > { %v4726_v24 = vpop.f32.mrf.mxu1 }
 0x54a   : > { %v4727_v28 = vadd.f32 %v4726_v24, %v13590_v49  ;;  %v4808_v6 = vpop.f32.mrf.mxu0  ;;  %5151 = vmatpush.bf16.msra.mxu2 %v9315_v8 }
 0x54c   : > { %4889 = vmatmul.bf16.gmra.mxu1 %v13240_v52  ;;  %4930 = vmatmul.bf16.gmra.mxu3 %v13245_v9 }
 0x54d   : > { %4971 = vmatmul.bf16.gmra.mxu0 %v13265_v43  ;;  %5012 = vmatmul.bf16.gmra.mxu2 %v13269_v14 }
 0x54f   : > { %v4767_v61 = vpop.f32.mrf.mxu3 }
 0x550   : > { %v4768_v41 = vadd.f32 %v4767_v61, %v4727_v28  ;;  %v4849_v23 = vpop.f32.mrf.mxu2  ;;  %v13655_v28 = vperm.slane %v11864_v34, 2 }
 0x551   : > { %v4728_v22 = vpop.f32.mrf.mxu1 }
 0x552   : > { %v4809_v15 = vadd.f32 %v4808_v6, %v4768_v41  ;;  %v4810_v3 = vpop.f32.mrf.mxu0 }
 0x554   : > { %v13646_v49 = vadd.f32 %v4849_v23, %v4809_v15 }
 0x556   : > { %14146 = vst [vmem:[#allocation31_spill] sm:$0xff] %v13646_v49 }
 0x557   : > { %v4769_v54 = vpop.f32.mrf.mxu3 }
 0x558   : > { %v4851_v50 = vpop.f32.mrf.mxu2 }
 0x559   : > { %v4730_v58 = vpop.f32.mrf.mxu1 }
 0x55a   : > { %v4731_v27 = vadd.f32 %v4730_v58, %v13597_v25  ;;  %v4812_v42 = vpop.f32.mrf.mxu0 }
 0x55c   : > { %4893 = vmatmul.bf16.gmra.mxu1 %v13265_v43  ;;  %4934 = vmatmul.bf16.gmra.mxu3 %v13269_v14 }
 0x55d   : > { %4975 = vmatmul.bf16.gmra.mxu0 %v13295_v35  ;;  %5016 = vmatmul.bf16.gmra.mxu2 %v13304_v32 }
 0x55f   : > { %v4771_v60 = vpop.f32.mrf.mxu3 }
 0x560   : > { %v4772_v46 = vadd.f32 %v4771_v60, %v4731_v27  ;;  %v4853_v4 = vpop.f32.mrf.mxu2 }
 0x561   : > { %v4732_v30 = vpop.f32.mrf.mxu1 }
 0x562   : > { %v4813_v48 = vadd.f32 %v4812_v42, %v4772_v46  ;;  %v4814_v24 = vpop.f32.mrf.mxu0 }
 0x564   : > { %v13653_v39 = vadd.f32 %v4853_v4, %v4813_v48  ;;  %v9682_v4 = vld [vmem:[#allocation8 + $0x9e8] sm:$0xf]  ;;  %v11199_v48 = vld [vmem:[#allocation8 + $0x9f4] sm:$0xf0] }
 0x566   : > { %14147 = vst [vmem:[#allocation32_spill] sm:$0xff] %v13653_v39 }
 0x567   : > { %v4773_v29 = vpop.f32.mrf.mxu3 }
 0x568   : > { %v4855_v19 = vpop.f32.mrf.mxu2 }
 0x569   : > { %v4866_v25 = vpop.f32.mrf.mxu1  ;;  %v9683_v19 = vor.u32 %v11199_v48, %v9682_v4 }
 0x56a   : > { %v4948_v8 = vpop.f32.mrf.mxu0  ;;  %v4867_v6 = vadd.f32 %v4866_v25, %v13655_v28 }
 0x56b   : > { %5226 = vmatpush.bf16.msrb.mxu3 %v9683_v19 }
 0x56c   : > { %5029 = vmatmul.bf16.vlgmr.msra.gmra.mxu1 %v13163_v63  ;;  %5070 = vmatmul.bf16.vlgmr.msra.gmra.mxu3 %v13167_v53 }
 0x56d   : > { %5111 = vmatmul.bf16.vlgmr.msra.gmra.mxu0 %v13179_v13  ;;  %5152 = vmatmul.bf16.vlgmr.msra.gmra.mxu2 %v13183_v18 }
 0x56f   : > { %v4907_v61 = vpop.f32.mrf.mxu3 }
 0x570   : > { %v4908_v41 = vadd.f32 %v4907_v61, %v4867_v6  ;;  %v4989_v23 = vpop.f32.mrf.mxu2  ;;  %v9554_v6 = vld [vmem:[#allocation8 + $0x8e8] sm:$0xf]  ;;  %v11167_v61 = vld [vmem:[#allocation8 + $0x8f4] sm:$0xf0] }
 0x571   : > { %v4868_v22 = vpop.f32.mrf.mxu1 }
 0x572   : > { %v4949_v15 = vadd.f32 %v4948_v8, %v4908_v41  ;;  %v4950_v3 = vpop.f32.mrf.mxu0  ;;  %v10941_v41 = vld [vmem:[#allocation8 + $0x1ec] sm:$0xf]  ;;  %v9555_v22 = vor.u32 %v11167_v61, %v9554_v6 }
 0x574   : > { %v13662_v54 = vadd.f32 %v4989_v23, %v4949_v15  ;;  %v8660_v23 = vld [vmem:[#allocation8 + $0x1f8] sm:$0xf0]  ;;  %5185 = vmatpush.bf16.msrb.mxu1 %v9555_v22  ;;  %v9538_v22 = vld [vmem:[#allocation8 + $0x8c8] sm:$0xf] }
 0x575   : > { %v8663_v15 = vor.u32 %v10941_v41, %v8660_v23  ;;  %v11163_v23 = vld [vmem:[#allocation8 + $0x8d4] sm:$0xf0] }
 0x577   : > { %v4909_v58 = vpop.f32.mrf.mxu3  ;;  %5308 = vmatpush.bf16.msrb.mxu2 %v8663_v15  ;;  %v10937_v15 = vld [vmem:[#allocation8 + $0x1cc] sm:$0xf] }
 0x578   : > { %v4991_v27 = vpop.f32.mrf.mxu2  ;;  %v10909_v58 = vld [vmem:[#allocation8 + $0xec] sm:$0xf] }
 0x579   : > { %v4870_v50 = vpop.f32.mrf.mxu1 }
 0x57a   : > { %v4952_v42 = vpop.f32.mrf.mxu0  ;;  %v4871_v60 = vadd.f32 %v4870_v50, %v13655_v28  ;;  %v8532_v50 = vld [vmem:[#allocation8 + $0xf8] sm:$0xf0] }
 0x57b   : > { %v8535_v27 = vor.u32 %v10909_v58, %v8532_v50  ;;  %v8644_v58 = vld [vmem:[#allocation8 + $0x1d8] sm:$0xf0] }
 0x57c   : > { %5033 = vmatmul.bf16.gmra.mxu1 %v13179_v13  ;;  %5074 = vmatmul.bf16.gmra.mxu3 %v13183_v18  ;;  %v8647_v50 = vor.u32 %v10937_v15, %v8644_v58  ;;  %v9522_v58 = vld [vmem:[#allocation8 + $0x8a8] sm:$0xf] }
 0x57d   : > { %5115 = vmatmul.bf16.gmra.mxu0 %v13197_v7  ;;  %5156 = vmatmul.bf16.gmra.mxu2 %v13202_v47 }
 0x57e   : > { %5267 = vmatpush.bf16.msrb.mxu0 %v8535_v27  ;;  %5309 = vmatpush.bf16.msrb.mxu2 %v8647_v50  ;;  %v11159_v50 = vld [vmem:[#allocation8 + $0x8b4] sm:$0xf0] }
 0x57f   : > { %v4911_v46 = vpop.f32.mrf.mxu3 }
 0x580   : > { %v4912_v30 = vadd.f32 %v4911_v46, %v4871_v60  ;;  %v4993_v29 = vpop.f32.mrf.mxu2 }
 0x581   : > { %v4872_v24 = vpop.f32.mrf.mxu1 }
 0x582   : > { %v4953_v25 = vadd.f32 %v4952_v42, %v4912_v30  ;;  %v4954_v34 = vpop.f32.mrf.mxu0  ;;  %v9666_v24 = vld [vmem:[#allocation8 + $0x9c8] sm:$0xf] }
 0x584   : > { %v13669_v8 = vadd.f32 %v4993_v29, %v4953_v25  ;;  %v11195_v29 = vld [vmem:[#allocation8 + $0x9d4] sm:$0xf0] }
 0x585   : > { %v9667_v34 = vor.u32 %v11195_v29, %v9666_v24 }
 0x587   : > { %v4913_v3 = vpop.f32.mrf.mxu3  ;;  %5227 = vmatpush.bf16.msrb.mxu3 %v9667_v34  ;;  %v11191_v34 = vld [vmem:[#allocation8 + $0x9b4] sm:$0xf0] }
 0x588   : > { %v4995_v46 = vpop.f32.mrf.mxu2  ;;  %v9539_v3 = vor.u32 %v11163_v23, %v9538_v22 }
 0x589   : > { %v4874_v60 = vpop.f32.mrf.mxu1  ;;  %v8516_v46 = vld [vmem:[#allocation8 + $0xd8] sm:$0xf0] }
 0x58a   : > { %v4956_v42 = vpop.f32.mrf.mxu0  ;;  %v4875_v30 = vadd.f32 %v4874_v60, %v13655_v28  ;;  %5186 = vmatpush.bf16.msrb.mxu1 %v9539_v3  ;;  %v10905_v60 = vld [vmem:[#allocation8 + $0xcc] sm:$0xf] }
 0x58c   : > { %5037 = vmatmul.bf16.gmra.mxu1 %v13197_v7  ;;  %5078 = vmatmul.bf16.gmra.mxu3 %v13202_v47 }
 0x58d   : > { %5119 = vmatmul.bf16.gmra.mxu0 %v13217_v5  ;;  %5160 = vmatmul.bf16.gmra.mxu2 %v13222_v56 }
 0x58f   : > { %v4915_v4 = vpop.f32.mrf.mxu3 }
 0x590   : > { %v4916_v48 = vadd.f32 %v4915_v4, %v4875_v30  ;;  %v4997_v25 = vpop.f32.mrf.mxu2  ;;  %v8519_v30 = vor.u32 %v10905_v60, %v8516_v46  ;;  %v9523_v60 = vor.u32 %v11159_v50, %v9522_v58  ;;  %v8628_v46 = vld [vmem:[#allocation8 + $0x1b8] sm:$0xf0] }
 0x591   : > { %v4876_v19 = vpop.f32.mrf.mxu1 }
 0x592   : > { %v4957_v6 = vadd.f32 %v4956_v42, %v4916_v48  ;;  %v4958_v61 = vpop.f32.mrf.mxu0  ;;  %5268 = vmatpush.bf16.msrb.mxu0 %v8519_v30  ;;  %5187 = vmatpush.bf16.msrb.mxu1 %v9523_v60  ;;  %v9506_v60 = vld [vmem:[#allocation8 + $0x888] sm:$0xf] }
 0x594   : > { %v13676_v41 = vadd.f32 %v4997_v25, %v4957_v6  ;;  %v9650_v25 = vld [vmem:[#allocation8 + $0x9a8] sm:$0xf] }
 0x595   : > { %v9651_v22 = vor.u32 %v11191_v34, %v9650_v25 }
 0x597   : > { %v4917_v27 = vpop.f32.mrf.mxu3  ;;  %5228 = vmatpush.bf16.msrb.mxu3 %v9651_v22  ;;  %v11187_v22 = vld [vmem:[#allocation8 + $0x994] sm:$0xf0] }
 0x598   : > { %v4999_v19 = vpop.f32.mrf.mxu2  ;;  %v10933_v27 = vld [vmem:[#allocation8 + $0x1ac] sm:$0xf] }
 0x599   : > { %v4878_v4 = vpop.f32.mrf.mxu1  ;;  %v8631_v30 = vor.u32 %v10933_v27, %v8628_v46  ;;  %v10901_v19 = vld [vmem:[#allocation8 + $0xac] sm:$0xf]  ;;  %v11155_v46 = vld [vmem:[#allocation8 + $0x894] sm:$0xf0] }
 0x59a   : > { %v4960_v42 = vpop.f32.mrf.mxu0  ;;  %v4879_v48 = vadd.f32 %v4878_v4, %v13655_v28 }
 0x59b   : > { %5310 = vmatpush.bf16.msrb.mxu2 %v8631_v30  ;;  %v10929_v30 = vld [vmem:[#allocation8 + $0x18c] sm:$0xf] }
 0x59c   : > { %5041 = vmatmul.bf16.gmra.mxu1 %v13217_v5  ;;  %5082 = vmatmul.bf16.gmra.mxu3 %v13222_v56 }
 0x59d   : > { %5123 = vmatmul.bf16.gmra.mxu0 %v13240_v52  ;;  %5164 = vmatmul.bf16.gmra.mxu2 %v13245_v9 }
 0x59f   : > { %v4919_v24 = vpop.f32.mrf.mxu3 }
 0x5a0   : > { %v4920_v29 = vadd.f32 %v4919_v24, %v4879_v48  ;;  %v5001_v61 = vpop.f32.mrf.mxu2  ;;  %v8500_v48 = vld [vmem:[#allocation8 + $0xb8] sm:$0xf0] }
 0x5a1   : > { %v4880_v6 = vpop.f32.mrf.mxu1  ;;  %v8503_v24 = vor.u32 %v10901_v19, %v8500_v48  ;;  %v8612_v19 = vld [vmem:[#allocation8 + $0x198] sm:$0xf0] }
 0x5a2   : > { %v4961_v23 = vadd.f32 %v4960_v42, %v4920_v29  ;;  %v4962_v15 = vpop.f32.mrf.mxu0  ;;  %v8615_v48 = vor.u32 %v10929_v30, %v8612_v19 }
 0x5a3   : > { %5269 = vmatpush.bf16.msrb.mxu0 %v8503_v24 }
 0x5a4   : > { %v13683_v3 = vadd.f32 %v5001_v61, %v4961_v23  ;;  %v9634_v61 = vld [vmem:[#allocation8 + $0x988] sm:$0xf]  ;;  %5311 = vmatpush.bf16.msrb.mxu2 %v8615_v48 }
 0x5a5   : > { %v9635_v58 = vor.u32 %v11187_v22, %v9634_v61  ;;  %v9618_v61 = vld [vmem:[#allocation8 + $0x968] sm:$0xf] }
 0x5a6   : > { %v9474_v48 = vld [vmem:[#allocation8 + $0x848] sm:$0xf] }
 0x5a7   : > { %v4921_v4 = vpop.f32.mrf.mxu3  ;;  %5229 = vmatpush.bf16.msrb.mxu3 %v9635_v58  ;;  %v11183_v58 = vld [vmem:[#allocation8 + $0x974] sm:$0xf0] }
 0x5a8   : > { %v5003_v39 = vpop.f32.mrf.mxu2  ;;  %v9507_v4 = vor.u32 %v11155_v46, %v9506_v60  ;;  %v8468_v60 = vld [vmem:[#allocation8 + $0x78] sm:$0xf0]  ;;  %v10925_v46 = vld [vmem:[#allocation8 + $0x16c] sm:$0xf] }
 0x5a9   : > { %v4882_v6 = vpop.f32.mrf.mxu1 }
 0x5aa   : > { %v4964_v42 = vpop.f32.mrf.mxu0  ;;  %v4883_v29 = vadd.f32 %v4882_v6, %v13655_v28  ;;  %5188 = vmatpush.bf16.msrb.mxu1 %v9507_v4  ;;  %v10897_v6 = vld [vmem:[#allocation8 + $0x8c] sm:$0xf]  ;;  %v8596_v4 = vld [vmem:[#allocation8 + $0x178] sm:$0xf0] }
 0x5ab   : > { %v8599_v19 = vor.u32 %v10925_v46, %v8596_v4 }
 0x5ac   : > { %5045 = vmatmul.bf16.gmra.mxu1 %v13240_v52  ;;  %5086 = vmatmul.bf16.gmra.mxu3 %v13245_v9 }
 0x5ad   : > { %5127 = vmatmul.bf16.gmra.mxu0 %v13265_v43  ;;  %5168 = vmatmul.bf16.gmra.mxu2 %v13269_v14 }
 0x5ae   : > { %5312 = vmatpush.bf16.msrb.mxu2 %v8599_v19 }
 0x5af   : > { %v4923_v25 = vpop.f32.mrf.mxu3 }
 0x5b0   : > { %v4924_v34 = vadd.f32 %v4923_v25, %v4883_v29  ;;  %v5005_v15 = vpop.f32.mrf.mxu2  ;;  %v8484_v29 = vld [vmem:[#allocation8 + $0x98] sm:$0xf0] }
 0x5b1   : > { %v4884_v23 = vpop.f32.mrf.mxu1  ;;  %v8487_v25 = vor.u32 %v10897_v6, %v8484_v29  ;;  %v9602_v6 = vld [vmem:[#allocation8 + $0x948] sm:$0xf] }
 0x5b2   : > { %v4965_v39 = vadd.f32 %v4964_v42, %v4924_v34  ;;  %v4966_v50 = vpop.f32.mrf.mxu0  ;;  %v9490_v42 = vld [vmem:[#allocation8 + $0x868] sm:$0xf]  ;;  %v11151_v34 = vld [vmem:[#allocation8 + $0x874] sm:$0xf0] }
 0x5b3   : > { %5270 = vmatpush.bf16.msrb.mxu0 %v8487_v25  ;;  %v10893_v50 = vld [vmem:[#allocation8 + $0x6c] sm:$0xf] }
 0x5b4   : > { %v13690_v27 = vadd.f32 %v5005_v15, %v4965_v39  ;;  %v9491_v15 = vor.u32 %v11151_v34, %v9490_v42  ;;  %v9619_v39 = vor.u32 %v11183_v58, %v9618_v61  ;;  %v8471_v30 = vor.u32 %v10893_v50, %v8468_v60  ;;  %v11179_v42 = vld [vmem:[#allocation8 + $0x954] sm:$0xf0]  ;;  %v8452_v58 = vld [vmem:[#allocation8 + $0x58] sm:$0xf0]  ;;  %v10921_v50 = vld [vmem:[#allocation8 + $0x14c] sm:$0xf] }
 0x5b5   : > { %v9603_v61 = vor.u32 %v11179_v42, %v9602_v6  ;;  %v8583_v4 = vor.u32 %v10921_v50, %v8580_v1  ;;  %v8436_v6 = vld [vmem:[#allocation8 + $0x38] sm:$0xf0]  ;;  %v9442_v1 = vld [vmem:[#allocation8 + $0x808] sm:$0xf] }
 0x5b6   : > { %5189 = vmatpush.bf16.msrb.mxu1 %v9491_v15  ;;  %5230 = vmatpush.bf16.msrb.mxu3 %v9619_v39  ;;  %v10889_v15 = vld [vmem:[#allocation8 + $0x4c] sm:$0xf]  ;;  %v8564_v42 = vld [vmem:[#allocation8 + $0x138] sm:$0xf0] }
 0x5b7   : > { %v4925_v24 = vpop.f32.mrf.mxu3  ;;  %5271 = vmatpush.bf16.msrb.mxu0 %v8471_v30  ;;  %v8455_v21 = vor.u32 %v10889_v15, %v8452_v58  ;;  %v9459_v30 = vor.u32 %v11143_v38, %v9458_v59  ;;  %5313 = vmatpush.bf16.msrb.mxu2 %v8583_v4  ;;  %v9570_v15 = vld [vmem:[#allocation8 + $0x908] sm:$0xf]  ;;  %v11171_v38 = vld [vmem:[#allocation8 + $0x914] sm:$0xf0]  ;;  %v8420_v50 = vld [vmem:[#allocation8 + $0x18] sm:$0xf0] }
 0x5b8   : > { %v5007_v49 = vpop.f32.mrf.mxu2  ;;  %v11147_v24 = vld [vmem:[#allocation8 + $0x854] sm:$0xf0]  ;;  %v9571_v59 = vor.u32 %v11171_v38, %v9570_v15  ;;  %v8548_v4 = vld [vmem:[#allocation8 + $0x118] sm:$0xf0] }
 0x5b9   : > { %v4886_v23 = vpop.f32.mrf.mxu1  ;;  %v9475_v25 = vor.u32 %v11147_v24, %v9474_v48  ;;  %v10885_v24 = vld [vmem:[#allocation8 + $0x2c] sm:$0xf] }
 0x5ba   : > { %v4968_v22 = vpop.f32.mrf.mxu0  ;;  %v4887_v49 = vadd.f32 %v4886_v23, %v13655_v28  ;;  %5231 = vmatpush.bf16.msrb.mxu3 %v9603_v61  ;;  %v10881_v61 = vld [vmem:[#allocation8 + $0xc] sm:$0xf] }
 0x5bb   : > { %5190 = vmatpush.bf16.msrb.mxu1 %v9475_v25  ;;  %5272 = vmatpush.bf16.msrb.mxu0 %v8455_v21  ;;  %v8439_v25 = vor.u32 %v10885_v24, %v8436_v6 }
 0x5bc   : > { %5049 = vmatmul.bf16.gmra.mxu1 %v13265_v43  ;;  %5090 = vmatmul.bf16.gmra.mxu3 %v13269_v14 }
 0x5bd   : > { %5131 = vmatmul.bf16.gmra.mxu0 %v13295_v35  ;;  %5172 = vmatmul.bf16.gmra.mxu2 %v13304_v32 }
 0x5bf   : > { %v4927_v29 = vpop.f32.mrf.mxu3  ;;  %5191 = vmatpush.bf16.msrb.mxu1 %v9459_v30  ;;  %5273 = vmatpush.bf16.msrb.mxu0 %v8439_v25 }
 0x5c0   : > { %v4928_v34 = vadd.f32 %v4927_v29, %v4887_v49  ;;  %v5009_v60 = vpop.f32.mrf.mxu2  ;;  %v11175_v49 = vld [vmem:[#allocation8 + $0x934] sm:$0xf0]  ;;  %v10917_v29 = vld [vmem:[#allocation8 + $0x12c] sm:$0xf] }
 0x5c1   : > { %v4888_v23 = vpop.f32.mrf.mxu1  ;;  %v9587_v48 = vor.u32 %v11175_v49, %v9586_v20  ;;  %v10913_v20 = vld [vmem:[#allocation8 + $0x10c] sm:$0xf] }
 0x5c2   : > { %v4969_v46 = vadd.f32 %v4968_v22, %v4928_v34  ;;  %v4970_v39 = vpop.f32.mrf.mxu0  ;;  %v8567_v22 = vor.u32 %v10917_v29, %v8564_v42  ;;  %v11139_v34 = vld [vmem:[#allocation8 + $0x814] sm:$0xf0] }
 0x5c3   : > { %5232 = vmatpush.bf16.msrb.mxu3 %v9587_v48  ;;  %v9443_v21 = vor.u32 %v11139_v34, %v9442_v1  ;;  %v8551_v39 = vor.u32 %v10913_v20, %v8548_v4 }
 0x5c4   : > { %v13697_v19 = vadd.f32 %v5009_v60, %v4969_v46  ;;  %5314 = vmatpush.bf16.msrb.mxu2 %v8567_v22  ;;  %v8423_v46 = vor.u32 %v10881_v61, %v8420_v50 }
 0x5c5   : > { %5192 = vmatpush.bf16.msrb.mxu1 %v9443_v21 }
 0x5c6   : > { %5274 = vmatpush.bf16.msrb.mxu0 %v8423_v46 }
 0x5c7   : > { %v4929_v58 = vpop.f32.mrf.mxu3  ;;  %5233 = vmatpush.bf16.msrb.mxu3 %v9571_v59 }
 0x5c8   : > { %v5011_v60 = vpop.f32.mrf.mxu2  ;;  %5315 = vmatpush.bf16.msrb.mxu2 %v8551_v39 }
 0x5c9   : > { %v4890_v23 = vpop.f32.mrf.mxu1 }
 0x5ca   : > { %v4972_v30 = vpop.f32.mrf.mxu0  ;;  %v4891_v49 = vadd.f32 %v4890_v23, %v13655_v28 }
 0x5cc   : > { %5053 = vmatmul.bf16.gmra.mxu1 %v13295_v35  ;;  %5094 = vmatmul.bf16.gmra.mxu3 %v13304_v32 }
 0x5cd   : > { %5135 = vmatmul.bf16.gmra.mxu0 %v13318_v40  ;;  %5176 = vmatmul.bf16.gmra.mxu2 %v13322_v33 }
 0x5cf   : > { %v4931_v48 = vpop.f32.mrf.mxu3 }
 0x5d0   : > { %v4932_v24 = vadd.f32 %v4931_v48, %v4891_v49  ;;  %v5013_v29 = vpop.f32.mrf.mxu2 }
 0x5d1   : > { %v4892_v6 = vpop.f32.mrf.mxu1 }
 0x5d2   : > { %v4973_v25 = vadd.f32 %v4972_v30, %v4932_v24  ;;  %v4974_v42 = vpop.f32.mrf.mxu0 }
 0x5d4   : > { %v13704_v22 = vadd.f32 %v5013_v29, %v4973_v25 }
 0x5d7   : > { %v4933_v1 = vpop.f32.mrf.mxu3 }
 0x5d8   : > { %v5015_v15 = vpop.f32.mrf.mxu2 }
 0x5d9   : > { %v4894_v34 = vpop.f32.mrf.mxu1 }
 0x5da   : > { %v4976_v58 = vpop.f32.mrf.mxu0  ;;  %v4895_v21 = vadd.f32 %v4894_v34, %v13655_v28 }
 0x5dc   : > { %5057 = vmatmul.bf16.gmra.mxu1 %v13318_v40  ;;  %5098 = vmatmul.bf16.gmra.mxu3 %v13322_v33 }
 0x5dd   : > { %5139 = vmatmul.bf16.gmra.mxu0 %v13334_v55  ;;  %5180 = vmatmul.bf16.gmra.mxu2 %v13340_v0 }
 0x5df   : > { %v4935_v38 = vpop.f32.mrf.mxu3 }
 0x5e0   : > { %v4936_v59 = vadd.f32 %v4935_v38, %v4895_v21  ;;  %v5017_v50 = vpop.f32.mrf.mxu2  ;;  %v11005_v21 = vld [vmem:[#allocation8 + $0x3ec] sm:$0xf]  ;;  %v8916_v38 = vld [vmem:[#allocation8 + $0x3f8] sm:$0xf0] }
 0x5e1   : > { %v4896_v61 = vpop.f32.mrf.mxu1 }
 0x5e2   : > { %v4977_v20 = vadd.f32 %v4976_v58, %v4936_v59  ;;  %v4978_v23 = vpop.f32.mrf.mxu0 }
 0x5e4   : > { %v13711_v60 = vadd.f32 %v5017_v50, %v4977_v20  ;;  %v8919_v50 = vor.u32 %v11005_v21, %v8916_v38 }
 0x5e6   : > { %5390 = vmatpush.bf16.msra.mxu3 %v8919_v50 }
 0x5e7   : > { %v4937_v46 = vpop.f32.mrf.mxu3 }
 0x5e8   : > { %v5019_v4 = vpop.f32.mrf.mxu2  ;;  %v10973_v46 = vld [vmem:[#allocation8 + $0x2ec] sm:$0xf] }
 0x5e9   : > { %v5030_v39 = vpop.f32.mrf.mxu1  ;;  %v8788_v4 = vld [vmem:[#allocation8 + $0x2f8] sm:$0xf0] }
 0x5ea   : > { %v5031_v30 = vadd.f32 %v5030_v39, %v13662_v54  ;;  %v5112_v49 = vpop.f32.mrf.mxu0  ;;  %v11069_v39 = vld [vmem:[#allocation8 + $0x5ec] sm:$0xf] }
 0x5ec   : > { %5193 = vmatmul.bf16.vlgmr.msrb.gmra.mxu1 %v13197_v7  ;;  %5234 = vmatmul.bf16.vlgmr.msrb.gmra.mxu3 %v13202_v47 }
 0x5ed   : > { %5275 = vmatmul.bf16.vlgmr.msrb.gmra.mxu0 %v13125_v17  ;;  %5316 = vmatmul.bf16.vlgmr.msrb.gmra.mxu2 %v13129_v16 }
 0x5ef   : > { %v5071_v28 = vpop.f32.mrf.mxu3 }
 0x5f0   : > { %v5072_v48 = vadd.f32 %v5071_v28, %v5031_v30  ;;  %v5153_v6 = vpop.f32.mrf.mxu2  ;;  %v8791_v30 = vor.u32 %v10973_v46, %v8788_v4  ;;  %v11065_v46 = vld [vmem:[#allocation8 + $0x5cc] sm:$0xf] }
 0x5f1   : > { %v5032_v24 = vpop.f32.mrf.mxu1 }
 0x5f2   : > { %v5113_v29 = vadd.f32 %v5112_v49, %v5072_v48  ;;  %v5114_v25 = vpop.f32.mrf.mxu0  ;;  %v9172_v49 = vld [vmem:[#allocation8 + $0x5f8] sm:$0xf0]  ;;  %5349 = vmatpush.bf16.msra.mxu1 %v8791_v30  ;;  %v11037_v24 = vld [vmem:[#allocation8 + $0x4ec] sm:$0xf] }
 0x5f3   : > { %v9175_v28 = vor.u32 %v11069_v39, %v9172_v49  ;;  %v9156_v39 = vld [vmem:[#allocation8 + $0x5d8] sm:$0xf0] }
 0x5f4   : > { %v13718_v42 = vadd.f32 %v5153_v6, %v5113_v29  ;;  %v9044_v6 = vld [vmem:[#allocation8 + $0x4f8] sm:$0xf0]  ;;  %v9159_v30 = vor.u32 %v11065_v46, %v9156_v39 }
 0x5f5   : > { %5472 = vmatpush.bf16.msra.mxu2 %v9175_v28  ;;  %v9047_v29 = vor.u32 %v11037_v24, %v9044_v6  ;;  %v11033_v28 = vld [vmem:[#allocation8 + $0x4cc] sm:$0xf]  ;;  %v9140_v46 = vld [vmem:[#allocation8 + $0x5b8] sm:$0xf0] }
 0x5f7   : > { %v5073_v1 = vpop.f32.mrf.mxu3  ;;  %5431 = vmatpush.bf16.msra.mxu0 %v9047_v29 }
 0x5f8   : > { %v5155_v54 = vpop.f32.mrf.mxu2 }
 0x5f9   : > { %v5034_v34 = vpop.f32.mrf.mxu1  ;;  %5473 = vmatpush.bf16.msra.mxu2 %v9159_v30  ;;  %v11029_v30 = vld [vmem:[#allocation8 + $0x4ac] sm:$0xf] }
 0x5fa   : > { %v5035_v15 = vadd.f32 %v5034_v34, %v13669_v8  ;;  %v5116_v58 = vpop.f32.mrf.mxu0 }
 0x5fc   : > { %5197 = vmatmul.bf16.gmra.mxu1 %v13217_v5  ;;  %5238 = vmatmul.bf16.gmra.mxu3 %v13222_v56 }
 0x5fd   : > { %5279 = vmatmul.bf16.gmra.mxu0 %v13145_v51  ;;  %5320 = vmatmul.bf16.gmra.mxu2 %v13149_v44 }
 0x5ff   : > { %v5075_v17 = vpop.f32.mrf.mxu3 }
 0x600   : > { %v5076_v16 = vadd.f32 %v5075_v17, %v5035_v15  ;;  %v5157_v61 = vpop.f32.mrf.mxu2  ;;  %v11001_v17 = vld [vmem:[#allocation8 + $0x3cc] sm:$0xf] }
 0x601   : > { %v5036_v59 = vpop.f32.mrf.mxu1 }
 0x602   : > { %v5117_v20 = vadd.f32 %v5116_v58, %v5076_v16  ;;  %v5118_v23 = vpop.f32.mrf.mxu0  ;;  %v8900_v16 = vld [vmem:[#allocation8 + $0x3d8] sm:$0xf0] }
 0x603   : > { %v8903_v59 = vor.u32 %v11001_v17, %v8900_v16  ;;  %v8772_v23 = vld [vmem:[#allocation8 + $0x2d8] sm:$0xf0] }
 0x604   : > { %v13725_v8 = vadd.f32 %v5157_v61, %v5117_v20  ;;  %v10969_v20 = vld [vmem:[#allocation8 + $0x2cc] sm:$0xf] }
 0x605   : > { %5391 = vmatpush.bf16.msra.mxu3 %v8903_v59  ;;  %v8775_v4 = vor.u32 %v10969_v20, %v8772_v23  ;;  %v11061_v20 = vld [vmem:[#allocation8 + $0x5ac] sm:$0xf] }
 0x607   : > { %v5077_v48 = vpop.f32.mrf.mxu3  ;;  %5350 = vmatpush.bf16.msra.mxu1 %v8775_v4  ;;  %v9143_v4 = vor.u32 %v11061_v20, %v9140_v46  ;;  %v9124_v20 = vld [vmem:[#allocation8 + $0x598] sm:$0xf0] }
 0x608   : > { %v5159_v1 = vpop.f32.mrf.mxu2  ;;  %v9028_v48 = vld [vmem:[#allocation8 + $0x4d8] sm:$0xf0] }
 0x609   : > { %v5038_v25 = vpop.f32.mrf.mxu1  ;;  %v9031_v24 = vor.u32 %v11033_v28, %v9028_v48  ;;  %5474 = vmatpush.bf16.msra.mxu2 %v9143_v4  ;;  %v11025_v4 = vld [vmem:[#allocation8 + $0x48c] sm:$0xf] }
 0x60a   : > { %v5039_v34 = vadd.f32 %v5038_v25, %v13676_v41  ;;  %v5120_v54 = vpop.f32.mrf.mxu0 }
 0x60b   : > { %5432 = vmatpush.bf16.msra.mxu0 %v9031_v24 }
 0x60c   : > { %5201 = vmatmul.bf16.gmra.mxu1 %v13240_v52  ;;  %5242 = vmatmul.bf16.gmra.mxu3 %v13245_v9 }
 0x60d   : > { %5283 = vmatmul.bf16.gmra.mxu0 %v13163_v63  ;;  %5324 = vmatmul.bf16.gmra.mxu2 %v13167_v53 }
 0x60f   : > { %v5079_v15 = vpop.f32.mrf.mxu3 }
 0x610   : > { %v5080_v58 = vadd.f32 %v5079_v15, %v5039_v34  ;;  %v5161_v38 = vpop.f32.mrf.mxu2  ;;  %v10997_v15 = vld [vmem:[#allocation8 + $0x3ac] sm:$0xf] }
 0x611   : > { %v5040_v21 = vpop.f32.mrf.mxu1 }
 0x612   : > { %v5121_v61 = vadd.f32 %v5120_v54, %v5080_v58  ;;  %v5122_v50 = vpop.f32.mrf.mxu0  ;;  %v8884_v58 = vld [vmem:[#allocation8 + $0x3b8] sm:$0xf0] }
 0x613   : > { %v8887_v21 = vor.u32 %v10997_v15, %v8884_v58  ;;  %v8756_v50 = vld [vmem:[#allocation8 + $0x2b8] sm:$0xf0] }
 0x614   : > { %v13732_v41 = vadd.f32 %v5161_v38, %v5121_v61  ;;  %v10965_v61 = vld [vmem:[#allocation8 + $0x2ac] sm:$0xf] }
 0x615   : > { %5392 = vmatpush.bf16.msra.mxu3 %v8887_v21  ;;  %v8759_v23 = vor.u32 %v10965_v61, %v8756_v50  ;;  %v11057_v61 = vld [vmem:[#allocation8 + $0x58c] sm:$0xf] }
 0x617   : > { %v5081_v49 = vpop.f32.mrf.mxu3  ;;  %5351 = vmatpush.bf16.msra.mxu1 %v8759_v23  ;;  %v9127_v23 = vor.u32 %v11057_v61, %v9124_v20  ;;  %v10985_v61 = vld [vmem:[#allocation8 + $0x34c] sm:$0xf] }
 0x618   : > { %v5163_v29 = vpop.f32.mrf.mxu2  ;;  %v9012_v49 = vld [vmem:[#allocation8 + $0x4b8] sm:$0xf0] }
 0x619   : > { %v5042_v6 = vpop.f32.mrf.mxu1  ;;  %v9015_v28 = vor.u32 %v11029_v30, %v9012_v49  ;;  %5475 = vmatpush.bf16.msra.mxu2 %v9127_v23  ;;  %v8836_v23 = vld [vmem:[#allocation8 + $0x358] sm:$0xf0] }
 0x61a   : > { %v5043_v25 = vadd.f32 %v5042_v6, %v13683_v3  ;;  %v5124_v1 = vpop.f32.mrf.mxu0 }
 0x61b   : > { %5433 = vmatpush.bf16.msra.mxu0 %v9015_v28 }
 0x61c   : > { %5205 = vmatmul.bf16.gmra.mxu1 %v13265_v43  ;;  %5246 = vmatmul.bf16.gmra.mxu3 %v13269_v14 }
 0x61d   : > { %5287 = vmatmul.bf16.gmra.mxu0 %v13179_v13  ;;  %5328 = vmatmul.bf16.gmra.mxu2 %v13183_v18 }
 0x61f   : > { %v5083_v34 = vpop.f32.mrf.mxu3 }
 0x620   : > { %v5084_v54 = vadd.f32 %v5083_v34, %v5043_v25  ;;  %v5165_v16 = vpop.f32.mrf.mxu2  ;;  %v10993_v34 = vld [vmem:[#allocation8 + $0x38c] sm:$0xf] }
 0x621   : > { %v5044_v17 = vpop.f32.mrf.mxu1 }
 0x622   : > { %v5125_v38 = vadd.f32 %v5124_v1, %v5084_v54  ;;  %v5126_v59 = vpop.f32.mrf.mxu0  ;;  %v8868_v54 = vld [vmem:[#allocation8 + $0x398] sm:$0xf0] }
 0x623   : > { %v8871_v17 = vor.u32 %v10993_v34, %v8868_v54  ;;  %v8740_v59 = vld [vmem:[#allocation8 + $0x298] sm:$0xf0] }
 0x624   : > { %v13739_v3 = vadd.f32 %v5165_v16, %v5125_v38  ;;  %v10961_v38 = vld [vmem:[#allocation8 + $0x28c] sm:$0xf]  ;;  %v8852_v34 = vld [vmem:[#allocation8 + $0x378] sm:$0xf0] }
 0x625   : > { %5393 = vmatpush.bf16.msra.mxu3 %v8871_v17  ;;  %v8743_v50 = vor.u32 %v10961_v38, %v8740_v59  ;;  %v11053_v17 = vld [vmem:[#allocation8 + $0x56c] sm:$0xf]  ;;  %v8708_v59 = vld [vmem:[#allocation8 + $0x258] sm:$0xf0] }
 0x626   : > { %v10953_v38 = vld [vmem:[#allocation8 + $0x24c] sm:$0xf] }
 0x627   : > { %v5085_v39 = vpop.f32.mrf.mxu3  ;;  %5352 = vmatpush.bf16.msra.mxu1 %v8743_v50  ;;  %v8711_v20 = vor.u32 %v10953_v38, %v8708_v59  ;;  %v11013_v38 = vld [vmem:[#allocation8 + $0x42c] sm:$0xf]  ;;  %v8948_v59 = vld [vmem:[#allocation8 + $0x438] sm:$0xf0] }
 0x628   : > { %v5167_v24 = vpop.f32.mrf.mxu2  ;;  %v8996_v39 = vld [vmem:[#allocation8 + $0x498] sm:$0xf0] }
 0x629   : > { %v5046_v48 = vpop.f32.mrf.mxu1  ;;  %v8999_v30 = vor.u32 %v11025_v4, %v8996_v39  ;;  %v10957_v24 = vld [vmem:[#allocation8 + $0x26c] sm:$0xf]  ;;  %v8839_v4 = vor.u32 %v10985_v61, %v8836_v23 }
 0x62a   : > { %v5047_v6 = vadd.f32 %v5046_v48, %v13690_v27  ;;  %v5128_v29 = vpop.f32.mrf.mxu0  ;;  %v11017_v39 = vld [vmem:[#allocation8 + $0x44c] sm:$0xf] }
 0x62b   : > { %5434 = vmatpush.bf16.msra.mxu0 %v8999_v30  ;;  %v8964_v30 = vld [vmem:[#allocation8 + $0x458] sm:$0xf0]  ;;  %v11045_v61 = vld [vmem:[#allocation8 + $0x52c] sm:$0xf] }
 0x62c   : > { %5209 = vmatmul.bf16.gmra.mxu1 %v13295_v35  ;;  %5250 = vmatmul.bf16.gmra.mxu3 %v13304_v32  ;;  %v10945_v23 = vld [vmem:[#allocation8 + $0x20c] sm:$0xf] }
 0x62d   : > { %5291 = vmatmul.bf16.gmra.mxu0 %v13197_v7  ;;  %5332 = vmatmul.bf16.gmra.mxu2 %v13202_v47 }
 0x62f   : > { %v5087_v25 = vpop.f32.mrf.mxu3 }
 0x630   : > { %v5088_v1 = vadd.f32 %v5087_v25, %v5047_v6  ;;  %v5169_v58 = vpop.f32.mrf.mxu2  ;;  %v8724_v6 = vld [vmem:[#allocation8 + $0x278] sm:$0xf0] }
 0x631   : > { %v5048_v15 = vpop.f32.mrf.mxu1 }
 0x632   : > { %v5129_v16 = vadd.f32 %v5128_v29, %v5088_v1  ;;  %v5130_v21 = vpop.f32.mrf.mxu0  ;;  %v10989_v29 = vld [vmem:[#allocation8 + $0x36c] sm:$0xf]  ;;  %v8727_v1 = vor.u32 %v10957_v24, %v8724_v6  ;;  %v8967_v6 = vor.u32 %v11017_v39, %v8964_v30 }
 0x633   : > { %v8855_v54 = vor.u32 %v10989_v29, %v8852_v34  ;;  %v11021_v15 = vld [vmem:[#allocation8 + $0x46c] sm:$0xf]  ;;  %v9108_v21 = vld [vmem:[#allocation8 + $0x578] sm:$0xf0] }
 0x634   : > { %v13746_v27 = vadd.f32 %v5169_v58, %v5129_v16  ;;  %v8980_v58 = vld [vmem:[#allocation8 + $0x478] sm:$0xf0]  ;;  %5353 = vmatpush.bf16.msra.mxu1 %v8727_v1  ;;  %v10977_v39 = vld [vmem:[#allocation8 + $0x30c] sm:$0xf] }
 0x635   : > { %v8983_v16 = vor.u32 %v11021_v15, %v8980_v58  ;;  %5394 = vmatpush.bf16.msra.mxu3 %v8855_v54  ;;  %v9092_v29 = vld [vmem:[#allocation8 + $0x558] sm:$0xf0]  ;;  %v10949_v15 = vld [vmem:[#allocation8 + $0x22c] sm:$0xf] }
 0x636   : > { %v8692_v58 = vld [vmem:[#allocation8 + $0x238] sm:$0xf0] }
 0x637   : > { %v5089_v46 = vpop.f32.mrf.mxu3  ;;  %5435 = vmatpush.bf16.msra.mxu0 %v8983_v16  ;;  %v8695_v16 = vor.u32 %v10949_v15, %v8692_v58  ;;  %v9060_v58 = vld [vmem:[#allocation8 + $0x518] sm:$0xf0] }
 0x638   : > { %v5171_v28 = vpop.f32.mrf.mxu2  ;;  %5354 = vmatpush.bf16.msra.mxu1 %v8711_v20  ;;  %v9076_v20 = vld [vmem:[#allocation8 + $0x538] sm:$0xf0] }
 0x639   : > { %v5050_v49 = vpop.f32.mrf.mxu1  ;;  %5395 = vmatpush.bf16.msra.mxu3 %v8839_v4 }
 0x63a   : > { %v5051_v48 = vadd.f32 %v5050_v49, %v13697_v19  ;;  %v5132_v25 = vpop.f32.mrf.mxu0  ;;  %v9111_v19 = vor.u32 %v11053_v17, %v9108_v21  ;;  %v11049_v49 = vld [vmem:[#allocation8 + $0x54c] sm:$0xf] }
 0x63b   : > { %v9095_v34 = vor.u32 %v11049_v49, %v9092_v29  ;;  %v10981_v17 = vld [vmem:[#allocation8 + $0x32c] sm:$0xf]  ;;  %5436 = vmatpush.bf16.msra.mxu0 %v8967_v6  ;;  %v8804_v49 = vld [vmem:[#allocation8 + $0x318] sm:$0xf0] }
 0x63c   : > { %5213 = vmatmul.bf16.gmra.mxu1 %v13318_v40  ;;  %5254 = vmatmul.bf16.gmra.mxu3 %v13322_v33  ;;  %v8932_v6 = vld [vmem:[#allocation8 + $0x418] sm:$0xf0]  ;;  %v11041_v29 = vld [vmem:[#allocation8 + $0x50c] sm:$0xf] }
 0x63d   : > { %5295 = vmatmul.bf16.gmra.mxu0 %v13217_v5  ;;  %5336 = vmatmul.bf16.gmra.mxu2 %v13222_v56 }
 0x63e   : > { %5476 = vmatpush.bf16.msra.mxu2 %v9111_v19  ;;  %5355 = vmatpush.bf16.msra.mxu1 %v8695_v16 }
 0x63f   : > { %v5091_v50 = vpop.f32.mrf.mxu3 }
 0x640   : > { %v5092_v46 = vadd.f32 %v5091_v50, %v5051_v48  ;;  %v5173_v24 = vpop.f32.mrf.mxu2  ;;  %v8820_v48 = vld [vmem:[#allocation8 + $0x338] sm:$0xf0]  ;;  %v8951_v50 = vor.u32 %v11013_v38, %v8948_v59 }
 0x641   : > { %v5052_v28 = vpop.f32.mrf.mxu1  ;;  %v8823_v19 = vor.u32 %v10981_v17, %v8820_v48 }
 0x642   : > { %v5133_v1 = vadd.f32 %v5132_v25, %v5092_v46  ;;  %v5134_v54 = vpop.f32.mrf.mxu0  ;;  %5477 = vmatpush.bf16.msra.mxu2 %v9095_v34  ;;  %v9079_v25 = vor.u32 %v11045_v61, %v9076_v20  ;;  %v8676_v46 = vld [vmem:[#allocation8 + $0x218] sm:$0xf0]  ;;  %5437 = vmatpush.bf16.msra.mxu0 %v8951_v50  ;;  %v8807_v28 = vor.u32 %v10977_v39, %v8804_v49 }
 0x643   : > { %5396 = vmatpush.bf16.msra.mxu3 %v8823_v19  ;;  %v8679_v4 = vor.u32 %v10945_v23, %v8676_v46  ;;  %v9063_v54 = vor.u32 %v11041_v29, %v9060_v58 }
 0x644   : > { %v13753_v21 = vadd.f32 %v5173_v24, %v5133_v1  ;;  %v11009_v24 = vld [vmem:[#allocation8 + $0x40c] sm:$0xf] }
 0x645   : > { %5356 = vmatpush.bf16.msra.mxu1 %v8679_v4  ;;  %v8935_v15 = vor.u32 %v11009_v24, %v8932_v6 }
 0x646   : > { %5478 = vmatpush.bf16.msra.mxu2 %v9079_v25 }
 0x647   : > { %v5093_v30 = vpop.f32.mrf.mxu3  ;;  %5397 = vmatpush.bf16.msra.mxu3 %v8807_v28  ;;  %5438 = vmatpush.bf16.msra.mxu0 %v8935_v15 }
 0x648   : > { %v5175_v34 = vpop.f32.mrf.mxu2 }
 0x649   : > { %v5054_v1 = vpop.f32.mrf.mxu1 }
 0x64a   : > { %v5055_v17 = vadd.f32 %v5054_v1, %v13704_v22  ;;  %v5136_v16 = vpop.f32.mrf.mxu0  ;;  %5479 = vmatpush.bf16.msra.mxu2 %v9063_v54 }
 0x64c   : > { %5217 = vmatmul.bf16.gmra.mxu1 %v13334_v55  ;;  %5258 = vmatmul.bf16.gmra.mxu3 %v13340_v0 }
 0x64d   : > { %5299 = vmatmul.bf16.gmra.mxu0 %v13240_v52  ;;  %5340 = vmatmul.bf16.gmra.mxu2 %v13245_v9 }
 0x64f   : > { %v5095_v48 = vpop.f32.mrf.mxu3 }
 0x650   : > { %v5096_v19 = vadd.f32 %v5095_v48, %v5055_v17  ;;  %v5177_v59 = vpop.f32.mrf.mxu2  ;;  %v11865_v17 = vld [vmem:[#allocation9] sm:$0xf] }
 0x651   : > { %v5056_v38 = vpop.f32.mrf.mxu1  ;;  %v13770_v54 = vperm.slane %v11865_v17, 3 }
 0x652   : > { %v5137_v61 = vadd.f32 %v5136_v16, %v5096_v19  ;;  %v5138_v50 = vpop.f32.mrf.mxu0 }
 0x654   : > { %v13760_v22 = vadd.f32 %v5177_v59, %v5137_v61 }
 0x657   : > { %v5097_v20 = vpop.f32.mrf.mxu3 }
 0x658   : > { %v5179_v23 = vpop.f32.mrf.mxu2 }
 0x659   : > { %v5058_v25 = vpop.f32.mrf.mxu1 }
 0x65a   : > { %v5059_v46 = vadd.f32 %v5058_v25, %v13711_v60  ;;  %v5140_v39 = vpop.f32.mrf.mxu0 }
 0x65c   : > { %5221 = vmatmul.bf16.gmra.mxu1 %v13350_v36  ;;  %5262 = vmatmul.bf16.gmra.mxu3 %v13352_v11 }
 0x65d   : > { %5303 = vmatmul.bf16.gmra.mxu0 %v13265_v43  ;;  %5344 = vmatmul.bf16.gmra.mxu2 %v13269_v14 }
 0x65f   : > { %v5099_v30 = vpop.f32.mrf.mxu3 }
 0x660   : > { %v5100_v4 = vadd.f32 %v5099_v30, %v5059_v46  ;;  %v5181_v28 = vpop.f32.mrf.mxu2 }
 0x661   : > { %v5060_v49 = vpop.f32.mrf.mxu1 }
 0x662   : > { %v5141_v24 = vadd.f32 %v5140_v39, %v5100_v4  ;;  %v5142_v6 = vpop.f32.mrf.mxu0 }
 0x664   : > { %v13767_v29 = vadd.f32 %v5181_v28, %v5141_v24  ;;  %v5681_v24 = vmax.f32 %v13479_v2, 0.0 }
 0x667   : > { %v5101_v1 = vpop.f32.mrf.mxu3 }
 0x668   : > { %v5183_v34 = vpop.f32.mrf.mxu2 }
 0x669   : > { %v5194_v60 = vpop.f32.mrf.mxu1 }
 0x66a   : > { %v5195_v15 = vadd.f32 %v5194_v60, %v13718_v42  ;;  %v5276_v58 = vpop.f32.mrf.mxu0  ;;  %v5677_v42 = vmax.f32 %v13469_v12, 0.0  ;;  %v11133_v60 = vld [vmem:[#allocation8 + $0x7ec] sm:$0xf] }
 0x66b   : > { %v5277_v48 = vadd.f32 %v5276_v58, %v13770_v54  ;;  %v11101_v58 = vld [vmem:[#allocation8 + $0x6ec] sm:$0xf] }
 0x66c   : > { %5357 = vmatmul.bf16.vlgmr.msra.gmra.mxu1 %v13145_v51  ;;  %5398 = vmatmul.bf16.vlgmr.msra.gmra.mxu3 %v13149_v44 }
 0x66d   : > { %5439 = vmatmul.bf16.vlgmr.msra.gmra.mxu0 %v13163_v63  ;;  %5480 = vmatmul.bf16.vlgmr.msra.gmra.mxu2 %v13167_v53 }
 0x66f   : > { %v5235_v16 = vpop.f32.mrf.mxu3 }
 0x670   : > { %v5236_v19 = vadd.f32 %v5235_v16, %v5195_v15  ;;  %v5317_v59 = vpop.f32.mrf.mxu2  ;;  %v9428_v15 = vld [vmem:[#allocation8 + $0x7f8] sm:$0xf0] }
 0x671   : > { %v5196_v38 = vpop.f32.mrf.mxu1  ;;  %v13778_v50 = vadd.f32 %v5317_v59, %v5277_v48  ;;  %v9431_v48 = vor.u32 %v11133_v60, %v9428_v15  ;;  %v9684_v59 = vld [vmem:[#allocation8 + $0x9f8] sm:$0xf0]  ;;  %v11193_v15 = vld [vmem:[#allocation8 + $0x9cc] sm:$0xf] }
 0x672   : > { %v5679_v61 = vmax.f32 %v5236_v19, 0.0  ;;  %v5278_v20 = vpop.f32.mrf.mxu0  ;;  %v9300_v19 = vld [vmem:[#allocation8 + $0x6f8] sm:$0xf0]  ;;  %v11197_v38 = vld [vmem:[#allocation8 + $0x9ec] sm:$0xf] }
 0x673   : > { %v9303_v2 = vor.u32 %v11101_v58, %v9300_v19  ;;  %v11165_v20 = vld [vmem:[#allocation8 + $0x8ec] sm:$0xf]  ;;  %5554 = vmatpush.bf16.msrb.mxu3 %v9431_v48  ;;  %v9284_v60 = vld [vmem:[#allocation8 + $0x6d8] sm:$0xf0] }
 0x674   : > { %v5709_v25 = vmax.f32 %v5677_v42, %v5679_v61  ;;  %v9687_v61 = vor.u32 %v11197_v38, %v9684_v59  ;;  %v9668_v58 = vld [vmem:[#allocation8 + $0x9d8] sm:$0xf0]  ;;  %v11161_v19 = vld [vmem:[#allocation8 + $0x8cc] sm:$0xf] }
 0x675   : > { %5513 = vmatpush.bf16.msrb.mxu1 %v9303_v2  ;;  %v9540_v38 = vld [vmem:[#allocation8 + $0x8d8] sm:$0xf0] }
 0x676   : > { %5636 = vmatpush.bf16.msrb.mxu2 %v9687_v61 }
 0x677   : > { %v5237_v51 = vpop.f32.mrf.mxu3 }
 0x678   : > { %v5319_v44 = vpop.f32.mrf.mxu2  ;;  %v9556_v51 = vld [vmem:[#allocation8 + $0x8f8] sm:$0xf0] }
 0x679   : > { %v5198_v23 = vpop.f32.mrf.mxu1 }
 0x67a   : > { %v5199_v46 = vadd.f32 %v5198_v23, %v13725_v8  ;;  %v5280_v39 = vpop.f32.mrf.mxu0 }
 0x67b   : > { %v5281_v30 = vadd.f32 %v5280_v39, %v13770_v54 }
 0x67c   : > { %5361 = vmatmul.bf16.gmra.mxu1 %v13163_v63  ;;  %5402 = vmatmul.bf16.gmra.mxu3 %v13167_v53 }
 0x67d   : > { %5443 = vmatmul.bf16.gmra.mxu0 %v13179_v13  ;;  %5484 = vmatmul.bf16.gmra.mxu2 %v13183_v18 }
 0x67f   : > { %v5239_v12 = vpop.f32.mrf.mxu3 }
 0x680   : > { %v5240_v4 = vadd.f32 %v5239_v12, %v5199_v46  ;;  %v5321_v28 = vpop.f32.mrf.mxu2 }
 0x681   : > { %v5200_v49 = vpop.f32.mrf.mxu1  ;;  %v13787_v1 = vadd.f32 %v5321_v28, %v5281_v30  ;;  %v5685_v30 = vmax.f32 %v13489_v26, 0.0  ;;  %v9543_v26 = vor.u32 %v11161_v19, %v9540_v38  ;;  %v11157_v19 = vld [vmem:[#allocation8 + $0x8ac] sm:$0xf]  ;;  %v9524_v38 = vld [vmem:[#allocation8 + $0x8b8] sm:$0xf0] }
 0x682   : > { %v5683_v6 = vmax.f32 %v5240_v4, 0.0  ;;  %v5282_v8 = vpop.f32.mrf.mxu0 }
 0x683   : > { %v9412_v8 = vld [vmem:[#allocation8 + $0x7d8] sm:$0xf0] }
 0x684   : > { %v5711_v34 = vmax.f32 %v5681_v24, %v5683_v6  ;;  %v11129_v6 = vld [vmem:[#allocation8 + $0x7cc] sm:$0xf] }
 0x686   : > { %v13789_v63 = vmax.f32 %v5709_v25, %v5711_v34  ;;  %v9559_v25 = vor.u32 %v11165_v20, %v9556_v51  ;;  %v11097_v34 = vld [vmem:[#allocation8 + $0x6cc] sm:$0xf] }
 0x687   : > { %v5241_v53 = vpop.f32.mrf.mxu3 }
 0x688   : > { %v5323_v16 = vpop.f32.mrf.mxu2  ;;  %5595 = vmatpush.bf16.msrb.mxu0 %v9559_v25  ;;  %v9415_v53 = vor.u32 %v11129_v6, %v9412_v8  ;;  %v9396_v6 = vld [vmem:[#allocation8 + $0x7b8] sm:$0xf0]  ;;  %v11093_v8 = vld [vmem:[#allocation8 + $0x6ac] sm:$0xf] }
 0x689   : > { %v5202_v17 = vpop.f32.mrf.mxu1  ;;  %v9671_v16 = vor.u32 %v11193_v15, %v9668_v58  ;;  %v9268_v15 = vld [vmem:[#allocation8 + $0x6b8] sm:$0xf0]  ;;  %v11189_v58 = vld [vmem:[#allocation8 + $0x9ac] sm:$0xf] }
 0x68a   : > { %v5203_v42 = vadd.f32 %v5202_v17, %v13732_v41  ;;  %v5284_v23 = vpop.f32.mrf.mxu0  ;;  %v9287_v17 = vor.u32 %v11097_v34, %v9284_v60  ;;  %5555 = vmatpush.bf16.msrb.mxu3 %v9415_v53 }
 0x68b   : > { %v5285_v41 = vadd.f32 %v5284_v23, %v13770_v54  ;;  %5637 = vmatpush.bf16.msrb.mxu2 %v9671_v16 }
 0x68c   : > { %5365 = vmatmul.bf16.gmra.mxu1 %v13179_v13  ;;  %5406 = vmatmul.bf16.gmra.mxu3 %v13183_v18 }
 0x68d   : > { %5447 = vmatmul.bf16.gmra.mxu0 %v13197_v7  ;;  %5488 = vmatmul.bf16.gmra.mxu2 %v13202_v47 }
 0x68e   : > { %5514 = vmatpush.bf16.msrb.mxu1 %v9287_v17  ;;  %5596 = vmatpush.bf16.msrb.mxu0 %v9543_v26  ;;  %v9652_v17 = vld [vmem:[#allocation8 + $0x9b8] sm:$0xf0] }
 0x68f   : > { %v5243_v44 = vpop.f32.mrf.mxu3 }
 0x690   : > { %v5244_v46 = vadd.f32 %v5243_v44, %v5203_v42  ;;  %v5325_v12 = vpop.f32.mrf.mxu2 }
 0x691   : > { %v5204_v39 = vpop.f32.mrf.mxu1  ;;  %v13798_v49 = vadd.f32 %v5325_v12, %v5285_v41  ;;  %v5689_v41 = vmax.f32 %v13499_v31, 0.0  ;;  %v9271_v31 = vor.u32 %v11093_v8, %v9268_v15  ;;  %v9508_v15 = vld [vmem:[#allocation8 + $0x898] sm:$0xf0] }
 0x692   : > { %v5687_v4 = vmax.f32 %v5244_v46, 0.0  ;;  %v5286_v28 = vpop.f32.mrf.mxu0 }
 0x693   : > { %v11125_v28 = vld [vmem:[#allocation8 + $0x7ac] sm:$0xf]  ;;  %5515 = vmatpush.bf16.msrb.mxu1 %v9271_v31 }
 0x694   : > { %v5713_v24 = vmax.f32 %v5685_v30, %v5687_v4  ;;  %v9399_v60 = vor.u32 %v11125_v28, %v9396_v6  ;;  %v11185_v28 = vld [vmem:[#allocation8 + $0x98c] sm:$0xf]  ;;  %v9636_v6 = vld [vmem:[#allocation8 + $0x998] sm:$0xf0] }
 0x695   : > { %v11085_v31 = vld [vmem:[#allocation8 + $0x66c] sm:$0xf] }
 0x696   : > { %5556 = vmatpush.bf16.msrb.mxu3 %v9399_v60  ;;  %v11153_v60 = vld [vmem:[#allocation8 + $0x88c] sm:$0xf] }
 0x697   : > { %v5245_v48 = vpop.f32.mrf.mxu3 }
 0x698   : > { %v5327_v42 = vpop.f32.mrf.mxu2  ;;  %v9655_v48 = vor.u32 %v11189_v58, %v9652_v17 }
 0x699   : > { %v5206_v59 = vpop.f32.mrf.mxu1 }
 0x69a   : > { %v5207_v2 = vadd.f32 %v5206_v59, %v13739_v3  ;;  %v5288_v61 = vpop.f32.mrf.mxu0  ;;  %5638 = vmatpush.bf16.msrb.mxu2 %v9655_v48  ;;  %v9236_v48 = vld [vmem:[#allocation8 + $0x678] sm:$0xf0] }
 0x69b   : > { %v5289_v51 = vadd.f32 %v5288_v61, %v13770_v54 }
 0x69c   : > { %5369 = vmatmul.bf16.gmra.mxu1 %v13197_v7  ;;  %5410 = vmatmul.bf16.gmra.mxu3 %v13202_v47 }
 0x69d   : > { %5451 = vmatmul.bf16.gmra.mxu0 %v13217_v5  ;;  %5492 = vmatmul.bf16.gmra.mxu2 %v13222_v56 }
 0x69f   : > { %v5247_v20 = vpop.f32.mrf.mxu3 }
 0x6a0   : > { %v5248_v23 = vadd.f32 %v5247_v20, %v5207_v2  ;;  %v5329_v44 = vpop.f32.mrf.mxu2  ;;  %v5693_v20 = vmax.f32 %v13509_v62, 0.0  ;;  %v9511_v62 = vor.u32 %v11153_v60, %v9508_v15 }
 0x6a1   : > { %v5208_v25 = vpop.f32.mrf.mxu1  ;;  %v13807_v3 = vadd.f32 %v5329_v44, %v5289_v51 }
 0x6a2   : > { %v5691_v46 = vmax.f32 %v5248_v23, 0.0  ;;  %v5290_v39 = vpop.f32.mrf.mxu0 }
 0x6a3   : > { %v11089_v39 = vld [vmem:[#allocation8 + $0x68c] sm:$0xf] }
 0x6a4   : > { %v5715_v12 = vmax.f32 %v5689_v41, %v5691_v46  ;;  %v11121_v41 = vld [vmem:[#allocation8 + $0x78c] sm:$0xf]  ;;  %v9380_v46 = vld [vmem:[#allocation8 + $0x798] sm:$0xf0] }
 0x6a6   : > { %v13809_v30 = vmax.f32 %v5713_v24, %v5715_v12  ;;  %v9527_v24 = vor.u32 %v11157_v19, %v9524_v38  ;;  %v9383_v12 = vor.u32 %v11121_v41, %v9380_v46  ;;  %v11117_v19 = vld [vmem:[#allocation8 + $0x76c] sm:$0xf] }
 0x6a7   : > { %v5249_v4 = vpop.f32.mrf.mxu3  ;;  %v11113_v41 = vld [vmem:[#allocation8 + $0x74c] sm:$0xf] }
 0x6a8   : > { %v5331_v53 = vpop.f32.mrf.mxu2  ;;  %5597 = vmatpush.bf16.msrb.mxu0 %v9527_v24  ;;  %v9252_v4 = vld [vmem:[#allocation8 + $0x698] sm:$0xf0]  ;;  %5557 = vmatpush.bf16.msrb.mxu3 %v9383_v12 }
 0x6a9   : > { %v5210_v34 = vpop.f32.mrf.mxu1  ;;  %v9255_v8 = vor.u32 %v11089_v39, %v9252_v4  ;;  %v9364_v24 = vld [vmem:[#allocation8 + $0x778] sm:$0xf0] }
 0x6aa   : > { %v5211_v16 = vadd.f32 %v5210_v34, %v13746_v27  ;;  %v5292_v26 = vpop.f32.mrf.mxu0  ;;  %v9639_v34 = vor.u32 %v11185_v28, %v9636_v6  ;;  %v9348_v12 = vld [vmem:[#allocation8 + $0x758] sm:$0xf0] }
 0x6ab   : > { %v5293_v27 = vadd.f32 %v5292_v26, %v13770_v54  ;;  %5516 = vmatpush.bf16.msrb.mxu1 %v9255_v8  ;;  %v9239_v26 = vor.u32 %v11085_v31, %v9236_v48  ;;  %v9351_v6 = vor.u32 %v11113_v41, %v9348_v12  ;;  %v11145_v8 = vld [vmem:[#allocation8 + $0x84c] sm:$0xf] }
 0x6ac   : > { %5373 = vmatmul.bf16.gmra.mxu1 %v13217_v5  ;;  %5414 = vmatmul.bf16.gmra.mxu3 %v13222_v56  ;;  %v11105_v12 = vld [vmem:[#allocation8 + $0x70c] sm:$0xf] }
 0x6ad   : > { %5455 = vmatmul.bf16.gmra.mxu0 %v13240_v52  ;;  %5496 = vmatmul.bf16.gmra.mxu2 %v13245_v9 }
 0x6ae   : > { %5639 = vmatpush.bf16.msrb.mxu2 %v9639_v34  ;;  %5598 = vmatpush.bf16.msrb.mxu0 %v9511_v62  ;;  %v9476_v34 = vld [vmem:[#allocation8 + $0x858] sm:$0xf0] }
 0x6af   : > { %v5251_v59 = vpop.f32.mrf.mxu3  ;;  %5517 = vmatpush.bf16.msrb.mxu1 %v9239_v26  ;;  %v9479_v62 = vor.u32 %v11145_v8, %v9476_v34  ;;  %v11077_v26 = vld [vmem:[#allocation8 + $0x62c] sm:$0xf] }
 0x6b0   : > { %v5252_v42 = vadd.f32 %v5251_v59, %v5211_v16  ;;  %v5333_v61 = vpop.f32.mrf.mxu2  ;;  %v9367_v59 = vor.u32 %v11117_v19, %v9364_v24  ;;  %v9204_v24 = vld [vmem:[#allocation8 + $0x638] sm:$0xf0]  ;;  %v11137_v34 = vld [vmem:[#allocation8 + $0x80c] sm:$0xf] }
 0x6b1   : > { %v5212_v2 = vpop.f32.mrf.mxu1  ;;  %v13818_v23 = vadd.f32 %v5333_v61, %v5293_v27  ;;  %v11149_v27 = vld [vmem:[#allocation8 + $0x86c] sm:$0xf] }
 0x6b2   : > { %v5695_v51 = vmax.f32 %v5252_v42, 0.0  ;;  %v5294_v25 = vpop.f32.mrf.mxu0  ;;  %v9492_v42 = vld [vmem:[#allocation8 + $0x878] sm:$0xf0]  ;;  %v11181_v2 = vld [vmem:[#allocation8 + $0x96c] sm:$0xf]  ;;  %5558 = vmatpush.bf16.msrb.mxu3 %v9367_v59 }
 0x6b3   : > { %v9495_v61 = vor.u32 %v11149_v27, %v9492_v42  ;;  %v9220_v25 = vld [vmem:[#allocation8 + $0x658] sm:$0xf0]  ;;  %v11109_v59 = vld [vmem:[#allocation8 + $0x72c] sm:$0xf] }
 0x6b4   : > { %v13820_v44 = vmax.f32 %v5693_v20, %v5695_v51  ;;  %v9620_v20 = vld [vmem:[#allocation8 + $0x978] sm:$0xf0]  ;;  %v11081_v51 = vld [vmem:[#allocation8 + $0x64c] sm:$0xf] }
 0x6b5   : > { %5599 = vmatpush.bf16.msrb.mxu0 %v9495_v61  ;;  %v9223_v39 = vor.u32 %v11081_v51, %v9220_v25  ;;  %v9332_v27 = vld [vmem:[#allocation8 + $0x738] sm:$0xf0]  ;;  %v11141_v61 = vld [vmem:[#allocation8 + $0x82c] sm:$0xf] }
 0x6b6   : > { %5559 = vmatpush.bf16.msrb.mxu3 %v9351_v6  ;;  %v9588_v51 = vld [vmem:[#allocation8 + $0x938] sm:$0xf0] }
 0x6b7   : > { %v5253_v53 = vpop.f32.mrf.mxu3  ;;  %5518 = vmatpush.bf16.msrb.mxu1 %v9223_v39  ;;  %v9188_v39 = vld [vmem:[#allocation8 + $0x618] sm:$0xf0] }
 0x6b8   : > { %v5335_v17 = vpop.f32.mrf.mxu2  ;;  %v11177_v53 = vld [vmem:[#allocation8 + $0x94c] sm:$0xf]  ;;  %v9316_v6 = vld [vmem:[#allocation8 + $0x718] sm:$0xf0] }
 0x6b9   : > { %v5214_v58 = vpop.f32.mrf.mxu1  ;;  %v5697_v17 = vmax.f32 %v13519_v37, 0.0  ;;  %5600 = vmatpush.bf16.msrb.mxu0 %v9479_v62  ;;  %v9319_v8 = vor.u32 %v11105_v12, %v9316_v6 }
 0x6ba   : > { %v5215_v16 = vadd.f32 %v5214_v58, %v13753_v21  ;;  %v5296_v38 = vpop.f32.mrf.mxu0  ;;  %v9623_v21 = vor.u32 %v11181_v2, %v9620_v20  ;;  %v9604_v58 = vld [vmem:[#allocation8 + $0x958] sm:$0xf0]  ;;  %v9335_v2 = vor.u32 %v11109_v59, %v9332_v27 }
 0x6bb   : > { %v5297_v4 = vadd.f32 %v5296_v38, %v13770_v54  ;;  %v9607_v19 = vor.u32 %v11177_v53, %v9604_v58  ;;  %v9460_v20 = vld [vmem:[#allocation8 + $0x838] sm:$0xf0] }
 0x6bc   : > { %5377 = vmatmul.bf16.gmra.mxu1 %v13240_v52  ;;  %5418 = vmatmul.bf16.gmra.mxu3 %v13245_v9  ;;  %v9463_v37 = vor.u32 %v11141_v61, %v9460_v20  ;;  %v9444_v53 = vld [vmem:[#allocation8 + $0x818] sm:$0xf0] }
 0x6bd   : > { %5459 = vmatmul.bf16.gmra.mxu0 %v13265_v43  ;;  %5500 = vmatmul.bf16.gmra.mxu2 %v13269_v14  ;;  %v9447_v58 = vor.u32 %v11137_v34, %v9444_v53 }
 0x6be   : > { %5640 = vmatpush.bf16.msrb.mxu2 %v9623_v21  ;;  %v11173_v21 = vld [vmem:[#allocation8 + $0x92c] sm:$0xf]  ;;  %5560 = vmatpush.bf16.msrb.mxu3 %v9335_v2 }
 0x6bf   : > { %v5255_v46 = vpop.f32.mrf.mxu3  ;;  %v9591_v41 = vor.u32 %v11173_v21, %v9588_v51  ;;  %5601 = vmatpush.bf16.msrb.mxu0 %v9463_v37 }
 0x6c0   : > { %v5256_v28 = vadd.f32 %v5255_v46, %v5215_v16  ;;  %v5337_v15 = vpop.f32.mrf.mxu2  ;;  %v9207_v16 = vor.u32 %v11077_v26, %v9204_v24  ;;  %v11073_v46 = vld [vmem:[#allocation8 + $0x60c] sm:$0xf] }
 0x6c1   : > { %v5216_v60 = vpop.f32.mrf.mxu1  ;;  %v13829_v48 = vadd.f32 %v5337_v15, %v5297_v4 }
 0x6c2   : > { %v5699_v31 = vmax.f32 %v5256_v28, 0.0  ;;  %v5298_v38 = vpop.f32.mrf.mxu0  ;;  %5641 = vmatpush.bf16.msrb.mxu2 %v9607_v19  ;;  %5519 = vmatpush.bf16.msrb.mxu1 %v9207_v16  ;;  %v9191_v28 = vor.u32 %v11073_v46, %v9188_v39  ;;  %v11169_v60 = vld [vmem:[#allocation8 + $0x90c] sm:$0xf] }
 0x6c3   : > { %5561 = vmatpush.bf16.msrb.mxu3 %v9319_v8  ;;  %5602 = vmatpush.bf16.msrb.mxu0 %v9447_v58 }
 0x6c4   : > { %v5719_v42 = vmax.f32 %v5697_v17, %v5699_v31 }
 0x6c6   : > { %v13832_v25 = vmax.f32 %v13820_v44, %v5719_v42  ;;  %5642 = vmatpush.bf16.msrb.mxu2 %v9591_v41  ;;  %5520 = vmatpush.bf16.msrb.mxu1 %v9191_v28  ;;  %v9572_v44 = vld [vmem:[#allocation8 + $0x918] sm:$0xf0]  ;;  %v5705_v28 = vmax.f32 %v13539_v10, 0.0 }
 0x6c7   : > { %v5257_v4 = vpop.f32.mrf.mxu3  ;;  %v9575_v31 = vor.u32 %v11169_v60, %v9572_v44 }
 0x6c8   : > { %v5339_v62 = vpop.f32.mrf.mxu2 }
 0x6c9   : > { %v5218_v15 = vpop.f32.mrf.mxu1 }
 0x6ca   : > { %v5219_v17 = vadd.f32 %v5218_v15, %v13760_v22  ;;  %v5300_v19 = vpop.f32.mrf.mxu0  ;;  %5643 = vmatpush.bf16.msrb.mxu2 %v9575_v31  ;;  %v5701_v22 = vmax.f32 %v13529_v45, 0.0 }
 0x6cb   : > { %v5301_v24 = vadd.f32 %v5300_v19, %v13770_v54 }
 0x6cc   : > { %5381 = vmatmul.bf16.gmra.mxu1 %v13265_v43  ;;  %5422 = vmatmul.bf16.gmra.mxu3 %v13269_v14 }
 0x6cd   : > { %5463 = vmatmul.bf16.gmra.mxu0 %v13295_v35  ;;  %5504 = vmatmul.bf16.gmra.mxu2 %v13304_v32 }
 0x6cf   : > { %v5259_v26 = vpop.f32.mrf.mxu3 }
 0x6d0   : > { %v5260_v38 = vadd.f32 %v5259_v26, %v5219_v17  ;;  %v5341_v59 = vpop.f32.mrf.mxu2 }
 0x6d1   : > { %v5220_v16 = vpop.f32.mrf.mxu1  ;;  %v13841_v42 = vadd.f32 %v5341_v59, %v5301_v24 }
 0x6d2   : > { %v5703_v27 = vmax.f32 %v5260_v38, 0.0  ;;  %v5302_v2 = vpop.f32.mrf.mxu0 }
 0x6d4   : > { %v5721_v61 = vmax.f32 %v5701_v22, %v5703_v27 }
 0x6d7   : > { %v5261_v20 = vpop.f32.mrf.mxu3 }
 0x6d8   : > { %v5343_v37 = vpop.f32.mrf.mxu2 }
 0x6d9   : > { %v5222_v21 = vpop.f32.mrf.mxu1 }
 0x6da   : > { %v5223_v51 = vadd.f32 %v5222_v21, %v13767_v29  ;;  %v5304_v41 = vpop.f32.mrf.mxu0 }
 0x6db   : > { %v5305_v46 = vadd.f32 %v5304_v41, %v13770_v54 }
 0x6dc   : > { %5385 = vmatmul.bf16.gmra.mxu1 %v13295_v35  ;;  %5426 = vmatmul.bf16.gmra.mxu3 %v13304_v32 }
 0x6dd   : > { %5467 = vmatmul.bf16.gmra.mxu0 %v13318_v40  ;;  %5508 = vmatmul.bf16.gmra.mxu2 %v13322_v33 }
 0x6df   : > { %v5263_v45 = vpop.f32.mrf.mxu3 }
 0x6e0   : > { %v5264_v39 = vadd.f32 %v5263_v45, %v5223_v51  ;;  %v5345_v4 = vpop.f32.mrf.mxu2  ;;  %v9802_v45 = vld [vmem:[#allocation11 + $0xe0] sm:$0xf] }
 0x6e1   : > { %v5224_v12 = vpop.f32.mrf.mxu1  ;;  %v13850_v8 = vadd.f32 %v5345_v4, %v5305_v46  ;;  %v11230_v46 = vld [vmem:[#allocation11 + $0xec] sm:$0xf0] }
 0x6e2   : > { %v5707_v6 = vmax.f32 %v5264_v39, 0.0  ;;  %v5306_v29 = vpop.f32.mrf.mxu0  ;;  %v9803_v12 = vor.u32 %v11230_v46, %v9802_v45 }
 0x6e3   : > { %v11294_v29 = vld [vmem:[#allocation11 + $0x2ec] sm:$0xf0] }
 0x6e4   : > { %v5723_v34 = vmax.f32 %v5705_v28, %v5707_v6  ;;  %v10058_v6 = vld [vmem:[#allocation11 + $0x2e0] sm:$0xf]  ;;  %7287 = vmatpush.bf16.msra.mxu1 %v9803_v12 }
 0x6e6   : > { %v13852_v53 = vmax.f32 %v5721_v61, %v5723_v34 }
 0x6e7   : > { %v5265_v60 = vpop.f32.mrf.mxu3 }
 0x6e8   : > { %v5347_v15 = vpop.f32.mrf.mxu2 }
 0x6e9   : > { %v5358_v62 = vpop.f32.mrf.mxu1  ;;  %v11226_v15 = vld [vmem:[#allocation11 + $0xcc] sm:$0xf0] }
 0x6ea   : > { %v5359_v58 = vadd.f32 %v5358_v62, %v13778_v50  ;;  %v5440_v44 = vpop.f32.mrf.mxu0 }
 0x6ec   : > { %5521 = vmatmul.bf16.vlgmr.msrb.gmra.mxu1 %v13179_v13  ;;  %5562 = vmatmul.bf16.vlgmr.msrb.gmra.mxu3 %v13183_v18 }
 0x6ed   : > { %5603 = vmatmul.bf16.vlgmr.msrb.gmra.mxu0 %v13197_v7  ;;  %5644 = vmatmul.bf16.vlgmr.msrb.gmra.mxu2 %v13202_v47 }
 0x6ef   : > { %v5399_v10 = vpop.f32.mrf.mxu3 }
 0x6f0   : > { %v5400_v54 = vadd.f32 %v5399_v10, %v5359_v58  ;;  %v5481_v31 = vpop.f32.mrf.mxu2  ;;  %v10042_v58 = vld [vmem:[#allocation11 + $0x2c0] sm:$0xf] }
 0x6f1   : > { %v5360_v17 = vpop.f32.mrf.mxu1 }
 0x6f2   : > { %v5441_v19 = vadd.f32 %v5440_v44, %v5400_v54  ;;  %v5442_v26 = vpop.f32.mrf.mxu0  ;;  %v11290_v44 = vld [vmem:[#allocation11 + $0x2cc] sm:$0xf0]  ;;  %v9770_v17 = vld [vmem:[#allocation11 + $0xa0] sm:$0xf] }
 0x6f3   : > { %v10043_v10 = vor.u32 %v11290_v44, %v10042_v58 }
 0x6f4   : > { %v13859_v24 = vadd.f32 %v5481_v31, %v5441_v19  ;;  %v11222_v31 = vld [vmem:[#allocation11 + $0xac] sm:$0xf0] }
 0x6f5   : > { %v9771_v19 = vor.u32 %v11222_v31, %v9770_v17  ;;  %v11270_v17 = vld [vmem:[#allocation11 + $0x22c] sm:$0xf0] }
 0x6f7   : > { %v5401_v38 = vpop.f32.mrf.mxu3 }
 0x6f8   : > { %v5483_v50 = vpop.f32.mrf.mxu2 }
 0x6f9   : > { %v5362_v16 = vpop.f32.mrf.mxu1  ;;  %v11286_v50 = vld [vmem:[#allocation11 + $0x2ac] sm:$0xf0] }
 0x6fa   : > { %v5363_v59 = vadd.f32 %v5362_v16, %v13787_v1  ;;  %v5444_v13 = vpop.f32.mrf.mxu0  ;;  %v10026_v16 = vld [vmem:[#allocation11 + $0x2a0] sm:$0xf] }
 0x6fc   : > { %5525 = vmatmul.bf16.gmra.mxu1 %v13197_v7  ;;  %5566 = vmatmul.bf16.gmra.mxu3 %v13202_v47 }
 0x6fd   : > { %5607 = vmatmul.bf16.gmra.mxu0 %v13217_v5  ;;  %5648 = vmatmul.bf16.gmra.mxu2 %v13222_v56 }
 0x6ff   : > { %v5403_v18 = vpop.f32.mrf.mxu3 }
 0x700   : > { %v5404_v22 = vadd.f32 %v5403_v18, %v5363_v59  ;;  %v5485_v2 = vpop.f32.mrf.mxu2 }
 0x701   : > { %v5364_v27 = vpop.f32.mrf.mxu1 }
 0x702   : > { %v5445_v61 = vadd.f32 %v5444_v13, %v5404_v22  ;;  %v5446_v20 = vpop.f32.mrf.mxu0  ;;  %v10027_v13 = vor.u32 %v11286_v50, %v10026_v16  ;;  %v9754_v22 = vld [vmem:[#allocation11 + $0x80] sm:$0xf]  ;;  %v11218_v27 = vld [vmem:[#allocation11 + $0x8c] sm:$0xf0] }
 0x703   : > { %v11282_v20 = vld [vmem:[#allocation11 + $0x28c] sm:$0xf0] }
 0x704   : > { %v13866_v21 = vadd.f32 %v5485_v2, %v5445_v61  ;;  %v9755_v2 = vor.u32 %v11218_v27, %v9754_v22  ;;  %v10010_v61 = vld [vmem:[#allocation11 + $0x280] sm:$0xf]  ;;  %v11202_v16 = vld [vmem:[#allocation11 + $0xc] sm:$0xf0] }
 0x705   : > { %v9946_v22 = vld [vmem:[#allocation11 + $0x200] sm:$0xf]  ;;  %v11266_v27 = vld [vmem:[#allocation11 + $0x20c] sm:$0xf0] }
 0x707   : > { %v5405_v37 = vpop.f32.mrf.mxu3 }
 0x708   : > { %v5487_v1 = vpop.f32.mrf.mxu2  ;;  %v10011_v37 = vor.u32 %v11282_v20, %v10010_v61  ;;  %v11422_v61 = vld [vmem:[#allocation11 + $0x6ec] sm:$0xf0] }
 0x709   : > { %v5366_v51 = vpop.f32.mrf.mxu1  ;;  %v11214_v1 = vld [vmem:[#allocation11 + $0x6c] sm:$0xf0] }
 0x70a   : > { %v5367_v41 = vadd.f32 %v5366_v51, %v13798_v49  ;;  %v5448_v7 = vpop.f32.mrf.mxu0  ;;  %v10059_v49 = vor.u32 %v11294_v29, %v10058_v6 }
 0x70c   : > { %5529 = vmatmul.bf16.gmra.mxu1 %v13217_v5  ;;  %5570 = vmatmul.bf16.gmra.mxu3 %v13222_v56  ;;  %v9786_v5 = vld [vmem:[#allocation11 + $0xc0] sm:$0xf] }
 0x70d   : > { %5611 = vmatmul.bf16.gmra.mxu0 %v13240_v52  ;;  %5652 = vmatmul.bf16.gmra.mxu2 %v13245_v9  ;;  %v9787_v62 = vor.u32 %v11226_v15, %v9786_v5  ;;  %v9706_v15 = vld [vmem:[#allocation11 + $0x20] sm:$0xf] }
 0x70e   : > { %7313 = vmatpush.bf16.msra.mxu0 %v10059_v49  ;;  %v11274_v49 = vld [vmem:[#allocation11 + $0x24c] sm:$0xf0] }
 0x70f   : > { %v5407_v47 = vpop.f32.mrf.mxu3  ;;  %7288 = vmatpush.bf16.msra.mxu1 %v9787_v62  ;;  %v11206_v62 = vld [vmem:[#allocation11 + $0x2c] sm:$0xf0] }
 0x710   : > { %v5408_v39 = vadd.f32 %v5407_v47, %v5367_v41  ;;  %v5489_v28 = vpop.f32.mrf.mxu2  ;;  %v9707_v58 = vor.u32 %v11206_v62, %v9706_v15 }
 0x711   : > { %v5368_v4 = vpop.f32.mrf.mxu1 }
 0x712   : > { %v5449_v34 = vadd.f32 %v5448_v7, %v5408_v39  ;;  %v5450_v60 = vpop.f32.mrf.mxu0  ;;  %7314 = vmatpush.bf16.msra.mxu0 %v10043_v10  ;;  %v9722_v4 = vld [vmem:[#allocation11 + $0x40] sm:$0xf] }
 0x713   : > { %7289 = vmatpush.bf16.msra.mxu1 %v9771_v19 }
 0x714   : > { %v13873_v56 = vadd.f32 %v5489_v28, %v5449_v34  ;;  %v11210_v28 = vld [vmem:[#allocation11 + $0x4c] sm:$0xf0]  ;;  %v9978_v34 = vld [vmem:[#allocation11 + $0x240] sm:$0xf] }
 0x715   : > { %v9723_v29 = vor.u32 %v11210_v28, %v9722_v4  ;;  %v9979_v60 = vor.u32 %v11274_v49, %v9978_v34  ;;  %v10538_v28 = vld [vmem:[#allocation11 + $0x6a0] sm:$0xf] }
 0x716   : > { %7315 = vmatpush.bf16.msra.mxu0 %v10027_v13  ;;  %v11358_v13 = vld [vmem:[#allocation11 + $0x4ec] sm:$0xf0] }
 0x717   : > { %v5409_v54 = vpop.f32.mrf.mxu3  ;;  %7290 = vmatpush.bf16.msra.mxu1 %v9755_v2  ;;  %v10570_v2 = vld [vmem:[#allocation11 + $0x6e0] sm:$0xf] }
 0x718   : > { %v5491_v38 = vpop.f32.mrf.mxu2  ;;  %v9962_v54 = vld [vmem:[#allocation11 + $0x220] sm:$0xf] }
 0x719   : > { %v5370_v26 = vpop.f32.mrf.mxu1  ;;  %v9963_v19 = vor.u32 %v11270_v17, %v9962_v54  ;;  %v9690_v38 = vld [vmem:[#allocation11] sm:$0xf]  ;;  %v11410_v54 = vld [vmem:[#allocation11 + $0x68c] sm:$0xf0] }
 0x71a   : > { %v5371_v59 = vadd.f32 %v5370_v26, %v13807_v3  ;;  %v5452_v18 = vpop.f32.mrf.mxu0  ;;  %v9738_v3 = vld [vmem:[#allocation11 + $0x60] sm:$0xf]  ;;  %7316 = vmatpush.bf16.msra.mxu0 %v10011_v37  ;;  %v9691_v50 = vor.u32 %v11202_v16, %v9690_v38  ;;  %v10571_v37 = vor.u32 %v11422_v61, %v10570_v2  ;;  %v11402_v61 = vld [vmem:[#allocation11 + $0x64c] sm:$0xf0] }
 0x71b   : > { %v9739_v7 = vor.u32 %v11214_v1, %v9738_v3  ;;  %v10506_v16 = vld [vmem:[#allocation11 + $0x660] sm:$0xf] }
 0x71c   : > { %5533 = vmatmul.bf16.gmra.mxu1 %v13240_v52  ;;  %5574 = vmatmul.bf16.gmra.mxu3 %v13245_v9  ;;  %v9994_v52 = vld [vmem:[#allocation11 + $0x260] sm:$0xf]  ;;  %v11278_v9 = vld [vmem:[#allocation11 + $0x26c] sm:$0xf0] }
 0x71d   : > { %5615 = vmatmul.bf16.gmra.mxu0 %v13265_v43  ;;  %5656 = vmatmul.bf16.gmra.mxu2 %v13269_v14  ;;  %v9995_v39 = vor.u32 %v11278_v9, %v9994_v52  ;;  %v10490_v2 = vld [vmem:[#allocation11 + $0x640] sm:$0xf] }
 0x71e   : > { %7291 = vmatpush.bf16.msra.mxu1 %v9739_v7 }
 0x71f   : > { %v5411_v51 = vpop.f32.mrf.mxu3  ;;  %7317 = vmatpush.bf16.msra.mxu0 %v9995_v39  ;;  %v10282_v39 = vld [vmem:[#allocation11 + $0x4a0] sm:$0xf] }
 0x720   : > { %v5412_v41 = vadd.f32 %v5411_v51, %v5371_v59  ;;  %v5493_v45 = vpop.f32.mrf.mxu2  ;;  %v10314_v59 = vld [vmem:[#allocation11 + $0x4e0] sm:$0xf]  ;;  %v11354_v51 = vld [vmem:[#allocation11 + $0x4cc] sm:$0xf0] }
 0x721   : > { %v5372_v47 = vpop.f32.mrf.mxu1 }
 0x722   : > { %v5453_v46 = vadd.f32 %v5452_v18, %v5412_v41  ;;  %v5454_v12 = vpop.f32.mrf.mxu0  ;;  %7292 = vmatpush.bf16.msra.mxu1 %v9723_v29  ;;  %v10315_v18 = vor.u32 %v11358_v13, %v10314_v59  ;;  %v10554_v47 = vld [vmem:[#allocation11 + $0x6c0] sm:$0xf]  ;;  %v11414_v29 = vld [vmem:[#allocation11 + $0x6ac] sm:$0xf0] }
 0x723   : > { %7318 = vmatpush.bf16.msra.mxu0 %v9979_v60  ;;  %v11350_v12 = vld [vmem:[#allocation11 + $0x4ac] sm:$0xf0]  ;;  %v10539_v49 = vor.u32 %v11414_v29, %v10538_v28  ;;  %v10266_v60 = vld [vmem:[#allocation11 + $0x480] sm:$0xf] }
 0x724   : > { %v13880_v6 = vadd.f32 %v5493_v45, %v5453_v46  ;;  %v11418_v45 = vld [vmem:[#allocation11 + $0x6cc] sm:$0xf0]  ;;  %v10283_v4 = vor.u32 %v11350_v12, %v10282_v39  ;;  %v10458_v29 = vld [vmem:[#allocation11 + $0x600] sm:$0xf] }
 0x725   : > { %v10555_v9 = vor.u32 %v11418_v45, %v10554_v47  ;;  %v10202_v45 = vld [vmem:[#allocation11 + $0x400] sm:$0xf] }
 0x726   : > { %7293 = vmatpush.bf16.msra.mxu1 %v9707_v58 }
 0x727   : > { %v5413_v5 = vpop.f32.mrf.mxu3  ;;  %7319 = vmatpush.bf16.msra.mxu0 %v9963_v19  ;;  %v10250_v19 = vld [vmem:[#allocation11 + $0x460] sm:$0xf] }
 0x728   : > { %v5495_v10 = vpop.f32.mrf.mxu2  ;;  %v11346_v5 = vld [vmem:[#allocation11 + $0x48c] sm:$0xf0] }
 0x729   : > { %v5374_v44 = vpop.f32.mrf.mxu1  ;;  %v10267_v58 = vor.u32 %v11346_v5, %v10266_v60  ;;  %v10522_v10 = vld [vmem:[#allocation11 + $0x680] sm:$0xf]  ;;  %v11262_v5 = vld [vmem:[#allocation11 + $0x1ec] sm:$0xf0] }
 0x72a   : > { %v5375_v31 = vadd.f32 %v5374_v44, %v13818_v23  ;;  %v5456_v26 = vpop.f32.mrf.mxu0  ;;  %v9947_v23 = vor.u32 %v11266_v27, %v9946_v22  ;;  %7294 = vmatpush.bf16.msra.mxu1 %v9691_v50  ;;  %v11406_v50 = vld [vmem:[#allocation11 + $0x66c] sm:$0xf0]  ;;  %v9930_v60 = vld [vmem:[#allocation11 + $0x1e0] sm:$0xf] }
 0x72b   : > { %v10507_v59 = vor.u32 %v11406_v50, %v10506_v16  ;;  %v11338_v22 = vld [vmem:[#allocation11 + $0x44c] sm:$0xf0] }
 0x72c   : > { %5537 = vmatmul.bf16.gmra.mxu1 %v13265_v43  ;;  %5578 = vmatmul.bf16.gmra.mxu3 %v13269_v14  ;;  %v10298_v14 = vld [vmem:[#allocation11 + $0x4c0] sm:$0xf] }
 0x72d   : > { %5619 = vmatmul.bf16.gmra.mxu0 %v13295_v35  ;;  %5660 = vmatmul.bf16.gmra.mxu2 %v13304_v32  ;;  %v10299_v41 = vor.u32 %v11354_v51, %v10298_v14  ;;  %v10218_v14 = vld [vmem:[#allocation11 + $0x420] sm:$0xf]  ;;  %v11334_v51 = vld [vmem:[#allocation11 + $0x42c] sm:$0xf0] }
 0x72e   : > { %7339 = vmatpush.bf16.msrb.mxu1 %v10315_v18  ;;  %7320 = vmatpush.bf16.msra.mxu0 %v9947_v23  ;;  %v10234_v18 = vld [vmem:[#allocation11 + $0x440] sm:$0xf] }
 0x72f   : > { %v5415_v20 = vpop.f32.mrf.mxu3 }
 0x730   : > { %v5416_v43 = vadd.f32 %v5415_v20, %v5375_v31  ;;  %v5497_v1 = vpop.f32.mrf.mxu2  ;;  %v10523_v31 = vor.u32 %v11410_v54, %v10522_v10  ;;  %v9914_v10 = vld [vmem:[#allocation11 + $0x1c0] sm:$0xf]  ;;  %v11258_v54 = vld [vmem:[#allocation11 + $0x1cc] sm:$0xf0] }
 0x731   : > { %v5376_v3 = vpop.f32.mrf.mxu1 }
 0x732   : > { %v5457_v7 = vadd.f32 %v5456_v26, %v5416_v43  ;;  %7365 = vmatpush.bf16.msrb.mxu0 %v10571_v37  ;;  %v5458_v52 = vpop.f32.mrf.mxu0  ;;  %7340 = vmatpush.bf16.msrb.mxu1 %v10299_v41  ;;  %v11342_v26 = vld [vmem:[#allocation11 + $0x46c] sm:$0xf0]  ;;  %v10491_v37 = vor.u32 %v11402_v61, %v10490_v2  ;;  %v10219_v3 = vor.u32 %v11334_v51, %v10218_v14 }
 0x733   : > { %v10251_v38 = vor.u32 %v11342_v26, %v10250_v19  ;;  %v11398_v41 = vld [vmem:[#allocation11 + $0x62c] sm:$0xf0]  ;;  %v9898_v19 = vld [vmem:[#allocation11 + $0x1a0] sm:$0xf] }
 0x734   : > { %v13887_v46 = vadd.f32 %v5497_v1, %v5457_v7  ;;  %v10474_v1 = vld [vmem:[#allocation11 + $0x620] sm:$0xf]  ;;  %v11330_v52 = vld [vmem:[#allocation11 + $0x40c] sm:$0xf0] }
 0x735   : > { %v10475_v47 = vor.u32 %v11398_v41, %v10474_v1  ;;  %v10203_v12 = vor.u32 %v11330_v52, %v10202_v45  ;;  %v11254_v26 = vld [vmem:[#allocation11 + $0x1ac] sm:$0xf0]  ;;  %v11292_v45 = vld [vmem:[#allocation11 + $0x2e4] sm:$0xf]  ;;  %v10060_v52 = vld [vmem:[#allocation11 + $0x2f0] sm:$0xf0] }
 0x736   : > { %7366 = vmatpush.bf16.msrb.mxu0 %v10555_v9  ;;  %7341 = vmatpush.bf16.msrb.mxu1 %v10283_v4  ;;  %v11242_v14 = vld [vmem:[#allocation11 + $0x14c] sm:$0xf0] }
 0x737   : > { %v5417_v34 = vpop.f32.mrf.mxu3  ;;  %v11238_v41 = vld [vmem:[#allocation11 + $0x12c] sm:$0xf0] }
 0x738   : > { %v5499_v62 = vpop.f32.mrf.mxu2  ;;  %v11394_v34 = vld [vmem:[#allocation11 + $0x60c] sm:$0xf0] }
 0x739   : > { %v5378_v15 = vpop.f32.mrf.mxu1 }
 0x73a   : > { %v5379_v44 = vadd.f32 %v5378_v15, %v13829_v48  ;;  %7367 = vmatpush.bf16.msrb.mxu0 %v10539_v49  ;;  %v5460_v17 = vpop.f32.mrf.mxu0  ;;  %7342 = vmatpush.bf16.msrb.mxu1 %v10267_v58  ;;  %v10459_v49 = vor.u32 %v11394_v34, %v10458_v29  ;;  %v9931_v15 = vor.u32 %v11262_v5, %v9930_v60  ;;  %v11224_v34 = vld [vmem:[#allocation11 + $0xc4] sm:$0xf] }
 0x73b   : > { %v13912_v29 = vpack.c.bf16 %v13789_v63, %v13789_v63 }
 0x73c   : > { %5541 = vmatmul.bf16.gmra.mxu1 %v13295_v35  ;;  %5582 = vmatmul.bf16.gmra.mxu3 %v13304_v32  ;;  %v10235_v32 = vor.u32 %v11338_v22, %v10234_v18 }
 0x73d   : > { %5623 = vmatmul.bf16.gmra.mxu0 %v13318_v40  ;;  %5664 = vmatmul.bf16.gmra.mxu2 %v13322_v33 }
 0x73e   : > { %7368 = vmatpush.bf16.msrb.mxu0 %v10523_v31  ;;  %7343 = vmatpush.bf16.msrb.mxu1 %v10251_v38  ;;  %v9899_v38 = vor.u32 %v11254_v26, %v9898_v19 }
 0x73f   : > { %v5419_v48 = vpop.f32.mrf.mxu3  ;;  %7300 = vmatpush.bf16.msra.mxu3 %v9931_v15  ;;  %v10063_v15 = vor.u32 %v11292_v45, %v10060_v52 }
 0x740   : > { %v5420_v13 = vadd.f32 %v5419_v48, %v5379_v44  ;;  %v5501_v35 = vpop.f32.mrf.mxu2 }
 0x741   : > { %v5380_v27 = vpop.f32.mrf.mxu1 }
 0x742   : > { %v5461_v23 = vadd.f32 %v5460_v17, %v5420_v13  ;;  %v5462_v20 = vpop.f32.mrf.mxu0  ;;  %7369 = vmatpush.bf16.msrb.mxu0 %v10507_v59  ;;  %7344 = vmatpush.bf16.msrb.mxu1 %v10235_v32  ;;  %v9915_v17 = vor.u32 %v11258_v54, %v9914_v10  ;;  %v9882_v59 = vld [vmem:[#allocation11 + $0x180] sm:$0xf]  ;;  %v11250_v13 = vld [vmem:[#allocation11 + $0x18c] sm:$0xf0] }
 0x743   : > { %v9883_v22 = vor.u32 %v11250_v13, %v9882_v59  ;;  %v11246_v32 = vld [vmem:[#allocation11 + $0x16c] sm:$0xf0]  ;;  %v10186_v10 = vld [vmem:[#allocation11 + $0x3e0] sm:$0xf]  ;;  %v11216_v13 = vld [vmem:[#allocation11 + $0x84] sm:$0xf] }
 0x744   : > { %v13894_v43 = vadd.f32 %v5501_v35, %v5461_v23  ;;  %7301 = vmatpush.bf16.msra.mxu3 %v9915_v17  ;;  %v9866_v35 = vld [vmem:[#allocation11 + $0x160] sm:$0xf]  ;;  %v11326_v54 = vld [vmem:[#allocation11 + $0x3ec] sm:$0xf0]  ;;  %v9772_v17 = vld [vmem:[#allocation11 + $0xb0] sm:$0xf0] }
 0x745   : > { %v9867_v23 = vor.u32 %v11246_v32, %v9866_v35  ;;  %v10442_v32 = vld [vmem:[#allocation11 + $0x5e0] sm:$0xf] }
 0x746   : > { %7370 = vmatpush.bf16.msrb.mxu0 %v10491_v37  ;;  %7345 = vmatpush.bf16.msrb.mxu1 %v10219_v3 }
 0x747   : > { %v5421_v7 = vpop.f32.mrf.mxu3 }
 0x748   : > { %v5503_v39 = vpop.f32.mrf.mxu2  ;;  %7302 = vmatpush.bf16.msra.mxu3 %v9899_v38  ;;  %v11228_v7 = vld [vmem:[#allocation11 + $0xe4] sm:$0xf] }
 0x749   : > { %v5382_v9 = vpop.f32.mrf.mxu1  ;;  %v11284_v38 = vld [vmem:[#allocation11 + $0x2a4] sm:$0xf] }
 0x74a   : > { %v5383_v4 = vadd.f32 %v5382_v9, %v13841_v42  ;;  %v5464_v28 = vpop.f32.mrf.mxu0  ;;  %7371 = vmatpush.bf16.msrb.mxu0 %v10475_v47  ;;  %7346 = vmatpush.bf16.msrb.mxu1 %v10203_v12 }
 0x74c   : > { %5545 = vmatmul.bf16.gmra.mxu1 %v13318_v40  ;;  %5586 = vmatmul.bf16.gmra.mxu3 %v13322_v33 }
 0x74d   : > { %5627 = vmatmul.bf16.gmra.mxu0 %v13334_v55  ;;  %5668 = vmatmul.bf16.gmra.mxu2 %v13340_v0 }
 0x74e   : > { %7372 = vmatpush.bf16.msrb.mxu0 %v10459_v49  ;;  %7303 = vmatpush.bf16.msra.mxu3 %v9883_v22  ;;  %v9788_v49 = vld [vmem:[#allocation11 + $0xd0] sm:$0xf0]  ;;  %v11322_v22 = vld [vmem:[#allocation11 + $0x3cc] sm:$0xf0] }
 0x74f   : > { %v5423_v62 = vpop.f32.mrf.mxu3 }
 0x750   : > { %v5424_v42 = vadd.f32 %v5423_v62, %v5383_v4  ;;  %v5505_v44 = vpop.f32.mrf.mxu2  ;;  %v9818_v4 = vld [vmem:[#allocation11 + $0x100] sm:$0xf]  ;;  %v13916_v62 = vpack.c.bf16 %v13809_v30, %v13809_v30 }
 0x751   : > { %v5384_v58 = vpop.f32.mrf.mxu1 }
 0x752   : > { %v5465_v40 = vadd.f32 %v5464_v28, %v5424_v42  ;;  %v5466_v33 = vpop.f32.mrf.mxu0  ;;  %7304 = vmatpush.bf16.msra.mxu3 %v9867_v23  ;;  %v11234_v28 = vld [vmem:[#allocation11 + $0x10c] sm:$0xf0]  ;;  %v11288_v42 = vld [vmem:[#allocation11 + $0x2c4] sm:$0xf]  ;;  %v10044_v58 = vld [vmem:[#allocation11 + $0x2d0] sm:$0xf0] }
 0x753   : > { %v9819_v60 = vor.u32 %v11234_v28, %v9818_v4  ;;  %v10187_v33 = vor.u32 %v11326_v54, %v10186_v10  ;;  %v10047_v30 = vor.u32 %v11288_v42, %v10044_v58  ;;  %v11390_v23 = vld [vmem:[#allocation11 + $0x5ec] sm:$0xf0]  ;;  %v9996_v4 = vld [vmem:[#allocation11 + $0x270] sm:$0xf0]  ;;  %v13926_v42 = vpack.c.bf16 %v13832_v25, %v13832_v25  ;;  %v10410_v10 = vld [vmem:[#allocation11 + $0x5a0] sm:$0xf] }
 0x754   : > { %v13901_v31 = vadd.f32 %v5505_v44, %v5465_v40  ;;  %v9791_v44 = vor.u32 %v11224_v34, %v9788_v49  ;;  %v11220_v40 = vld [vmem:[#allocation11 + $0xa4] sm:$0xf]  ;;  %v9724_v58 = vld [vmem:[#allocation11 + $0x50] sm:$0xf0]  ;;  %v11382_v54 = vld [vmem:[#allocation11 + $0x5ac] sm:$0xf0] }
 0x755   : > { %7326 = vmatpush.bf16.msra.mxu2 %v10187_v33  ;;  %v9775_v59 = vor.u32 %v11220_v40, %v9772_v17  ;;  %v10411_v17 = vor.u32 %v11382_v54, %v10410_v10  ;;  %v13930_v33 = vpack.c.bf16 %v13852_v53, %v13852_v53  ;;  %v11378_v53 = vld [vmem:[#allocation11 + $0x58c] sm:$0xf0]  ;;  %v11352_v54 = vld [vmem:[#allocation11 + $0x4c4] sm:$0xf] }
 0x757   : > { %v5425_v16 = vpop.f32.mrf.mxu3 }
 0x758   : > { %v5507_v48 = vpop.f32.mrf.mxu2  ;;  %v10028_v16 = vld [vmem:[#allocation11 + $0x2b0] sm:$0xf0] }
 0x759   : > { %v5386_v50 = vpop.f32.mrf.mxu1 }
 0x75a   : > { %v5387_v18 = vadd.f32 %v5386_v50, %v13850_v8  ;;  %v5468_v27 = vpop.f32.mrf.mxu0  ;;  %v9850_v8 = vld [vmem:[#allocation11 + $0x140] sm:$0xf] }
 0x75b   : > { %v9851_v3 = vor.u32 %v11242_v14, %v9850_v8  ;;  %v11280_v8 = vld [vmem:[#allocation11 + $0x284] sm:$0xf]  ;;  %v10012_v14 = vld [vmem:[#allocation11 + $0x290] sm:$0xf0] }
 0x75c   : > { %5549 = vmatmul.bf16.gmra.mxu1 %v13334_v55  ;;  %5590 = vmatmul.bf16.gmra.mxu3 %v13340_v0  ;;  %v9834_v0 = vld [vmem:[#allocation11 + $0x120] sm:$0xf]  ;;  %v10015_v52 = vor.u32 %v11280_v8, %v10012_v14  ;;  %v9692_v14 = vld [vmem:[#allocation11 + $0x10] sm:$0xf0] }
 0x75d   : > { %5631 = vmatmul.bf16.gmra.mxu0 %v13350_v36  ;;  %5672 = vmatmul.bf16.gmra.mxu2 %v13352_v11  ;;  %v9804_v36 = vld [vmem:[#allocation11 + $0xf0] sm:$0xf0]  ;;  %v9835_v47 = vor.u32 %v11238_v41, %v9834_v0  ;;  %v11318_v0 = vld [vmem:[#allocation11 + $0x3ac] sm:$0xf0]  ;;  %v5678_v41 = vmax.f32 %v13604_v57, 0.0 }
 0x75e   : > { %7305 = vmatpush.bf16.msra.mxu3 %v9851_v3  ;;  %v9807_v12 = vor.u32 %v11228_v7, %v9804_v36  ;;  %v11212_v3 = vld [vmem:[#allocation11 + $0x64] sm:$0xf]  ;;  %v9740_v36 = vld [vmem:[#allocation11 + $0x70] sm:$0xf0]  ;;  %v10138_v57 = vld [vmem:[#allocation11 + $0x380] sm:$0xf] }
 0x75f   : > { %v5427_v2 = vpop.f32.mrf.mxu3 }
 0x760   : > { %v5428_v61 = vadd.f32 %v5427_v2, %v5387_v18  ;;  %v5509_v37 = vpop.f32.mrf.mxu2  ;;  %v10170_v18 = vld [vmem:[#allocation11 + $0x3c0] sm:$0xf] }
 0x761   : > { %v5388_v20 = vpop.f32.mrf.mxu1  ;;  %v10171_v35 = vor.u32 %v11322_v22, %v10170_v18 }
 0x762   : > { %v5469_v51 = vadd.f32 %v5468_v27, %v5428_v61  ;;  %v5470_v55 = vpop.f32.mrf.mxu0  ;;  %7306 = vmatpush.bf16.msra.mxu3 %v9835_v47  ;;  %v9756_v27 = vld [vmem:[#allocation11 + $0x90] sm:$0xf0]  ;;  %v10031_v61 = vor.u32 %v11284_v38, %v10028_v16  ;;  %v10443_v20 = vor.u32 %v11390_v23, %v10442_v32  ;;  %v10122_v38 = vld [vmem:[#allocation11 + $0x360] sm:$0xf]  ;;  %v11310_v16 = vld [vmem:[#allocation11 + $0x36c] sm:$0xf0] }
 0x763   : > { %7327 = vmatpush.bf16.msra.mxu2 %v10171_v35  ;;  %v10154_v55 = vld [vmem:[#allocation11 + $0x3a0] sm:$0xf]  ;;  %v11268_v35 = vld [vmem:[#allocation11 + $0x224] sm:$0xf]  ;;  %v9964_v32 = vld [vmem:[#allocation11 + $0x230] sm:$0xf0] }
 0x764   : > { %v13908_v1 = vadd.f32 %v5509_v37, %v5469_v51  ;;  %v9759_v51 = vor.u32 %v11216_v13, %v9756_v27  ;;  %v10155_v47 = vor.u32 %v11318_v0, %v10154_v55  ;;  %v10394_v13 = vld [vmem:[#allocation11 + $0x580] sm:$0xf]  ;;  %v11374_v55 = vld [vmem:[#allocation11 + $0x56c] sm:$0xf0] }
 0x766   : > { %7307 = vmatpush.bf16.msra.mxu3 %v9819_v60  ;;  %v9743_v60 = vor.u32 %v11212_v3, %v9740_v36  ;;  %v10378_v3 = vld [vmem:[#allocation11 + $0x560] sm:$0xf]  ;;  %v10316_v36 = vld [vmem:[#allocation11 + $0x4f0] sm:$0xf0] }
 0x767   : > { %v5429_v11 = vpop.f32.mrf.mxu3  ;;  %7328 = vmatpush.bf16.msra.mxu2 %v10155_v47  ;;  %v10379_v47 = vor.u32 %v11374_v55, %v10378_v3  ;;  %v10268_v3 = vld [vmem:[#allocation11 + $0x490] sm:$0xf0] }
 0x768   : > { %v5511_v9 = vpop.f32.mrf.mxu2  ;;  %v10426_v11 = vld [vmem:[#allocation11 + $0x5c0] sm:$0xf] }
 0x769   : > { %v5522_v39 = vpop.f32.mrf.mxu1  ;;  %v11386_v9 = vld [vmem:[#allocation11 + $0x5cc] sm:$0xf0] }
 0x76a   : > { %v5604_v5 = vpop.f32.mrf.mxu0  ;;  %v5523_v63 = vadd.f32 %v5522_v39, %v13859_v24  ;;  %7352 = vmatpush.bf16.msrb.mxu3 %v10443_v20  ;;  %v10427_v28 = vor.u32 %v11386_v9, %v10426_v11  ;;  %v10106_v20 = vld [vmem:[#allocation11 + $0x340] sm:$0xf]  ;;  %v11420_v9 = vld [vmem:[#allocation11 + $0x6e4] sm:$0xf] }
 0x76c   : > { %7295 = vmatmul.bf16.vlgmr.msra.gmra.mxu1 %v13912_v29 }
 0x76d   : > { %7391 = vmatpush.bf16.msra.mxu1 %v9807_v12  ;;  %7321 = vmatmul.bf16.vlgmr.msra.gmra.mxu0 %v13916_v62  ;;  %v11276_v12 = vld [vmem:[#allocation11 + $0x264] sm:$0xf] }
 0x76e   : > { %7417 = vmatpush.bf16.msra.mxu0 %v10063_v15  ;;  %v11314_v15 = vld [vmem:[#allocation11 + $0x38c] sm:$0xf0]  ;;  %7353 = vmatpush.bf16.msrb.mxu3 %v10427_v28  ;;  %v9999_v40 = vor.u32 %v11276_v12, %v9996_v4  ;;  %v10572_v4 = vld [vmem:[#allocation11 + $0x6f0] sm:$0xf0]  ;;  %v10090_v28 = vld [vmem:[#allocation11 + $0x320] sm:$0xf] }
 0x76f   : > { %v5563_v19 = vpop.f32.mrf.mxu3 }
 0x770   : > { %v5564_v26 = vadd.f32 %v5563_v19, %v5523_v63  ;;  %v5645_v48 = vpop.f32.mrf.mxu2  ;;  %v11272_v19 = vld [vmem:[#allocation11 + $0x244] sm:$0xf] }
 0x771   : > { %7392 = vmatpush.bf16.msra.mxu1 %v9791_v44  ;;  %v5524_v50 = vpop.f32.mrf.mxu1  ;;  %v10139_v44 = vor.u32 %v11314_v15, %v10138_v57 }
 0x772   : > { %v5605_v24 = vadd.f32 %v5604_v5, %v5564_v26  ;;  %7418 = vmatpush.bf16.msra.mxu0 %v10047_v30  ;;  %v5606_v2 = vpop.f32.mrf.mxu0  ;;  %v11208_v5 = vld [vmem:[#allocation11 + $0x44] sm:$0xf]  ;;  %v9980_v30 = vld [vmem:[#allocation11 + $0x250] sm:$0xf0]  ;;  %7354 = vmatpush.bf16.msrb.mxu3 %v10411_v17 }
 0x773   : > { %7329 = vmatpush.bf16.msra.mxu2 %v10139_v44  ;;  %v9727_v25 = vor.u32 %v11208_v5, %v9724_v58  ;;  %v11204_v26 = vld [vmem:[#allocation11 + $0x24] sm:$0xf]  ;;  %v9983_v22 = vor.u32 %v11272_v19, %v9980_v30  ;;  %v10362_v58 = vld [vmem:[#allocation11 + $0x540] sm:$0xf]  ;;  %v10575_v19 = vor.u32 %v11420_v9, %v10572_v4 }
 0x774   : > { %v5646_v37 = vadd.f32 %v5645_v48, %v5605_v24  ;;  %v9708_v48 = vld [vmem:[#allocation11 + $0x30] sm:$0xf0]  ;;  %v10395_v24 = vor.u32 %v11378_v53, %v10394_v13  ;;  %v11416_v30 = vld [vmem:[#allocation11 + $0x6c4] sm:$0xf] }
 0x775   : > { %7393 = vmatpush.bf16.msra.mxu1 %v9775_v59  ;;  %v10123_v59 = vor.u32 %v11310_v16, %v10122_v38  ;;  %v10556_v16 = vld [vmem:[#allocation11 + $0x6d0] sm:$0xf0]  ;;  %v11340_v4 = vld [vmem:[#allocation11 + $0x464] sm:$0xf] }
 0x776   : > { %v5680_v7 = vmax.f32 %v5646_v37, 0.0  ;;  %7419 = vmatpush.bf16.msra.mxu0 %v10031_v61  ;;  %v9711_v61 = vor.u32 %v11204_v26, %v9708_v48  ;;  %v11306_v37 = vld [vmem:[#allocation11 + $0x34c] sm:$0xf0]  ;;  %7355 = vmatpush.bf16.msrb.mxu3 %v10395_v24 }
 0x777   : > { %v5565_v45 = vpop.f32.mrf.mxu3  ;;  %7330 = vmatpush.bf16.msra.mxu2 %v10123_v59  ;;  %v11298_v48 = vld [vmem:[#allocation11 + $0x30c] sm:$0xf0] }
 0x778   : > { %v13922_v39 = vmax.f32 %v5678_v41, %v5680_v7  ;;  %v5647_v49 = vpop.f32.mrf.mxu2  ;;  %v9967_v41 = vor.u32 %v11268_v35, %v9964_v32  ;;  %v11356_v7 = vld [vmem:[#allocation11 + $0x4e4] sm:$0xf]  ;;  %v10284_v35 = vld [vmem:[#allocation11 + $0x4b0] sm:$0xf0] }
 0x779   : > { %7394 = vmatpush.bf16.msra.mxu1 %v9759_v51  ;;  %v5526_v34 = vpop.f32.mrf.mxu1  ;;  %v10107_v51 = vor.u32 %v11306_v37, %v10106_v20  ;;  %v11264_v45 = vld [vmem:[#allocation11 + $0x204] sm:$0xf]  ;;  %v14148_v49 = vld [vmem:[#allocation26_spill] sm:$0xff]  ;;  %v10319_v57 = vor.u32 %v11356_v7, %v10316_v36 }
 0x77a   : > { %7420 = vmatpush.bf16.msra.mxu0 %v10015_v52  ;;  %v5608_v63 = vpop.f32.mrf.mxu0  ;;  %v5527_v50 = vadd.f32 %v5526_v34, %v13866_v21  ;;  %v11200_v21 = vld [vmem:[#allocation11 + $0x4] sm:$0xf]  ;;  %v9948_v52 = vld [vmem:[#allocation11 + $0x210] sm:$0xf0]  ;;  %v11302_v34 = vld [vmem:[#allocation11 + $0x32c] sm:$0xf0]  ;;  %7356 = vmatpush.bf16.msrb.mxu3 %v10379_v47 }
 0x77b   : > { %7331 = vmatpush.bf16.msra.mxu2 %v10107_v51  ;;  %v9695_v12 = vor.u32 %v11200_v21, %v9692_v14  ;;  %v10091_v15 = vor.u32 %v11302_v34, %v10090_v28  ;;  %v9951_v10 = vor.u32 %v11264_v45, %v9948_v52  ;;  %v10540_v21 = vld [vmem:[#allocation11 + $0x6b0] sm:$0xf0]  ;;  %v11344_v37 = vld [vmem:[#allocation11 + $0x484] sm:$0xf]  ;;  %v11362_v14 = vld [vmem:[#allocation11 + $0x50c] sm:$0xf0] }
 0x77c   : > { %7347 = vmatmul.bf16.vlgmr.msrb.gmra.mxu1 %v13926_v42  ;;  %v11408_v45 = vld [vmem:[#allocation11 + $0x684] sm:$0xf]  ;;  %v10524_v52 = vld [vmem:[#allocation11 + $0x690] sm:$0xf0]  ;;  %v10698_v28 = vld [vmem:[#allocation11 + $0x7e0] sm:$0xf] }
 0x77d   : > { %7395 = vmatpush.bf16.msra.mxu1 %v9743_v60  ;;  %7373 = vmatmul.bf16.vlgmr.msrb.gmra.mxu0 %v13930_v33  ;;  %v5682_v60 = vmax.f32 %v14148_v49, 0.0  ;;  %v11454_v34 = vld [vmem:[#allocation11 + $0x7ec] sm:$0xf0] }
 0x77e   : > { %7421 = vmatpush.bf16.msra.mxu0 %v9999_v40  ;;  %v11370_v40 = vld [vmem:[#allocation11 + $0x54c] sm:$0xf0] }
 0x77f   : > { %v5567_v18 = vpop.f32.mrf.mxu3  ;;  %7332 = vmatpush.bf16.msra.mxu2 %v10091_v15  ;;  %v9916_v15 = vld [vmem:[#allocation11 + $0x1d0] sm:$0xf0] }
 0x780   : > { %v5568_v27 = vadd.f32 %v5567_v18, %v5527_v50  ;;  %v5649_v2 = vpop.f32.mrf.mxu2  ;;  %v10074_v50 = vld [vmem:[#allocation11 + $0x300] sm:$0xf] }
 0x781   : > { %7396 = vmatpush.bf16.msra.mxu1 %v9727_v25  ;;  %v5528_v23 = vpop.f32.mrf.mxu1  ;;  %v10363_v25 = vor.u32 %v11370_v40, %v10362_v58  ;;  %v10075_v53 = vor.u32 %v11298_v48, %v10074_v50  ;;  %v10346_v18 = vld [vmem:[#allocation11 + $0x520] sm:$0xf]  ;;  %v10236_v50 = vld [vmem:[#allocation11 + $0x450] sm:$0xf0] }
 0x782   : > { %v5609_v8 = vadd.f32 %v5608_v63, %v5568_v27  ;;  %7422 = vmatpush.bf16.msra.mxu0 %v9983_v22  ;;  %v5610_v0 = vpop.f32.mrf.mxu0  ;;  %v10300_v63 = vld [vmem:[#allocation11 + $0x4d0] sm:$0xf0]  ;;  %v11366_v22 = vld [vmem:[#allocation11 + $0x52c] sm:$0xf0]  ;;  %v11348_v27 = vld [vmem:[#allocation11 + $0x4a4] sm:$0xf] }
 0x783   : > { %v10303_v13 = vor.u32 %v11352_v54, %v10300_v63  ;;  %7357 = vmatpush.bf16.msrb.mxu3 %v10363_v25  ;;  %v10347_v32 = vor.u32 %v11366_v22, %v10346_v18  ;;  %7333 = vmatpush.bf16.msra.mxu2 %v10075_v53  ;;  %v10287_v20 = vor.u32 %v11348_v27, %v10284_v35  ;;  %v11260_v0 = vld [vmem:[#allocation11 + $0x1e4] sm:$0xf]  ;;  %v10508_v63 = vld [vmem:[#allocation11 + $0x670] sm:$0xf0]  ;;  %v10682_v25 = vld [vmem:[#allocation11 + $0x7c0] sm:$0xf] }
 0x784   : > { %v5650_v11 = vadd.f32 %v5649_v2, %v5609_v8  ;;  %v10559_v2 = vor.u32 %v11416_v30, %v10556_v16  ;;  %v10330_v8 = vld [vmem:[#allocation11 + $0x500] sm:$0xf]  ;;  %v11404_v54 = vld [vmem:[#allocation11 + $0x664] sm:$0xf]  ;;  %v9900_v18 = vld [vmem:[#allocation11 + $0x1b0] sm:$0xf0] }
 0x785   : > { %7397 = vmatpush.bf16.msra.mxu1 %v9711_v61  ;;  %v11412_v61 = vld [vmem:[#allocation11 + $0x6a4] sm:$0xf]  ;;  %v10331_v55 = vor.u32 %v11362_v14, %v10330_v8  ;;  %v10511_v53 = vor.u32 %v11404_v54, %v10508_v63  ;;  %v10492_v35 = vld [vmem:[#allocation11 + $0x650] sm:$0xf0]  ;;  %v11295_v63 = vld [vmem:[#allocation11 + $0x2f4] sm:$0xf0] }
 0x786   : > { %v5684_v5 = vmax.f32 %v5650_v11, 0.0  ;;  %7423 = vmatpush.bf16.msra.mxu0 %v9967_v41  ;;  %v9932_v41 = vld [vmem:[#allocation11 + $0x1f0] sm:$0xf0]  ;;  %v10543_v36 = vor.u32 %v11412_v61, %v10540_v21  ;;  %v14149_v40 = vld [vmem:[#allocation27_spill] sm:$0xff] }
 0x787   : > { %v5569_v44 = vpop.f32.mrf.mxu3  ;;  %7358 = vmatpush.bf16.msrb.mxu3 %v10347_v32  ;;  %v9935_v47 = vor.u32 %v11260_v0, %v9932_v41  ;;  %v11336_v16 = vld [vmem:[#allocation11 + $0x444] sm:$0xf]  ;;  %v10666_v21 = vld [vmem:[#allocation11 + $0x7a0] sm:$0xf]  ;;  %v10476_v41 = vld [vmem:[#allocation11 + $0x630] sm:$0xf0] }
 0x788   : > { %v5712_v17 = vmax.f32 %v5682_v60, %v5684_v5  ;;  %v5651_v38 = vpop.f32.mrf.mxu2  ;;  %v10252_v60 = vld [vmem:[#allocation11 + $0x470] sm:$0xf0]  ;;  %v10699_v5 = vor.u32 %v11454_v34, %v10698_v28  ;;  %v10527_v44 = vor.u32 %v11408_v45, %v10524_v52  ;;  %v11400_v27 = vld [vmem:[#allocation11 + $0x644] sm:$0xf] }
 0x789   : > { %7398 = vmatpush.bf16.msra.mxu1 %v9695_v12  ;;  %v5530_v26 = vpop.f32.mrf.mxu1  ;;  %v10271_v12 = vor.u32 %v11344_v37, %v10268_v3  ;;  %v10255_v30 = vor.u32 %v11340_v4, %v10252_v60  ;;  %v11332_v61 = vld [vmem:[#allocation11 + $0x424] sm:$0xf]  ;;  %v10220_v37 = vld [vmem:[#allocation11 + $0x430] sm:$0xf0]  ;;  %v10495_v3 = vor.u32 %v11400_v27, %v10492_v35  ;;  %v11231_v60 = vld [vmem:[#allocation11 + $0xf4] sm:$0xf0] }
 0x78a   : > { %v5726_v59 = vmax.f32 %v13922_v39, %v5712_v17  ;;  %7424 = vmatpush.bf16.msra.mxu0 %v9951_v10  ;;  %v5612_v24 = vpop.f32.mrf.mxu0  ;;  %v5531_v39 = vadd.f32 %v5530_v26, %v13873_v56  ;;  %7378 = vmatpush.bf16.msrb.mxu2 %v10699_v5  ;;  %v5686_v17 = vmax.f32 %v14149_v40, 0.0  ;;  %v11450_v26 = vld [vmem:[#allocation11 + $0x7cc] sm:$0xf0]  ;;  %v11248_v14 = vld [vmem:[#allocation11 + $0x184] sm:$0xf] }
 0x78b   : > { %7359 = vmatpush.bf16.msrb.mxu3 %v10331_v55  ;;  %v10683_v48 = vor.u32 %v11450_v26, %v10682_v25  ;;  %v11396_v0 = vld [vmem:[#allocation11 + $0x624] sm:$0xf]  ;;  %v10204_v52 = vld [vmem:[#allocation11 + $0x410] sm:$0xf0]  ;;  %v10634_v40 = vld [vmem:[#allocation11 + $0x760] sm:$0xf] }
 0x78c   : > { %v13937_v23 = vpack.c.bf16 %v5726_v59, %v5726_v59  ;;  %7399 = vmatmul.bf16.vlgmr.msra.gmra.mxu1 %v13912_v29  ;;  %v11252_v59 = vld [vmem:[#allocation11 + $0x1a4] sm:$0xf]  ;;  %v9868_v4 = vld [vmem:[#allocation11 + $0x170] sm:$0xf0]  ;;  %v10479_v34 = vor.u32 %v11396_v0, %v10476_v41 }
 0x78d   : > { %7443 = vmatpush.bf16.msrb.mxu1 %v10319_v57  ;;  %7425 = vmatmul.bf16.vlgmr.msra.gmra.mxu0 %v13916_v62  ;;  %v11256_v57 = vld [vmem:[#allocation11 + $0x1c4] sm:$0xf]  ;;  %v9903_v32 = vor.u32 %v11252_v59, %v9900_v18  ;;  %v11227_v59 = vld [vmem:[#allocation11 + $0xd4] sm:$0xf0] }
 0x78e   : > { %7469 = vmatpush.bf16.msrb.mxu0 %v10575_v19  ;;  %7308 = vmatmul.bf16.vlgmr.msra.gmra.mxu3 %v13937_v23  ;;  %v9919_v10 = vor.u32 %v11256_v57, %v9916_v15  ;;  %v11240_v26 = vld [vmem:[#allocation11 + $0x144] sm:$0xf] }
 0x78f   : > { %v5571_v51 = vpop.f32.mrf.mxu3  ;;  %7404 = vmatpush.bf16.msra.mxu3 %v9935_v47  ;;  %7379 = vmatpush.bf16.msrb.mxu2 %v10683_v48  ;;  %v11328_v47 = vld [vmem:[#allocation11 + $0x404] sm:$0xf]  ;;  %v9794_v48 = vld [vmem:[#allocation11 + $0xc8] sm:$0xf] }
 0x790   : > { %v5572_v7 = vadd.f32 %v5571_v51, %v5531_v39  ;;  %v5653_v11 = vpop.f32.mrf.mxu2  ;;  %v11446_v39 = vld [vmem:[#allocation11 + $0x7ac] sm:$0xf0]  ;;  %v9884_v51 = vld [vmem:[#allocation11 + $0x190] sm:$0xf0]  ;;  %v10207_v54 = vor.u32 %v11328_v47, %v10204_v52  ;;  %v14150_v27 = vld [vmem:[#allocation28_spill] sm:$0xff] }
 0x791   : > { %7444 = vmatpush.bf16.msrb.mxu1 %v10303_v13  ;;  %v5532_v56 = vpop.f32.mrf.mxu1  ;;  %v10667_v8 = vor.u32 %v11446_v39, %v10666_v21  ;;  %v9887_v55 = vor.u32 %v11248_v14, %v9884_v51  ;;  %v5690_v35 = vmax.f32 %v14150_v27, 0.0  ;;  %v9795_v39 = vor.u32 %v11227_v59, %v9794_v48  ;;  %v9778_v51 = vld [vmem:[#allocation11 + $0xa8] sm:$0xf]  ;;  %v11279_v59 = vld [vmem:[#allocation11 + $0x274] sm:$0xf0] }
 0x792   : > { %7470 = vmatpush.bf16.msrb.mxu0 %v10559_v2  ;;  %v5613_v9 = vadd.f32 %v5612_v24, %v5572_v7  ;;  %v5614_v49 = vpop.f32.mrf.mxu0  ;;  %v10239_v2 = vor.u32 %v11336_v16, %v10236_v50  ;;  %v10650_v56 = vld [vmem:[#allocation11 + $0x780] sm:$0xf]  ;;  %v10002_v48 = vld [vmem:[#allocation11 + $0x268] sm:$0xf] }
 0x793   : > { %7405 = vmatpush.bf16.msra.mxu3 %v9919_v10  ;;  %7380 = vmatpush.bf16.msrb.mxu2 %v10667_v8  ;;  %v9810_v49 = vld [vmem:[#allocation11 + $0xe8] sm:$0xf]  ;;  %v9836_v8 = vld [vmem:[#allocation11 + $0x130] sm:$0xf0] }
 0x794   : > { %v5654_v58 = vadd.f32 %v5653_v11, %v5613_v9  ;;  %v11442_v11 = vld [vmem:[#allocation11 + $0x78c] sm:$0xf0] }
 0x795   : > { %7445 = vmatpush.bf16.msrb.mxu1 %v10287_v20  ;;  %v10651_v9 = vor.u32 %v11442_v11, %v10650_v56  ;;  %v11287_v56 = vld [vmem:[#allocation11 + $0x2b4] sm:$0xf0]  ;;  %v10602_v11 = vld [vmem:[#allocation11 + $0x720] sm:$0xf] }
 0x796   : > { %7471 = vmatpush.bf16.msrb.mxu0 %v10543_v36  ;;  %v5688_v19 = vmax.f32 %v5654_v58, 0.0  ;;  %v10223_v36 = vor.u32 %v11332_v61, %v10220_v37  ;;  %v10460_v58 = vld [vmem:[#allocation11 + $0x610] sm:$0xf0]  ;;  %v11434_v61 = vld [vmem:[#allocation11 + $0x74c] sm:$0xf0] }
 0x797   : > { %v5573_v38 = vpop.f32.mrf.mxu3  ;;  %7406 = vmatpush.bf16.msra.mxu3 %v9903_v32  ;;  %7381 = vmatpush.bf16.msrb.mxu2 %v10651_v9  ;;  %v11236_v37 = vld [vmem:[#allocation11 + $0x124] sm:$0xf] }
 0x798   : > { %v13944_v13 = vmax.f32 %v5686_v17, %v5688_v19  ;;  %v5655_v24 = vpop.f32.mrf.mxu2  ;;  %v11438_v17 = vld [vmem:[#allocation11 + $0x76c] sm:$0xf0]  ;;  %v9852_v38 = vld [vmem:[#allocation11 + $0x150] sm:$0xf0] }
 0x799   : > { %7446 = vmatpush.bf16.msrb.mxu1 %v10271_v12  ;;  %v5534_v22 = vpop.f32.mrf.mxu1  ;;  %v11244_v12 = vld [vmem:[#allocation11 + $0x164] sm:$0xf]  ;;  %v10635_v25 = vor.u32 %v11438_v17, %v10634_v40  ;;  %v11291_v24 = vld [vmem:[#allocation11 + $0x2d4] sm:$0xf0]  ;;  %v10188_v17 = vld [vmem:[#allocation11 + $0x3f0] sm:$0xf0] }
 0x79a   : > { %7472 = vmatpush.bf16.msrb.mxu0 %v10527_v44  ;;  %v5616_v20 = vpop.f32.mrf.mxu0  ;;  %v5535_v7 = vadd.f32 %v5534_v22, %v13880_v6  ;;  %v9871_v5 = vor.u32 %v11244_v12, %v9868_v4  ;;  %v11392_v6 = vld [vmem:[#allocation11 + $0x604] sm:$0xf]  ;;  %v10066_v44 = vld [vmem:[#allocation11 + $0x2e8] sm:$0xf] }
 0x79b   : > { %7407 = vmatpush.bf16.msra.mxu3 %v9887_v55  ;;  %v10463_v50 = vor.u32 %v11392_v6, %v10460_v58  ;;  %v10067_v18 = vor.u32 %v11295_v63, %v10066_v44  ;;  %v10050_v22 = vld [vmem:[#allocation11 + $0x2c8] sm:$0xf]  ;;  %7382 = vmatpush.bf16.msrb.mxu2 %v10635_v25  ;;  %v9839_v55 = vor.u32 %v11236_v37, %v9836_v8  ;;  %v11232_v4 = vld [vmem:[#allocation11 + $0x104] sm:$0xf]  ;;  %v11283_v6 = vld [vmem:[#allocation11 + $0x294] sm:$0xf0] }
 0x79c   : > { %v10586_v58 = vld [vmem:[#allocation11 + $0x700] sm:$0xf]  ;;  %v11426_v44 = vld [vmem:[#allocation11 + $0x70c] sm:$0xf0]  ;;  %v11324_v40 = vld [vmem:[#allocation11 + $0x3e4] sm:$0xf] }
 0x79d   : > { %7447 = vmatpush.bf16.msrb.mxu1 %v10255_v30  ;;  %v9811_v30 = vor.u32 %v11231_v60, %v9810_v49  ;;  %v9762_v49 = vld [vmem:[#allocation11 + $0x88] sm:$0xf]  ;;  %v11219_v60 = vld [vmem:[#allocation11 + $0x94] sm:$0xf0]  ;;  %v10587_v63 = vor.u32 %v11426_v44, %v10586_v58 }
 0x79e   : > { %7473 = vmatpush.bf16.msrb.mxu0 %v10511_v53  ;;  %v9855_v53 = vor.u32 %v11240_v26, %v9852_v38  ;;  %v11215_v25 = vld [vmem:[#allocation11 + $0x74] sm:$0xf0]  ;;  %v10191_v26 = vor.u32 %v11324_v40, %v10188_v17  ;;  %v9986_v37 = vld [vmem:[#allocation11 + $0x248] sm:$0xf]  ;;  %v11308_v17 = vld [vmem:[#allocation11 + $0x364] sm:$0xf] }
 0x79f   : > { %v5575_v45 = vpop.f32.mrf.mxu3  ;;  %7408 = vmatpush.bf16.msra.mxu3 %v9871_v5  ;;  %v11275_v8 = vld [vmem:[#allocation11 + $0x254] sm:$0xf0]  ;;  %v9954_v58 = vld [vmem:[#allocation11 + $0x208] sm:$0xf] }
 0x7a0   : > { %v5576_v28 = vadd.f32 %v5575_v45, %v5535_v7  ;;  %v5657_v15 = vpop.f32.mrf.mxu2  ;;  %v10051_v7 = vor.u32 %v11291_v24, %v10050_v22  ;;  %v11430_v45 = vld [vmem:[#allocation11 + $0x72c] sm:$0xf0]  ;;  %v11320_v22 = vld [vmem:[#allocation11 + $0x3c4] sm:$0xf]  ;;  %v10172_v24 = vld [vmem:[#allocation11 + $0x3d0] sm:$0xf0] }
 0x7a1   : > { %7448 = vmatpush.bf16.msrb.mxu1 %v10239_v2  ;;  %v5536_v57 = vpop.f32.mrf.mxu1  ;;  %v10618_v2 = vld [vmem:[#allocation11 + $0x740] sm:$0xf]  ;;  %v10603_v12 = vor.u32 %v11430_v45, %v10602_v11  ;;  %v9987_v11 = vor.u32 %v11275_v8, %v9986_v37  ;;  %v9970_v45 = vld [vmem:[#allocation11 + $0x228] sm:$0xf]  ;;  %v11267_v44 = vld [vmem:[#allocation11 + $0x214] sm:$0xf0] }
 0x7a2   : > { %7474 = vmatpush.bf16.msrb.mxu0 %v10495_v3  ;;  %v5617_v10 = vadd.f32 %v5616_v20, %v5576_v28  ;;  %v5618_v19 = vpop.f32.mrf.mxu0  ;;  %v10619_v20 = vor.u32 %v11434_v61, %v10618_v2  ;;  %v11223_v3 = vld [vmem:[#allocation11 + $0xb4] sm:$0xf0]  ;;  %v9820_v28 = vld [vmem:[#allocation11 + $0x110] sm:$0xf0]  ;;  %v10018_v57 = vld [vmem:[#allocation11 + $0x288] sm:$0xf]  ;;  %v10175_v2 = vor.u32 %v11320_v22, %v10172_v24  ;;  %v10003_v61 = vor.u32 %v11279_v59, %v10002_v48 }
 0x7a3   : > { %7409 = vmatpush.bf16.msra.mxu3 %v9855_v53  ;;  %v9779_v9 = vor.u32 %v11223_v3, %v9778_v51  ;;  %v9823_v5 = vor.u32 %v11232_v4, %v9820_v28  ;;  %v11316_v3 = vld [vmem:[#allocation11 + $0x3a4] sm:$0xf]  ;;  %v10140_v28 = vld [vmem:[#allocation11 + $0x390] sm:$0xf0]  ;;  %v11423_v40 = vld [vmem:[#allocation11 + $0x6f4] sm:$0xf0] }
 0x7a4   : > { %v5658_v16 = vadd.f32 %v5657_v15, %v5617_v10  ;;  %7383 = vmatpush.bf16.msrb.mxu2 %v10619_v20  ;;  %v11312_v4 = vld [vmem:[#allocation11 + $0x384] sm:$0xf]  ;;  %v11355_v48 = vld [vmem:[#allocation11 + $0x4d4] sm:$0xf0] }
 0x7a5   : > { %7449 = vmatpush.bf16.msrb.mxu1 %v10223_v36  ;;  %v10034_v36 = vld [vmem:[#allocation11 + $0x2a8] sm:$0xf]  ;;  %v11419_v22 = vld [vmem:[#allocation11 + $0x6d4] sm:$0xf0] }
 0x7a6   : > { %7475 = vmatpush.bf16.msrb.mxu0 %v10479_v34  ;;  %v5692_v32 = vmax.f32 %v5658_v16, 0.0  ;;  %v10019_v16 = vor.u32 %v11283_v6, %v10018_v57  ;;  %v10322_v57 = vld [vmem:[#allocation11 + $0x4e8] sm:$0xf] }
 0x7a7   : > { %v5577_v21 = vpop.f32.mrf.mxu3  ;;  %7410 = vmatpush.bf16.msra.mxu3 %v9839_v55  ;;  %v10156_v55 = vld [vmem:[#allocation11 + $0x3b0] sm:$0xf0] }
 0x7a8   : > { %v5716_v14 = vmax.f32 %v5690_v35, %v5692_v32  ;;  %v5659_v41 = vpop.f32.mrf.mxu2  ;;  %7384 = vmatpush.bf16.msrb.mxu2 %v10603_v12  ;;  %v9730_v35 = vld [vmem:[#allocation11 + $0x48] sm:$0xf]  ;;  %v11211_v32 = vld [vmem:[#allocation11 + $0x54] sm:$0xf0]  ;;  %v14151_v21 = vld [vmem:[#allocation29_spill] sm:$0xff] }
 0x7a9   : > { %7450 = vmatpush.bf16.msrb.mxu1 %v10207_v54  ;;  %v5538_v0 = vpop.f32.mrf.mxu1  ;;  %v9763_v54 = vor.u32 %v11219_v60, %v9762_v49  ;;  %v9731_v51 = vor.u32 %v11211_v32, %v9730_v35  ;;  %v9714_v41 = vld [vmem:[#allocation11 + $0x28] sm:$0xf]  ;;  %v11203_v60 = vld [vmem:[#allocation11 + $0x14] sm:$0xf0]  ;;  %v11304_v35 = vld [vmem:[#allocation11 + $0x344] sm:$0xf] }
 0x7aa   : > { %7476 = vmatpush.bf16.msrb.mxu0 %v10463_v50  ;;  %v5728_v47 = vmax.f32 %v13944_v13, %v5716_v14  ;;  %v5620_v52 = vpop.f32.mrf.mxu0  ;;  %v10035_v13 = vor.u32 %v11287_v56, %v10034_v36  ;;  %v5539_v15 = vadd.f32 %v5538_v0, %v13887_v46  ;;  %v10159_v36 = vor.u32 %v11316_v3, %v10156_v55  ;;  %v9698_v49 = vld [vmem:[#allocation11 + $0x8] sm:$0xf]  ;;  %v10108_v32 = vld [vmem:[#allocation11 + $0x350] sm:$0xf0]  ;;  %v11415_v3 = vld [vmem:[#allocation11 + $0x6b4] sm:$0xf0] }
 0x7ab   : > { %7411 = vmatpush.bf16.msra.mxu3 %v9823_v5  ;;  %v10143_v5 = vor.u32 %v11312_v4, %v10140_v28  ;;  %v11388_v55 = vld [vmem:[#allocation11 + $0x5e4] sm:$0xf] }
 0x7ac   : > { %7451 = vmatmul.bf16.vlgmr.msrb.gmra.mxu1 %v13926_v42  ;;  %v13951_v34 = vpack.c.bf16 %v5728_v47, %v5728_v47  ;;  %7385 = vmatpush.bf16.msrb.mxu2 %v10587_v63  ;;  %v9699_v63 = vor.u32 %v11203_v60, %v9698_v49 }
 0x7ad   : > { %7495 = vmatpush.bf16.msra.mxu1 %v9811_v30  ;;  %7477 = vmatmul.bf16.vlgmr.msrb.gmra.mxu0 %v13930_v33  ;;  %v9746_v30 = vld [vmem:[#allocation11 + $0x68] sm:$0xf] }
 0x7ae   : > { %7521 = vmatpush.bf16.msra.mxu0 %v10067_v18  ;;  %7334 = vmatmul.bf16.vlgmr.msra.gmra.mxu2 %v13951_v34  ;;  %v9747_v18 = vor.u32 %v11215_v25, %v9746_v30 }
 0x7af   : > { %v5579_v10 = vpop.f32.mrf.mxu3 }
 0x7b0   : > { %v5580_v19 = vadd.f32 %v5579_v10, %v5539_v15  ;;  %v5661_v46 = vpop.f32.mrf.mxu2  ;;  %7430 = vmatpush.bf16.msra.mxu2 %v10191_v26  ;;  %v11359_v15 = vld [vmem:[#allocation11 + $0x4f4] sm:$0xf0]  ;;  %v10578_v10 = vld [vmem:[#allocation11 + $0x6e8] sm:$0xf] }
 0x7b1   : > { %7496 = vmatpush.bf16.msra.mxu1 %v9795_v39  ;;  %v5540_v38 = vpop.f32.mrf.mxu1  ;;  %v5694_v39 = vmax.f32 %v14151_v21, 0.0  ;;  %v10323_v25 = vor.u32 %v11359_v15, %v10322_v57  ;;  %v10579_v59 = vor.u32 %v11423_v40, %v10578_v10  ;;  %v10111_v21 = vor.u32 %v11304_v35, %v10108_v32  ;;  %v11384_v57 = vld [vmem:[#allocation11 + $0x5c4] sm:$0xf]  ;;  %v10076_v10 = vld [vmem:[#allocation11 + $0x310] sm:$0xf0] }
 0x7b2   : > { %7522 = vmatpush.bf16.msra.mxu0 %v10051_v7  ;;  %v5621_v50 = vadd.f32 %v5620_v52, %v5580_v19  ;;  %v5622_v53 = vpop.f32.mrf.mxu0  ;;  %v11207_v7 = vld [vmem:[#allocation11 + $0x34] sm:$0xf0]  ;;  %v10124_v19 = vld [vmem:[#allocation11 + $0x370] sm:$0xf0] }
 0x7b3   : > { %v11271_v52 = vld [vmem:[#allocation11 + $0x234] sm:$0xf0]  ;;  %v9715_v12 = vor.u32 %v11207_v7, %v9714_v41  ;;  %v10127_v26 = vor.u32 %v11308_v17, %v10124_v19 }
 0x7b4   : > { %v5662_v27 = vadd.f32 %v5661_v46, %v5621_v50  ;;  %7431 = vmatpush.bf16.msra.mxu2 %v10175_v2  ;;  %v10306_v50 = vld [vmem:[#allocation11 + $0x4c8] sm:$0xf]  ;;  %v11403_v35 = vld [vmem:[#allocation11 + $0x654] sm:$0xf0] }
 0x7b5   : > { %7497 = vmatpush.bf16.msra.mxu1 %v9779_v9  ;;  %v10290_v2 = vld [vmem:[#allocation11 + $0x4a8] sm:$0xf] }
 0x7b6   : > { %7523 = vmatpush.bf16.msra.mxu0 %v10035_v13  ;;  %v5696_v20 = vmax.f32 %v5662_v27, 0.0  ;;  %v9971_v13 = vor.u32 %v11271_v52, %v9970_v45  ;;  %v10307_v27 = vor.u32 %v11355_v48, %v10306_v50  ;;  %v10274_v52 = vld [vmem:[#allocation11 + $0x488] sm:$0xf]  ;;  %v10412_v50 = vld [vmem:[#allocation11 + $0x5b0] sm:$0xf0] }
 0x7b7   : > { %v5581_v14 = vpop.f32.mrf.mxu3 }
 0x7b8   : > { %v13956_v0 = vmax.f32 %v5694_v39, %v5696_v20  ;;  %v5663_v56 = vpop.f32.mrf.mxu2  ;;  %7432 = vmatpush.bf16.msra.mxu2 %v10159_v36  ;;  %v14152_v39 = vld [vmem:[#allocation30_spill] sm:$0xff] }
 0x7b9   : > { %7498 = vmatpush.bf16.msra.mxu1 %v9763_v54  ;;  %v5542_v47 = vpop.f32.mrf.mxu1  ;;  %v5698_v20 = vmax.f32 %v14152_v39, 0.0  ;;  %v10444_v36 = vld [vmem:[#allocation11 + $0x5f0] sm:$0xf0]  ;;  %v10226_v39 = vld [vmem:[#allocation11 + $0x428] sm:$0xf] }
 0x7ba   : > { %7524 = vmatpush.bf16.msra.mxu0 %v10019_v16  ;;  %v5624_v9 = vpop.f32.mrf.mxu0  ;;  %v5543_v6 = vadd.f32 %v5542_v47, %v13894_v43  ;;  %v9955_v16 = vor.u32 %v11267_v44, %v9954_v58  ;;  %v11300_v47 = vld [vmem:[#allocation11 + $0x324] sm:$0xf]  ;;  %v10092_v56 = vld [vmem:[#allocation11 + $0x330] sm:$0xf0]  ;;  %v10447_v60 = vor.u32 %v11388_v55, %v10444_v36 }
 0x7bb   : > { %v10428_v58 = vld [vmem:[#allocation11 + $0x5d0] sm:$0xf0]  ;;  %v11296_v44 = vld [vmem:[#allocation11 + $0x304] sm:$0xf] }
 0x7bc   : > { %7433 = vmatpush.bf16.msra.mxu2 %v10143_v5  ;;  %v10530_v5 = vld [vmem:[#allocation11 + $0x688] sm:$0xf]  ;;  %v10079_v40 = vor.u32 %v11296_v44, %v10076_v10  ;;  %v10364_v44 = vld [vmem:[#allocation11 + $0x550] sm:$0xf0] }
 0x7bd   : > { %7499 = vmatpush.bf16.msra.mxu1 %v9747_v18  ;;  %v10562_v18 = vld [vmem:[#allocation11 + $0x6c8] sm:$0xf] }
 0x7be   : > { %7525 = vmatpush.bf16.msra.mxu0 %v10003_v61  ;;  %v11351_v61 = vld [vmem:[#allocation11 + $0x4b4] sm:$0xf0]  ;;  %v10563_v8 = vor.u32 %v11419_v22, %v10562_v18 }
 0x7bf   : > { %v5583_v54 = vpop.f32.mrf.mxu3  ;;  %v10291_v7 = vor.u32 %v11351_v61, %v10290_v2  ;;  %v11376_v61 = vld [vmem:[#allocation11 + $0x584] sm:$0xf] }
 0x7c0   : > { %v5584_v30 = vadd.f32 %v5583_v54, %v5543_v6  ;;  %v5665_v46 = vpop.f32.mrf.mxu2  ;;  %7434 = vmatpush.bf16.msra.mxu2 %v10127_v26  ;;  %v10258_v54 = vld [vmem:[#allocation11 + $0x468] sm:$0xf]  ;;  %v11407_v26 = vld [vmem:[#allocation11 + $0x674] sm:$0xf0] }
 0x7c1   : > { %7500 = vmatpush.bf16.msra.mxu1 %v9731_v51  ;;  %v5544_v38 = vpop.f32.mrf.mxu1  ;;  %v10546_v51 = vld [vmem:[#allocation11 + $0x6a8] sm:$0xf] }
 0x7c2   : > { %7526 = vmatpush.bf16.msra.mxu0 %v9987_v11  ;;  %v5625_v43 = vadd.f32 %v5624_v9, %v5584_v30  ;;  %v5626_v53 = vpop.f32.mrf.mxu0  ;;  %v11347_v9 = vld [vmem:[#allocation11 + $0x494] sm:$0xf0]  ;;  %v10547_v28 = vor.u32 %v11415_v3, %v10546_v51  ;;  %v10431_v30 = vor.u32 %v11384_v57, %v10428_v58  ;;  %v11368_v58 = vld [vmem:[#allocation11 + $0x544] sm:$0xf] }
 0x7c3   : > { %v10275_v6 = vor.u32 %v11347_v9, %v10274_v52  ;;  %v11339_v53 = vld [vmem:[#allocation11 + $0x454] sm:$0xf0]  ;;  %v10210_v9 = vld [vmem:[#allocation11 + $0x408] sm:$0xf] }
 0x7c4   : > { %v5666_v24 = vadd.f32 %v5665_v46, %v5625_v43  ;;  %7435 = vmatpush.bf16.msra.mxu2 %v10111_v21  ;;  %v10396_v21 = vld [vmem:[#allocation11 + $0x590] sm:$0xf0]  ;;  %v11395_v57 = vld [vmem:[#allocation11 + $0x614] sm:$0xf0] }
 0x7c5   : > { %7501 = vmatpush.bf16.msra.mxu1 %v9715_v12  ;;  %v10095_v12 = vor.u32 %v11300_v47, %v10092_v56  ;;  %v10399_v55 = vor.u32 %v11376_v61, %v10396_v21  ;;  %v11372_v56 = vld [vmem:[#allocation11 + $0x564] sm:$0xf]  ;;  %v11285_v61 = vld [vmem:[#allocation11 + $0x2ac] sm:$0xf] }
 0x7c6   : > { %7527 = vmatpush.bf16.msra.mxu0 %v9971_v13  ;;  %v5700_v37 = vmax.f32 %v5666_v24, 0.0  ;;  %v11411_v13 = vld [vmem:[#allocation11 + $0x694] sm:$0xf0] }
 0x7c7   : > { %v5585_v14 = vpop.f32.mrf.mxu3  ;;  %v10531_v17 = vor.u32 %v11411_v13, %v10530_v5  ;;  %v10466_v13 = vld [vmem:[#allocation11 + $0x608] sm:$0xf] }
 0x7c8   : > { %v5720_v41 = vmax.f32 %v5698_v20, %v5700_v37  ;;  %v5667_v45 = vpop.f32.mrf.mxu2  ;;  %7436 = vmatpush.bf16.msra.mxu2 %v10095_v12  ;;  %v11335_v20 = vld [vmem:[#allocation11 + $0x434] sm:$0xf0]  ;;  %v14153_v37 = vld [vmem:[#allocation31_spill] sm:$0xff] }
 0x7c9   : > { %7502 = vmatpush.bf16.msra.mxu1 %v9699_v63  ;;  %v5546_v11 = vpop.f32.mrf.mxu1  ;;  %v11343_v63 = vld [vmem:[#allocation11 + $0x474] sm:$0xf0]  ;;  %v10227_v47 = vor.u32 %v11335_v20, %v10226_v39  ;;  %v10036_v39 = vld [vmem:[#allocation11 + $0x2b8] sm:$0xf0]  ;;  %v9938_v20 = vld [vmem:[#allocation11 + $0x1e8] sm:$0xf] }
 0x7ca   : > { %7528 = vmatpush.bf16.msra.mxu0 %v9955_v16  ;;  %v5730_v4 = vmax.f32 %v13956_v0, %v5720_v41  ;;  %v5628_v49 = vpop.f32.mrf.mxu0  ;;  %v5547_v0 = vadd.f32 %v5546_v11, %v13901_v31  ;;  %v10259_v46 = vor.u32 %v11343_v63, %v10258_v54  ;;  %v11380_v16 = vld [vmem:[#allocation11 + $0x5a4] sm:$0xf]  ;;  %v10482_v41 = vld [vmem:[#allocation11 + $0x628] sm:$0xf]  ;;  %v10380_v11 = vld [vmem:[#allocation11 + $0x570] sm:$0xf0] }
 0x7cb   : > { %v10415_v24 = vor.u32 %v11380_v16, %v10412_v50  ;;  %v11331_v12 = vld [vmem:[#allocation11 + $0x414] sm:$0xf0]  ;;  %v10383_v5 = vor.u32 %v11372_v56, %v10380_v11  ;;  %v11293_v54 = vld [vmem:[#allocation11 + $0x2ec] sm:$0xf]  ;;  %v10068_v63 = vld [vmem:[#allocation11 + $0x2f8] sm:$0xf0]  ;;  %v10039_v56 = vor.u32 %v11285_v61, %v10036_v39 }
 0x7cc   : > { %7503 = vmatmul.bf16.vlgmr.msra.gmra.mxu1 %v13912_v29  ;;  %v13963_v15 = vpack.c.bf16 %v5730_v4, %v5730_v4  ;;  %7437 = vmatpush.bf16.msra.mxu2 %v10079_v40  ;;  %v10348_v16 = vld [vmem:[#allocation11 + $0x530] sm:$0xf0] }
 0x7cd   : > { %7547 = vmatpush.bf16.msrb.mxu1 %v10323_v25  ;;  %7529 = vmatmul.bf16.vlgmr.msra.gmra.mxu0 %v13916_v62  ;;  %v10514_v25 = vld [vmem:[#allocation11 + $0x668] sm:$0xf]  ;;  %v10652_v39 = vld [vmem:[#allocation11 + $0x790] sm:$0xf0] }
 0x7ce   : > { %7573 = vmatpush.bf16.msrb.mxu0 %v10579_v59  ;;  %7360 = vmatmul.bf16.vlgmr.msrb.gmra.mxu3 %v13963_v15  ;;  %v10242_v59 = vld [vmem:[#allocation11 + $0x448] sm:$0xf]  ;;  %v10515_v18 = vor.u32 %v11407_v26, %v10514_v25  ;;  %v10367_v25 = vor.u32 %v11368_v58, %v10364_v44 }
 0x7cf   : > { %7456 = vmatpush.bf16.msrb.mxu3 %v10447_v60  ;;  %v5587_v19 = vpop.f32.mrf.mxu3  ;;  %v10243_v2 = vor.u32 %v11339_v53, %v10242_v59  ;;  %v11289_v59 = vld [vmem:[#allocation11 + $0x2cc] sm:$0xf] }
 0x7d0   : > { %v5588_v38 = vadd.f32 %v5587_v19, %v5547_v0  ;;  %v5669_v43 = vpop.f32.mrf.mxu2  ;;  %v10467_v0 = vor.u32 %v11395_v57, %v10466_v13  ;;  %v9796_v19 = vld [vmem:[#allocation11 + $0xd8] sm:$0xf0]  ;;  %v11213_v57 = vld [vmem:[#allocation11 + $0x6c] sm:$0xf] }
 0x7d1   : > { %7548 = vmatpush.bf16.msrb.mxu1 %v10307_v27  ;;  %v5548_v48 = vpop.f32.mrf.mxu1  ;;  %v10498_v27 = vld [vmem:[#allocation11 + $0x648] sm:$0xf] }
 0x7d2   : > { %7574 = vmatpush.bf16.msrb.mxu0 %v10563_v8  ;;  %v5629_v31 = vadd.f32 %v5628_v49, %v5588_v38  ;;  %v5630_v22 = vpop.f32.mrf.mxu0  ;;  %v5702_v8 = vmax.f32 %v14153_v37, 0.0  ;;  %v10499_v51 = vor.u32 %v11403_v35, %v10498_v27  ;;  %v9812_v49 = vld [vmem:[#allocation11 + $0xf8] sm:$0xf0]  ;;  %v10071_v38 = vor.u32 %v11293_v54, %v10068_v63  ;;  %v11263_v37 = vld [vmem:[#allocation11 + $0x1f4] sm:$0xf0] }
 0x7d3   : > { %7457 = vmatpush.bf16.msrb.mxu3 %v10431_v30  ;;  %v9939_v11 = vor.u32 %v11263_v37, %v9938_v20  ;;  %v11269_v20 = vld [vmem:[#allocation11 + $0x22c] sm:$0xf] }
 0x7d4   : > { %v5670_v32 = vadd.f32 %v5669_v43, %v5629_v31  ;;  %v11221_v31 = vld [vmem:[#allocation11 + $0xac] sm:$0xf] }
 0x7d5   : > { %7549 = vmatpush.bf16.msrb.mxu1 %v10291_v7  ;;  %v11399_v7 = vld [vmem:[#allocation11 + $0x634] sm:$0xf0] }
 0x7d6   : > { %7575 = vmatpush.bf16.msrb.mxu0 %v10547_v28  ;;  %v5704_v14 = vmax.f32 %v5670_v32, 0.0  ;;  %v10483_v4 = vor.u32 %v11399_v7, %v10482_v41  ;;  %v11229_v28 = vld [vmem:[#allocation11 + $0xec] sm:$0xf]  ;;  %v11360_v32 = vld [vmem:[#allocation11 + $0x504] sm:$0xf] }
 0x7d7   : > { %7458 = vmatpush.bf16.msrb.mxu3 %v10415_v24  ;;  %v5589_v3 = vpop.f32.mrf.mxu3  ;;  %v9815_v10 = vor.u32 %v11229_v28, %v9812_v49  ;;  %v10020_v49 = vld [vmem:[#allocation11 + $0x298] sm:$0xf0] }
 0x7d8   : > { %v13968_v36 = vmax.f32 %v5702_v8, %v5704_v14  ;;  %v5671_v52 = vpop.f32.mrf.mxu2  ;;  %v14154_v8 = vld [vmem:[#allocation32_spill] sm:$0xff] }
 0x7d9   : > { %7550 = vmatpush.bf16.msrb.mxu1 %v10275_v6  ;;  %v5550_v45 = vpop.f32.mrf.mxu1  ;;  %v10211_v6 = vor.u32 %v11331_v12, %v10210_v9  ;;  %v5706_v14 = vmax.f32 %v14154_v8, 0.0  ;;  %v11217_v3 = vld [vmem:[#allocation11 + $0x8c] sm:$0xf]  ;;  %v10700_v52 = vld [vmem:[#allocation11 + $0x7f0] sm:$0xf0] }
 0x7da   : > { %7576 = vmatpush.bf16.msrb.mxu0 %v10531_v17  ;;  %v5632_v60 = vpop.f32.mrf.mxu0  ;;  %v5551_v40 = vadd.f32 %v5550_v45, %v13908_v1  ;;  %v11225_v17 = vld [vmem:[#allocation11 + $0xcc] sm:$0xf]  ;;  %v10052_v1 = vld [vmem:[#allocation11 + $0x2d8] sm:$0xf0]  ;;  %v11452_v45 = vld [vmem:[#allocation11 + $0x7e4] sm:$0xf] }
 0x7db   : > { %7459 = vmatpush.bf16.msrb.mxu3 %v10399_v55  ;;  %v9799_v43 = vor.u32 %v11225_v17, %v9796_v19  ;;  %v10055_v35 = vor.u32 %v11289_v59, %v10052_v1  ;;  %v9764_v55 = vld [vmem:[#allocation11 + $0x98] sm:$0xf0]  ;;  %v11281_v9 = vld [vmem:[#allocation11 + $0x28c] sm:$0xf]  ;;  %v10703_v44 = vor.u32 %v11452_v45, %v10700_v52  ;;  %v11436_v45 = vld [vmem:[#allocation11 + $0x764] sm:$0xf] }
 0x7dc   : > { %v9767_v28 = vor.u32 %v11217_v3, %v9764_v55  ;;  %v10023_v54 = vor.u32 %v11281_v9, %v10020_v49  ;;  %v11277_v17 = vld [vmem:[#allocation11 + $0x26c] sm:$0xf]  ;;  %v9972_v8 = vld [vmem:[#allocation11 + $0x238] sm:$0xf0]  ;;  %v10636_v52 = vld [vmem:[#allocation11 + $0x770] sm:$0xf0] }
 0x7dd   : > { %7551 = vmatpush.bf16.msrb.mxu1 %v10259_v46  ;;  %v11364_v46 = vld [vmem:[#allocation11 + $0x524] sm:$0xf]  ;;  %v11273_v59 = vld [vmem:[#allocation11 + $0x24c] sm:$0xf]  ;;  %v9700_v55 = vld [vmem:[#allocation11 + $0x18] sm:$0xf0] }
 0x7de   : > { %7577 = vmatpush.bf16.msrb.mxu0 %v10515_v18  ;;  %7412 = vmatmul.bf16.vlgmr.msra.gmra.mxu3 %v13937_v23  ;;  %v9780_v18 = vld [vmem:[#allocation11 + $0xb8] sm:$0xf0]  ;;  %v10351_v24 = vor.u32 %v11364_v46, %v10348_v16  ;;  %v11201_v3 = vld [vmem:[#allocation11 + $0xc] sm:$0xf] }
 0x7df   : > { %7460 = vmatpush.bf16.msrb.mxu3 %v10383_v5  ;;  %v5591_v30 = vpop.f32.mrf.mxu3  ;;  %v9783_v21 = vor.u32 %v11221_v31, %v9780_v18  ;;  %v11259_v5 = vld [vmem:[#allocation11 + $0x1d4] sm:$0xf0]  ;;  %v9988_v31 = vld [vmem:[#allocation11 + $0x258] sm:$0xf0]  ;;  %v9890_v18 = vld [vmem:[#allocation11 + $0x188] sm:$0xf] }
 0x7e0   : > { %v5592_v26 = vadd.f32 %v5591_v30, %v5551_v40  ;;  %v5673_v48 = vpop.f32.mrf.mxu2  ;;  %v11448_v40 = vld [vmem:[#allocation11 + $0x7c4] sm:$0xf]  ;;  %v10004_v30 = vld [vmem:[#allocation11 + $0x278] sm:$0xf0]  ;;  %v11265_v9 = vld [vmem:[#allocation11 + $0x20c] sm:$0xf] }
 0x7e1   : > { %7552 = vmatpush.bf16.msrb.mxu1 %v10243_v2  ;;  %v5552_v50 = vpop.f32.mrf.mxu1  ;;  %v10332_v2 = vld [vmem:[#allocation11 + $0x510] sm:$0xf0]  ;;  %v10007_v16 = vor.u32 %v11277_v17, %v10004_v30  ;;  %v9956_v49 = vld [vmem:[#allocation11 + $0x218] sm:$0xf0] }
 0x7e2   : > { %7578 = vmatpush.bf16.msrb.mxu0 %v10499_v51  ;;  %v5633_v53 = vadd.f32 %v5632_v60, %v5592_v26  ;;  %v5634_v22 = vpop.f32.mrf.mxu0  ;;  %v10335_v7 = vor.u32 %v11360_v32, %v10332_v2  ;;  %v9922_v60 = vld [vmem:[#allocation11 + $0x1c8] sm:$0xf]  ;;  %v11209_v26 = vld [vmem:[#allocation11 + $0x4c] sm:$0xf]  ;;  %v9991_v2 = vor.u32 %v11273_v59, %v9988_v31  ;;  %v10620_v30 = vld [vmem:[#allocation11 + $0x750] sm:$0xf0] }
 0x7e3   : > { %7461 = vmatpush.bf16.msrb.mxu3 %v10367_v25  ;;  %v9923_v63 = vor.u32 %v11259_v5, %v9922_v60  ;;  %v9906_v25 = vld [vmem:[#allocation11 + $0x1a8] sm:$0xf]  ;;  %v11251_v22 = vld [vmem:[#allocation11 + $0x194] sm:$0xf0] }
 0x7e4   : > { %v5674_v27 = vadd.f32 %v5673_v48, %v5633_v53  ;;  %v11444_v48 = vld [vmem:[#allocation11 + $0x7a4] sm:$0xf]  ;;  %v9891_v61 = vor.u32 %v11251_v22, %v9890_v18  ;;  %v9858_v60 = vld [vmem:[#allocation11 + $0x148] sm:$0xf]  ;;  %v11243_v5 = vld [vmem:[#allocation11 + $0x154] sm:$0xf0] }
 0x7e5   : > { %7553 = vmatpush.bf16.msrb.mxu1 %v10227_v47  ;;  %v9859_v17 = vor.u32 %v11243_v5, %v9858_v60  ;;  %v9826_v22 = vld [vmem:[#allocation11 + $0x108] sm:$0xf] }
 0x7e6   : > { %7579 = vmatpush.bf16.msrb.mxu0 %v10483_v4  ;;  %v5708_v51 = vmax.f32 %v5674_v27, 0.0  ;;  %v9716_v27 = vld [vmem:[#allocation11 + $0x38] sm:$0xf0] }
 0x7e7   : > { %7462 = vmatpush.bf16.msrb.mxu3 %v10351_v24  ;;  %v5593_v41 = vpop.f32.mrf.mxu3  ;;  %v11205_v24 = vld [vmem:[#allocation11 + $0x2c] sm:$0xf] }
 0x7e8   : > { %v5724_v47 = vmax.f32 %v5706_v14, %v5708_v51  ;;  %v5675_v12 = vpop.f32.mrf.mxu2  ;;  %v9719_v37 = vor.u32 %v11205_v24, %v9716_v27  ;;  %v9874_v14 = vld [vmem:[#allocation11 + $0x168] sm:$0xf]  ;;  %v11247_v51 = vld [vmem:[#allocation11 + $0x174] sm:$0xf0]  ;;  %v11413_v27 = vld [vmem:[#allocation11 + $0x6ac] sm:$0xf] }
 0x7e9   : > { %7554 = vmatpush.bf16.msrb.mxu1 %v10211_v6  ;;  %v13975_v4 = vpop.f32.mrf.mxu1  ;;  %v9748_v6 = vld [vmem:[#allocation11 + $0x78] sm:$0xf0]  ;;  %v11235_v24 = vld [vmem:[#allocation11 + $0x114] sm:$0xf0] }
 0x7ea   : > { %7580 = vmatpush.bf16.msrb.mxu0 %v10467_v0  ;;  %v5732_v13 = vmax.f32 %v13968_v36, %v5724_v47  ;;  %v13978_v58 = vpop.f32.mrf.mxu0  ;;  %v10684_v0 = vld [vmem:[#allocation11 + $0x7d0] sm:$0xf0]  ;;  %v9751_v19 = vor.u32 %v11213_v57, %v9748_v6  ;;  %v11255_v36 = vld [vmem:[#allocation11 + $0x1b4] sm:$0xf0]  ;;  %v10324_v47 = vld [vmem:[#allocation11 + $0x4f8] sm:$0xf0] }
 0x7eb   : > { %7463 = vmatpush.bf16.msrb.mxu3 %v10335_v7  ;;  %v10687_v46 = vor.u32 %v11448_v40, %v10684_v0  ;;  %v9907_v50 = vor.u32 %v11255_v36, %v9906_v25  ;;  %v11357_v7 = vld [vmem:[#allocation11 + $0x4ec] sm:$0xf]  ;;  %v10580_v6 = vld [vmem:[#allocation11 + $0x6f8] sm:$0xf0]  ;;  %v9959_v0 = vor.u32 %v11265_v9, %v9956_v49  ;;  %v9842_v36 = vld [vmem:[#allocation11 + $0x128] sm:$0xf] }
 0x7ec   : > { %7555 = vmatmul.bf16.vlgmr.msrb.gmra.mxu1 %v13926_v42  ;;  %v11421_v57 = vld [vmem:[#allocation11 + $0x6ec] sm:$0xf]  ;;  %v10308_v40 = vld [vmem:[#allocation11 + $0x4d8] sm:$0xf0] }
 0x7ed   : > { %7599 = vmatpush.bf16.msra.mxu1 %v9815_v10  ;;  %7581 = vmatmul.bf16.vlgmr.msrb.gmra.mxu0 %v13930_v33  ;;  %v13980_v10 = vpack.c.bf16 %v5732_v13, %v5732_v13  ;;  %v10327_v13 = vor.u32 %v11357_v7, %v10324_v47  ;;  %v10583_v25 = vor.u32 %v11421_v57, %v10580_v6  ;;  %v11409_v7 = vld [vmem:[#allocation11 + $0x68c] sm:$0xf]  ;;  %v10260_v9 = vld [vmem:[#allocation11 + $0x478] sm:$0xf0]  ;;  %v10178_v57 = vld [vmem:[#allocation11 + $0x3c8] sm:$0xf] }
 0x7ee   : > { %7625 = vmatpush.bf16.msra.mxu0 %v10071_v38  ;;  %7464 = vmatmul.bf16.vlgmr.msrb.gmra.mxu3 %v13963_v15  ;;  %v9732_v38 = vld [vmem:[#allocation11 + $0x58] sm:$0xf0]  ;;  %v11323_v6 = vld [vmem:[#allocation11 + $0x3d4] sm:$0xf0] }
 0x7ef   : > { %7508 = vmatpush.bf16.msra.mxu3 %v9939_v11  ;;  %7386 = vmatmul.bf16.vlgmr.msrb.gmra.mxu2 %v13980_v10  ;;  %v9735_v53 = vor.u32 %v11209_v26, %v9732_v38  ;;  %v9875_v11 = vor.u32 %v11247_v51, %v9874_v14  ;;  %v11239_v26 = vld [vmem:[#allocation11 + $0x134] sm:$0xf0]  ;;  %v10588_v14 = vld [vmem:[#allocation11 + $0x710] sm:$0xf0] }
 0x7f0   : > { %7482 = vmatpush.bf16.msrb.mxu2 %v10703_v44  ;;  %v9843_v59 = vor.u32 %v11239_v26, %v9842_v36  ;;  %v10179_v26 = vor.u32 %v11323_v6, %v10178_v57  ;;  %v10114_v6 = vld [vmem:[#allocation11 + $0x348] sm:$0xf] }
 0x7f1   : > { %7600 = vmatpush.bf16.msra.mxu1 %v9799_v43  ;;  %v10668_v43 = vld [vmem:[#allocation11 + $0x7b0] sm:$0xf0]  ;;  %v7298_v1 = vpop.f32.mrf.mxu1 }
 0x7f2   : > { %7626 = vmatpush.bf16.msra.mxu0 %v10055_v35  ;;  %v7324_v35 = vpop.f32.mrf.mxu0  ;;  %v10671_v32 = vor.u32 %v11444_v48, %v10668_v43  ;;  %v11349_v48 = vld [vmem:[#allocation11 + $0x4ac] sm:$0xf]  ;;  %v10292_v43 = vld [vmem:[#allocation11 + $0x4b8] sm:$0xf0]  ;;  %v11428_v1 = vld [vmem:[#allocation11 + $0x724] sm:$0xf] }
 0x7f3   : > { %7509 = vmatpush.bf16.msra.mxu3 %v9923_v63  ;;  %v11353_v63 = vld [vmem:[#allocation11 + $0x4cc] sm:$0xf]  ;;  %v10295_v35 = vor.u32 %v11349_v48, %v10292_v43 }
 0x7f4   : > { %7483 = vmatpush.bf16.msrb.mxu2 %v10687_v46  ;;  %v10311_v38 = vor.u32 %v11353_v63, %v10308_v40  ;;  %v11417_v46 = vld [vmem:[#allocation11 + $0x6cc] sm:$0xf]  ;;  %v10516_v40 = vld [vmem:[#allocation11 + $0x678] sm:$0xf0] }
 0x7f5   : > { %7601 = vmatpush.bf16.msra.mxu1 %v9783_v21  ;;  %v11440_v21 = vld [vmem:[#allocation11 + $0x784] sm:$0xf]  ;;  %v11401_v48 = vld [vmem:[#allocation11 + $0x64c] sm:$0xf] }
 0x7f6   : > { %7627 = vmatpush.bf16.msra.mxu0 %v10039_v56  ;;  %v10655_v41 = vor.u32 %v11440_v21, %v10652_v39  ;;  %v9975_v56 = vor.u32 %v11269_v20, %v9972_v8  ;;  %v11345_v20 = vld [vmem:[#allocation11 + $0x48c] sm:$0xf]  ;;  %v11424_v8 = vld [vmem:[#allocation11 + $0x704] sm:$0xf] }
 0x7f7   : > { %7510 = vmatpush.bf16.msra.mxu3 %v9907_v50 }
 0x7f8   : > { %7484 = vmatpush.bf16.msrb.mxu2 %v10671_v32  ;;  %v10548_v32 = vld [vmem:[#allocation11 + $0x6b8] sm:$0xf0] }
 0x7f9   : > { %7602 = vmatpush.bf16.msra.mxu1 %v9767_v28  ;;  %v13984_v12 = vpop.f32.mrf.mxu1  ;;  %v9703_v28 = vor.u32 %v11201_v3, %v9700_v55  ;;  %v10551_v51 = vor.u32 %v11413_v27, %v10548_v32  ;;  %v10194_v55 = vld [vmem:[#allocation11 + $0x3e8] sm:$0xf] }
 0x7fa   : > { %7628 = vmatpush.bf16.msra.mxu0 %v10023_v54  ;;  %v13986_v44 = vpop.f32.mrf.mxu0  ;;  %v10639_v54 = vor.u32 %v11436_v45, %v10636_v52  ;;  %v10591_v45 = vor.u32 %v11424_v8, %v10588_v14  ;;  %v11341_v52 = vld [vmem:[#allocation11 + $0x46c] sm:$0xf]  ;;  %v10386_v8 = vld [vmem:[#allocation11 + $0x568] sm:$0xf]  ;;  %v11375_v14 = vld [vmem:[#allocation11 + $0x574] sm:$0xf0] }
 0x7fb   : > { %7511 = vmatpush.bf16.msra.mxu3 %v9891_v61  ;;  %v11391_v61 = vld [vmem:[#allocation11 + $0x5f4] sm:$0xf0]  ;;  %v10263_v63 = vor.u32 %v11341_v52, %v10260_v9  ;;  %v10468_v52 = vld [vmem:[#allocation11 + $0x618] sm:$0xf0]  ;;  %v10370_v9 = vld [vmem:[#allocation11 + $0x548] sm:$0xf] }
 0x7fc   : > { %7485 = vmatpush.bf16.msrb.mxu2 %v10655_v41  ;;  %v11327_v41 = vld [vmem:[#allocation11 + $0x3f4] sm:$0xf0] }
 0x7fd   : > { %7603 = vmatpush.bf16.msra.mxu1 %v9751_v19  ;;  %v11432_v19 = vld [vmem:[#allocation11 + $0x744] sm:$0xf]  ;;  %v10195_v49 = vor.u32 %v11327_v41, %v10194_v55 }
 0x7fe   : > { %7629 = vmatpush.bf16.msra.mxu0 %v10007_v16  ;;  %v10564_v16 = vld [vmem:[#allocation11 + $0x6d8] sm:$0xf0]  ;;  %v10623_v50 = vor.u32 %v11432_v19, %v10620_v30  ;;  %v11337_v19 = vld [vmem:[#allocation11 + $0x44c] sm:$0xf] }
 0x7ff   : > { %7512 = vmatpush.bf16.msra.mxu3 %v9875_v11  ;;  %7438 = vmatmul.bf16.vlgmr.msra.gmra.mxu2 %v13951_v34  ;;  %v10567_v18 = vor.u32 %v11417_v46, %v10564_v16  ;;  %v10434_v11 = vld [vmem:[#allocation11 + $0x5c8] sm:$0xf]  ;;  %v10244_v30 = vld [vmem:[#allocation11 + $0x458] sm:$0xf0] }
 0x800   : > { %7486 = vmatpush.bf16.msrb.mxu2 %v10639_v54  ;;  %v11405_v54 = vld [vmem:[#allocation11 + $0x66c] sm:$0xf]  ;;  %v10162_v16 = vld [vmem:[#allocation11 + $0x3a8] sm:$0xf]  ;;  %v10247_v43 = vor.u32 %v11337_v19, %v10244_v30  ;;  %v11303_v30 = vld [vmem:[#allocation11 + $0x334] sm:$0xf0] }
 0x801   : > { %7604 = vmatpush.bf16.msra.mxu1 %v9735_v53  ;;  %v10604_v53 = vld [vmem:[#allocation11 + $0x730] sm:$0xf0]  ;;  %v7350_v31 = vpop.f32.mrf.mxu1  ;;  %v10098_v19 = vld [vmem:[#allocation11 + $0x328] sm:$0xf] }
 0x802   : > { %7630 = vmatpush.bf16.msra.mxu0 %v9991_v2  ;;  %v10450_v2 = vld [vmem:[#allocation11 + $0x5e8] sm:$0xf]  ;;  %v7376_v21 = vpop.f32.mrf.mxu0  ;;  %v10607_v39 = vor.u32 %v11428_v1, %v10604_v53  ;;  %v11379_v53 = vld [vmem:[#allocation11 + $0x594] sm:$0xf0]  ;;  %v11333_v31 = vld [vmem:[#allocation11 + $0x42c] sm:$0xf] }
 0x803   : > { %7513 = vmatpush.bf16.msra.mxu3 %v9859_v17  ;;  %v10451_v3 = vor.u32 %v11391_v61, %v10450_v2  ;;  %v11383_v17 = vld [vmem:[#allocation11 + $0x5b4] sm:$0xf0]  ;;  %v10402_v1 = vld [vmem:[#allocation11 + $0x588] sm:$0xf] }
 0x804   : > { %7487 = vmatpush.bf16.msrb.mxu2 %v10623_v50  ;;  %v11319_v50 = vld [vmem:[#allocation11 + $0x3b4] sm:$0xf0]  ;;  %v10403_v2 = vor.u32 %v11379_v53, %v10402_v1  ;;  %v10146_v61 = vld [vmem:[#allocation11 + $0x388] sm:$0xf] }
 0x805   : > { %7605 = vmatpush.bf16.msra.mxu1 %v9719_v37  ;;  %v10276_v37 = vld [vmem:[#allocation11 + $0x498] sm:$0xf0]  ;;  %v11315_v21 = vld [vmem:[#allocation11 + $0x394] sm:$0xf0]  ;;  %v10706_v1 = vld [vmem:[#allocation11 + $0x7e8] sm:$0xf] }
 0x806   : > { %7631 = vmatpush.bf16.msra.mxu0 %v9975_v56  ;;  %v10279_v47 = vor.u32 %v11345_v20, %v10276_v37  ;;  %v10532_v56 = vld [vmem:[#allocation11 + $0x698] sm:$0xf0]  ;;  %v10147_v55 = vor.u32 %v11315_v21, %v10146_v61  ;;  %v11455_v53 = vld [vmem:[#allocation11 + $0x7f4] sm:$0xf0] }
 0x807   : > { %7514 = vmatpush.bf16.msra.mxu3 %v9843_v59  ;;  %v10535_v5 = vor.u32 %v11409_v7, %v10532_v56  ;;  %v10500_v59 = vld [vmem:[#allocation11 + $0x658] sm:$0xf0]  ;;  %v10130_v56 = vld [vmem:[#allocation11 + $0x368] sm:$0xf] }
 0x808   : > { %7488 = vmatpush.bf16.msrb.mxu2 %v10607_v39  ;;  %v10503_v32 = vor.u32 %v11401_v48, %v10500_v59  ;;  %v11397_v39 = vld [vmem:[#allocation11 + $0x62c] sm:$0xf]  ;;  %v10082_v48 = vld [vmem:[#allocation11 + $0x308] sm:$0xf] }
 0x809   : > { %7606 = vmatpush.bf16.msra.mxu1 %v9703_v28  ;;  %v13991_v28 = vld [vmem:[#allocation12] sm:$0xf]  ;;  %v13993_v60 = vpop.f32.mrf.mxu1 }
 0x80a   : > { %7632 = vmatpush.bf16.msra.mxu0 %v9959_v0  ;;  %v10418_v0 = vld [vmem:[#allocation11 + $0x5a8] sm:$0xf]  ;;  %v13997_v36 = vpop.f32.mrf.mxu0 }
 0x80b   : > { %v10419_v46 = vor.u32 %v11383_v17, %v10418_v0 }
 0x80c   : > { %7607 = vmatmul.bf16.vlgmr.msra.gmra.mxu1 %v13912_v29  ;;  %v9827_v29 = vor.u32 %v11235_v24, %v9826_v22  ;;  %7489 = vmatpush.bf16.msrb.mxu2 %v10591_v45  ;;  %v10163_v24 = vor.u32 %v11319_v50, %v10162_v16  ;;  %v10099_v16 = vor.u32 %v11303_v30, %v10098_v19  ;;  %v11463_v19 = vld [vmem:[#allocation14 + $0x38] sm:$0xff] }
 0x80d   : > { %7651 = vmatpush.bf16.msrb.mxu1 %v10327_v13  ;;  %7633 = vmatmul.bf16.vlgmr.msra.gmra.mxu0 %v13916_v62  ;;  %v11387_v62 = vld [vmem:[#allocation11 + $0x5d4] sm:$0xf0] }
 0x80e   : > { %7677 = vmatpush.bf16.msrb.mxu0 %v10583_v25  ;;  %7515 = vmatpush.bf16.msra.mxu3 %v9827_v29  ;;  %v10435_v13 = vor.u32 %v11387_v62, %v10434_v11  ;;  %v5999_v25 = vperm.slane %v13991_v28, 0  ;;  %v10484_v29 = vld [vmem:[#allocation11 + $0x638] sm:$0xf0]  ;;  %v11311_v11 = vld [vmem:[#allocation11 + $0x374] sm:$0xf0] }
 0x80f   : > { %7490 = vmatmul.bf16.vlgmr.msrb.gmra.mxu2 %v13980_v10  ;;  %v10487_v7 = vor.u32 %v11397_v39, %v10484_v29  ;;  %v11393_v62 = vld [vmem:[#allocation11 + $0x60c] sm:$0xf] }
 0x810   : > { %7534 = vmatpush.bf16.msra.mxu2 %v10195_v49  ;;  %v7297_v22 = vadd.f32 %v13975_v4, %v5999_v25  ;;  %v11371_v49 = vld [vmem:[#allocation11 + $0x554] sm:$0xf0]  ;;  %v10471_v57 = vor.u32 %v11393_v62, %v10468_v52  ;;  %v10338_v25 = vld [vmem:[#allocation11 + $0x508] sm:$0xf]  ;;  %v11249_v29 = vld [vmem:[#allocation11 + $0x18c] sm:$0xf] }
 0x811   : > { %7652 = vmatpush.bf16.msrb.mxu1 %v10311_v38  ;;  %7516 = vmatmul.bf16.vlgmr.msra.gmra.mxu3 %v13937_v23  ;;  %v10519_v38 = vor.u32 %v11405_v54, %v10516_v40  ;;  %v7309_v27 = vpop.f32.mrf.mxu3  ;;  %v11307_v54 = vld [vmem:[#allocation11 + $0x354] sm:$0xf0] }
 0x812   : > { %7678 = vmatpush.bf16.msrb.mxu0 %v10567_v18  ;;  %7560 = vmatpush.bf16.msrb.mxu3 %v10451_v3  ;;  %v10228_v18 = vld [vmem:[#allocation11 + $0x438] sm:$0xf0]  ;;  %v7310_v20 = vadd.f32 %v7309_v27, %v7297_v22  ;;  %v7428_v4 = vpop.f32.mrf.mxu0  ;;  %v11367_v40 = vld [vmem:[#allocation11 + $0x534] sm:$0xf0]  ;;  %v10115_v0 = vor.u32 %v11307_v54, %v10114_v6  ;;  %v10626_v54 = vld [vmem:[#allocation11 + $0x748] sm:$0xf] }
 0x813   : > { %v10231_v37 = vor.u32 %v11333_v31, %v10228_v18  ;;  %v10212_v3 = vld [vmem:[#allocation11 + $0x418] sm:$0xf0]  ;;  %v11257_v31 = vld [vmem:[#allocation11 + $0x1cc] sm:$0xf]  ;;  %v10658_v4 = vld [vmem:[#allocation11 + $0x788] sm:$0xf] }
 0x814   : > { %7535 = vmatpush.bf16.msra.mxu2 %v10179_v26  ;;  %v14002_v41 = vadd.f32 %v13978_v58, %v7310_v20  ;;  %v10371_v58 = vor.u32 %v11371_v49, %v10370_v9  ;;  %v11363_v26 = vld [vmem:[#allocation11 + $0x514] sm:$0xf0]  ;;  %v9924_v18 = vld [vmem:[#allocation11 + $0x1d8] sm:$0xf0]  ;;  %v10674_v20 = vld [vmem:[#allocation11 + $0x7a8] sm:$0xf] }
 0x815   : > { %7653 = vmatpush.bf16.msrb.mxu1 %v10295_v35  ;;  %v7402_v35 = vpop.f32.mrf.mxu1  ;;  %v10339_v50 = vor.u32 %v11363_v26, %v10338_v25  ;;  %v9927_v27 = vor.u32 %v11257_v31, %v9924_v18  ;;  %v10642_v9 = vld [vmem:[#allocation11 + $0x768] sm:$0xf]  ;;  %v11439_v49 = vld [vmem:[#allocation11 + $0x774] sm:$0xf0]  ;;  %v11325_v31 = vld [vmem:[#allocation11 + $0x3ec] sm:$0xf] }
 0x816   : > { %7679 = vmatpush.bf16.msrb.mxu0 %v10551_v51  ;;  %7561 = vmatpush.bf16.msrb.mxu3 %v10435_v13  ;;  %v11329_v51 = vld [vmem:[#allocation11 + $0x40c] sm:$0xf]  ;;  %v11451_v35 = vld [vmem:[#allocation11 + $0x7d4] sm:$0xf0]  ;;  %v10610_v25 = vld [vmem:[#allocation11 + $0x728] sm:$0xf] }
 0x817   : > { %v10215_v45 = vor.u32 %v11329_v51, %v10212_v3  ;;  %v11431_v26 = vld [vmem:[#allocation11 + $0x734] sm:$0xf0]  ;;  %v10196_v18 = vld [vmem:[#allocation11 + $0x3f8] sm:$0xf0] }
 0x818   : > { %7536 = vmatpush.bf16.msra.mxu2 %v10163_v24 }
 0x819   : > { %7654 = vmatpush.bf16.msrb.mxu1 %v10279_v47  ;;  %v10387_v47 = vor.u32 %v11375_v14, %v10386_v8  ;;  %v7311_v13 = vpop.f32.mrf.mxu3  ;;  %v9892_v8 = vld [vmem:[#allocation11 + $0x198] sm:$0xf0] }
 0x81a   : > { %7680 = vmatpush.bf16.msrb.mxu0 %v10535_v5  ;;  %7562 = vmatpush.bf16.msrb.mxu3 %v10419_v46  ;;  %v10131_v5 = vor.u32 %v11311_v11, %v10130_v56  ;;  %v9940_v46 = vld [vmem:[#allocation11 + $0x1f8] sm:$0xf0]  ;;  %v9895_v3 = vor.u32 %v11249_v29, %v9892_v8  ;;  %v11460_v8 = vld [vmem:[#allocation14 + $0x20] sm:$0xff] }
 0x81b   : > { %v9860_v13 = vld [vmem:[#allocation11 + $0x158] sm:$0xf0] }
 0x81c   : > { %7537 = vmatpush.bf16.msra.mxu2 %v10147_v55  ;;  %v11443_v55 = vld [vmem:[#allocation11 + $0x794] sm:$0xf0] }
 0x81d   : > { %7655 = vmatpush.bf16.msrb.mxu1 %v10263_v63  ;;  %v10354_v63 = vld [vmem:[#allocation11 + $0x528] sm:$0xf]  ;;  %v10659_v62 = vor.u32 %v11443_v55, %v10658_v4  ;;  %v10164_v4 = vld [vmem:[#allocation11 + $0x3b8] sm:$0xf0]  ;;  %v11377_v55 = vld [vmem:[#allocation11 + $0x58c] sm:$0xf] }
 0x81e   : > { %7681 = vmatpush.bf16.msrb.mxu0 %v10519_v38  ;;  %7563 = vmatpush.bf16.msrb.mxu3 %v10403_v2  ;;  %v10355_v17 = vor.u32 %v11367_v40, %v10354_v63  ;;  %v11261_v38 = vld [vmem:[#allocation11 + $0x1ec] sm:$0xf]  ;;  %v9908_v2 = vld [vmem:[#allocation11 + $0x1b8] sm:$0xf0]  ;;  %v11435_v63 = vld [vmem:[#allocation11 + $0x754] sm:$0xf0] }
 0x81f   : > { %v9943_v59 = vor.u32 %v11261_v38, %v9940_v46  ;;  %v11237_v40 = vld [vmem:[#allocation11 + $0x12c] sm:$0xf]  ;;  %v9828_v46 = vld [vmem:[#allocation11 + $0x118] sm:$0xf0] }
 0x820   : > { %7538 = vmatpush.bf16.msra.mxu2 %v10131_v5  ;;  %v11241_v5 = vld [vmem:[#allocation11 + $0x14c] sm:$0xf] }
 0x821   : > { %7656 = vmatpush.bf16.msrb.mxu1 %v10247_v43  ;;  %v11299_v43 = vld [vmem:[#allocation11 + $0x314] sm:$0xf0]  ;;  %v9863_v6 = vor.u32 %v11241_v5, %v9860_v13  ;;  %v11233_v38 = vld [vmem:[#allocation11 + $0x10c] sm:$0xf] }
 0x822   : > { %7682 = vmatpush.bf16.msrb.mxu0 %v10503_v32  ;;  %7564 = vmatpush.bf16.msrb.mxu3 %v10387_v47  ;;  %v10083_v22 = vor.u32 %v11299_v43, %v10082_v48  ;;  %v11253_v32 = vld [vmem:[#allocation11 + $0x1ac] sm:$0xf]  ;;  %v9876_v47 = vld [vmem:[#allocation11 + $0x178] sm:$0xf0]  ;;  %v11462_v48 = vld [vmem:[#allocation14 + $0x30] sm:$0xff]  ;;  %v9831_v43 = vor.u32 %v11233_v38, %v9828_v46 }
 0x823   : > { %v9911_v39 = vor.u32 %v11253_v32, %v9908_v2  ;;  %v10356_v38 = vld [vmem:[#allocation11 + $0x538] sm:$0xf0]  ;;  %v11456_v46 = vld [vmem:[#allocation14] sm:$0xff] }
 0x824   : > { %7539 = vmatpush.bf16.msra.mxu2 %v10115_v0  ;;  %v9844_v0 = vld [vmem:[#allocation11 + $0x138] sm:$0xf0] }
 0x825   : > { %7657 = vmatpush.bf16.msrb.mxu1 %v10231_v37  ;;  %v11447_v37 = vld [vmem:[#allocation11 + $0x7b4] sm:$0xf0]  ;;  %v9847_v30 = vor.u32 %v11237_v40, %v9844_v0  ;;  %v10372_v40 = vld [vmem:[#allocation11 + $0x558] sm:$0xf0] }
 0x826   : > { %7683 = vmatpush.bf16.msrb.mxu0 %v10487_v7  ;;  %7565 = vmatpush.bf16.msrb.mxu3 %v10371_v58  ;;  %v10675_v14 = vor.u32 %v11447_v37, %v10674_v20  ;;  %v11245_v7 = vld [vmem:[#allocation11 + $0x16c] sm:$0xf]  ;;  %v10643_v58 = vor.u32 %v11439_v49, %v10642_v9  ;;  %v10420_v37 = vld [vmem:[#allocation11 + $0x5b8] sm:$0xf0] }
 0x827   : > { %v9879_v52 = vor.u32 %v11245_v7, %v9876_v47  ;;  %v11381_v20 = vld [vmem:[#allocation11 + $0x5ac] sm:$0xf]  ;;  %v10404_v7 = vld [vmem:[#allocation11 + $0x598] sm:$0xf0] }
 0x828   : > { %7540 = vmatpush.bf16.msra.mxu2 %v10099_v16  ;;  %v10452_v16 = vld [vmem:[#allocation11 + $0x5f8] sm:$0xf0]  ;;  %v11373_v9 = vld [vmem:[#allocation11 + $0x56c] sm:$0xf] }
 0x829   : > { %7658 = vmatpush.bf16.msrb.mxu1 %v10215_v45  ;;  %v14006_v24 = vpop.f32.mrf.mxu1  ;;  %v11459_v47 = vld [vmem:[#allocation14 + $0x18] sm:$0xff] }
 0x82a   : > { %7684 = vmatpush.bf16.msrb.mxu0 %v10471_v57  ;;  %7566 = vmatpush.bf16.msrb.mxu3 %v10355_v17  ;;  %v14008_v61 = vpop.f32.mrf.mxu0  ;;  %v10388_v49 = vld [vmem:[#allocation11 + $0x578] sm:$0xf0] }
 0x82c   : > { %7659 = vmatmul.bf16.vlgmr.msrb.gmra.mxu1 %v13926_v42  ;;  %v10707_v42 = vor.u32 %v11455_v53, %v10706_v1  ;;  %7541 = vmatpush.bf16.msra.mxu2 %v10083_v22  ;;  %v11427_v1 = vld [vmem:[#allocation11 + $0x714] sm:$0xf0]  ;;  %v11385_v22 = vld [vmem:[#allocation11 + $0x5cc] sm:$0xf] }
 0x82d   : > { %7685 = vmatmul.bf16.vlgmr.msrb.gmra.mxu0 %v13930_v33  ;;  %v10690_v33 = vld [vmem:[#allocation11 + $0x7c8] sm:$0xf]  ;;  %7971 = vmatpush.bf16.msra.mxu1 %v11463_v19 }
 0x82e   : > { %7567 = vmatpush.bf16.msrb.mxu3 %v10339_v50  ;;  %v10691_v21 = vor.u32 %v11451_v35, %v10690_v33  ;;  %v10611_v50 = vor.u32 %v11431_v26, %v10610_v25  ;;  %v11461_v33 = vld [vmem:[#allocation14 + $0x28] sm:$0xff]  ;;  %v10199_v35 = vor.u32 %v11325_v31, %v10196_v18  ;;  %v10116_v25 = vld [vmem:[#allocation11 + $0x358] sm:$0xf0] }
 0x82f   : > { %7542 = vmatmul.bf16.vlgmr.msra.gmra.mxu2 %v13951_v34  ;;  %v11365_v26 = vld [vmem:[#allocation11 + $0x52c] sm:$0xf] }
 0x830   : > { %7586 = vmatpush.bf16.msrb.mxu2 %v10707_v42  ;;  %v10436_v42 = vld [vmem:[#allocation11 + $0x5d8] sm:$0xf0]  ;;  %v11297_v18 = vld [vmem:[#allocation11 + $0x30c] sm:$0xf] }
 0x831   : > { %7568 = vmatmul.bf16.vlgmr.msrb.gmra.mxu3 %v13963_v15  ;;  %v7454_v51 = vpop.f32.mrf.mxu1  ;;  %v7335_v11 = vpop.f32.mrf.mxu2  ;;  %7972 = vmatpush.bf16.msra.mxu1 %v11462_v48  ;;  %v10439_v2 = vor.u32 %v11385_v22, %v10436_v42  ;;  %v10100_v48 = vld [vmem:[#allocation11 + $0x338] sm:$0xf0]  ;;  %v11453_v42 = vld [vmem:[#allocation11 + $0x7ec] sm:$0xf] }
 0x832   : > { %7612 = vmatpush.bf16.msra.mxu3 %v9943_v59  ;;  %v7480_v56 = vpop.f32.mrf.mxu0  ;;  %v7336_v45 = vadd.f32 %v7335_v11, %v14002_v41  ;;  %v10627_v41 = vor.u32 %v11435_v63, %v10626_v54  ;;  %v10594_v59 = vld [vmem:[#allocation11 + $0x708] sm:$0xf]  ;;  %v10423_v51 = vor.u32 %v11381_v20, %v10420_v37  ;;  %v10132_v54 = vld [vmem:[#allocation11 + $0x378] sm:$0xf0]  ;;  %v11369_v63 = vld [vmem:[#allocation11 + $0x54c] sm:$0xf] }
 0x833   : > { %v10375_v19 = vor.u32 %v11369_v63, %v10372_v40  ;;  %v10084_v22 = vld [vmem:[#allocation11 + $0x318] sm:$0xf0]  ;;  %v11470_v37 = vld [vmem:[#allocation14 + $0x70] sm:$0xff] }
 0x834   : > { %7587 = vmatpush.bf16.msrb.mxu2 %v10691_v21  ;;  %v14014_v57 = vadd.f32 %v13984_v12, %v7336_v45  ;;  %v11389_v12 = vld [vmem:[#allocation11 + $0x5ec] sm:$0xf]  ;;  %v10692_v20 = vld [vmem:[#allocation11 + $0x7d8] sm:$0xf0] }
 0x835   : > { %v10455_v53 = vor.u32 %v11389_v12, %v10452_v16  ;;  %v11321_v21 = vld [vmem:[#allocation11 + $0x3cc] sm:$0xf]  ;;  %7973 = vmatpush.bf16.msra.mxu1 %v11461_v33  ;;  %v10359_v16 = vor.u32 %v11365_v26, %v10356_v38  ;;  %v11471_v33 = vld [vmem:[#allocation14 + $0x78] sm:$0xff]  ;;  %v6000_v38 = vperm.slane %v13991_v28, 1 }
 0x836   : > { %7613 = vmatpush.bf16.msra.mxu3 %v9927_v27  ;;  %v10595_v27 = vor.u32 %v11427_v1, %v10594_v59  ;;  %v11313_v45 = vld [vmem:[#allocation11 + $0x38c] sm:$0xf]  ;;  %v10340_v59 = vld [vmem:[#allocation11 + $0x518] sm:$0xf0] }
 0x838   : > { %7588 = vmatpush.bf16.msrb.mxu2 %v10675_v14 }
 0x839   : > { %v7337_v17 = vpop.f32.mrf.mxu2  ;;  %7974 = vmatpush.bf16.msra.mxu1 %v11460_v8 }
 0x83a   : > { %7614 = vmatpush.bf16.msra.mxu3 %v9911_v39  ;;  %v10180_v39 = vld [vmem:[#allocation11 + $0x3d8] sm:$0xf0]  ;;  %v11457_v17 = vld [vmem:[#allocation14 + $0x8] sm:$0xff] }
 0x83b   : > { %v10183_v14 = vor.u32 %v11321_v21, %v10180_v39  ;;  %v11449_v39 = vld [vmem:[#allocation11 + $0x7cc] sm:$0xf] }
 0x83c   : > { %7589 = vmatpush.bf16.msrb.mxu2 %v10659_v62  ;;  %v10407_v62 = vor.u32 %v11377_v55, %v10404_v7  ;;  %v11469_v55 = vld [vmem:[#allocation14 + $0x68] sm:$0xff] }
 0x83d   : > { %7975 = vmatpush.bf16.msra.mxu1 %v11459_v47 }
 0x83e   : > { %7615 = vmatpush.bf16.msra.mxu3 %v9895_v3  ;;  %v11317_v3 = vld [vmem:[#allocation11 + $0x3ac] sm:$0xf] }
 0x83f   : > { %v10167_v56 = vor.u32 %v11317_v3, %v10164_v4  ;;  %v11445_v3 = vld [vmem:[#allocation11 + $0x7ac] sm:$0xf]  ;;  %v10676_v4 = vld [vmem:[#allocation11 + $0x7b8] sm:$0xf0] }
 0x840   : > { %7590 = vmatpush.bf16.msrb.mxu2 %v10643_v58  ;;  %v10391_v58 = vor.u32 %v11373_v9, %v10388_v49  ;;  %v10679_v7 = vor.u32 %v11445_v3, %v10676_v4  ;;  %v11437_v9 = vld [vmem:[#allocation11 + $0x76c] sm:$0xf]  ;;  %v10644_v49 = vld [vmem:[#allocation11 + $0x778] sm:$0xf0] }
 0x842   : > { %7616 = vmatpush.bf16.msra.mxu3 %v9879_v52  ;;  %v11458_v52 = vld [vmem:[#allocation14 + $0x10] sm:$0xff] }
 0x843   : > { %7976 = vmatpush.bf16.msra.mxu1 %v11458_v52 }
 0x844   : > { %7591 = vmatpush.bf16.msrb.mxu2 %v10627_v41 }
 0x846   : > { %7617 = vmatpush.bf16.msra.mxu3 %v9863_v6  ;;  %v11309_v6 = vld [vmem:[#allocation11 + $0x36c] sm:$0xf] }
 0x847   : > { %v10135_v41 = vor.u32 %v11309_v6, %v10132_v54  ;;  %7977 = vmatpush.bf16.msra.mxu1 %v11457_v17  ;;  %v10628_v6 = vld [vmem:[#allocation11 + $0x758] sm:$0xf0]  ;;  %v11466_v54 = vld [vmem:[#allocation14 + $0x50] sm:$0xff] }
 0x848   : > { %7592 = vmatpush.bf16.msrb.mxu2 %v10611_v50  ;;  %v11301_v50 = vld [vmem:[#allocation11 + $0x32c] sm:$0xf] }
 0x849   : > { %v14016_v32 = vpop.f32.mrf.mxu1 }
 0x84a   : > { %7618 = vmatpush.bf16.msra.mxu3 %v9847_v30  ;;  %v14018_v29 = vpop.f32.mrf.mxu0  ;;  %v11305_v30 = vld [vmem:[#allocation11 + $0x34c] sm:$0xf] }
 0x84b   : > { %v10119_v12 = vor.u32 %v11305_v30, %v10116_v25  ;;  %7978 = vmatpush.bf16.msra.mxu1 %v11456_v46  ;;  %v11429_v30 = vld [vmem:[#allocation11 + $0x72c] sm:$0xf]  ;;  %v10596_v46 = vld [vmem:[#allocation11 + $0x718] sm:$0xf0] }
 0x84c   : > { %7593 = vmatpush.bf16.msrb.mxu2 %v10595_v27  ;;  %v10708_v27 = vld [vmem:[#allocation11 + $0x7f8] sm:$0xf0] }
 0x84e   : > { %7619 = vmatpush.bf16.msra.mxu3 %v9831_v43  ;;  %v11361_v43 = vld [vmem:[#allocation11 + $0x50c] sm:$0xf] }
 0x84f   : > { %7594 = vmatmul.bf16.vlgmr.msrb.gmra.mxu2 %v13980_v10  ;;  %v10343_v31 = vor.u32 %v11361_v43, %v10340_v59  ;;  %v7401_v43 = vadd.f32 %v13993_v60, %v6000_v38 }
 0x850   : > { %7638 = vmatpush.bf16.msra.mxu2 %v10199_v35  ;;  %v10087_v35 = vor.u32 %v11297_v18, %v10084_v22 }
 0x851   : > { %7620 = vmatmul.bf16.vlgmr.msra.gmra.mxu3 %v13937_v23  ;;  %v7506_v11 = vpop.f32.mrf.mxu1  ;;  %v10148_v23 = vld [vmem:[#allocation11 + $0x398] sm:$0xf0]  ;;  %v7361_v0 = vpop.f32.mrf.mxu3 }
 0x852   : > { %7664 = vmatpush.bf16.msrb.mxu3 %v10455_v53  ;;  %v7532_v5 = vpop.f32.mrf.mxu0  ;;  %v10151_v13 = vor.u32 %v11313_v45, %v10148_v23  ;;  %v10103_v53 = vor.u32 %v11301_v50, %v10100_v48  ;;  %v10660_v11 = vld [vmem:[#allocation11 + $0x798] sm:$0xf0] }
 0x853   : > { %v11467_v5 = vld [vmem:[#allocation14 + $0x58] sm:$0xff] }
 0x854   : > { %7639 = vmatpush.bf16.msra.mxu2 %v10183_v14 }
 0x856   : > { %7665 = vmatpush.bf16.msrb.mxu3 %v10439_v2  ;;  %v10711_v2 = vor.u32 %v11453_v42, %v10708_v27 }
 0x858   : > { %7640 = vmatpush.bf16.msra.mxu2 %v10167_v56  ;;  %v11441_v56 = vld [vmem:[#allocation11 + $0x78c] sm:$0xf] }
 0x859   : > { %v7363_v1 = vpop.f32.mrf.mxu3  ;;  %v10663_v52 = vor.u32 %v11441_v56, %v10660_v11  ;;  %v11475_v56 = vld [vmem:[#allocation14 + $0x98] sm:$0xff] }
 0x85a   : > { %7666 = vmatpush.bf16.msrb.mxu3 %v10423_v51  ;;  %v10695_v51 = vor.u32 %v11449_v39, %v10692_v20 }
 0x85c   : > { %7641 = vmatpush.bf16.msra.mxu2 %v10151_v13  ;;  %v10647_v13 = vor.u32 %v11437_v9, %v10644_v49  ;;  %v6001_v9 = vperm.slane %v13991_v28, 2 }
 0x85e   : > { %7667 = vmatpush.bf16.msrb.mxu3 %v10407_v62  ;;  %v11468_v62 = vld [vmem:[#allocation14 + $0x60] sm:$0xff] }
 0x860   : > { %7642 = vmatpush.bf16.msra.mxu2 %v10135_v41 }
 0x861   : > { %v7413_v8 = vpop.f32.mrf.mxu3 }
 0x862   : > { %7668 = vmatpush.bf16.msrb.mxu3 %v10391_v58  ;;  %v11433_v58 = vld [vmem:[#allocation11 + $0x74c] sm:$0xf]  ;;  %v7414_v59 = vadd.f32 %v7413_v8, %v7401_v43  ;;  %v11479_v8 = vld [vmem:[#allocation14 + $0xb8] sm:$0xff] }
 0x863   : > { %v10631_v41 = vor.u32 %v11433_v58, %v10628_v6  ;;  %7997 = vmatpush.bf16.msra.mxu0 %v11479_v8 }
 0x864   : > { %7643 = vmatpush.bf16.msra.mxu2 %v10119_v12  ;;  %v11464_v12 = vld [vmem:[#allocation14 + $0x40] sm:$0xff]  ;;  %v7427_v18 = vadd.f32 %v13997_v36, %v7414_v59  ;;  %v11478_v36 = vld [vmem:[#allocation14 + $0xb0] sm:$0xff] }
 0x866   : > { %7669 = vmatpush.bf16.msrb.mxu3 %v10375_v19 }
 0x867   : > { %7998 = vmatpush.bf16.msra.mxu0 %v11478_v36 }
 0x868   : > { %7644 = vmatpush.bf16.msra.mxu2 %v10103_v53 }
 0x869   : > { %v14022_v21 = vpop.f32.mrf.mxu1  ;;  %v7415_v45 = vpop.f32.mrf.mxu3 }
 0x86a   : > { %7670 = vmatpush.bf16.msrb.mxu3 %v10359_v16  ;;  %v14024_v14 = vpop.f32.mrf.mxu0  ;;  %v11473_v45 = vld [vmem:[#allocation14 + $0x88] sm:$0xff] }
 0x86c   : > { %7645 = vmatpush.bf16.msra.mxu2 %v10087_v35 }
 0x86e   : > { %7671 = vmatpush.bf16.msrb.mxu3 %v10343_v31 }
 0x86f   : > { %7646 = vmatmul.bf16.vlgmr.msra.gmra.mxu2 %v13951_v34 }
 0x870   : > { %7690 = vmatpush.bf16.msrb.mxu2 %v10711_v2 }
 0x871   : > { %7672 = vmatmul.bf16.vlgmr.msrb.gmra.mxu3 %v13963_v15  ;;  %v7558_v47 = vpop.f32.mrf.mxu1  ;;  %v7362_v15 = vadd.f32 %v7361_v0, %v14014_v57  ;;  %v7465_v40 = vpop.f32.mrf.mxu3  ;;  %v10612_v57 = vld [vmem:[#allocation11 + $0x738] sm:$0xf0]  ;;  %v11465_v0 = vld [vmem:[#allocation14 + $0x48] sm:$0xff] }
 0x872   : > { %7984 = vmatpush.bf16.msra.mxu3 %v11471_v33  ;;  %v7584_v23 = vpop.f32.mrf.mxu0  ;;  %v7387_v63 = vpop.f32.mrf.mxu2  ;;  %v10615_v26 = vor.u32 %v11429_v30, %v10612_v57  ;;  %v11487_v30 = vld [vmem:[#allocation14 + $0xf8] sm:$0xff] }
 0x873   : > { %v7375_v34 = vadd.f32 %v13986_v44, %v7362_v15  ;;  %v11425_v44 = vld [vmem:[#allocation11 + $0x70c] sm:$0xf]  ;;  %v11472_v15 = vld [vmem:[#allocation14 + $0x80] sm:$0xff] }
 0x874   : > { %7691 = vmatpush.bf16.msrb.mxu2 %v10695_v51  ;;  %v10599_v48 = vor.u32 %v11425_v44, %v10596_v46  ;;  %v11482_v44 = vld [vmem:[#allocation14 + $0xd0] sm:$0xff] }
 0x875   : > { %v7388_v17 = vadd.f32 %v7387_v63, %v7375_v34 }
 0x876   : > { %7985 = vmatpush.bf16.msra.mxu3 %v11470_v37 }
 0x877   : > { %v7703_v19 = vmax.f32 %v7388_v17, 0.0 }
 0x878   : > { %7692 = vmatpush.bf16.msrb.mxu2 %v10679_v7 }
 0x879   : > { %v7707_v25 = vpack.c.bf16 %v7703_v19, %v7703_v19  ;;  %v7467_v50 = vpop.f32.mrf.mxu3 }
 0x87a   : > { %7986 = vmatpush.bf16.msra.mxu3 %v11469_v55  ;;  %v7389_v16 = vpop.f32.mrf.mxu2  ;;  %v6002_v50 = vperm.slane %v13991_v28, 3  ;;  %v11858_v28 = vld [vmem:[#allocation15] ss:$0 sm:$0xff] }
 0x87b   : > { %7979 = vmatmul.bf16.vlgmr.msra.gmra.mxu1 %v7707_v25  ;;  %v11480_v16 = vld [vmem:[#allocation14 + $0xc0] sm:$0xff] }
 0x87c   : > { %7693 = vmatpush.bf16.msrb.mxu2 %v10663_v52 }
 0x87e   : > { %7987 = vmatpush.bf16.msra.mxu3 %v11468_v62 }
 0x880   : > { %7694 = vmatpush.bf16.msrb.mxu2 %v10647_v13 }
 0x882   : > { %7988 = vmatpush.bf16.msra.mxu3 %v11467_v5  ;;  %v7439_v31 = vpop.f32.mrf.mxu2  ;;  %v7505_v5 = vadd.f32 %v14016_v32, %v6001_v9  ;;  %v11485_v32 = vld [vmem:[#allocation14 + $0xe8] sm:$0xff] }
 0x883   : > { %v7440_v22 = vadd.f32 %v7439_v31, %v7427_v18 }
 0x884   : > { %7695 = vmatpush.bf16.msrb.mxu2 %v10631_v41 }
 0x885   : > { %v7453_v27 = vadd.f32 %v14006_v24, %v7440_v22  ;;  %v11476_v24 = vld [vmem:[#allocation14 + $0xa0] sm:$0xff] }
 0x886   : > { %7989 = vmatpush.bf16.msra.mxu3 %v11466_v54 }
 0x887   : > { %v7466_v2 = vadd.f32 %v7465_v40, %v7453_v27 }
 0x888   : > { %7696 = vmatpush.bf16.msrb.mxu2 %v10615_v26  ;;  %v11486_v26 = vld [vmem:[#allocation14 + $0xf0] sm:$0xff] }
 0x889   : > { %v14032_v1 = vpop.f32.mrf.mxu1  ;;  %v7479_v39 = vadd.f32 %v14008_v61, %v7466_v2  ;;  %v11474_v61 = vld [vmem:[#allocation14 + $0x90] sm:$0xff] }
 0x88a   : > { %7990 = vmatpush.bf16.msra.mxu3 %v11465_v0  ;;  %v14034_v53 = vpop.f32.mrf.mxu0  ;;  %v7441_v35 = vpop.f32.mrf.mxu2  ;;  %v7609_v43 = vadd.f32 %v14032_v1, %v6002_v50 }
 0x88c   : > { %7697 = vmatpush.bf16.msrb.mxu2 %v10599_v48 }
 0x88e   : > { %7991 = vmatpush.bf16.msra.mxu3 %v11464_v12 }
 0x88f   : > { %7698 = vmatmul.bf16.vlgmr.msrb.gmra.mxu2 %v13980_v10  ;;  %v11477_v10 = vld [vmem:[#allocation14 + $0xa8] sm:$0xff] }
 0x890   : > { %7999 = vmatpush.bf16.msra.mxu0 %v11477_v10  ;;  %8010 = vmatpush.bf16.msra.mxu2 %v11487_v30 }
 0x891   : > { %v7610_v42 = vpop.f32.mrf.mxu1 }
 0x892   : > { %v7636_v33 = vpop.f32.mrf.mxu0  ;;  %v7491_v20 = vpop.f32.mrf.mxu2 }
 0x893   : > { %v7492_v37 = vadd.f32 %v7491_v20, %v7479_v39 }
 0x894   : > { %v7517_v60 = vpop.f32.mrf.mxu3  ;;  %8000 = vmatpush.bf16.msra.mxu0 %v11476_v24  ;;  %8011 = vmatpush.bf16.msra.mxu2 %v11486_v26 }
 0x895   : > { %v7704_v51 = vmax.f32 %v7492_v37, 0.0  ;;  %v7518_v34 = vadd.f32 %v7517_v60, %v7505_v5 }
 0x897   : > { %v7708_v3 = vpack.c.bf16 %v7704_v51, %v7704_v51  ;;  %v7531_v58 = vadd.f32 %v14018_v29, %v7518_v34  ;;  %v11484_v29 = vld [vmem:[#allocation14 + $0xe0] sm:$0xff] }
 0x898   : > { %8001 = vmatpush.bf16.msra.mxu0 %v11475_v56  ;;  %8012 = vmatpush.bf16.msra.mxu2 %v11485_v32 }
 0x899   : > { %7992 = vmatmul.bf16.vlgmr.msra.gmra.mxu3 %v7708_v3 }
 0x89a   : > { %v7493_v55 = vpop.f32.mrf.mxu2 }
 0x89c   : > { %v7519_v4 = vpop.f32.mrf.mxu3  ;;  %8002 = vmatpush.bf16.msra.mxu0 %v11474_v61  ;;  %8013 = vmatpush.bf16.msra.mxu2 %v11484_v29 }
 0x8a0   : > { %8003 = vmatpush.bf16.msra.mxu0 %v11473_v45 }
 0x8a4   : > { %8004 = vmatpush.bf16.msra.mxu0 %v11472_v15 }
 0x8a9   : > { %v7660_v7 = vpop.f32.mrf.mxu1 }
 0x8aa   : > { %v7686_v47 = vpop.f32.mrf.mxu0 }
 0x8b1   : > { %v7662_v11 = vpop.f32.mrf.mxu1 }
 0x8b2   : > { %v7688_v62 = vpop.f32.mrf.mxu0  ;;  %v7543_v52 = vpop.f32.mrf.mxu2 }
 0x8b3   : > { %v7544_v6 = vadd.f32 %v7543_v52, %v7531_v58 }
 0x8b4   : > { %v7569_v23 = vpop.f32.mrf.mxu3 }
 0x8b5   : > { %v7557_v54 = vadd.f32 %v14022_v21, %v7544_v6  ;;  %v11483_v21 = vld [vmem:[#allocation14 + $0xd8] sm:$0xff] }
 0x8b6   : > { %8014 = vmatpush.bf16.msra.mxu2 %v11483_v21 }
 0x8b7   : > { %v7570_v63 = vadd.f32 %v7569_v23, %v7557_v54 }
 0x8b9   : > { %v7583_v17 = vadd.f32 %v14024_v14, %v7570_v63  ;;  %v11481_v14 = vld [vmem:[#allocation14 + $0xc8] sm:$0xff] }
 0x8ba   : > { %v7545_v13 = vpop.f32.mrf.mxu2  ;;  %8015 = vmatpush.bf16.msra.mxu2 %v11482_v44 }
 0x8bc   : > { %v7571_v49 = vpop.f32.mrf.mxu3 }
 0x8be   : > { %8016 = vmatpush.bf16.msra.mxu2 %v11481_v14 }
 0x8c2   : > { %8017 = vmatpush.bf16.msra.mxu2 %v11480_v16 }
 0x8d2   : > { %v7595_v41 = vpop.f32.mrf.mxu2 }
 0x8d3   : > { %v7596_v19 = vadd.f32 %v7595_v41, %v7583_v17 }
 0x8d4   : > { %v7621_v40 = vpop.f32.mrf.mxu3 }
 0x8d5   : > { %v7705_v57 = vmax.f32 %v7596_v19, 0.0  ;;  %v7622_v31 = vadd.f32 %v7621_v40, %v7609_v43 }
 0x8d7   : > { %v7709_v0 = vpack.c.bf16 %v7705_v57, %v7705_v57  ;;  %v7635_v22 = vadd.f32 %v14034_v53, %v7622_v31 }
 0x8d9   : > { %8005 = vmatmul.bf16.vlgmr.msra.gmra.mxu0 %v7709_v0 }
 0x8da   : > { %v7597_v38 = vpop.f32.mrf.mxu2 }
 0x8dc   : > { %v7623_v25 = vpop.f32.mrf.mxu3 }
 0x8f2   : > { %v7647_v12 = vpop.f32.mrf.mxu2 }
 0x8f3   : > { %v7648_v42 = vadd.f32 %v7647_v12, %v7635_v22 }
 0x8f4   : > { %v7673_v46 = vpop.f32.mrf.mxu3 }
 0x8f5   : > { %v7661_v27 = vadd.f32 %v7660_v7, %v7648_v42 }
 0x8f7   : > { %v7674_v35 = vadd.f32 %v7673_v46, %v7661_v27 }
 0x8f8   : > { %v7980_v18 = vpop.f32.mrf.mxu1 }
 0x8f9   : > { %v7687_v2 = vadd.f32 %v7686_v47, %v7674_v35  ;;  %v7981_v51 = vadd.f32 %v11858_v28, %v7980_v18 }
 0x8fa   : > { %v7649_v59 = vpop.f32.mrf.mxu2 }
 0x8fc   : > { %v7675_v48 = vpop.f32.mrf.mxu3 }
 0x900   : > { %v7982_v33 = vpop.f32.mrf.mxu1 }
 0x912   : > { %v7699_v60 = vpop.f32.mrf.mxu2 }
 0x913   : > { %v7700_v39 = vadd.f32 %v7699_v60, %v7687_v2 }
 0x915   : > { %v7706_v20 = vmax.f32 %v7700_v39, 0.0 }
 0x917   : > { %v7710_v37 = vpack.c.bf16 %v7706_v20, %v7706_v20 }
 0x919   : > { %8018 = vmatmul.bf16.vlgmr.msra.gmra.mxu2 %v7710_v37 }
 0x91a   : > { %v7701_v8 = vpop.f32.mrf.mxu2 }
 0x91c   : > { %v7993_v3 = vpop.f32.mrf.mxu3 }
 0x91d   : > { %v7994_v1 = vadd.f32 %v7993_v3, %v7981_v51 }
 0x924   : > { %v7995_v4 = vpop.f32.mrf.mxu3 }
 0x956   : > { %v8006_v36 = vpop.f32.mrf.mxu0 }
 0x957   : > { %v8007_v10 = vadd.f32 %v8006_v36, %v7994_v1 }
 0x95e   : > { %v8008_v53 = vpop.f32.mrf.mxu0 }
 0x99c   : > { %v8019_v55 = vpop.f32.mrf.mxu2 }
 0x99d   : > { %v8020_v7 = vadd.f32 %v8019_v55, %v8007_v10 }
 0x99f   : > { %8023 = vmax.xlane.f32.xlu0 %v8020_v7 }
 0x9a4   : > { %v8021_v24 = vpop.f32.mrf.mxu2 }
 0xa12   : > { %v8024_v47 = vpop.xlane.xlu0 %8023 }
 0xa13   : > { %v8025_v56 = vsub.f32 %v8020_v7, %v8024_v47 }
 0xa15   : > { %v8026_v11 = vmul.f32 1.442695, %v8025_v56 }
 0xa17   : > { %11859 = vpow2.f32 %v8026_v11 }
 0xa1d   : > { %v11860_v61 = vpop.eup %11859 }
 0xa1e   : > { %8028 = vadd.xlane.f32.xlu1 %v11860_v61 }
 0xa91   : > { %v8029_v62 = vpop.xlane.xlu1 %8028 }
 0xa92   : > { %11861 = vlog2.f32 %v8029_v62 }
 0xa98   : > { %v11862_v45 = vpop.eup %11861 }
 0xa99   : > { %v8031_v23 = vmul.f32 0.6931472, %v11862_v45 }
 0xa9b   : > { %v8032_v52 = vsub.f32 %v8025_v56, %v8031_v23 }
 0xa9d   : > { %8033 = vst [vmem:[%s598_s25] sm:$0xff] %v8032_v52 }
 0xa9e   : > { %12133 = shalt.err (!%p12130_p9)
}
 0xa9f   : > { %11522 = dma.vmem_to_hbm [thread:$0]  (%p12299_p6), %s8048_s15, 128, %s8050_s17, %s8035_s4  }
 0xaa0 PF: > { %s8061_s16 = sand.u32 1, %s12176_s30   ;;  %p11550_p11 = pnand %p8204_p1, %p12305_p10 }
 0xaa1   : > { %s8062_s28 = scalar_lea.sflag [#allocation5], %s8061_s16 }
 0xaa2   : > { %p11551_p12 = pneg %p11550_p11 }
 0xaa4   : > { %12171 = dma.done.wait (%p11551_p12), %s8062_s28, 128  }
 0xaa5   : > { %12173 = vsyncadd (%p11551_p12), %s8062_s28, 4294967168  ;;  %s14155_s12 = sld [smem:[#allocation24_spill]]  ;;  %s14157_s30 = smov %s12180_s10 }
 0xaa6   : > { %s14156_s29 = sld [smem:[#allocation25_spill]]  ;;  %s14158_s10 = smov %s12184_s11 }
 0xaab   : > { %p24_p13 = scmp.ge.s32.totalorder %s14155_s12, 4  }
 0xaac   : > { %s14159_s11 = smov %s14156_s29 }
 0xaad   :  { %26 = sbr.rel (!%p24_p13) target bundleno = 13 (0xd), region = 167 }
 0xab2   :  { %8068 = vsyncpa [#allocation4], 1 }
 0xab3   :  { %8070 = vsyncpa [#allocation4 + $0x1], 1 }
 0xab4   :  { %8071 = vsyncpa [#allocation7], 1 }
 0xab5   :  { %8072 = vsyncpa [#allocation10], 1 }
 0xab6   :  { %8073 = vsyncpa [#allocation13], 1 }
 0xab7   :  { %8074 = vsyncpa [#allocation16], 1 }
 0xab8   :  { %8075 = vsyncpa [#allocation5], 1 }
 0xab9   :  { %8077 = vsyncpa [#allocation5 + $0x1], 1 }

</bundles_post_ra>
